<compile_context>
chip_gen: v5e
topology: v5e:2x2
jax: 0.10.0
libtpu: 0.0.40
codegen_flags: <defaults>
</compile_context>

<pallas_src>
import jax
import jax.numpy as jnp
from jax.experimental import pallas as pl
from jax.experimental.pallas import tpu as pltpu

# ---- small hyperparameters consistent with the module structure ----
B = 2                          # scene batch
N_OBS = 3                      # observations per scene (forward default)
IMG = 64                       # image is 64x64 (encoder -> 16x16 view cells)
PATCH = 4
GRID16 = IMG // PATCH          # 16
N_VIEW_CELLS = GRID16 * GRID16 # 16*16 = 256 (hard-coded in the module)
PATCH_DIM = PATCH * PATCH * 3  # 48
TSIZE = 32                     # module default 128 (scaled down)
ENC_CH = 16                    # module default ch=64
N_WRD = 256                    # module default n_wrd_cells=2048
N_REN = 128                    # module default n_ren_cells=512
VSIZE = 7
WT_CH = 32                     # WorldTransform pose-embedding ch (default 64)
REN_STEPS = 6                  # Renderer n_steps=6
G_CH = 32                      # generator hidden channels
Z_CH = 16                      # generator latent channels
G_L = 6                        # GeneratorNetwork L=6
QI = 2 * Z_CH + G_CH           # fused q_mu / q_logvar / h_inf head width = 64
LW = QI + 2 * Z_CH + G_CH      # per-layer fused hi/hg-matmul output rows = 128

# ---- static row offsets inside the packed weight / bias slabs ----
# w48 slab (lane width 48): [enc_w1T ; gen_weT]
O48_ENC1 = 0
O48_GE = ENC_CH                                # 16
# w16 slab (lane width 16): [enc_w2T ; gg_z (stacked over layers)]
O16_ENC2 = 0
O16_GG_Z = TSIZE                               # 32
# w32 slab (lane width 32): [v2w_pin ; w2r_pin ; ginf_e ; ginf_r ; gg_r]
O32_V2W_PIN = 0
O32_W2R_PIN = O32_V2W_PIN + N_VIEW_CELLS       # 256
O32_GINF_E = O32_W2R_PIN + N_WRD               # 512
O32_GINF_R = O32_GINF_E + G_L * QI             # 896
O32_GG_R = O32_GINF_R + G_L * QI               # 1280
W32_ROWS = O32_GG_R + G_L * G_CH               # 1472
# bias slab (column, width 1)
OB_ENC1 = 0
OB_ENC2 = OB_ENC1 + ENC_CH                     # 16
OB_GE = OB_ENC2 + TSIZE                        # 48
OB_GOUT = OB_GE + G_CH                         # 80
OB_GEN = OB_GOUT + PATCH_DIM                   # 128; per-layer 128-row blocks
BIAS_ROWS = OB_GEN + G_L * LW                  # 896

_CPARAMS = pltpu.CompilerParams(
    dimension_semantics=("parallel",),
    vmem_limit_bytes=32 * 1024 * 1024,
)


# --------------------------------------------------------------------------
# Fused kernel: one program per scene.
# --------------------------------------------------------------------------
def _srgqn_kernel(
    # per-scene inputs
    xp_ref,        # (1, 48, N_OBS*256)  observation patches (transposed, obs on lanes)
    tv_ref,        # (1, N_OBS, WT_CH)   pose embeddings of observations
    xqp_ref,       # (1, 48, 256)        query-image patches (transposed)
    tvq_ref,       # (1, 1, WT_CH)       pose embedding of query view
    # packed weight slabs (grouped by lane width)
    w48_ref,       # (48, 48)            [enc_w1T ; gen_weT]
    w16_ref,       # (224, 16)           [enc_w2T ; gg_z stacked]
    w32_ref,       # (1472, 32)          [v2w_pin ; w2r_pin ; ginf_e ; ginf_r ; gg_r]
    whihg_ref,     # (G_L*128, 64)       per-layer fused [hi|hg] weight blocks
    w256_ref,      # (64, 256)           [v2w_poutT ; w2r_poutT zero-padded]
    renw_ref,      # (128, 6*256)        renderer step matrices packed on lanes
    wout_ref,      # (48, 192)           host-folded goutT @ gu_l blocks
    bias_ref,      # (896, 1)            all biases packed in one column slab
    # outputs
    x_ref,         # (1, 48, 256)        lane-dense reconstructed query patches
    kl_ref,        # (1, 1, 1)
):
    f32 = jnp.float32

    def mm(a, b):
        return jnp.dot(a, b, preferred_element_type=f32)

    def sig(t):  # sigmoid via tanh: one EUP transcendental per element
        return 0.5 * jnp.tanh(0.5 * t) + 0.5

    n_obs = tv_ref.shape[1]
    tv = tv_ref[0]                                                 # (n_obs, 32)

    # ---- step_observation_encode: all observations in one wide matmul ------
    p_all = xp_ref[0]                                              # (48, n_obs*256)
    h = jnp.maximum(mm(w48_ref[O48_ENC1:O48_ENC1 + ENC_CH, :], p_all)
                    + bias_ref[OB_ENC1:OB_ENC1 + ENC_CH, :], 0.0)  # (16, 768)
    view_all = (mm(w16_ref[O16_ENC2:O16_ENC2 + TSIZE, :], h)
                + bias_ref[OB_ENC2:OB_ENC2 + TSIZE, :])            # (32, 768)

    # ---- view2wrd routing (all obs stacked) + step_scene_fusion ('sum') ----
    pin_v = w32_ref[O32_V2W_PIN:O32_V2W_PIN + N_VIEW_CELLS, :]     # (256, 32)
    pin_tv = jnp.concatenate([pin_v * tv[o:o + 1, :] for o in range(n_obs)],
                             axis=0)                               # (768, 32)
    routes = sig(mm(pin_tv, w256_ref[0:WT_CH, :]))                 # (768, 256)
    # Sum over observations falls out of the K = n_obs*256 contraction.
    scene_cell = sig(mm(view_all, routes))                         # (32, 256)

    # ---- step_query_view: wrd2ren routing + renderer -----------------------
    tvq = tvq_ref[0]                                               # (1, 32)
    pin_w = w32_ref[O32_W2R_PIN:O32_W2R_PIN + N_WRD, :]            # (256, 32)
    route_q = sig(mm(pin_w * tvq,
                     w256_ref[WT_CH:2 * WT_CH, 0:N_REN]))          # (256, 128)
    ren_cell = mm(scene_cell, route_q)                             # (32, 128)
    # TODO(synk): renderer internals synthesized; all REN_STEPS step products
    # fused into one MXU push (valid because each step consumes ren_cell).
    prods = mm(ren_cell, renw_ref[...])                            # (32, 6*256)
    h_r = jnp.zeros((TSIZE, N_VIEW_CELLS), f32)
    for s in range(REN_STEPS):
        h_r = jnp.tanh(h_r + prods[:, s * N_VIEW_CELLS:(s + 1) * N_VIEW_CELLS])
    r_T = h_r                                                      # (32, 256)

    # ---- generator (simplified ConvDRAW, L steps, transposed layout) -------
    e_T = jnp.maximum(mm(w48_ref[O48_GE:O48_GE + G_CH, :], xqp_ref[0])
                      + bias_ref[OB_GE:OB_GE + G_CH, :], 0.0)      # (32, 256)
    # Loop-invariant e / r contributions for all 6 layers, hoisted & stacked.
    const_inf = (mm(w32_ref[O32_GINF_E:O32_GINF_E + G_L * QI, :], e_T)
                 + mm(w32_ref[O32_GINF_R:O32_GINF_R + G_L * QI, :], r_T))  # (384, 256)
    const_g = mm(w32_ref[O32_GG_R:O32_GG_R + G_L * G_CH, :], r_T)          # (192, 256)

    hg = jnp.zeros((G_CH, N_VIEW_CELLS), f32)
    hi = jnp.zeros((G_CH, N_VIEW_CELLS), f32)
    kl_acc = jnp.zeros((Z_CH, N_VIEW_CELLS), f32)
    hg_steps = []
    for l in range(G_L):
        # One fused matmul consuming [hi; hg]: rows 0:64 = inf head (hi & hg
        # contributions), 64:96 = prior head, 96:128 = recurrent g-head.
        hihg = jnp.concatenate([hi, hg], axis=0)                   # (64, 256)
        out = (mm(whihg_ref[l * LW:(l + 1) * LW, :], hihg)
               + bias_ref[OB_GEN + l * LW:OB_GEN + (l + 1) * LW, :])  # (128, 256)
        inf_out = const_inf[l * QI:(l + 1) * QI] + out[:QI]        # (64, 256)
        q_mu = inf_out[:Z_CH]
        q_lv = inf_out[Z_CH:2 * Z_CH]
        p_mu = out[QI:QI + Z_CH]
        p_lv = out[QI + Z_CH:QI + 2 * Z_CH]
        # TODO(synk): posterior sampling z ~ N(q_mu, exp(q_lv)) replaced by its
        # mean (deterministic forward); the KL term is computed exactly.
        z = q_mu
        kl_acc = kl_acc + 0.5 * (p_lv - q_lv + jnp.exp(q_lv - p_lv)
                                 + (q_mu - p_mu) ** 2 * jnp.exp(-p_lv) - 1.0)
        hg = jnp.tanh(const_g[l * G_CH:(l + 1) * G_CH]
                      + out[QI + 2 * Z_CH:]
                      + mm(w16_ref[O16_GG_Z + l * G_CH:
                                   O16_GG_Z + (l + 1) * G_CH, :], z))      # (32, 256)
        hi = jnp.tanh(inf_out[2 * Z_CH:])                                  # (32, 256)
        hg_steps.append(hg)

    # Deferred u-accumulation: one matmul with the host-folded (goutT @ gu_l)
    # weight replaces the 6 in-loop u += gu_l @ hg_l and the output projection.
    u_slab = jnp.concatenate(hg_steps, axis=0)                     # (192, 256)
    x_ref[0] = sig(mm(wout_ref[...], u_slab)
                   + bias_ref[OB_GOUT:OB_GOUT + PATCH_DIM, :])     # (48, 256)
    # Single cross-lane reduction for the KL scalar.
    kl_ref[0] = jnp.sum(kl_acc, keepdims=True)


# --------------------------------------------------------------------------
# Pallas wrapper
# --------------------------------------------------------------------------
def srgqn_pallas(xp, tv, xqp, tvq, p):
    b, n_obs = tv.shape[0], tv.shape[1]
    weights = (p['w48'], p['w16'], p['w32'], p['w_hihg'], p['w256'],
               p['ren_w'], p['w_out'], p['bias'])
    in_specs = [
        pl.BlockSpec((1, PATCH_DIM, n_obs * N_VIEW_CELLS), lambda i: (i, 0, 0)),
        pl.BlockSpec((1, n_obs, WT_CH), lambda i: (i, 0, 0)),
        pl.BlockSpec((1, PATCH_DIM, N_VIEW_CELLS), lambda i: (i, 0, 0)),
        pl.BlockSpec((1, 1, WT_CH), lambda i: (i, 0, 0)),
    ] + [pl.BlockSpec(w.shape, lambda i: (0, 0)) for w in weights]
    out_shape = (jax.ShapeDtypeStruct((b, PATCH_DIM, N_VIEW_CELLS), jnp.float32),
                 jax.ShapeDtypeStruct((b, 1, 1), jnp.float32))
    out_specs = (pl.BlockSpec((1, PATCH_DIM, N_VIEW_CELLS), lambda i: (i, 0, 0)),
                 pl.BlockSpec((1, 1, 1), lambda i: (i, 0, 0)))
    return pl.pallas_call(
        _srgqn_kernel,
        out_shape=out_shape,
        grid=(b,),
        in_specs=in_specs,
        out_specs=out_specs,
        compiler_params=_CPARAMS,
    )(xp, tv, xqp, tvq, *weights)


# --------------------------------------------------------------------------
# Glue: layout conversion + parameter setup (plain JAX)
# --------------------------------------------------------------------------
def extract_patches_T(x_nchw):
    # NCHW (N,3,64,64) -> (N, 48, 256); dim 48 = (ph, pw, c), dim 256 = gh*16+gw.
    n = x_nchw.shape[0]
    x = jnp.transpose(x_nchw, (0, 2, 3, 1))                     # NHWC
    x = x.reshape(n, GRID16, PATCH, GRID16, PATCH, 3)           # (n, gh, ph, gw, pw, c)
    x = jnp.transpose(x, (0, 2, 4, 5, 1, 3))                    # (n, ph, pw, c, gh, gw)
    return x.reshape(n, PATCH_DIM, N_VIEW_CELLS)


def assemble_image(x_flat_T):
    # (B, 48, 256) -> NCHW (B, 3, 64, 64)
    b = x_flat_T.shape[0]
    x = x_flat_T.reshape(b, PATCH, PATCH, 3, GRID16, GRID16)    # (b, ph, pw, c, gh, gw)
    x = jnp.transpose(x, (0, 3, 4, 1, 5, 2))                    # (b, c, gh, ph, gw, pw)
    return x.reshape(b, 3, IMG, IMG)


def init_params(key):
    """Builds the synthesized sub-module weights and packs them into the
    lane-dense slabs consumed by the kernel."""
    def nrm(k, shape, scale):
        return scale * jax.random.normal(k, shape, jnp.float32)

    ks = jax.random.split(key, 24)
    f32 = jnp.float32
    # Encoder(ch, tsize) — transposed (out-ch on rows)
    enc_w1T = nrm(ks[0], (ENC_CH, PATCH_DIM), 0.2)
    enc_w2T = nrm(ks[1], (TSIZE, ENC_CH), 0.2)
    # view2wrd = WorldTransform(16*16, n_wrd_cells, vsize, ch)
    v2w_wv = nrm(ks[2], (VSIZE, WT_CH), 0.5)
    v2w_pin = nrm(ks[3], (N_VIEW_CELLS, WT_CH), 0.3)
    v2w_poutT = nrm(ks[4], (WT_CH, N_WRD), 0.3)
    # wrd2ren = WorldTransform(n_wrd_cells, n_ren_cells, vsize, ch)
    w2r_wv = nrm(ks[5], (VSIZE, WT_CH), 0.5)
    w2r_pin = nrm(ks[6], (N_WRD, WT_CH), 0.3)
    w2r_poutT = nrm(ks[7], (WT_CH, N_REN), 0.3)
    # Renderer(n_ren_cells, (16,16), tsize, n_steps=6): steps packed on lanes
    ren_w = nrm(ks[8], (N_REN, REN_STEPS * N_VIEW_CELLS), 0.05)
    # GeneratorNetwork(x_dim=3, r_dim=tsize, L=6)
    gen_weT = nrm(ks[9], (G_CH, PATCH_DIM), 0.2)
    ginf_e = nrm(ks[10], (G_L * QI, G_CH), 0.1)
    ginf_r = nrm(ks[11], (G_L * QI, TSIZE), 0.1)
    ginf_hi = nrm(ks[12], (G_L, QI, G_CH), 0.1)
    ginf_hg = nrm(ks[13], (G_L, QI, G_CH), 0.1)
    gp = nrm(ks[14], (G_L, 2 * Z_CH, G_CH), 0.1)
    gg_hg = nrm(ks[15], (G_L, G_CH, G_CH), 0.1)
    gg_z = nrm(ks[16], (G_L, G_CH, Z_CH), 0.1)
    gg_r = nrm(ks[17], (G_L * G_CH, TSIZE), 0.1)
    gu = nrm(ks[18], (G_L, G_CH, G_CH), 0.1)
    goutT = nrm(ks[19], (PATCH_DIM, G_CH), 0.1)

    # ---- pack lane-width-grouped weight slabs (single prologue DMA each) ----
    w48 = jnp.concatenate([enc_w1T, gen_weT], axis=0)                  # (48, 48)
    w16 = jnp.concatenate([enc_w2T, gg_z.reshape(G_L * G_CH, Z_CH)],
                          axis=0)                                      # (224, 16)
    w32 = jnp.concatenate([v2w_pin, w2r_pin, ginf_e, ginf_r, gg_r],
                          axis=0)                                      # (1472, 32)
    # per-layer fused [hi|hg] weight: rows = [inf head ; prior ; g-head]
    z_p = jnp.zeros((2 * Z_CH, G_CH), f32)
    z_g = jnp.zeros((G_CH, G_CH), f32)
    blocks = []
    for l in range(G_L):
        top = jnp.concatenate([ginf_hi[l], ginf_hg[l]], axis=1)        # (64, 64)
        mid = jnp.concatenate([z_p, gp[l]], axis=1)                    # (32, 64)
        bot = jnp.concatenate([z_g, gg_hg[l]], axis=1)                 # (32, 64)
        blocks.append(jnp.concatenate([top, mid, bot], axis=0))        # (128, 64)
    w_hihg = jnp.concatenate(blocks, axis=0)                           # (768, 64)
    w256 = jnp.concatenate(
        [v2w_poutT,
         jnp.pad(w2r_poutT, ((0, 0), (0, N_WRD - N_REN)))], axis=0)    # (64, 256)
    # fold the per-layer u-projection into the output head: goutT @ gu_l
    w_out = jnp.concatenate([goutT @ gu[l] for l in range(G_L)], axis=1)  # (48, 192)
    # all biases (zero-init, as in the reference) packed in one column slab
    bias = jnp.zeros((BIAS_ROWS, 1), f32)

    return {
        # host-side pose-embedding weights (tiny (N,7)@(7,32) matmuls)
        'v2w_wv': v2w_wv, 'v2w_bv': jnp.zeros((1, WT_CH), f32),
        'w2r_wv': w2r_wv, 'w2r_bv': jnp.zeros((1, WT_CH), f32),
        # kernel weight slabs
        'w48': w48, 'w16': w16, 'w32': w32, 'w_hihg': w_hihg,
        'w256': w256, 'ren_w': ren_w, 'w_out': w_out, 'bias': bias,
    }


def srgqn_forward(p, x, v, xq, vq, n_obs=N_OBS):
    b = xq.shape[0]
    # Host side does only layout prep (patch extraction, obs stacked on lanes)
    # and the tiny (N,7)@(7,32) pose embeddings; everything else is one kernel.
    xp = extract_patches_T(x).reshape(b, n_obs, PATCH_DIM, N_VIEW_CELLS)
    xp = jnp.transpose(xp, (0, 2, 1, 3)).reshape(b, PATCH_DIM,
                                                 n_obs * N_VIEW_CELLS)
    xqp = extract_patches_T(xq)                                   # (B, 48, 256)
    t_v = jnp.maximum(v @ p['v2w_wv'] + p['v2w_bv'], 0.0).reshape(b, n_obs, WT_CH)
    t_vq = jnp.maximum(vq @ p['w2r_wv'] + p['w2r_bv'], 0.0).reshape(b, 1, WT_CH)
    x_flat_T, kl = srgqn_pallas(xp, t_v, xqp, t_vq, p)
    x_query = assemble_image(x_flat_T)                            # (B, 3, 64, 64) NCHW
    return x_query, kl.reshape(-1)


# --------------------------------------------------------------------------
if __name__ == "__main__":
    key = jax.random.PRNGKey(0)
    kx, kv, kxq, kvq = jax.random.split(key, 4)
    x = jax.random.normal(kx, (B * N_OBS, 3, IMG, IMG), jnp.float32)
    v = jax.random.normal(kv, (B * N_OBS, VSIZE), jnp.float32)
    xq = jax.random.normal(kxq, (B, 3, IMG, IMG), jnp.float32)
    vq = jax.random.normal(kvq, (B, VSIZE), jnp.float32)

    params = init_params(jax.random.PRNGKey(42))
    fwd = jax.jit(srgqn_forward, static_argnames=('n_obs',))
    x_query, kl = fwd(params, x, v, xq, vq, n_obs=N_OBS)
    jax.block_until_ready((x_query, kl))

    assert x_query.shape == (B, 3, IMG, IMG) and x_query.dtype == jnp.float32
    assert kl.shape == (B,)
    assert bool(jnp.all(jnp.isfinite(x_query))) and bool(jnp.all(jnp.isfinite(kl)))
    print("KERNEL_OK")
</pallas_src>

<mosaic_0001>
module attributes {stable_mosaic.version = 11 : i64} {
  func.func @_srgqn_kernel(%arg0: i32, %arg1: memref<1x48x768xf32, #tpu.memory_space<vmem>>, %arg2: memref<1x3x32xf32, #tpu.memory_space<vmem>>, %arg3: memref<1x48x256xf32, #tpu.memory_space<vmem>>, %arg4: memref<1x1x32xf32, #tpu.memory_space<vmem>>, %arg5: memref<48x48xf32, #tpu.memory_space<vmem>>, %arg6: memref<224x16xf32, #tpu.memory_space<vmem>>, %arg7: memref<1472x32xf32, #tpu.memory_space<vmem>>, %arg8: memref<768x64xf32, #tpu.memory_space<vmem>>, %arg9: memref<64x256xf32, #tpu.memory_space<vmem>>, %arg10: memref<128x1536xf32, #tpu.memory_space<vmem>>, %arg11: memref<48x192xf32, #tpu.memory_space<vmem>>, %arg12: memref<896x1xf32, #tpu.memory_space<vmem>>, %arg13: memref<1x48x256xf32, #tpu.memory_space<vmem>>, %arg14: memref<1x1x1xf32, #tpu.memory_space<vmem>>) attributes {dimension_semantics = [#tpu.dimension_semantics<parallel>], iteration_bounds = array<i64: 2>, scalar_prefetch = 0 : i64, scratch_operands = 0 : i64, tpu.core_type = #tpu.core_type<tc>, window_params = [{transform_indices = @transform_0, window_bounds = array<i64: 1, 48, 768>}, {transform_indices = @transform_1, window_bounds = array<i64: 1, 3, 32>}, {transform_indices = @transform_2, window_bounds = array<i64: 1, 48, 256>}, {transform_indices = @transform_3, window_bounds = array<i64: 1, 1, 32>}, {pipeline_mode = #tpu.pipeline_mode<synchronous>, transform_indices = @transform_4, window_bounds = array<i64: 48, 48>}, {pipeline_mode = #tpu.pipeline_mode<synchronous>, transform_indices = @transform_5, window_bounds = array<i64: 224, 16>}, {pipeline_mode = #tpu.pipeline_mode<synchronous>, transform_indices = @transform_6, window_bounds = array<i64: 1472, 32>}, {pipeline_mode = #tpu.pipeline_mode<synchronous>, transform_indices = @transform_7, window_bounds = array<i64: 768, 64>}, {pipeline_mode = #tpu.pipeline_mode<synchronous>, transform_indices = @transform_8, window_bounds = array<i64: 64, 256>}, {pipeline_mode = #tpu.pipeline_mode<synchronous>, transform_indices = @transform_9, window_bounds = array<i64: 128, 1536>}, {pipeline_mode = #tpu.pipeline_mode<synchronous>, transform_indices = @transform_10, window_bounds = array<i64: 48, 192>}, {pipeline_mode = #tpu.pipeline_mode<synchronous>, transform_indices = @transform_11, window_bounds = array<i64: 896, 1>}, {transform_indices = @transform_12, window_bounds = array<i64: 1, 48, 256>}, {transform_indices = @transform_13, window_bounds = array<i64: 1, 1, 1>}]} {
    %c0 = arith.constant 0 : index
    %c0_0 = arith.constant 0 : index
    %c0_1 = arith.constant 0 : index
    %0 = vector.load %arg2[%c0, %c0_0, %c0_1] : memref<1x3x32xf32, #tpu.memory_space<vmem>>, vector<1x3x32xf32>
    %1 = vector.shape_cast %0 : vector<1x3x32xf32> to vector<3x32xf32>
    %c0_2 = arith.constant 0 : index
    %c0_3 = arith.constant 0 : index
    %c0_4 = arith.constant 0 : index
    %2 = vector.load %arg1[%c0_2, %c0_3, %c0_4] : memref<1x48x768xf32, #tpu.memory_space<vmem>>, vector<1x48x768xf32>
    %3 = vector.shape_cast %2 : vector<1x48x768xf32> to vector<48x768xf32>
    %c0_5 = arith.constant 0 : index
    %c0_6 = arith.constant 0 : index
    %4 = vector.load %arg5[%c0_5, %c0_6] : memref<48x48xf32, #tpu.memory_space<vmem>>, vector<16x48xf32>
    %cst = arith.constant dense<0.000000e+00> : vector<16x768xf32>
    %5 = tpu.matmul %4, %3, %cst {dimension_numbers = #tpu.dot_dimension_numbers<[1], [0], [0], [1], [0, 0, 1, 1], [], []>} : vector<16x48xf32>, vector<48x768xf32>, vector<16x768xf32> -> vector<16x768xf32>
    %c0_7 = arith.constant 0 : index
    %c0_8 = arith.constant 0 : index
    %6 = vector.load %arg12[%c0_7, %c0_8] : memref<896x1xf32, #tpu.memory_space<vmem>>, vector<16x1xf32>
    %7 = vector.broadcast %6 : vector<16x1xf32> to vector<16x768xf32>
    %8 = arith.addf %5, %7 : vector<16x768xf32>
    %cst_9 = arith.constant 0.000000e+00 : f32
    %9 = vector.broadcast %cst_9 : f32 to vector<16x768xf32>
    %10 = arith.maximumf %8, %9 : vector<16x768xf32>
    %c0_10 = arith.constant 0 : index
    %c0_11 = arith.constant 0 : index
    %11 = vector.load %arg6[%c0_10, %c0_11] : memref<224x16xf32, #tpu.memory_space<vmem>>, vector<32x16xf32>
    %cst_12 = arith.constant dense<0.000000e+00> : vector<32x768xf32>
    %12 = tpu.matmul %11, %10, %cst_12 {dimension_numbers = #tpu.dot_dimension_numbers<[1], [0], [0], [1], [0, 0, 1, 1], [], []>} : vector<32x16xf32>, vector<16x768xf32>, vector<32x768xf32> -> vector<32x768xf32>
    %c16 = arith.constant 16 : index
    %c0_13 = arith.constant 0 : index
    %13 = vector.load %arg12[%c16, %c0_13] : memref<896x1xf32, #tpu.memory_space<vmem>>, vector<32x1xf32>
    %14 = vector.broadcast %13 : vector<32x1xf32> to vector<32x768xf32>
    %15 = arith.addf %12, %14 : vector<32x768xf32>
    %c0_14 = arith.constant 0 : index
    %c0_15 = arith.constant 0 : index
    %16 = vector.load %arg7[%c0_14, %c0_15] : memref<1472x32xf32, #tpu.memory_space<vmem>>, vector<256x32xf32>
    %17 = vector.extract_strided_slice %1 {offsets = [0, 0], sizes = [1, 32], strides = [1, 1]} : vector<3x32xf32> to vector<1x32xf32>
    %18 = vector.broadcast %17 : vector<1x32xf32> to vector<256x32xf32>
    %19 = arith.mulf %16, %18 : vector<256x32xf32>
    %20 = vector.extract_strided_slice %1 {offsets = [1, 0], sizes = [1, 32], strides = [1, 1]} : vector<3x32xf32> to vector<1x32xf32>
    %21 = vector.broadcast %20 : vector<1x32xf32> to vector<256x32xf32>
    %22 = arith.mulf %16, %21 : vector<256x32xf32>
    %23 = vector.extract_strided_slice %1 {offsets = [2, 0], sizes = [1, 32], strides = [1, 1]} : vector<3x32xf32> to vector<1x32xf32>
    %24 = vector.broadcast %23 : vector<1x32xf32> to vector<256x32xf32>
    %25 = arith.mulf %16, %24 : vector<256x32xf32>
    %26 = tpu.concatenate %19, %22, %25 in 0 : vector<256x32xf32>, vector<256x32xf32>, vector<256x32xf32> -> vector<768x32xf32>
    %c0_16 = arith.constant 0 : index
    %c0_17 = arith.constant 0 : index
    %27 = vector.load %arg9[%c0_16, %c0_17] : memref<64x256xf32, #tpu.memory_space<vmem>>, vector<32x256xf32>
    %cst_18 = arith.constant dense<0.000000e+00> : vector<768x256xf32>
    %28 = tpu.matmul %26, %27, %cst_18 {dimension_numbers = #tpu.dot_dimension_numbers<[1], [0], [0], [1], [0, 0, 1, 1], [], []>} : vector<768x32xf32>, vector<32x256xf32>, vector<768x256xf32> -> vector<768x256xf32>
    %cst_19 = arith.constant 5.000000e-01 : f32
    %29 = vector.broadcast %cst_19 : f32 to vector<768x256xf32>
    %30 = arith.mulf %29, %28 : vector<768x256xf32>
    %31 = math.tanh %30 : vector<768x256xf32>
    %cst_20 = arith.constant 5.000000e-01 : f32
    %32 = vector.broadcast %cst_20 : f32 to vector<768x256xf32>
    %33 = arith.mulf %32, %31 : vector<768x256xf32>
    %cst_21 = arith.constant 5.000000e-01 : f32
    %34 = vector.broadcast %cst_21 : f32 to vector<768x256xf32>
    %35 = arith.addf %33, %34 : vector<768x256xf32>
    %cst_22 = arith.constant dense<0.000000e+00> : vector<32x256xf32>
    %36 = tpu.matmul %15, %35, %cst_22 {dimension_numbers = #tpu.dot_dimension_numbers<[1], [0], [0], [1], [0, 0, 1, 1], [], []>} : vector<32x768xf32>, vector<768x256xf32>, vector<32x256xf32> -> vector<32x256xf32>
    %cst_23 = arith.constant 5.000000e-01 : f32
    %37 = vector.broadcast %cst_23 : f32 to vector<32x256xf32>
    %38 = arith.mulf %37, %36 : vector<32x256xf32>
    %39 = math.tanh %38 : vector<32x256xf32>
    %cst_24 = arith.constant 5.000000e-01 : f32
    %40 = vector.broadcast %cst_24 : f32 to vector<32x256xf32>
    %41 = arith.mulf %40, %39 : vector<32x256xf32>
    %cst_25 = arith.constant 5.000000e-01 : f32
    %42 = vector.broadcast %cst_25 : f32 to vector<32x256xf32>
    %43 = arith.addf %41, %42 : vector<32x256xf32>
    %c0_26 = arith.constant 0 : index
    %c0_27 = arith.constant 0 : index
    %c0_28 = arith.constant 0 : index
    %44 = vector.load %arg4[%c0_26, %c0_27, %c0_28] : memref<1x1x32xf32, #tpu.memory_space<vmem>>, vector<1x1x32xf32>
    %45 = vector.shape_cast %44 : vector<1x1x32xf32> to vector<1x32xf32>
    %c256 = arith.constant 256 : index
    %c0_29 = arith.constant 0 : index
    %46 = vector.load %arg7[%c256, %c0_29] : memref<1472x32xf32, #tpu.memory_space<vmem>>, vector<256x32xf32>
    %47 = vector.broadcast %45 : vector<1x32xf32> to vector<256x32xf32>
    %48 = arith.mulf %46, %47 : vector<256x32xf32>
    %c32 = arith.constant 32 : index
    %c0_30 = arith.constant 0 : index
    %49 = vector.load %arg9[%c32, %c0_30] : memref<64x256xf32, #tpu.memory_space<vmem>>, vector<32x128xf32>
    %cst_31 = arith.constant dense<0.000000e+00> : vector<256x128xf32>
    %50 = tpu.matmul %48, %49, %cst_31 {dimension_numbers = #tpu.dot_dimension_numbers<[1], [0], [0], [1], [0, 0, 1, 1], [], []>} : vector<256x32xf32>, vector<32x128xf32>, vector<256x128xf32> -> vector<256x128xf32>
    %cst_32 = arith.constant 5.000000e-01 : f32
    %51 = vector.broadcast %cst_32 : f32 to vector<256x128xf32>
    %52 = arith.mulf %51, %50 : vector<256x128xf32>
    %53 = math.tanh %52 : vector<256x128xf32>
    %cst_33 = arith.constant 5.000000e-01 : f32
    %54 = vector.broadcast %cst_33 : f32 to vector<256x128xf32>
    %55 = arith.mulf %54, %53 : vector<256x128xf32>
    %cst_34 = arith.constant 5.000000e-01 : f32
    %56 = vector.broadcast %cst_34 : f32 to vector<256x128xf32>
    %57 = arith.addf %55, %56 : vector<256x128xf32>
    %cst_35 = arith.constant dense<0.000000e+00> : vector<32x128xf32>
    %58 = tpu.matmul %43, %57, %cst_35 {dimension_numbers = #tpu.dot_dimension_numbers<[1], [0], [0], [1], [0, 0, 1, 1], [], []>} : vector<32x256xf32>, vector<256x128xf32>, vector<32x128xf32> -> vector<32x128xf32>
    %c0_36 = arith.constant 0 : index
    %c0_37 = arith.constant 0 : index
    %59 = vector.load %arg10[%c0_36, %c0_37] : memref<128x1536xf32, #tpu.memory_space<vmem>>, vector<128x1536xf32>
    %cst_38 = arith.constant dense<0.000000e+00> : vector<32x1536xf32>
    %60 = tpu.matmul %58, %59, %cst_38 {dimension_numbers = #tpu.dot_dimension_numbers<[1], [0], [0], [1], [0, 0, 1, 1], [], []>} : vector<32x128xf32>, vector<128x1536xf32>, vector<32x1536xf32> -> vector<32x1536xf32>
    %cst_39 = arith.constant 0.000000e+00 : f32
    %61 = vector.broadcast %cst_39 : f32 to vector<32x256xf32>
    %62 = vector.extract_strided_slice %60 {offsets = [0, 0], sizes = [32, 256], strides = [1, 1]} : vector<32x1536xf32> to vector<32x256xf32>
    %63 = arith.addf %61, %62 : vector<32x256xf32>
    %64 = math.tanh %63 : vector<32x256xf32>
    %65 = vector.extract_strided_slice %60 {offsets = [0, 256], sizes = [32, 256], strides = [1, 1]} : vector<32x1536xf32> to vector<32x256xf32>
    %66 = arith.addf %64, %65 : vector<32x256xf32>
    %67 = math.tanh %66 : vector<32x256xf32>
    %68 = vector.extract_strided_slice %60 {offsets = [0, 512], sizes = [32, 256], strides = [1, 1]} : vector<32x1536xf32> to vector<32x256xf32>
    %69 = arith.addf %67, %68 : vector<32x256xf32>
    %70 = math.tanh %69 : vector<32x256xf32>
    %71 = vector.extract_strided_slice %60 {offsets = [0, 768], sizes = [32, 256], strides = [1, 1]} : vector<32x1536xf32> to vector<32x256xf32>
    %72 = arith.addf %70, %71 : vector<32x256xf32>
    %73 = math.tanh %72 : vector<32x256xf32>
    %74 = vector.extract_strided_slice %60 {offsets = [0, 1024], sizes = [32, 256], strides = [1, 1]} : vector<32x1536xf32> to vector<32x256xf32>
    %75 = arith.addf %73, %74 : vector<32x256xf32>
    %76 = math.tanh %75 : vector<32x256xf32>
    %77 = vector.extract_strided_slice %60 {offsets = [0, 1280], sizes = [32, 256], strides = [1, 1]} : vector<32x1536xf32> to vector<32x256xf32>
    %78 = arith.addf %76, %77 : vector<32x256xf32>
    %79 = math.tanh %78 : vector<32x256xf32>
    %c16_40 = arith.constant 16 : index
    %c0_41 = arith.constant 0 : index
    %80 = vector.load %arg5[%c16_40, %c0_41] : memref<48x48xf32, #tpu.memory_space<vmem>>, vector<32x48xf32>
    %c0_42 = arith.constant 0 : index
    %c0_43 = arith.constant 0 : index
    %c0_44 = arith.constant 0 : index
    %81 = vector.load %arg3[%c0_42, %c0_43, %c0_44] : memref<1x48x256xf32, #tpu.memory_space<vmem>>, vector<1x48x256xf32>
    %82 = vector.shape_cast %81 : vector<1x48x256xf32> to vector<48x256xf32>
    %cst_45 = arith.constant dense<0.000000e+00> : vector<32x256xf32>
    %83 = tpu.matmul %80, %82, %cst_45 {dimension_numbers = #tpu.dot_dimension_numbers<[1], [0], [0], [1], [0, 0, 1, 1], [], []>} : vector<32x48xf32>, vector<48x256xf32>, vector<32x256xf32> -> vector<32x256xf32>
    %c48 = arith.constant 48 : index
    %c0_46 = arith.constant 0 : index
    %84 = vector.load %arg12[%c48, %c0_46] : memref<896x1xf32, #tpu.memory_space<vmem>>, vector<32x1xf32>
    %85 = vector.broadcast %84 : vector<32x1xf32> to vector<32x256xf32>
    %86 = arith.addf %83, %85 : vector<32x256xf32>
    %cst_47 = arith.constant 0.000000e+00 : f32
    %87 = vector.broadcast %cst_47 : f32 to vector<32x256xf32>
    %88 = arith.maximumf %86, %87 : vector<32x256xf32>
    %c512 = arith.constant 512 : index
    %c0_48 = arith.constant 0 : index
    %89 = vector.load %arg7[%c512, %c0_48] : memref<1472x32xf32, #tpu.memory_space<vmem>>, vector<384x32xf32>
    %cst_49 = arith.constant dense<0.000000e+00> : vector<384x256xf32>
    %90 = tpu.matmul %89, %88, %cst_49 {dimension_numbers = #tpu.dot_dimension_numbers<[1], [0], [0], [1], [0, 0, 1, 1], [], []>} : vector<384x32xf32>, vector<32x256xf32>, vector<384x256xf32> -> vector<384x256xf32>
    %c896 = arith.constant 896 : index
    %c0_50 = arith.constant 0 : index
    %91 = vector.load %arg7[%c896, %c0_50] : memref<1472x32xf32, #tpu.memory_space<vmem>>, vector<384x32xf32>
    %cst_51 = arith.constant dense<0.000000e+00> : vector<384x256xf32>
    %92 = tpu.matmul %91, %79, %cst_51 {dimension_numbers = #tpu.dot_dimension_numbers<[1], [0], [0], [1], [0, 0, 1, 1], [], []>} : vector<384x32xf32>, vector<32x256xf32>, vector<384x256xf32> -> vector<384x256xf32>
    %93 = arith.addf %90, %92 : vector<384x256xf32>
    %c1280 = arith.constant 1280 : index
    %c0_52 = arith.constant 0 : index
    %94 = vector.load %arg7[%c1280, %c0_52] : memref<1472x32xf32, #tpu.memory_space<vmem>>, vector<192x32xf32>
    %cst_53 = arith.constant dense<0.000000e+00> : vector<192x256xf32>
    %95 = tpu.matmul %94, %79, %cst_53 {dimension_numbers = #tpu.dot_dimension_numbers<[1], [0], [0], [1], [0, 0, 1, 1], [], []>} : vector<192x32xf32>, vector<32x256xf32>, vector<192x256xf32> -> vector<192x256xf32>
    %cst_54 = arith.constant 0.000000e+00 : f32
    %96 = vector.broadcast %cst_54 : f32 to vector<32x256xf32>
    %cst_55 = arith.constant 0.000000e+00 : f32
    %97 = vector.broadcast %cst_55 : f32 to vector<32x256xf32>
    %cst_56 = arith.constant 0.000000e+00 : f32
    %98 = vector.broadcast %cst_56 : f32 to vector<16x256xf32>
    %99 = tpu.concatenate %97, %96 in 0 : vector<32x256xf32>, vector<32x256xf32> -> vector<64x256xf32>
    %c0_57 = arith.constant 0 : index
    %c0_58 = arith.constant 0 : index
    %100 = vector.load %arg8[%c0_57, %c0_58] : memref<768x64xf32, #tpu.memory_space<vmem>>, vector<128x64xf32>
    %cst_59 = arith.constant dense<0.000000e+00> : vector<128x256xf32>
    %101 = tpu.matmul %100, %99, %cst_59 {dimension_numbers = #tpu.dot_dimension_numbers<[1], [0], [0], [1], [0, 0, 1, 1], [], []>} : vector<128x64xf32>, vector<64x256xf32>, vector<128x256xf32> -> vector<128x256xf32>
    %c128 = arith.constant 128 : index
    %c0_60 = arith.constant 0 : index
    %102 = vector.load %arg12[%c128, %c0_60] : memref<896x1xf32, #tpu.memory_space<vmem>>, vector<128x1xf32>
    %103 = vector.broadcast %102 : vector<128x1xf32> to vector<128x256xf32>
    %104 = arith.addf %101, %103 : vector<128x256xf32>
    %105 = vector.extract_strided_slice %93 {offsets = [0, 0], sizes = [64, 256], strides = [1, 1]} : vector<384x256xf32> to vector<64x256xf32>
    %106 = vector.extract_strided_slice %104 {offsets = [0, 0], sizes = [64, 256], strides = [1, 1]} : vector<128x256xf32> to vector<64x256xf32>
    %107 = arith.addf %105, %106 : vector<64x256xf32>
    %108 = vector.extract_strided_slice %107 {offsets = [0, 0], sizes = [16, 256], strides = [1, 1]} : vector<64x256xf32> to vector<16x256xf32>
    %109 = vector.extract_strided_slice %107 {offsets = [16, 0], sizes = [16, 256], strides = [1, 1]} : vector<64x256xf32> to vector<16x256xf32>
    %110 = vector.extract_strided_slice %104 {offsets = [64, 0], sizes = [16, 256], strides = [1, 1]} : vector<128x256xf32> to vector<16x256xf32>
    %111 = vector.extract_strided_slice %104 {offsets = [80, 0], sizes = [16, 256], strides = [1, 1]} : vector<128x256xf32> to vector<16x256xf32>
    %112 = arith.subf %111, %109 : vector<16x256xf32>
    %113 = arith.subf %109, %111 : vector<16x256xf32>
    %114 = math.exp %113 : vector<16x256xf32>
    %115 = arith.addf %112, %114 : vector<16x256xf32>
    %116 = arith.subf %108, %110 : vector<16x256xf32>
    %117 = arith.mulf %116, %116 : vector<16x256xf32>
    %cst_61 = arith.constant 0.000000e+00 : f32
    %118 = vector.broadcast %cst_61 : f32 to vector<16x256xf32>
    %119 = arith.subf %118, %111 : vector<16x256xf32>
    %120 = math.exp %119 : vector<16x256xf32>
    %121 = arith.mulf %117, %120 : vector<16x256xf32>
    %122 = arith.addf %115, %121 : vector<16x256xf32>
    %cst_62 = arith.constant 1.000000e+00 : f32
    %123 = vector.broadcast %cst_62 : f32 to vector<16x256xf32>
    %124 = arith.subf %122, %123 : vector<16x256xf32>
    %cst_63 = arith.constant 5.000000e-01 : f32
    %125 = vector.broadcast %cst_63 : f32 to vector<16x256xf32>
    %126 = arith.mulf %125, %124 : vector<16x256xf32>
    %127 = arith.addf %98, %126 : vector<16x256xf32>
    %128 = vector.extract_strided_slice %95 {offsets = [0, 0], sizes = [32, 256], strides = [1, 1]} : vector<192x256xf32> to vector<32x256xf32>
    %129 = vector.extract_strided_slice %104 {offsets = [96, 0], sizes = [32, 256], strides = [1, 1]} : vector<128x256xf32> to vector<32x256xf32>
    %130 = arith.addf %128, %129 : vector<32x256xf32>
    %c32_64 = arith.constant 32 : index
    %c0_65 = arith.constant 0 : index
    %131 = vector.load %arg6[%c32_64, %c0_65] : memref<224x16xf32, #tpu.memory_space<vmem>>, vector<32x16xf32>
    %cst_66 = arith.constant dense<0.000000e+00> : vector<32x256xf32>
    %132 = tpu.matmul %131, %108, %cst_66 {dimension_numbers = #tpu.dot_dimension_numbers<[1], [0], [0], [1], [0, 0, 1, 1], [], []>} : vector<32x16xf32>, vector<16x256xf32>, vector<32x256xf32> -> vector<32x256xf32>
    %133 = arith.addf %130, %132 : vector<32x256xf32>
    %134 = math.tanh %133 : vector<32x256xf32>
    %135 = vector.extract_strided_slice %107 {offsets = [32, 0], sizes = [32, 256], strides = [1, 1]} : vector<64x256xf32> to vector<32x256xf32>
    %136 = math.tanh %135 : vector<32x256xf32>
    %137 = tpu.concatenate %136, %134 in 0 : vector<32x256xf32>, vector<32x256xf32> -> vector<64x256xf32>
    %c128_67 = arith.constant 128 : index
    %c0_68 = arith.constant 0 : index
    %138 = vector.load %arg8[%c128_67, %c0_68] : memref<768x64xf32, #tpu.memory_space<vmem>>, vector<128x64xf32>
    %cst_69 = arith.constant dense<0.000000e+00> : vector<128x256xf32>
    %139 = tpu.matmul %138, %137, %cst_69 {dimension_numbers = #tpu.dot_dimension_numbers<[1], [0], [0], [1], [0, 0, 1, 1], [], []>} : vector<128x64xf32>, vector<64x256xf32>, vector<128x256xf32> -> vector<128x256xf32>
    %c256_70 = arith.constant 256 : index
    %c0_71 = arith.constant 0 : index
    %140 = vector.load %arg12[%c256_70, %c0_71] : memref<896x1xf32, #tpu.memory_space<vmem>>, vector<128x1xf32>
    %141 = vector.broadcast %140 : vector<128x1xf32> to vector<128x256xf32>
    %142 = arith.addf %139, %141 : vector<128x256xf32>
    %143 = vector.extract_strided_slice %93 {offsets = [64, 0], sizes = [64, 256], strides = [1, 1]} : vector<384x256xf32> to vector<64x256xf32>
    %144 = vector.extract_strided_slice %142 {offsets = [0, 0], sizes = [64, 256], strides = [1, 1]} : vector<128x256xf32> to vector<64x256xf32>
    %145 = arith.addf %143, %144 : vector<64x256xf32>
    %146 = vector.extract_strided_slice %145 {offsets = [0, 0], sizes = [16, 256], strides = [1, 1]} : vector<64x256xf32> to vector<16x256xf32>
    %147 = vector.extract_strided_slice %145 {offsets = [16, 0], sizes = [16, 256], strides = [1, 1]} : vector<64x256xf32> to vector<16x256xf32>
    %148 = vector.extract_strided_slice %142 {offsets = [64, 0], sizes = [16, 256], strides = [1, 1]} : vector<128x256xf32> to vector<16x256xf32>
    %149 = vector.extract_strided_slice %142 {offsets = [80, 0], sizes = [16, 256], strides = [1, 1]} : vector<128x256xf32> to vector<16x256xf32>
    %150 = arith.subf %149, %147 : vector<16x256xf32>
    %151 = arith.subf %147, %149 : vector<16x256xf32>
    %152 = math.exp %151 : vector<16x256xf32>
    %153 = arith.addf %150, %152 : vector<16x256xf32>
    %154 = arith.subf %146, %148 : vector<16x256xf32>
    %155 = arith.mulf %154, %154 : vector<16x256xf32>
    %cst_72 = arith.constant 0.000000e+00 : f32
    %156 = vector.broadcast %cst_72 : f32 to vector<16x256xf32>
    %157 = arith.subf %156, %149 : vector<16x256xf32>
    %158 = math.exp %157 : vector<16x256xf32>
    %159 = arith.mulf %155, %158 : vector<16x256xf32>
    %160 = arith.addf %153, %159 : vector<16x256xf32>
    %cst_73 = arith.constant 1.000000e+00 : f32
    %161 = vector.broadcast %cst_73 : f32 to vector<16x256xf32>
    %162 = arith.subf %160, %161 : vector<16x256xf32>
    %cst_74 = arith.constant 5.000000e-01 : f32
    %163 = vector.broadcast %cst_74 : f32 to vector<16x256xf32>
    %164 = arith.mulf %163, %162 : vector<16x256xf32>
    %165 = arith.addf %127, %164 : vector<16x256xf32>
    %166 = vector.extract_strided_slice %95 {offsets = [32, 0], sizes = [32, 256], strides = [1, 1]} : vector<192x256xf32> to vector<32x256xf32>
    %167 = vector.extract_strided_slice %142 {offsets = [96, 0], sizes = [32, 256], strides = [1, 1]} : vector<128x256xf32> to vector<32x256xf32>
    %168 = arith.addf %166, %167 : vector<32x256xf32>
    %c64 = arith.constant 64 : index
    %c0_75 = arith.constant 0 : index
    %169 = vector.load %arg6[%c64, %c0_75] : memref<224x16xf32, #tpu.memory_space<vmem>>, vector<32x16xf32>
    %cst_76 = arith.constant dense<0.000000e+00> : vector<32x256xf32>
    %170 = tpu.matmul %169, %146, %cst_76 {dimension_numbers = #tpu.dot_dimension_numbers<[1], [0], [0], [1], [0, 0, 1, 1], [], []>} : vector<32x16xf32>, vector<16x256xf32>, vector<32x256xf32> -> vector<32x256xf32>
    %171 = arith.addf %168, %170 : vector<32x256xf32>
    %172 = math.tanh %171 : vector<32x256xf32>
    %173 = vector.extract_strided_slice %145 {offsets = [32, 0], sizes = [32, 256], strides = [1, 1]} : vector<64x256xf32> to vector<32x256xf32>
    %174 = math.tanh %173 : vector<32x256xf32>
    %175 = tpu.concatenate %174, %172 in 0 : vector<32x256xf32>, vector<32x256xf32> -> vector<64x256xf32>
    %c256_77 = arith.constant 256 : index
    %c0_78 = arith.constant 0 : index
    %176 = vector.load %arg8[%c256_77, %c0_78] : memref<768x64xf32, #tpu.memory_space<vmem>>, vector<128x64xf32>
    %cst_79 = arith.constant dense<0.000000e+00> : vector<128x256xf32>
    %177 = tpu.matmul %176, %175, %cst_79 {dimension_numbers = #tpu.dot_dimension_numbers<[1], [0], [0], [1], [0, 0, 1, 1], [], []>} : vector<128x64xf32>, vector<64x256xf32>, vector<128x256xf32> -> vector<128x256xf32>
    %c384 = arith.constant 384 : index
    %c0_80 = arith.constant 0 : index
    %178 = vector.load %arg12[%c384, %c0_80] : memref<896x1xf32, #tpu.memory_space<vmem>>, vector<128x1xf32>
    %179 = vector.broadcast %178 : vector<128x1xf32> to vector<128x256xf32>
    %180 = arith.addf %177, %179 : vector<128x256xf32>
    %181 = vector.extract_strided_slice %93 {offsets = [128, 0], sizes = [64, 256], strides = [1, 1]} : vector<384x256xf32> to vector<64x256xf32>
    %182 = vector.extract_strided_slice %180 {offsets = [0, 0], sizes = [64, 256], strides = [1, 1]} : vector<128x256xf32> to vector<64x256xf32>
    %183 = arith.addf %181, %182 : vector<64x256xf32>
    %184 = vector.extract_strided_slice %183 {offsets = [0, 0], sizes = [16, 256], strides = [1, 1]} : vector<64x256xf32> to vector<16x256xf32>
    %185 = vector.extract_strided_slice %183 {offsets = [16, 0], sizes = [16, 256], strides = [1, 1]} : vector<64x256xf32> to vector<16x256xf32>
    %186 = vector.extract_strided_slice %180 {offsets = [64, 0], sizes = [16, 256], strides = [1, 1]} : vector<128x256xf32> to vector<16x256xf32>
    %187 = vector.extract_strided_slice %180 {offsets = [80, 0], sizes = [16, 256], strides = [1, 1]} : vector<128x256xf32> to vector<16x256xf32>
    %188 = arith.subf %187, %185 : vector<16x256xf32>
    %189 = arith.subf %185, %187 : vector<16x256xf32>
    %190 = math.exp %189 : vector<16x256xf32>
    %191 = arith.addf %188, %190 : vector<16x256xf32>
    %192 = arith.subf %184, %186 : vector<16x256xf32>
    %193 = arith.mulf %192, %192 : vector<16x256xf32>
    %cst_81 = arith.constant 0.000000e+00 : f32
    %194 = vector.broadcast %cst_81 : f32 to vector<16x256xf32>
    %195 = arith.subf %194, %187 : vector<16x256xf32>
    %196 = math.exp %195 : vector<16x256xf32>
    %197 = arith.mulf %193, %196 : vector<16x256xf32>
    %198 = arith.addf %191, %197 : vector<16x256xf32>
    %cst_82 = arith.constant 1.000000e+00 : f32
    %199 = vector.broadcast %cst_82 : f32 to vector<16x256xf32>
    %200 = arith.subf %198, %199 : vector<16x256xf32>
    %cst_83 = arith.constant 5.000000e-01 : f32
    %201 = vector.broadcast %cst_83 : f32 to vector<16x256xf32>
    %202 = arith.mulf %201, %200 : vector<16x256xf32>
    %203 = arith.addf %165, %202 : vector<16x256xf32>
    %204 = vector.extract_strided_slice %95 {offsets = [64, 0], sizes = [32, 256], strides = [1, 1]} : vector<192x256xf32> to vector<32x256xf32>
    %205 = vector.extract_strided_slice %180 {offsets = [96, 0], sizes = [32, 256], strides = [1, 1]} : vector<128x256xf32> to vector<32x256xf32>
    %206 = arith.addf %204, %205 : vector<32x256xf32>
    %c96 = arith.constant 96 : index
    %c0_84 = arith.constant 0 : index
    %207 = vector.load %arg6[%c96, %c0_84] : memref<224x16xf32, #tpu.memory_space<vmem>>, vector<32x16xf32>
    %cst_85 = arith.constant dense<0.000000e+00> : vector<32x256xf32>
    %208 = tpu.matmul %207, %184, %cst_85 {dimension_numbers = #tpu.dot_dimension_numbers<[1], [0], [0], [1], [0, 0, 1, 1], [], []>} : vector<32x16xf32>, vector<16x256xf32>, vector<32x256xf32> -> vector<32x256xf32>
    %209 = arith.addf %206, %208 : vector<32x256xf32>
    %210 = math.tanh %209 : vector<32x256xf32>
    %211 = vector.extract_strided_slice %183 {offsets = [32, 0], sizes = [32, 256], strides = [1, 1]} : vector<64x256xf32> to vector<32x256xf32>
    %212 = math.tanh %211 : vector<32x256xf32>
    %213 = tpu.concatenate %212, %210 in 0 : vector<32x256xf32>, vector<32x256xf32> -> vector<64x256xf32>
    %c384_86 = arith.constant 384 : index
    %c0_87 = arith.constant 0 : index
    %214 = vector.load %arg8[%c384_86, %c0_87] : memref<768x64xf32, #tpu.memory_space<vmem>>, vector<128x64xf32>
    %cst_88 = arith.constant dense<0.000000e+00> : vector<128x256xf32>
    %215 = tpu.matmul %214, %213, %cst_88 {dimension_numbers = #tpu.dot_dimension_numbers<[1], [0], [0], [1], [0, 0, 1, 1], [], []>} : vector<128x64xf32>, vector<64x256xf32>, vector<128x256xf32> -> vector<128x256xf32>
    %c512_89 = arith.constant 512 : index
    %c0_90 = arith.constant 0 : index
    %216 = vector.load %arg12[%c512_89, %c0_90] : memref<896x1xf32, #tpu.memory_space<vmem>>, vector<128x1xf32>
    %217 = vector.broadcast %216 : vector<128x1xf32> to vector<128x256xf32>
    %218 = arith.addf %215, %217 : vector<128x256xf32>
    %219 = vector.extract_strided_slice %93 {offsets = [192, 0], sizes = [64, 256], strides = [1, 1]} : vector<384x256xf32> to vector<64x256xf32>
    %220 = vector.extract_strided_slice %218 {offsets = [0, 0], sizes = [64, 256], strides = [1, 1]} : vector<128x256xf32> to vector<64x256xf32>
    %221 = arith.addf %219, %220 : vector<64x256xf32>
    %222 = vector.extract_strided_slice %221 {offsets = [0, 0], sizes = [16, 256], strides = [1, 1]} : vector<64x256xf32> to vector<16x256xf32>
    %223 = vector.extract_strided_slice %221 {offsets = [16, 0], sizes = [16, 256], strides = [1, 1]} : vector<64x256xf32> to vector<16x256xf32>
    %224 = vector.extract_strided_slice %218 {offsets = [64, 0], sizes = [16, 256], strides = [1, 1]} : vector<128x256xf32> to vector<16x256xf32>
    %225 = vector.extract_strided_slice %218 {offsets = [80, 0], sizes = [16, 256], strides = [1, 1]} : vector<128x256xf32> to vector<16x256xf32>
    %226 = arith.subf %225, %223 : vector<16x256xf32>
    %227 = arith.subf %223, %225 : vector<16x256xf32>
    %228 = math.exp %227 : vector<16x256xf32>
    %229 = arith.addf %226, %228 : vector<16x256xf32>
    %230 = arith.subf %222, %224 : vector<16x256xf32>
    %231 = arith.mulf %230, %230 : vector<16x256xf32>
    %cst_91 = arith.constant 0.000000e+00 : f32
    %232 = vector.broadcast %cst_91 : f32 to vector<16x256xf32>
    %233 = arith.subf %232, %225 : vector<16x256xf32>
    %234 = math.exp %233 : vector<16x256xf32>
    %235 = arith.mulf %231, %234 : vector<16x256xf32>
    %236 = arith.addf %229, %235 : vector<16x256xf32>
    %cst_92 = arith.constant 1.000000e+00 : f32
    %237 = vector.broadcast %cst_92 : f32 to vector<16x256xf32>
    %238 = arith.subf %236, %237 : vector<16x256xf32>
    %cst_93 = arith.constant 5.000000e-01 : f32
    %239 = vector.broadcast %cst_93 : f32 to vector<16x256xf32>
    %240 = arith.mulf %239, %238 : vector<16x256xf32>
    %241 = arith.addf %203, %240 : vector<16x256xf32>
    %242 = vector.extract_strided_slice %95 {offsets = [96, 0], sizes = [32, 256], strides = [1, 1]} : vector<192x256xf32> to vector<32x256xf32>
    %243 = vector.extract_strided_slice %218 {offsets = [96, 0], sizes = [32, 256], strides = [1, 1]} : vector<128x256xf32> to vector<32x256xf32>
    %244 = arith.addf %242, %243 : vector<32x256xf32>
    %c128_94 = arith.constant 128 : index
    %c0_95 = arith.constant 0 : index
    %245 = vector.load %arg6[%c128_94, %c0_95] : memref<224x16xf32, #tpu.memory_space<vmem>>, vector<32x16xf32>
    %cst_96 = arith.constant dense<0.000000e+00> : vector<32x256xf32>
    %246 = tpu.matmul %245, %222, %cst_96 {dimension_numbers = #tpu.dot_dimension_numbers<[1], [0], [0], [1], [0, 0, 1, 1], [], []>} : vector<32x16xf32>, vector<16x256xf32>, vector<32x256xf32> -> vector<32x256xf32>
    %247 = arith.addf %244, %246 : vector<32x256xf32>
    %248 = math.tanh %247 : vector<32x256xf32>
    %249 = vector.extract_strided_slice %221 {offsets = [32, 0], sizes = [32, 256], strides = [1, 1]} : vector<64x256xf32> to vector<32x256xf32>
    %250 = math.tanh %249 : vector<32x256xf32>
    %251 = tpu.concatenate %250, %248 in 0 : vector<32x256xf32>, vector<32x256xf32> -> vector<64x256xf32>
    %c512_97 = arith.constant 512 : index
    %c0_98 = arith.constant 0 : index
    %252 = vector.load %arg8[%c512_97, %c0_98] : memref<768x64xf32, #tpu.memory_space<vmem>>, vector<128x64xf32>
    %cst_99 = arith.constant dense<0.000000e+00> : vector<128x256xf32>
    %253 = tpu.matmul %252, %251, %cst_99 {dimension_numbers = #tpu.dot_dimension_numbers<[1], [0], [0], [1], [0, 0, 1, 1], [], []>} : vector<128x64xf32>, vector<64x256xf32>, vector<128x256xf32> -> vector<128x256xf32>
    %c640 = arith.constant 640 : index
    %c0_100 = arith.constant 0 : index
    %254 = vector.load %arg12[%c640, %c0_100] : memref<896x1xf32, #tpu.memory_space<vmem>>, vector<128x1xf32>
    %255 = vector.broadcast %254 : vector<128x1xf32> to vector<128x256xf32>
    %256 = arith.addf %253, %255 : vector<128x256xf32>
    %257 = vector.extract_strided_slice %93 {offsets = [256, 0], sizes = [64, 256], strides = [1, 1]} : vector<384x256xf32> to vector<64x256xf32>
    %258 = vector.extract_strided_slice %256 {offsets = [0, 0], sizes = [64, 256], strides = [1, 1]} : vector<128x256xf32> to vector<64x256xf32>
    %259 = arith.addf %257, %258 : vector<64x256xf32>
    %260 = vector.extract_strided_slice %259 {offsets = [0, 0], sizes = [16, 256], strides = [1, 1]} : vector<64x256xf32> to vector<16x256xf32>
    %261 = vector.extract_strided_slice %259 {offsets = [16, 0], sizes = [16, 256], strides = [1, 1]} : vector<64x256xf32> to vector<16x256xf32>
    %262 = vector.extract_strided_slice %256 {offsets = [64, 0], sizes = [16, 256], strides = [1, 1]} : vector<128x256xf32> to vector<16x256xf32>
    %263 = vector.extract_strided_slice %256 {offsets = [80, 0], sizes = [16, 256], strides = [1, 1]} : vector<128x256xf32> to vector<16x256xf32>
    %264 = arith.subf %263, %261 : vector<16x256xf32>
    %265 = arith.subf %261, %263 : vector<16x256xf32>
    %266 = math.exp %265 : vector<16x256xf32>
    %267 = arith.addf %264, %266 : vector<16x256xf32>
    %268 = arith.subf %260, %262 : vector<16x256xf32>
    %269 = arith.mulf %268, %268 : vector<16x256xf32>
    %cst_101 = arith.constant 0.000000e+00 : f32
    %270 = vector.broadcast %cst_101 : f32 to vector<16x256xf32>
    %271 = arith.subf %270, %263 : vector<16x256xf32>
    %272 = math.exp %271 : vector<16x256xf32>
    %273 = arith.mulf %269, %272 : vector<16x256xf32>
    %274 = arith.addf %267, %273 : vector<16x256xf32>
    %cst_102 = arith.constant 1.000000e+00 : f32
    %275 = vector.broadcast %cst_102 : f32 to vector<16x256xf32>
    %276 = arith.subf %274, %275 : vector<16x256xf32>
    %cst_103 = arith.constant 5.000000e-01 : f32
    %277 = vector.broadcast %cst_103 : f32 to vector<16x256xf32>
    %278 = arith.mulf %277, %276 : vector<16x256xf32>
    %279 = arith.addf %241, %278 : vector<16x256xf32>
    %280 = vector.extract_strided_slice %95 {offsets = [128, 0], sizes = [32, 256], strides = [1, 1]} : vector<192x256xf32> to vector<32x256xf32>
    %281 = vector.extract_strided_slice %256 {offsets = [96, 0], sizes = [32, 256], strides = [1, 1]} : vector<128x256xf32> to vector<32x256xf32>
    %282 = arith.addf %280, %281 : vector<32x256xf32>
    %c160 = arith.constant 160 : index
    %c0_104 = arith.constant 0 : index
    %283 = vector.load %arg6[%c160, %c0_104] : memref<224x16xf32, #tpu.memory_space<vmem>>, vector<32x16xf32>
    %cst_105 = arith.constant dense<0.000000e+00> : vector<32x256xf32>
    %284 = tpu.matmul %283, %260, %cst_105 {dimension_numbers = #tpu.dot_dimension_numbers<[1], [0], [0], [1], [0, 0, 1, 1], [], []>} : vector<32x16xf32>, vector<16x256xf32>, vector<32x256xf32> -> vector<32x256xf32>
    %285 = arith.addf %282, %284 : vector<32x256xf32>
    %286 = math.tanh %285 : vector<32x256xf32>
    %287 = vector.extract_strided_slice %259 {offsets = [32, 0], sizes = [32, 256], strides = [1, 1]} : vector<64x256xf32> to vector<32x256xf32>
    %288 = math.tanh %287 : vector<32x256xf32>
    %289 = tpu.concatenate %288, %286 in 0 : vector<32x256xf32>, vector<32x256xf32> -> vector<64x256xf32>
    %c640_106 = arith.constant 640 : index
    %c0_107 = arith.constant 0 : index
    %290 = vector.load %arg8[%c640_106, %c0_107] : memref<768x64xf32, #tpu.memory_space<vmem>>, vector<128x64xf32>
    %cst_108 = arith.constant dense<0.000000e+00> : vector<128x256xf32>
    %291 = tpu.matmul %290, %289, %cst_108 {dimension_numbers = #tpu.dot_dimension_numbers<[1], [0], [0], [1], [0, 0, 1, 1], [], []>} : vector<128x64xf32>, vector<64x256xf32>, vector<128x256xf32> -> vector<128x256xf32>
    %c768 = arith.constant 768 : index
    %c0_109 = arith.constant 0 : index
    %292 = vector.load %arg12[%c768, %c0_109] : memref<896x1xf32, #tpu.memory_space<vmem>>, vector<128x1xf32>
    %293 = vector.broadcast %292 : vector<128x1xf32> to vector<128x256xf32>
    %294 = arith.addf %291, %293 : vector<128x256xf32>
    %295 = vector.extract_strided_slice %93 {offsets = [320, 0], sizes = [64, 256], strides = [1, 1]} : vector<384x256xf32> to vector<64x256xf32>
    %296 = vector.extract_strided_slice %294 {offsets = [0, 0], sizes = [64, 256], strides = [1, 1]} : vector<128x256xf32> to vector<64x256xf32>
    %297 = arith.addf %295, %296 : vector<64x256xf32>
    %298 = vector.extract_strided_slice %297 {offsets = [0, 0], sizes = [16, 256], strides = [1, 1]} : vector<64x256xf32> to vector<16x256xf32>
    %299 = vector.extract_strided_slice %297 {offsets = [16, 0], sizes = [16, 256], strides = [1, 1]} : vector<64x256xf32> to vector<16x256xf32>
    %300 = vector.extract_strided_slice %294 {offsets = [64, 0], sizes = [16, 256], strides = [1, 1]} : vector<128x256xf32> to vector<16x256xf32>
    %301 = vector.extract_strided_slice %294 {offsets = [80, 0], sizes = [16, 256], strides = [1, 1]} : vector<128x256xf32> to vector<16x256xf32>
    %302 = arith.subf %301, %299 : vector<16x256xf32>
    %303 = arith.subf %299, %301 : vector<16x256xf32>
    %304 = math.exp %303 : vector<16x256xf32>
    %305 = arith.addf %302, %304 : vector<16x256xf32>
    %306 = arith.subf %298, %300 : vector<16x256xf32>
    %307 = arith.mulf %306, %306 : vector<16x256xf32>
    %cst_110 = arith.constant 0.000000e+00 : f32
    %308 = vector.broadcast %cst_110 : f32 to vector<16x256xf32>
    %309 = arith.subf %308, %301 : vector<16x256xf32>
    %310 = math.exp %309 : vector<16x256xf32>
    %311 = arith.mulf %307, %310 : vector<16x256xf32>
    %312 = arith.addf %305, %311 : vector<16x256xf32>
    %cst_111 = arith.constant 1.000000e+00 : f32
    %313 = vector.broadcast %cst_111 : f32 to vector<16x256xf32>
    %314 = arith.subf %312, %313 : vector<16x256xf32>
    %cst_112 = arith.constant 5.000000e-01 : f32
    %315 = vector.broadcast %cst_112 : f32 to vector<16x256xf32>
    %316 = arith.mulf %315, %314 : vector<16x256xf32>
    %317 = arith.addf %279, %316 : vector<16x256xf32>
    %318 = vector.extract_strided_slice %95 {offsets = [160, 0], sizes = [32, 256], strides = [1, 1]} : vector<192x256xf32> to vector<32x256xf32>
    %319 = vector.extract_strided_slice %294 {offsets = [96, 0], sizes = [32, 256], strides = [1, 1]} : vector<128x256xf32> to vector<32x256xf32>
    %320 = arith.addf %318, %319 : vector<32x256xf32>
    %c192 = arith.constant 192 : index
    %c0_113 = arith.constant 0 : index
    %321 = vector.load %arg6[%c192, %c0_113] : memref<224x16xf32, #tpu.memory_space<vmem>>, vector<32x16xf32>
    %cst_114 = arith.constant dense<0.000000e+00> : vector<32x256xf32>
    %322 = tpu.matmul %321, %298, %cst_114 {dimension_numbers = #tpu.dot_dimension_numbers<[1], [0], [0], [1], [0, 0, 1, 1], [], []>} : vector<32x16xf32>, vector<16x256xf32>, vector<32x256xf32> -> vector<32x256xf32>
    %323 = arith.addf %320, %322 : vector<32x256xf32>
    %324 = math.tanh %323 : vector<32x256xf32>
    %325 = tpu.concatenate %134, %172, %210, %248, %286, %324 in 0 : vector<32x256xf32>, vector<32x256xf32>, vector<32x256xf32>, vector<32x256xf32>, vector<32x256xf32>, vector<32x256xf32> -> vector<192x256xf32>
    %c0_115 = arith.constant 0 : index
    %c0_116 = arith.constant 0 : index
    %326 = vector.load %arg11[%c0_115, %c0_116] : memref<48x192xf32, #tpu.memory_space<vmem>>, vector<48x192xf32>
    %cst_117 = arith.constant dense<0.000000e+00> : vector<48x256xf32>
    %327 = tpu.matmul %326, %325, %cst_117 {dimension_numbers = #tpu.dot_dimension_numbers<[1], [0], [0], [1], [0, 0, 1, 1], [], []>} : vector<48x192xf32>, vector<192x256xf32>, vector<48x256xf32> -> vector<48x256xf32>
    %c80 = arith.constant 80 : index
    %c0_118 = arith.constant 0 : index
    %328 = vector.load %arg12[%c80, %c0_118] : memref<896x1xf32, #tpu.memory_space<vmem>>, vector<48x1xf32>
    %329 = vector.broadcast %328 : vector<48x1xf32> to vector<48x256xf32>
    %330 = arith.addf %327, %329 : vector<48x256xf32>
    %cst_119 = arith.constant 5.000000e-01 : f32
    %331 = vector.broadcast %cst_119 : f32 to vector<48x256xf32>
    %332 = arith.mulf %331, %330 : vector<48x256xf32>
    %333 = math.tanh %332 : vector<48x256xf32>
    %cst_120 = arith.constant 5.000000e-01 : f32
    %334 = vector.broadcast %cst_120 : f32 to vector<48x256xf32>
    %335 = arith.mulf %334, %333 : vector<48x256xf32>
    %cst_121 = arith.constant 5.000000e-01 : f32
    %336 = vector.broadcast %cst_121 : f32 to vector<48x256xf32>
    %337 = arith.addf %335, %336 : vector<48x256xf32>
    %c0_122 = arith.constant 0 : index
    %c0_123 = arith.constant 0 : index
    %c0_124 = arith.constant 0 : index
    %338 = vector.load %arg13[%c0_122, %c0_123, %c0_124] : memref<1x48x256xf32, #tpu.memory_space<vmem>>, vector<1x48x256xf32>
    %339 = vector.shape_cast %338 : vector<1x48x256xf32> to vector<48x256xf32>
    %340 = vector.shape_cast %337 : vector<48x256xf32> to vector<1x48x256xf32>
    tpu.vector_store %arg13[%c0_122, %c0_123, %c0_124], %340 {strides = array<i32>} : memref<1x48x256xf32, #tpu.memory_space<vmem>>, vector<1x48x256xf32>,
    %341 = vector.shape_cast %317 : vector<16x256xf32> to vector<1x16x256xf32>
    %cst_125 = arith.constant dense<0.000000e+00> : vector<1xf32>
    %342 = vector.multi_reduction <add>, %341, %cst_125 [1, 2] : vector<1x16x256xf32> to vector<1xf32>
    %343 = vector.shape_cast %342 : vector<1xf32> to vector<1x1x1xf32>
    %344 = vector.extract %343[0, 0, 0] : f32 from vector<1x1x1xf32>
    %345 = vector.broadcast %344 : f32 to vector<1x1xf32>
    %c0_126 = arith.constant 0 : index
    %c0_127 = arith.constant 0 : index
    %c0_128 = arith.constant 0 : index
    %346 = vector.load %arg14[%c0_126, %c0_127, %c0_128] : memref<1x1x1xf32, #tpu.memory_space<vmem>>, vector<1x1x1xf32>
    %347 = vector.shape_cast %346 : vector<1x1x1xf32> to vector<1x1xf32>
    %348 = vector.shape_cast %345 : vector<1x1xf32> to vector<1x1x1xf32>
    tpu.vector_store %arg14[%c0_126, %c0_127, %c0_128], %348 {strides = array<i32>} : memref<1x1x1xf32, #tpu.memory_space<vmem>>, vector<1x1x1xf32>,
    return
  }
  func.func @transform_0(%arg0: i32) -> (i32, i32, i32) {
    %c0_i32 = arith.constant 0 : i32
    %c0_i32_0 = arith.constant 0 : i32
    %c0_i32_1 = arith.constant 0 : i32
    return %arg0, %c0_i32, %c0_i32_0 : i32, i32, i32
  }
  func.func @transform_1(%arg0: i32) -> (i32, i32, i32) {
    %c0_i32 = arith.constant 0 : i32
    %c0_i32_0 = arith.constant 0 : i32
    %c0_i32_1 = arith.constant 0 : i32
    return %arg0, %c0_i32, %c0_i32_0 : i32, i32, i32
  }
  func.func @transform_2(%arg0: i32) -> (i32, i32, i32) {
    %c0_i32 = arith.constant 0 : i32
    %c0_i32_0 = arith.constant 0 : i32
    %c0_i32_1 = arith.constant 0 : i32
    return %arg0, %c0_i32, %c0_i32_0 : i32, i32, i32
  }
  func.func @transform_3(%arg0: i32) -> (i32, i32, i32) {
    %c0_i32 = arith.constant 0 : i32
    %c0_i32_0 = arith.constant 0 : i32
    %c0_i32_1 = arith.constant 0 : i32
    return %arg0, %c0_i32, %c0_i32_0 : i32, i32, i32
  }
  func.func @transform_4(%arg0: i32) -> (i32, i32) {
    %c0_i32 = arith.constant 0 : i32
    %c0_i32_0 = arith.constant 0 : i32
    %c0_i32_1 = arith.constant 0 : i32
    return %c0_i32, %c0_i32_0 : i32, i32
  }
  func.func @transform_5(%arg0: i32) -> (i32, i32) {
    %c0_i32 = arith.constant 0 : i32
    %c0_i32_0 = arith.constant 0 : i32
    %c0_i32_1 = arith.constant 0 : i32
    return %c0_i32, %c0_i32_0 : i32, i32
  }
  func.func @transform_6(%arg0: i32) -> (i32, i32) {
    %c0_i32 = arith.constant 0 : i32
    %c0_i32_0 = arith.constant 0 : i32
    %c0_i32_1 = arith.constant 0 : i32
    return %c0_i32, %c0_i32_0 : i32, i32
  }
  func.func @transform_7(%arg0: i32) -> (i32, i32) {
    %c0_i32 = arith.constant 0 : i32
    %c0_i32_0 = arith.constant 0 : i32
    %c0_i32_1 = arith.constant 0 : i32
    return %c0_i32, %c0_i32_0 : i32, i32
  }
  func.func @transform_8(%arg0: i32) -> (i32, i32) {
    %c0_i32 = arith.constant 0 : i32
    %c0_i32_0 = arith.constant 0 : i32
    %c0_i32_1 = arith.constant 0 : i32
    return %c0_i32, %c0_i32_0 : i32, i32
  }
  func.func @transform_9(%arg0: i32) -> (i32, i32) {
    %c0_i32 = arith.constant 0 : i32
    %c0_i32_0 = arith.constant 0 : i32
    %c0_i32_1 = arith.constant 0 : i32
    return %c0_i32, %c0_i32_0 : i32, i32
  }
  func.func @transform_10(%arg0: i32) -> (i32, i32) {
    %c0_i32 = arith.constant 0 : i32
    %c0_i32_0 = arith.constant 0 : i32
    %c0_i32_1 = arith.constant 0 : i32
    return %c0_i32, %c0_i32_0 : i32, i32
  }
  func.func @transform_11(%arg0: i32) -> (i32, i32) {
    %c0_i32 = arith.constant 0 : i32
    %c0_i32_0 = arith.constant 0 : i32
    %c0_i32_1 = arith.constant 0 : i32
    return %c0_i32, %c0_i32_0 : i32, i32
  }
  func.func @transform_12(%arg0: i32) -> (i32, i32, i32) {
    %c0_i32 = arith.constant 0 : i32
    %c0_i32_0 = arith.constant 0 : i32
    %c0_i32_1 = arith.constant 0 : i32
    return %arg0, %c0_i32, %c0_i32_0 : i32, i32, i32
  }
  func.func @transform_13(%arg0: i32) -> (i32, i32, i32) {
    %c0_i32 = arith.constant 0 : i32
    %c0_i32_0 = arith.constant 0 : i32
    %c0_i32_1 = arith.constant 0 : i32
    return %arg0, %c0_i32, %c0_i32_0 : i32, i32, i32
  }
}

</mosaic_0001>

<bundles_post_ra>
// kernel: srgqn_forward.1
= control target key start
LH: loop header
LB: loop body
LE: loop exit
PB: predicated region body
PF: predicated region fallthrough
CT: control target
= control target key end

     0   :  { %s10511_s25 = smov 0   ;;  %s16968_s0 = inlined_call_operand.vmem [shape: f32[2,48,768], index: 0, kind: input, shape index: {}]   ;;  %s16969_s1 = inlined_call_operand.vmem [shape: f32[2,3,32], index: 1, kind: input, shape index: {}]   ;;  %s16970_s2 = inlined_call_operand.vmem [shape: f32[2,48,256], index: 2, kind: input, shape index: {}]   ;;  %s16971_s3 = inlined_call_operand.vmem [shape: f32[2,1,32], index: 3, kind: input, shape index: {}]   ;;  %s16972_s4 = inlined_call_operand.vmem [shape: f32[48,48], index: 4, kind: input, shape index: {}]   ;;  %s16973_s5 = inlined_call_operand.vmem [shape: f32[224,16], index: 5, kind: input, shape index: {}]   ;;  %s16974_s6 = inlined_call_operand.vmem [shape: f32[1472,32], index: 6, kind: input, shape index: {}]   ;;  %s16975_s7 = inlined_call_operand.vmem [shape: f32[768,64], index: 7, kind: input, shape index: {}]   ;;  %s16976_s8 = inlined_call_operand.vmem [shape: f32[64,256], index: 8, kind: input, shape index: {}]   ;;  %s16977_s9 = inlined_call_operand.vmem [shape: f32[128,1536], index: 9, kind: input, shape index: {}]   ;;  %s16978_s10 = inlined_call_operand.vmem [shape: f32[48,192], index: 10, kind: input, shape index: {}]   ;;  %s16979_s11 = inlined_call_operand.vmem [shape: f32[896,1], index: 11, kind: input, shape index: {}]   ;;  %s16980_s12 = inlined_call_operand.vmem [shape: f32[2,48,256], index: 12, kind: output, shape index: {0}]   ;;  %s16981_s13 = inlined_call_operand.vmem [shape: f32[2,1,1], index: 13, kind: output, shape index: {1}]  }
   0x1 LB: > { %s8745_s26 = sadd.s32 4294967295, %s10437_s25   ;;  %p8749_p0 = scmp.ge.s32.totalorder %s10437_s25, 1  ;;  %s10437_s25 = sphi %s10511_s25, %s24_s25  }
   0x2   : > { %p417_p1 = scmp.lt.s32.totalorder %s10437_s25, 3 }
   0x4   : > { %p418_p2 = pnand %p8749_p0, %p417_p1 }
   0x6   : > { %421 = sbr.rel (%p418_p2) target bundleno = 4547 (0x11c3), region = 68 }
   0xb   : > { %v541_v0 = vld [vmem:[%s16979_s11 + $0x8] sm:$0xff]  ;;  %p476_p3 = scmp.lt.s32.totalorder %s8745_s26, 1  ;;  %v10439_v1 = vmov 0   ;;  %v540_v2 = vld [vmem:[%s16979_s11] sm:$0xff]  ;;  %vm552_vm0 = vcmask 392192   ;;  %v4229_v33 = vld [vmem:[%s16979_s11 + $0x30] sm:$0xff] }
   0xc   : > { %9542 = vset.pattern.permute.xlu0 %v10439_v1  ;;  %9543 = vset.pattern.permute.xlu1 %v10439_v1  ;;  %v4232_v23 = vld [vmem:[%s16979_s11 + $0x48] sm:$0xff]  ;;  %v538_v28 = vld [vmem:[%s16972_s4] sm:$0xff]  ;;  %v5648_v41 = vld [vmem:[%s16979_s11 + $0xf8] sm:$0xff]  ;;  %vm737_vm1 = vcmask 130048   ;;  %vm1063_vm2 = vcmask 261120   ;;  %vm5729_vm3 = vcmask 523264  }
   0xd   : > { %549 = vperm.xlu0 %9542, %v541_v0   ;;  %s17614_s26 = smov (!%p476_p3, %s8745_s26), 1  ;;  %9544 = vset.pattern.permute.xlu2 %v10439_v1  ;;  %v539_v36 = vld [vmem:[%s16972_s4 + $0x8] sm:$0xff]  ;;  %v5645_v44 = vld [vmem:[%s16979_s11 + $0xe0] sm:$0xff]  ;;  %v6041_v48 = vld [vmem:[%s16979_s11 + $0x130] sm:$0xff]  ;;  %vm8630_vm4 = vcmask 0  }
   0xe   : > { %s9528_s29 = smul.u32 288, %s17614_s26  ;;  %s492_s15 = scalar_lea.vmem %s16971_s3, %s17614_s26  ;;  %v5638_v45 = vld [vmem:[%s16979_s11 + $0xa8] sm:$0xff]  ;;  %v6035_v46 = vld [vmem:[%s16979_s11 + $0x100] sm:$0xff]  ;;  %v6521_v50 = vld [vmem:[%s16979_s11 + $0x1f0] sm:$0xff] }
   0xf   : > { %v6048_v47 = vld [vmem:[%s16979_s11 + $0x168] sm:$0xff]  ;;  %v6514_v51 = vld [vmem:[%s16979_s11 + $0x1b8] sm:$0xff]  ;;  %v6511_v52 = vld [vmem:[%s16979_s11 + $0x1a0] sm:$0xff]  ;;  %s8751_s20 = sshll.u32 %s17614_s26, 2 }
  0x10   : > { %s10532_s18 = scalar_lea.vmem %s16968_s0, %s9528_s29  ;;  %v6508_v49 = vld [vmem:[%s16979_s11 + $0x188] sm:$0xff]  ;;  %v6994_v53 = vld [vmem:[%s16979_s11 + $0x278] sm:$0xff]  ;;  %v6991_v54 = vld [vmem:[%s16979_s11 + $0x260] sm:$0xff]  ;;  %s10729_s24 = scalar_lea.vmem %s16969_s1, %s8751_s20 }
  0x11   : > { %v532_v3 = vld [vmem:[%s10532_s18 + $0xf0] sm:$0xff]  ;;  %v533_v4 = vld [vmem:[%s10532_s18 + $0xf8] sm:$0xff]  ;;  %v534_v5 = vld [vmem:[%s10532_s18 + $0x100] sm:$0xff] }
  0x12   : > { %569 = vmatpush.msra.mxu0 %v532_v3  ;;  %592 = vmatpush.msra.mxu1 %v533_v4  ;;  %v535_v6 = vld [vmem:[%s10532_s18 + $0x108] sm:$0xff]  ;;  %v526_v7 = vld [vmem:[%s10532_s18 + $0xc0] sm:$0xff]  ;;  %v528_v9 = vld [vmem:[%s10532_s18 + $0xd0] sm:$0xff] }
  0x13   : > { %v527_v8 = vld [vmem:[%s10532_s18 + $0xc8] sm:$0xff]  ;;  %615 = vmatpush.msra.mxu2 %v534_v5  ;;  %638 = vmatpush.msra.mxu3 %v535_v6  ;;  %v529_v10 = vld [vmem:[%s10532_s18 + $0xd8] sm:$0xff]  ;;  %v520_v11 = vld [vmem:[%s10532_s18 + $0x90] sm:$0xff] }
  0x14   : > { %570 = vmatpush.msra.mxu0 %v526_v7  ;;  %v521_v12 = vld [vmem:[%s10532_s18 + $0x98] sm:$0xff]  ;;  %v522_v13 = vld [vmem:[%s10532_s18 + $0xa0] sm:$0xff]  ;;  %593 = vmatpush.msra.mxu1 %v527_v8  ;;  %v523_v14 = vld [vmem:[%s10532_s18 + $0xa8] sm:$0xff] }
  0x15   : > { %544 = vperm.xlu0 %9542, %v540_v2   ;;  %616 = vmatpush.msra.mxu2 %v528_v9  ;;  %v514_v15 = vld [vmem:[%s10532_s18 + $0x60] sm:$0xff]  ;;  %v515_v16 = vld [vmem:[%s10532_s18 + $0x68] sm:$0xff]  ;;  %v516_v17 = vld [vmem:[%s10532_s18 + $0x70] sm:$0xff] }
  0x16   : > { %639 = vmatpush.msra.mxu3 %v529_v10  ;;  %571 = vmatpush.msra.mxu0 %v520_v11  ;;  %v517_v18 = vld [vmem:[%s10532_s18 + $0x78] sm:$0xff]  ;;  %v508_v19 = vld [vmem:[%s10532_s18 + $0x30] sm:$0xff]  ;;  %v510_v21 = vld [vmem:[%s10532_s18 + $0x40] sm:$0xff] }
  0x17   : > { %594 = vmatpush.msra.mxu1 %v521_v12  ;;  %617 = vmatpush.msra.mxu2 %v522_v13  ;;  %v509_v20 = vld [vmem:[%s10532_s18 + $0x38] sm:$0xff]  ;;  %v511_v22 = vld [vmem:[%s10532_s18 + $0x48] sm:$0xff]  ;;  %v502_v24 = vld [vmem:[%s10532_s18] sm:$0xff] }
  0x18   : > { %640 = vmatpush.msra.mxu3 %v523_v14  ;;  %572 = vmatpush.msra.mxu0 %v514_v15  ;;  %v503_v25 = vld [vmem:[%s10532_s18 + $0x8] sm:$0xff]  ;;  %v504_v26 = vld [vmem:[%s10532_s18 + $0x10] sm:$0xff]  ;;  %v505_v27 = vld [vmem:[%s10532_s18 + $0x18] sm:$0xff] }
  0x19   : > { %595 = vmatpush.msra.mxu1 %v515_v16  ;;  %618 = vmatpush.msra.mxu2 %v516_v17  ;;  %v536_v29 = vld [vmem:[%s10532_s18 + $0x110] sm:$0xff]  ;;  %v537_v30 = vld [vmem:[%s10532_s18 + $0x118] sm:$0xff]  ;;  %v530_v31 = vld [vmem:[%s10532_s18 + $0xe0] sm:$0xff] }
  0x1a   : > { %641 = vmatpush.msra.mxu3 %v517_v18  ;;  %573 = vmatpush.msra.mxu0 %v508_v19  ;;  %v531_v32 = vld [vmem:[%s10532_s18 + $0xe8] sm:$0xff]  ;;  %v524_v34 = vld [vmem:[%s10532_s18 + $0xb0] sm:$0xff]  ;;  %v525_v35 = vld [vmem:[%s10532_s18 + $0xb8] sm:$0xff] }
  0x1b   : > { %596 = vmatpush.msra.mxu1 %v509_v20  ;;  %619 = vmatpush.msra.mxu2 %v510_v21  ;;  %v518_v37 = vld [vmem:[%s10532_s18 + $0x80] sm:$0xff]  ;;  %v519_v38 = vld [vmem:[%s10532_s18 + $0x88] sm:$0xff]  ;;  %v512_v39 = vld [vmem:[%s10532_s18 + $0x50] sm:$0xff] }
  0x1c   : > { %642 = vmatpush.msra.mxu3 %v511_v22  ;;  %574 = vmatpush.msra.mxu0 %v502_v24  ;;  %v513_v40 = vld [vmem:[%s10532_s18 + $0x58] sm:$0xff]  ;;  %v506_v42 = vld [vmem:[%s10532_s18 + $0x20] sm:$0xff]  ;;  %v507_v43 = vld [vmem:[%s10532_s18 + $0x28] sm:$0xff] }
  0x1d   : > { %4250 = vperm.xlu0 %9542, %v4232_v23   ;;  %597 = vmatpush.msra.mxu1 %v503_v25  ;;  %v6984_v55 = vld [vmem:[%s16979_s11 + $0x228] sm:$0xff]  ;;  %v7451_v56 = vld [vmem:[%s16979_s11 + $0x280] sm:$0xff]  ;;  %v713_v57 = vld [vmem:[%s16979_s11 + $0x10] sm:$0xff] }
  0x1e   : > { %620 = vmatpush.msra.mxu2 %v504_v26  ;;  %643 = vmatpush.msra.mxu3 %v505_v27  ;;  %v7464_v59 = vld [vmem:[%s16979_s11 + $0x2e8] sm:$0xff]  ;;  %v7457_v62 = vld [vmem:[%s16979_s11 + $0x2b0] sm:$0xff]  ;;  %v714_v8 = vld [vmem:[%s16979_s11 + $0x18] sm:$0xff] }
  0x1f   : > { %8754 = vmatmul.msk.f32.vlgmr.msra.gmra.mxu0 %vm552_vm0, %v538_v28  ;;  %8756 = vmatmul.msk.f32.vlgmr.msra.gmra.mxu1 %vm552_vm0, %v538_v28  ;;  %v10658_v13 = vld [vmem:[%s16973_s5] sm:$0xff]  ;;  %v7924_v14 = vld [vmem:[%s16979_s11 + $0x308] sm:$0xff] }
  0x20   : > { %8758 = vmatmul.msk.f32.vlgmr.msra.gmra.mxu2 %vm552_vm0, %v538_v28  ;;  %8760 = vmatmul.msk.f32.vlgmr.msra.gmra.mxu3 %vm552_vm0, %v538_v28  ;;  %v10672_v23 = vld [vmem:[%s16973_s5 + $0x8] sm:$0xff] }
  0x21   : > { %661 = vmatpush.msrb.mxu0 %v536_v29  ;;  %684 = vmatpush.msrb.mxu1 %v537_v30  ;;  %v5636_v29 = vld [vmem:[%s16979_s11 + $0x98] sm:$0xff]  ;;  %v1059_v30 = vld [vmem:[%s16976_s8 + $0x20] sm:$0xff] }
  0x22   : > { %719 = vperm.xlu1 %9543, %v713_v57   ;;  %v6509_v57 = vld [vmem:[%s16979_s11 + $0x190] sm:$0xff] }
  0x23   : > { %662 = vmatpush.msrb.mxu0 %v530_v31  ;;  %685 = vmatpush.msrb.mxu1 %v531_v32 }
  0x25   : > { %4235 = vperm.xlu0 %9542, %v4229_v33   ;;  %663 = vmatpush.msrb.mxu0 %v524_v34  ;;  %v1057_v34 = vld [vmem:[%s16976_s8 + $0x10] sm:$0xff] }
  0x26   : > { %686 = vmatpush.msrb.mxu1 %v525_v35 }
  0x27   : > { %8755 = vmatmul.msk.f32.gmra.mxu0 %vm552_vm0, %v539_v36  ;;  %8757 = vmatmul.msk.f32.gmra.mxu1 %vm552_vm0, %v539_v36 }
  0x28   : > { %8759 = vmatmul.msk.f32.gmra.mxu2 %vm552_vm0, %v539_v36  ;;  %8761 = vmatmul.msk.f32.gmra.mxu3 %vm552_vm0, %v539_v36 }
  0x29   : > { %664 = vmatpush.msrb.mxu0 %v518_v37  ;;  %687 = vmatpush.msrb.mxu1 %v519_v38  ;;  %v10697_v38 = vld [vmem:[%s16973_s5 + $0x10] sm:$0xff] }
  0x2a   : > { %724 = vperm.xlu1 %9543, %v714_v8   ;;  %v7933_v8 = vld [vmem:[%s16979_s11 + $0x350] sm:$0xff] }
  0x2b   : > { %665 = vmatpush.msrb.mxu0 %v512_v39  ;;  %688 = vmatpush.msrb.mxu1 %v513_v40 }
  0x2d   : > { %5726 = vperm.xlu0 %9542, %v5648_v41   ;;  %666 = vmatpush.msrb.mxu0 %v506_v42  ;;  %v1055_v41 = vld [vmem:[%s16976_s8] sm:$0xff] }
  0x2e   : > { %689 = vmatpush.msrb.mxu1 %v507_v43 }
  0x2f   : > { %8762 = vmatmul.msk.f32.vlgmr.msrb.gmra.mxu0 %vm552_vm0, %v538_v28  ;;  %8764 = vmatmul.msk.f32.vlgmr.msrb.gmra.mxu1 %vm552_vm0, %v538_v28  ;;  %v1061_v28 = vld [vmem:[%s16976_s8 + $0x30] sm:$0xff] }
  0x35   : > { %5711 = vperm.xlu0 %9542, %v5645_v44   ;;  %v5643_v44 = vld [vmem:[%s16979_s11 + $0xd0] sm:$0xff] }
  0x37   : > { %8763 = vmatmul.msk.f32.gmra.mxu0 %vm552_vm0, %v539_v36  ;;  %8765 = vmatmul.msk.f32.gmra.mxu1 %vm552_vm0, %v539_v36 }
  0x3d   : > { %5676 = vperm.xlu0 %9542, %v5638_v45   ;;  %v712_v45 = vld [vmem:[%s16973_s5 + $0x18] sm:$0xff] }
  0x45   : > { %6053 = vperm.xlu0 %9542, %v6035_v46   ;;  %v7938_v46 = vld [vmem:[%s16979_s11 + $0x378] sm:$0xff] }
  0x4d   : > { %6118 = vperm.xlu0 %9542, %v6048_v47   ;;  %v715_v47 = vld [vmem:[%s16979_s11 + $0x20] sm:$0xff] }
  0x4e   : > { %729 = vperm.xlu2 %9544, %v715_v47   ;;  %v10985_v47 = vld [vmem:[%s16974_s6 + $0x98] sm:$0xff] }
  0x55   : > { %6083 = vperm.xlu0 %9542, %v6041_v48   ;;  %v10735_v48 = vld [vmem:[%s10729_s24] sm:$0x7] }
  0x5d   : > { %6530 = vperm.xlu0 %9542, %v6508_v49   ;;  %v7935_v49 = vld [vmem:[%s16979_s11 + $0x360] sm:$0xff] }
  0x65   : > { %6595 = vperm.xlu0 %9542, %v6521_v50   ;;  %v10741_v50 = vperm.slane %v10735_v48, 0 }
  0x6d   : > { %6560 = vperm.xlu0 %9542, %v6514_v51   ;;  %v10747_v51 = vld [vmem:[%s16974_s6] sm:$0xff] }
  0x75   : > { %6545 = vperm.xlu0 %9542, %v6511_v52   ;;  %v716_v52 = vld [vmem:[%s16979_s11 + $0x28] sm:$0xff] }
  0x76   : > { %734 = vperm.xlu2 %9544, %v716_v52  }
  0x7d   : > { %7072 = vperm.xlu0 %9542, %v6994_v53   ;;  %v957_v53 = vmul.f32 %v10741_v50, %v10747_v51 }
  0x7f   : > { %v10642_v58 = vpop.permute.xlu0 %549 }
  0x85   : > { %7057 = vperm.xlu0 %9542, %v6991_v54   ;;  %v6044_v54 = vld [vmem:[%s16979_s11 + $0x148] sm:$0xff] }
  0x87   : > { %v545_v63 = vpop.permute.xlu0 %544 }
  0x8d   : > { %7022 = vperm.xlu0 %9542, %v6984_v55   ;;  %v10765_v55 = vld [vmem:[%s16974_s6 + $0x8] sm:$0xff] }
  0x95   : > { %7469 = vperm.xlu0 %9542, %v7451_v56   ;;  %v958_v56 = vmul.f32 %v10741_v50, %v10765_v55 }
  0x9c   : > { %v576_v60 = vpop.f32.mrf.mxu0  ;;  %v599_v61 = vpop.f32.mrf.mxu1 }
  0x9d   : > { %7534 = vperm.xlu0 %9542, %v7464_v59   ;;  %v577_v4 = vadd.f32 %v576_v60, %v545_v63  ;;  %v600_v5 = vadd.f32 %v599_v61, %v545_v63  ;;  %v6517_v60 = vld [vmem:[%s16979_s11 + $0x1d0] sm:$0xff]  ;;  %v10793_v61 = vld [vmem:[%s16974_s6 + $0x18] sm:$0xff] }
  0x9f   : > { %v698_v11 = vmax.f32 %v600_v5, 0.0  ;;  %v697_v12 = vmax.f32 %v577_v4, 0.0  ;;  %v7925_v5 = vld [vmem:[%s16979_s11 + $0x310] sm:$0xff] }
  0xa3   : > { %v622_v0 = vpop.f32.mrf.mxu2  ;;  %v645_v1 = vpop.f32.mrf.mxu3 }
  0xa4   : > { %v579_v2 = vpop.f32.mrf.mxu0  ;;  %v602_v3 = vpop.f32.mrf.mxu1  ;;  %v623_v15 = vadd.f32 %v622_v0, %v545_v63  ;;  %v646_v18 = vadd.f32 %v645_v1, %v545_v63  ;;  %v10806_v0 = vld [vmem:[%s16974_s6 + $0x20] sm:$0xff] }
  0xa5   : > { %7499 = vperm.xlu0 %9542, %v7457_v62   ;;  %v580_v6 = vadd.f32 %v579_v2, %v10642_v58  ;;  %v603_v7 = vadd.f32 %v602_v3, %v10642_v58  ;;  %v960_v62 = vmul.f32 %v10741_v50, %v10793_v61  ;;  %v961_v1 = vmul.f32 %v10741_v50, %v10806_v0  ;;  %v6990_v2 = vld [vmem:[%s16979_s11 + $0x258] sm:$0xff]  ;;  %v10819_v3 = vld [vmem:[%s16974_s6 + $0x28] sm:$0xff] }
  0xa6   : > { %v699_v26 = vmax.f32 %v623_v15, 0.0  ;;  %v700_v27 = vmax.f32 %v646_v18, 0.0  ;;  %v962_v4 = vmul.f32 %v10741_v50, %v10819_v3  ;;  %v10864_v15 = vld [vmem:[%s16974_s6 + $0x40] sm:$0xff]  ;;  %v7460_v18 = vld [vmem:[%s16979_s11 + $0x2c8] sm:$0xff] }
  0xa7   : > { %v704_v9 = vmax.f32 %v603_v7, 0.0  ;;  %v703_v10 = vmax.f32 %v580_v6, 0.0  ;;  %v10832_v6 = vld [vmem:[%s16974_s6 + $0x30] sm:$0xff] }
  0xa8   : > { %v963_v7 = vmul.f32 %v10741_v50, %v10832_v6 }
  0xa9   : > { %764 = vmatpush.msrb.mxu2 %v703_v10  ;;  %793 = vmatpush.msra.mxu0 %v704_v9 }
  0xaa   : > { %9524 = vmatpush.msrb.mxu3 %v704_v9  ;;  %v10844_v9 = vld [vmem:[%s16974_s6 + $0x38] sm:$0xff] }
  0xab   : > { %v625_v16 = vpop.f32.mrf.mxu2  ;;  %v648_v17 = vpop.f32.mrf.mxu3  ;;  %765 = vmatpush.msrb.mxu2 %v697_v12  ;;  %794 = vmatpush.msra.mxu0 %v698_v11  ;;  %v964_v10 = vmul.f32 %v10741_v50, %v10844_v9  ;;  %v1062_v12 = vld [vmem:[%s16976_s8 + $0x38] sm:$0xff] }
  0xac   : > { %v626_v19 = vadd.f32 %v625_v16, %v10642_v58  ;;  %v649_v20 = vadd.f32 %v648_v17, %v10642_v58  ;;  %9525 = vmatpush.msrb.mxu3 %v698_v11  ;;  %v668_v21 = vpop.f32.mrf.mxu0  ;;  %v691_v22 = vpop.f32.mrf.mxu1  ;;  %8770 = vmatmul.msk.f32.vlgmr.msra.gmra.mxu0 %vm737_vm1, %v10658_v13  ;;  %v6987_v11 = vld [vmem:[%s16979_s11 + $0x240] sm:$0xff]  ;;  %v1056_v16 = vld [vmem:[%s16976_s8 + $0x8] sm:$0xff]  ;;  %v965_v17 = vmul.f32 %v10741_v50, %v10864_v15 }
  0xad   : > { %7946 = vperm.xlu0 %9542, %v7924_v14   ;;  %8766 = vmatmul.msk.f32.vlgmr.msrb.gmra.mxu2 %vm737_vm1, %v10658_v13  ;;  %v669_v31 = vadd.f32 %v668_v21, %v545_v63  ;;  %v692_v35 = vadd.f32 %v691_v22, %v545_v63  ;;  %v6982_v63 = vld [vmem:[%s16979_s11 + $0x218] sm:$0xff]  ;;  %v10888_v21 = vld [vmem:[%s16974_s6 + $0x50] sm:$0xff] }
  0xae   : > { %v705_v24 = vmax.f32 %v626_v19, 0.0  ;;  %v706_v25 = vmax.f32 %v649_v20, 0.0  ;;  %8771 = vmatmul.msk.f32.vlgmr.msrb.gmra.mxu3 %vm737_vm1, %v10672_v23  ;;  %v1058_v14 = vld [vmem:[%s16976_s8 + $0x18] sm:$0xff]  ;;  %v10879_v19 = vld [vmem:[%s16974_s6 + $0x48] sm:$0xff]  ;;  %v967_v22 = vmul.f32 %v10741_v50, %v10888_v21 }
  0xaf   : > { %v701_v42 = vmax.f32 %v669_v31, 0.0  ;;  %v702_v43 = vmax.f32 %v692_v35, 0.0  ;;  %v966_v20 = vmul.f32 %v10741_v50, %v10879_v19  ;;  %v10941_v35 = vld [vmem:[%s16974_s6 + $0x78] sm:$0xff] }
  0xb0   : > { %822 = vmatpush.msrb.mxu0 %v705_v24  ;;  %851 = vmatpush.msra.mxu1 %v706_v25 }
  0xb1   : > { %9526 = vmatpush.msra.mxu2 %v706_v25 }
  0xb2   : > { %823 = vmatpush.msrb.mxu0 %v699_v26  ;;  %852 = vmatpush.msra.mxu1 %v700_v27  ;;  %v10908_v26 = vld [vmem:[%s16974_s6 + $0x60] sm:$0xff] }
  0xb3   : > { %9527 = vmatpush.msra.mxu2 %v700_v27  ;;  %8778 = vmatmul.msk.f32.vlgmr.msra.gmra.mxu1 %vm737_vm1, %v10658_v13  ;;  %v969_v27 = vmul.f32 %v10741_v50, %v10908_v26 }
  0xb4   : > { %1364 = vmatpush.msra.mxu0 %v1061_v28  ;;  %v671_v32 = vpop.f32.mrf.mxu0  ;;  %v694_v33 = vpop.f32.mrf.mxu1  ;;  %1669 = vmatpush.msrb.mxu1 %v1062_v12 }
  0xb5   : > { %8774 = vmatmul.msk.f32.vlgmr.msrb.gmra.mxu0 %vm737_vm1, %v10658_v13  ;;  %v672_v36 = vadd.f32 %v671_v32, %v10642_v58  ;;  %v695_v37 = vadd.f32 %v694_v33, %v10642_v58  ;;  %5666 = vperm.xlu0 %9542, %v5636_v29   ;;  %v10780_v58 = vld [vmem:[%s16974_s6 + $0x10] sm:$0xff]  ;;  %v10919_v29 = vld [vmem:[%s16974_s6 + $0x68] sm:$0xff] }
  0xb6   : > { %1365 = vmatpush.msra.mxu0 %v1059_v30  ;;  %8767 = vmatmul.msk.f32.gmra.mxu2 %vm737_vm1, %v10672_v23  ;;  %v959_v59 = vmul.f32 %v10741_v50, %v10780_v58  ;;  %v970_v30 = vmul.f32 %v10741_v50, %v10919_v29  ;;  %v10930_v32 = vld [vmem:[%s16974_s6 + $0x70] sm:$0xff] }
  0xb7   : > { %8772 = vmatmul.msk.f32.gmra.mxu3 %vm737_vm1, %v10697_v38  ;;  %v707_v39 = vmax.f32 %v672_v36, 0.0  ;;  %v708_v40 = vmax.f32 %v695_v37, 0.0  ;;  %v971_v33 = vmul.f32 %v10741_v50, %v10930_v32  ;;  %v972_v36 = vmul.f32 %v10741_v50, %v10941_v35 }
  0xb8   : > { %1366 = vmatpush.msra.mxu0 %v1057_v34 }
  0xb9   : > { %880 = vmatpush.msrb.mxu2 %v707_v39  ;;  %909 = vmatpush.msra.mxu3 %v708_v40 }
  0xba   : > { %1367 = vmatpush.msra.mxu0 %v1055_v41  ;;  %v10963_v41 = vld [vmem:[%s16974_s6 + $0x88] sm:$0xff] }
  0xbb   : > { %881 = vmatpush.msrb.mxu2 %v701_v42  ;;  %910 = vmatpush.msra.mxu3 %v702_v43  ;;  %v974_v42 = vmul.f32 %v10741_v50, %v10963_v41 }
  0xbd   : > { %8775 = vmatmul.msk.f32.gmra.mxu0 %vm737_vm1, %v10672_v23  ;;  %5701 = vperm.xlu0 %9542, %v5643_v44   ;;  %v10974_v44 = vld [vmem:[%s16974_s6 + $0x90] sm:$0xff] }
  0xbe   : > { %8768 = vmatmul.msk.f32.gmra.mxu2 %vm737_vm1, %v10697_v38 }
  0xbf   : > { %8773 = vmatmul.msk.f32.gmra.mxu3 %vm737_vm1, %v712_v45 }
  0xc5   : > { %8776 = vmatmul.msk.f32.gmra.mxu0 %vm737_vm1, %v10697_v38  ;;  %8012 = vperm.xlu0 %9542, %v7938_v46  }
  0xc6   : > { %8769 = vmatmul.msk.f32.gmra.mxu2 %vm737_vm1, %v712_v45 }
  0xc7   : > { %8786 = vmatmul.msk.f32.vlgmr.msra.gmra.mxu3 %vm737_vm1, %v10658_v13 }
  0xcd   : > { %8777 = vmatmul.msk.f32.gmra.mxu0 %vm737_vm1, %v712_v45  ;;  %7997 = vperm.xlu0 %9542, %v7935_v49   ;;  %v976_v49 = vmul.f32 %v10741_v50, %v10985_v47 }
  0xce   : > { %8779 = vmatmul.msk.f32.vlgmr.msra.gmra.mxu2 %vm737_vm1, %v10672_v23 }
  0xcf   : > { %8787 = vmatmul.msk.f32.gmra.mxu3 %vm737_vm1, %v10672_v23 }
  0xd5   : > { %8790 = vmatmul.msk.f32.vlgmr.msra.gmra.mxu0 %vm1063_vm2, %v957_v53  ;;  %6098 = vperm.xlu0 %9542, %v6044_v54  }
  0xd6   : > { %8780 = vmatmul.msk.f32.gmra.mxu2 %vm737_vm1, %v10697_v38 }
  0xd7   : > { %8788 = vmatmul.msk.f32.gmra.mxu3 %vm737_vm1, %v10697_v38 }
  0xdd   : > { %8791 = vmatmul.msk.f32.gmra.mxu0 %vm1063_vm2, %v958_v56  ;;  %6535 = vperm.xlu0 %9542, %v6509_v57   ;;  %v11007_v57 = vld [vmem:[%s16974_s6 + $0xa8] sm:$0xff] }
  0xde   : > { %8781 = vmatmul.msk.f32.gmra.mxu2 %vm737_vm1, %v712_v45 }
  0xdf   : > { %8789 = vmatmul.msk.f32.gmra.mxu3 %vm737_vm1, %v712_v45 }
  0xe5   : > { %8792 = vmatmul.msk.f32.gmra.mxu0 %vm1063_vm2, %v959_v59  ;;  %6575 = vperm.xlu0 %9542, %v6517_v60  }
  0xe6   : > { %8782 = vmatmul.msk.f32.vlgmr.msrb.gmra.mxu2 %vm737_vm1, %v10658_v13  ;;  %v1060_v13 = vld [vmem:[%s16976_s8 + $0x28] sm:$0xff] }
  0xe7   : > { %1670 = vmatpush.msrb.mxu1 %v1060_v13  ;;  %v11058_v13 = vld [vmem:[%s16974_s6 + $0xc8] sm:$0xff] }
  0xe9   : > { %1671 = vmatpush.msrb.mxu1 %v1058_v14  ;;  %v11062_v14 = vmul.f32 %v10741_v50, %v11058_v13 }
  0xeb   : > { %1672 = vmatpush.msrb.mxu1 %v1056_v16 }
  0xec   : > { %8886 = vmatmul.msk.f32.vlgmr.msrb.gmra.mxu1 %vm1063_vm2, %v957_v53  ;;  %v10996_v53 = vld [vmem:[%s16974_s6 + $0xa0] sm:$0xff] }
  0xed   : > { %8793 = vmatmul.msk.f32.gmra.mxu0 %vm1063_vm2, %v960_v62  ;;  %7012 = vperm.xlu0 %9542, %v6982_v63   ;;  %v977_v54 = vmul.f32 %v10741_v50, %v10996_v53 }
  0xee   : > { %8783 = vmatmul.msk.f32.gmra.mxu2 %vm737_vm1, %v10672_v23  ;;  %v10897_v23 = vld [vmem:[%s16974_s6 + $0x58] sm:$0xff] }
  0xef   : > { %v968_v24 = vmul.f32 %v10741_v50, %v10897_v23 }
  0xf4   : > { %8887 = vmatmul.msk.f32.gmra.mxu1 %vm1063_vm2, %v958_v56 }
  0xf5   : > { %8794 = vmatmul.msk.f32.gmra.mxu0 %vm1063_vm2, %v961_v1  ;;  %7052 = vperm.xlu0 %9542, %v6990_v2   ;;  %v11029_v2 = vld [vmem:[%s16974_s6 + $0xb8] sm:$0xff] }
  0xf6   : > { %8784 = vmatmul.msk.f32.gmra.mxu2 %vm737_vm1, %v10697_v38  ;;  %v10952_v38 = vld [vmem:[%s16974_s6 + $0x80] sm:$0xff] }
  0xf7   : > { %v973_v39 = vmul.f32 %v10741_v50, %v10952_v38 }
  0xfc   : > { %8888 = vmatmul.msk.f32.gmra.mxu1 %vm1063_vm2, %v959_v59  ;;  %v978_v59 = vmul.f32 %v10741_v50, %v11007_v57 }
  0xfd   : > { %8795 = vmatmul.msk.f32.gmra.mxu0 %vm1063_vm2, %v962_v4  ;;  %7951 = vperm.xlu0 %9542, %v7925_v5  }
  0xfe   : > { %8785 = vmatmul.msk.f32.gmra.mxu2 %vm737_vm1, %v712_v45  ;;  %v975_v45 = vmul.f32 %v10741_v50, %v10974_v44 }
 0x104   : > { %8889 = vmatmul.msk.f32.gmra.mxu1 %vm1063_vm2, %v960_v62  ;;  %v11018_v62 = vld [vmem:[%s16974_s6 + $0xb0] sm:$0xff] }
 0x105   : > { %8796 = vmatmul.msk.f32.gmra.mxu0 %vm1063_vm2, %v963_v7  ;;  %7987 = vperm.xlu0 %9542, %v7933_v8   ;;  %v979_v63 = vmul.f32 %v10741_v50, %v11018_v62  ;;  %v11042_v8 = vld [vmem:[%s16974_s6 + $0xc0] sm:$0xff] }
 0x10c   : > { %8890 = vmatmul.msk.f32.gmra.mxu1 %vm1063_vm2, %v961_v1 }
 0x10d   : > { %8797 = vmatmul.msk.f32.gmra.mxu0 %vm1063_vm2, %v964_v10  ;;  %7037 = vperm.xlu0 %9542, %v6987_v11  }
 0x114   : > { %8891 = vmatmul.msk.f32.gmra.mxu1 %vm1063_vm2, %v962_v4  ;;  %v980_v4 = vmul.f32 %v10741_v50, %v11029_v2 }
 0x115   : > { %8798 = vmatmul.msk.f32.gmra.mxu0 %vm1063_vm2, %v965_v17  ;;  %7514 = vperm.xlu0 %9542, %v7460_v18   ;;  %v11072_v18 = vld [vmem:[%s16974_s6 + $0xd0] sm:$0xff] }
 0x11c   : > { %8892 = vmatmul.msk.f32.gmra.mxu1 %vm1063_vm2, %v963_v7 }
 0x11d   : > { %8799 = vmatmul.msk.f32.gmra.mxu0 %vm1063_vm2, %v966_v20 }
 0x124   : > { %8893 = vmatmul.msk.f32.gmra.mxu1 %vm1063_vm2, %v964_v10  ;;  %v11046_v10 = vmul.f32 %v10741_v50, %v11042_v8 }
 0x125   : > { %8800 = vmatmul.msk.f32.gmra.mxu0 %vm1063_vm2, %v967_v22 }
 0x129   : > { %v10901_v25 = vpop.f32.mrf.mxu0 }
 0x12c   : > { %8894 = vmatmul.msk.f32.gmra.mxu1 %vm1063_vm2, %v965_v17 }
 0x12d   : > { %8801 = vmatmul.msk.f32.gmra.mxu0 %vm1063_vm2, %v968_v24 }
 0x130   : > { %v11033_v5 = vpop.f32.mrf.mxu1 }
 0x131   : > { %17059 = vst [vmem:[#allocation6_spill] sm:$0xff] %v11033_v5 }
 0x132   : > { %v10912_v28 = vpop.f32.mrf.mxu0 }
 0x133   : > { %17055 = vst [vmem:[#allocation2_spill] sm:$0xff] %v10912_v28 }
 0x134   : > { %8895 = vmatmul.msk.f32.gmra.mxu1 %vm1063_vm2, %v966_v20  ;;  %v11076_v20 = vmul.f32 %v10741_v50, %v11072_v18 }
 0x135   : > { %8802 = vmatmul.msk.f32.gmra.mxu0 %vm1063_vm2, %v969_v27 }
 0x13a   : > { %v10923_v31 = vpop.f32.mrf.mxu0 }
 0x13b   : > { %17056 = vst [vmem:[#allocation3_spill] sm:$0xff] %v10923_v31 }
 0x13c   : > { %8896 = vmatmul.msk.f32.gmra.mxu1 %vm1063_vm2, %v967_v22 }
 0x13d   : > { %8803 = vmatmul.msk.f32.gmra.mxu0 %vm1063_vm2, %v970_v30 }
 0x142   : > { %v10934_v34 = vpop.f32.mrf.mxu0 }
 0x143   : > { %17057 = vst [vmem:[#allocation4_spill] sm:$0xff] %v10934_v34 }
 0x144   : > { %8897 = vmatmul.msk.f32.gmra.mxu1 %vm1063_vm2, %v968_v24 }
 0x145   : > { %8804 = vmatmul.msk.f32.gmra.mxu0 %vm1063_vm2, %v971_v33 }
 0x14a   : > { %v10945_v37 = vpop.f32.mrf.mxu0 }
 0x14b   : > { %17058 = vst [vmem:[#allocation5_spill] sm:$0xff] %v10945_v37 }
 0x14c   : > { %8898 = vmatmul.msk.f32.gmra.mxu1 %vm1063_vm2, %v969_v27  ;;  %v11086_v27 = vld [vmem:[%s16974_s6 + $0xd8] sm:$0xff] }
 0x14d   : > { %8805 = vmatmul.msk.f32.gmra.mxu0 %vm1063_vm2, %v972_v36 }
 0x152   : > { %v10956_v40 = vpop.f32.mrf.mxu0 }
 0x154   : > { %8899 = vmatmul.msk.f32.gmra.mxu1 %vm1063_vm2, %v970_v30  ;;  %v11090_v30 = vmul.f32 %v10741_v50, %v11086_v27 }
 0x155   : > { %8806 = vmatmul.msk.f32.gmra.mxu0 %vm1063_vm2, %v973_v39 }
 0x15a   : > { %v10967_v43 = vpop.f32.mrf.mxu0 }
 0x15c   : > { %8900 = vmatmul.msk.f32.gmra.mxu1 %vm1063_vm2, %v971_v33 }
 0x15d   : > { %8807 = vmatmul.msk.f32.gmra.mxu0 %vm1063_vm2, %v974_v42 }
 0x162   : > { %v10978_v46 = vpop.f32.mrf.mxu0 }
 0x164   : > { %8901 = vmatmul.msk.f32.gmra.mxu1 %vm1063_vm2, %v972_v36 }
 0x165   : > { %8808 = vmatmul.msk.f32.gmra.mxu0 %vm1063_vm2, %v975_v45 }
 0x169   : > { %v11048_v11 = vpop.f32.mrf.mxu1 }
 0x16a   : > { %v10989_v52 = vpop.f32.mrf.mxu0  ;;  %17060 = vst [vmem:[#allocation7_spill] sm:$0xff] %v11048_v11 }
 0x16c   : > { %8902 = vmatmul.msk.f32.gmra.mxu1 %vm1063_vm2, %v973_v39  ;;  %v11100_v39 = vld [vmem:[%s16974_s6 + $0xe0] sm:$0xff] }
 0x16d   : > { %8809 = vmatmul.msk.f32.gmra.mxu0 %vm1063_vm2, %v976_v49  ;;  %17064 = vst [vmem:[#allocation11_spill] sm:$0xff] %v11100_v39 }
 0x171   : > { %v11064_v16 = vpop.f32.mrf.mxu1 }
 0x172   : > { %v11000_v56 = vpop.f32.mrf.mxu0  ;;  %17061 = vst [vmem:[#allocation8_spill] sm:$0xff] %v11064_v16 }
 0x174   : > { %8903 = vmatmul.msk.f32.gmra.mxu1 %vm1063_vm2, %v974_v42  ;;  %v11104_v42 = vmul.f32 %v10741_v50, %v11100_v39 }
 0x175   : > { %8810 = vmatmul.msk.f32.gmra.mxu0 %vm1063_vm2, %v977_v54 }
 0x179   : > { %v11078_v22 = vpop.f32.mrf.mxu1 }
 0x17a   : > { %v11011_v60 = vpop.f32.mrf.mxu0  ;;  %17062 = vst [vmem:[#allocation9_spill] sm:$0xff] %v11078_v22 }
 0x17c   : > { %8904 = vmatmul.msk.f32.gmra.mxu1 %vm1063_vm2, %v975_v45 }
 0x17d   : > { %8811 = vmatmul.msk.f32.gmra.mxu0 %vm1063_vm2, %v978_v59 }
 0x181   : > { %v11092_v33 = vpop.f32.mrf.mxu1 }
 0x182   : > { %v11022_v1 = vpop.f32.mrf.mxu0  ;;  %17063 = vst [vmem:[#allocation10_spill] sm:$0xff] %v11092_v33 }
 0x184   : > { %8905 = vmatmul.msk.f32.gmra.mxu1 %vm1063_vm2, %v976_v49  ;;  %v11114_v49 = vld [vmem:[%s16974_s6 + $0xe8] sm:$0xff] }
 0x185   : > { %8812 = vmatmul.msk.f32.gmra.mxu0 %vm1063_vm2, %v979_v63  ;;  %17066 = vst [vmem:[#allocation13_spill] sm:$0xff] %v11114_v49  ;;  %v11118_v16 = vmul.f32 %v10741_v50, %v11114_v49  ;;  %v11152_v49 = vperm.slane %v10735_v48, 1 }
 0x189   : > { %v11106_v45 = vpop.f32.mrf.mxu1 }
 0x18a   : > { %v11035_v7 = vpop.f32.mrf.mxu0  ;;  %17065 = vst [vmem:[#allocation12_spill] sm:$0xff] %v11106_v45 }
 0x18c   : > { %8906 = vmatmul.msk.f32.gmra.mxu1 %vm1063_vm2, %v977_v54  ;;  %v11128_v54 = vld [vmem:[%s16974_s6 + $0xf0] sm:$0xff] }
 0x18d   : > { %8813 = vmatmul.msk.f32.gmra.mxu0 %vm1063_vm2, %v980_v4  ;;  %17068 = vst [vmem:[#allocation15_spill] sm:$0xff] %v11128_v54  ;;  %v11132_v45 = vmul.f32 %v10741_v50, %v11128_v54 }
 0x191   : > { %v11120_v22 = vpop.f32.mrf.mxu1 }
 0x192   : > { %v11050_v12 = vpop.f32.mrf.mxu0  ;;  %17067 = vst [vmem:[#allocation14_spill] sm:$0xff] %v11120_v22 }
 0x194   : > { %8907 = vmatmul.msk.f32.gmra.mxu1 %vm1063_vm2, %v978_v59  ;;  %v11142_v59 = vld [vmem:[%s16974_s6 + $0xf8] sm:$0xff] }
 0x195   : > { %8814 = vmatmul.msk.f32.gmra.mxu0 %vm1063_vm2, %v11046_v10  ;;  %v11146_v31 = vmul.f32 %v10741_v50, %v11142_v59 }
 0x199   : > { %v11134_v5 = vpop.f32.mrf.mxu1 }
 0x19a   : > { %v1396_v17 = vpop.f32.mrf.mxu0  ;;  %17069 = vst [vmem:[#allocation16_spill] sm:$0xff] %v11134_v5 }
 0x19c   : > { %8908 = vmatmul.msk.f32.gmra.mxu1 %vm1063_vm2, %v979_v63 }
 0x19d   : > { %8815 = vmatmul.msk.f32.gmra.mxu0 %vm1063_vm2, %v11062_v14 }
 0x1a1   : > { %v11148_v28 = vpop.f32.mrf.mxu1 }
 0x1a2   : > { %v1399_v24 = vpop.f32.mrf.mxu0  ;;  %17070 = vst [vmem:[#allocation17_spill] sm:$0xff] %v11148_v28  ;;  %v1974_v28 = vmul.f32 0.5, %v11022_v1 }
 0x1a4   : > { %8909 = vmatmul.msk.f32.gmra.mxu1 %vm1063_vm2, %v980_v4 }
 0x1a5   : > { %8816 = vmatmul.msk.f32.gmra.mxu0 %vm1063_vm2, %v11076_v20 }
 0x1aa   : > { %v1402_v36 = vpop.f32.mrf.mxu0 }
 0x1ab   : > { %v1984_v39 = vmul.f32 0.5, %v1402_v36 }
 0x1ac   : > { %8910 = vmatmul.msk.f32.gmra.mxu1 %vm1063_vm2, %v11046_v10  ;;  %v1972_v10 = vmul.f32 0.5, %v11011_v60 }
 0x1ad   : > { %8817 = vmatmul.msk.f32.gmra.mxu0 %vm1063_vm2, %v11090_v30 }
 0x1b2   : > { %v1405_v11 = vpop.f32.mrf.mxu0 }
 0x1b3   : > { %v1986_v54 = vmul.f32 0.5, %v1405_v11  ;;  %v11158_v11 = vmul.f32 %v11152_v49, %v10747_v51 }
 0x1b4   : > { %8911 = vmatmul.msk.f32.gmra.mxu1 %vm1063_vm2, %v11062_v14 }
 0x1b5   : > { %8818 = vmatmul.msk.f32.gmra.mxu0 %vm1063_vm2, %v11104_v42 }
 0x1ba   : > { %v1408_v33 = vpop.f32.mrf.mxu0 }
 0x1bb   : > { %v1988_v34 = vmul.f32 0.5, %v1408_v33  ;;  %v1980_v33 = vmul.f32 0.5, %v1396_v17 }
 0x1bc   : > { %8912 = vmatmul.msk.f32.gmra.mxu1 %vm1063_vm2, %v11076_v20  ;;  %v11203_v20 = vmul.f32 %v11152_v49, %v10793_v61 }
 0x1bd   : > { %8819 = vmatmul.msk.f32.gmra.mxu0 %vm1063_vm2, %v11118_v16 }
 0x1c2   : > { %v1411_v37 = vpop.f32.mrf.mxu0 }
 0x1c3   : > { %v1990_v22 = vmul.f32 0.5, %v1411_v37  ;;  %v1982_v37 = vmul.f32 0.5, %v1399_v24 }
 0x1c4   : > { %8913 = vmatmul.msk.f32.gmra.mxu1 %vm1063_vm2, %v11090_v30 }
 0x1c5   : > { %8820 = vmatmul.msk.f32.gmra.mxu0 %vm1063_vm2, %v11132_v45  ;;  %9546 = vtanh.f32 %v1990_v22  ;;  %v1978_v22 = vmul.f32 0.5, %v11050_v12 }
 0x1c6   : > { %9548 = vtanh.f32 %v1988_v34 }
 0x1ca   : > { %v1414_v5 = vpop.f32.mrf.mxu0 }
 0x1cb   : > { %v1992_v63 = vmul.f32 0.5, %v1414_v5  ;;  %v9547_v50 = vpop.eup %9546  ;;  %v11160_v5 = vpop.f32.mrf.mxu1 }
 0x1cc   : > { %17071 = vst [vmem:[#allocation18_spill] sm:$0xff] %v11160_v5  ;;  %v9549_v34 = vpop.eup %9548  ;;  %v2374_v24 = vmul.f32 0.5, %v9547_v50  ;;  %8914 = vmatmul.msk.f32.gmra.mxu1 %vm1063_vm2, %v11104_v42  ;;  %v996_v42 = vmul.f32 %v11152_v49, %v10832_v6  ;;  %v11254_v6 = vmul.f32 %v11152_v49, %v10864_v15 }
 0x1cd   : > { %9550 = vtanh.f32 %v1992_v63  ;;  %8821 = vmatmul.msk.f32.gmra.mxu0 %vm1063_vm2, %v11146_v31  ;;  %v2372_v51 = vmul.f32 0.5, %v9549_v34 }
 0x1ce   : > { %9552 = vtanh.f32 %v1986_v54 }
 0x1cf   : > { %9554 = vtanh.f32 %v1984_v39  ;;  %v1976_v39 = vmul.f32 0.5, %v11035_v7  ;;  %v11174_v7 = vmul.f32 %v11152_v49, %v10765_v55  ;;  %v1968_v55 = vmul.f32 0.5, %v10989_v52 }
 0x1d0   : > { %9556 = vtanh.f32 %v1982_v37  ;;  %v2566_v37 = vadd.f32 0.5, %v2374_v24  ;;  %v11190_v52 = vmul.f32 %v11152_v49, %v10780_v58 }
 0x1d1   : > { %9558 = vtanh.f32 %v1980_v33 }
 0x1d2   : > { %v11162_v4 = vpop.f32.mrf.mxu0  ;;  %9560 = vtanh.f32 %v1978_v22  ;;  %v1970_v22 = vmul.f32 0.5, %v11000_v56  ;;  %v1966_v56 = vmul.f32 0.5, %v10978_v46 }
 0x1d3   : > { %v9551_v48 = vpop.eup %9550  ;;  %9562 = vtanh.f32 %v1976_v39  ;;  %v11176_v50 = vpop.f32.mrf.mxu1 }
 0x1d4   : > { %v2376_v36 = vmul.f32 0.5, %v9551_v48  ;;  %v9553_v17 = vpop.eup %9552  ;;  %v2564_v48 = vadd.f32 0.5, %v2372_v51  ;;  %9564 = vtanh.f32 %v1974_v28  ;;  %8915 = vmatmul.msk.f32.gmra.mxu1 %vm1063_vm2, %v11118_v16 }
 0x1d5   : > { %8822 = vmatmul.msk.f32.gmra.mxu0 %vm1063_vm2, %v11158_v11  ;;  %v9555_v63 = vpop.eup %9554  ;;  %v2370_v12 = vmul.f32 0.5, %v9553_v17  ;;  %9566 = vtanh.f32 %v1972_v10 }
 0x1d6   : > { %v2568_v54 = vadd.f32 0.5, %v2376_v36  ;;  %v9557_v5 = vpop.eup %9556  ;;  %v2368_v33 = vmul.f32 0.5, %v9555_v63  ;;  %9568 = vtanh.f32 %v1970_v22 }
 0x1d7   : > { %v9559_v1 = vpop.eup %9558  ;;  %v2366_v60 = vmul.f32 0.5, %v9557_v5  ;;  %v2562_v24 = vadd.f32 0.5, %v2370_v12  ;;  %9570 = vtanh.f32 %v1968_v55 }
 0x1d8   : > { %2730 = vmatpush.msra.mxu2 %v2568_v54  ;;  %v9561_v36 = vpop.eup %9560  ;;  %v2364_v17 = vmul.f32 0.5, %v9559_v1  ;;  %v2560_v39 = vadd.f32 0.5, %v2368_v33  ;;  %v1964_v54 = vmul.f32 0.5, %v10967_v43  ;;  %v1962_v33 = vmul.f32 0.5, %v10956_v40 }
 0x1d9   : > { %v9563_v51 = vpop.eup %9562  ;;  %v2362_v28 = vmul.f32 0.5, %v9561_v36  ;;  %v2558_v14 = vadd.f32 0.5, %v2366_v60  ;;  %9572 = vtanh.f32 %v1966_v56 }
 0x1da   : > { %v11178_v34 = vpop.f32.mrf.mxu0  ;;  %2731 = vmatpush.msra.mxu2 %v2566_v37  ;;  %v9565_v5 = vpop.eup %9564  ;;  %v2360_v12 = vmul.f32 0.5, %v9563_v51  ;;  %v2556_v10 = vadd.f32 0.5, %v2364_v17  ;;  %9574 = vtanh.f32 %v1964_v54 }
 0x1db   : > { %v11192_v63 = vpop.f32.mrf.mxu1  ;;  %v9567_v46 = vpop.eup %9566  ;;  %v2358_v43 = vmul.f32 0.5, %v9565_v5  ;;  %9576 = vtanh.f32 %v1962_v33 }
 0x1dc   : > { %2732 = vmatpush.msra.mxu2 %v2564_v48  ;;  %v2554_v48 = vadd.f32 0.5, %v2362_v28  ;;  %v9569_v1 = vpop.eup %9568  ;;  %v2356_v58 = vmul.f32 0.5, %v9567_v46  ;;  %v2552_v22 = vadd.f32 0.5, %v2360_v12  ;;  %v994_v46 = vmul.f32 %v11152_v49, %v10806_v0  ;;  %8916 = vmatmul.msk.f32.gmra.mxu1 %vm1063_vm2, %v11132_v45 }
 0x1dd   : > { %8823 = vmatmul.msk.f32.gmra.mxu0 %vm1063_vm2, %v11174_v7  ;;  %v9571_v60 = vpop.eup %9570  ;;  %v2550_v40 = vadd.f32 0.5, %v2358_v43 }
 0x1de   : > { %2733 = vmatpush.msra.mxu2 %v2562_v24  ;;  %v2354_v24 = vmul.f32 0.5, %v9569_v1  ;;  %v2352_v17 = vmul.f32 0.5, %v9571_v60  ;;  %v2548_v51 = vadd.f32 0.5, %v2356_v58  ;;  %v995_v1 = vmul.f32 %v11152_v49, %v10819_v3 }
 0x1df   : > { %v9573_v36 = vpop.eup %9572  ;;  %v11242_v3 = vmul.f32 %v11152_v49, %v10844_v9  ;;  %v4231_v9 = vld [vmem:[%s16979_s11 + $0x40] sm:$0xff] }
 0x1e0   : > { %2734 = vmatpush.msra.mxu2 %v2560_v39  ;;  %v9575_v56 = vpop.eup %9574  ;;  %v2350_v28 = vmul.f32 0.5, %v9573_v36  ;;  %v2544_v54 = vadd.f32 0.5, %v2352_v17  ;;  %4245 = vperm.xlu1 %9543, %v4231_v9   ;;  %v5634_v17 = vld [vmem:[%s16979_s11 + $0x88] sm:$0xff] }
 0x1e1   : > { %v9577_v5 = vpop.eup %9576  ;;  %v2348_v61 = vmul.f32 0.5, %v9575_v56  ;;  %v5647_v56 = vld [vmem:[%s16979_s11 + $0xf0] sm:$0xff] }
 0x1e2   : > { %v11194_v37 = vpop.f32.mrf.mxu0  ;;  %2735 = vmatpush.msra.mxu2 %v2558_v14  ;;  %v2546_v14 = vadd.f32 0.5, %v2354_v24  ;;  %v2346_v12 = vmul.f32 0.5, %v9577_v5 }
 0x1e3   : > { %v11205_v55 = vpop.f32.mrf.mxu1  ;;  %v2540_v30 = vadd.f32 0.5, %v2348_v61  ;;  %v5637_v61 = vld [vmem:[%s16979_s11 + $0xa0] sm:$0xff] }
 0x1e4   : > { %2736 = vmatpush.msra.mxu2 %v2556_v10  ;;  %v2542_v10 = vadd.f32 0.5, %v2350_v28  ;;  %8917 = vmatmul.msk.f32.gmra.mxu1 %vm1063_vm2, %v11146_v31  ;;  %v11269_v31 = vmul.f32 %v11152_v49, %v10879_v19 }
 0x1e5   : > { %8824 = vmatmul.msk.f32.gmra.mxu0 %vm1063_vm2, %v11190_v52 }
 0x1e6   : > { %2737 = vmatpush.msra.mxu2 %v2554_v48  ;;  %v2538_v48 = vadd.f32 0.5, %v2346_v12  ;;  %v4230_v12 = vld [vmem:[%s16979_s11 + $0x38] sm:$0xff] }
 0x1e7   : > { %4240 = vperm.xlu2 %9544, %v4230_v12  }
 0x1e8   : > { %2738 = vmatpush.msra.mxu2 %v2552_v22  ;;  %5656 = vperm.xlu1 %9543, %v5634_v17   ;;  %v11352_v17 = vmul.f32 %v11152_v49, %v10941_v35 }
 0x1ea   : > { %v11207_v39 = vpop.f32.mrf.mxu0  ;;  %2739 = vmatpush.msra.mxu2 %v2550_v40 }
 0x1eb   : > { %v11215_v33 = vpop.f32.mrf.mxu1 }
 0x1ec   : > { %2740 = vmatpush.msra.mxu2 %v2548_v51  ;;  %8918 = vmatmul.msk.f32.gmra.mxu1 %vm1063_vm2, %v11158_v11  ;;  %v11284_v11 = vmul.f32 %v11152_v49, %v10888_v21 }
 0x1ed   : > { %8825 = vmatmul.msk.f32.gmra.mxu0 %vm1063_vm2, %v11203_v20 }
 0x1ee   : > { %2741 = vmatpush.msra.mxu2 %v2546_v14  ;;  %v5640_v14 = vld [vmem:[%s16979_s11 + $0xb8] sm:$0xff] }
 0x1f0   : > { %2742 = vmatpush.msra.mxu2 %v2544_v54  ;;  %5721 = vperm.xlu1 %9543, %v5647_v56  }
 0x1f2   : > { %v11217_v43 = vpop.f32.mrf.mxu0  ;;  %2743 = vmatpush.msra.mxu2 %v2542_v10  ;;  %v6050_v10 = vld [vmem:[%s16979_s11 + $0x178] sm:$0xff] }
 0x1f3   : > { %v11224_v58 = vpop.f32.mrf.mxu1 }
 0x1f4   : > { %2744 = vmatpush.msra.mxu2 %v2540_v30  ;;  %8919 = vmatmul.msk.f32.gmra.mxu1 %vm1063_vm2, %v11174_v7  ;;  %v11297_v7 = vmul.f32 %v11152_v49, %v10897_v23 }
 0x1f5   : > { %8826 = vmatmul.msk.f32.gmra.mxu0 %vm1063_vm2, %v994_v46 }
 0x1f6   : > { %2745 = vmatpush.msra.mxu2 %v2538_v48  ;;  %v5633_v48 = vld [vmem:[%s16979_s11 + $0x80] sm:$0xff] }
 0x1f7   : > { %5651 = vperm.xlu2 %9544, %v5633_v48   ;;  %v11369_v48 = vmul.f32 %v11152_v49, %v10952_v38 }
 0x1f8   : > { %5686 = vperm.xlu1 %9543, %v5640_v14  }
 0x1fa   : > { %v11226_v0 = vpop.f32.mrf.mxu0 }
 0x1fb   : > { %v11233_v22 = vpop.f32.mrf.mxu1 }
 0x1fc   : > { %8920 = vmatmul.msk.f32.gmra.mxu1 %vm1063_vm2, %v11190_v52  ;;  %v11310_v52 = vmul.f32 %v11152_v49, %v10908_v26 }
 0x1fd   : > { %8827 = vmatmul.msk.f32.gmra.mxu0 %vm1063_vm2, %v995_v1 }
 0x200   : > { %5671 = vperm.xlu1 %9543, %v5637_v61  }
 0x202   : > { %v11235_v60 = vpop.f32.mrf.mxu0 }
 0x203   : > { %v11244_v24 = vpop.f32.mrf.mxu1 }
 0x204   : > { %8921 = vmatmul.msk.f32.gmra.mxu1 %vm1063_vm2, %v11203_v20  ;;  %v11322_v20 = vmul.f32 %v11152_v49, %v10919_v29  ;;  %v11337_v29 = vmul.f32 %v11152_v49, %v10930_v32 }
 0x205   : > { %8828 = vmatmul.msk.f32.gmra.mxu0 %vm1063_vm2, %v996_v42 }
 0x208   : > { %6128 = vperm.xlu1 %9543, %v6050_v10   ;;  %v6040_v10 = vld [vmem:[%s16979_s11 + $0x128] sm:$0xff] }
 0x20a   : > { %v11246_v16 = vpop.f32.mrf.mxu0 }
 0x20b   : > { %v11256_v45 = vpop.f32.mrf.mxu1 }
 0x20c   : > { %17072 = vst [vmem:[#allocation19_spill] sm:$0xff] %v11256_v45  ;;  %8922 = vmatmul.msk.f32.gmra.mxu1 %vm1063_vm2, %v994_v46  ;;  %v2006_v45 = vmul.f32 0.5, %v11235_v60 }
 0x20d   : > { %8829 = vmatmul.msk.f32.gmra.mxu0 %vm1063_vm2, %v11242_v3 }
 0x212   : > { %v11258_v40 = vpop.f32.mrf.mxu0 }
 0x213   : > { %v11271_v15 = vpop.f32.mrf.mxu1 }
 0x214   : > { %17073 = vst [vmem:[#allocation20_spill] sm:$0xff] %v11271_v15  ;;  %8923 = vmatmul.msk.f32.gmra.mxu1 %vm1063_vm2, %v995_v1  ;;  %v6047_v1 = vld [vmem:[%s16979_s11 + $0x160] sm:$0xff] }
 0x215   : > { %8830 = vmatmul.msk.f32.gmra.mxu0 %vm1063_vm2, %v11254_v6  ;;  %6113 = vperm.xlu1 %9543, %v6047_v1  }
 0x21a   : > { %v11273_v36 = vpop.f32.mrf.mxu0 }
 0x21b   : > { %v11286_v19 = vpop.f32.mrf.mxu1 }
 0x21c   : > { %17074 = vst [vmem:[#allocation21_spill] sm:$0xff] %v11286_v19  ;;  %8924 = vmatmul.msk.f32.gmra.mxu1 %vm1063_vm2, %v996_v42  ;;  %v5646_v42 = vld [vmem:[%s16979_s11 + $0xe8] sm:$0xff] }
 0x21d   : > { %8831 = vmatmul.msk.f32.gmra.mxu0 %vm1063_vm2, %v11269_v31  ;;  %5716 = vperm.xlu2 %9544, %v5646_v42  }
 0x21e   : > { %6078 = vperm.xlu1 %9543, %v6040_v10  }
 0x222   : > { %v1447_v51 = vpop.f32.mrf.mxu0 }
 0x223   : > { %v11299_v21 = vpop.f32.mrf.mxu1 }
 0x224   : > { %17075 = vst [vmem:[#allocation22_spill] sm:$0xff] %v11299_v21  ;;  %8925 = vmatmul.msk.f32.gmra.mxu1 %vm1063_vm2, %v11242_v3  ;;  %v11662_v21 = vmul.f32 %v11152_v49, %v11142_v59 }
 0x225   : > { %8832 = vmatmul.msk.f32.gmra.mxu0 %vm1063_vm2, %v11284_v11 }
 0x22a   : > { %v1450_v28 = vpop.f32.mrf.mxu0 }
 0x22b   : > { %v11312_v23 = vpop.f32.mrf.mxu1  ;;  %v2016_v35 = vmul.f32 0.5, %v1450_v28 }
 0x22c   : > { %17076 = vst [vmem:[#allocation23_spill] sm:$0xff] %v11312_v23  ;;  %8926 = vmatmul.msk.f32.gmra.mxu1 %vm1063_vm2, %v11254_v6 }
 0x22d   : > { %8833 = vmatmul.msk.f32.gmra.mxu0 %vm1063_vm2, %v11297_v7 }
 0x232   : > { %v1453_v5 = vpop.f32.mrf.mxu0 }
 0x233   : > { %v11324_v54 = vpop.f32.mrf.mxu1  ;;  %v2018_v61 = vmul.f32 0.5, %v1453_v5  ;;  %v2014_v5 = vmul.f32 0.5, %v1447_v51  ;;  %v5639_v51 = vld [vmem:[%s16979_s11 + $0xb0] sm:$0xff] }
 0x234   : > { %17077 = vst [vmem:[#allocation24_spill] sm:$0xff] %v11324_v54  ;;  %5681 = vperm.xlu2 %9544, %v5639_v51   ;;  %v11396_v51 = vmul.f32 %v11152_v49, %v10963_v41  ;;  %v6520_v41 = vld [vmem:[%s16979_s11 + $0x1e8] sm:$0xff]  ;;  %8927 = vmatmul.msk.f32.gmra.mxu1 %vm1063_vm2, %v11269_v31 }
 0x235   : > { %8834 = vmatmul.msk.f32.gmra.mxu0 %vm1063_vm2, %v11310_v52 }
 0x23a   : > { %v1456_v26 = vpop.f32.mrf.mxu0 }
 0x23b   : > { %v11339_v46 = vpop.f32.mrf.mxu1  ;;  %v2020_v9 = vmul.f32 0.5, %v1456_v26 }
 0x23c   : > { %17078 = vst [vmem:[#allocation25_spill] sm:$0xff] %v11339_v46  ;;  %8928 = vmatmul.msk.f32.gmra.mxu1 %vm1063_vm2, %v11284_v11  ;;  %v11438_v11 = vmul.f32 %v11152_v49, %v10985_v47 }
 0x23d   : > { %8835 = vmatmul.msk.f32.gmra.mxu0 %vm1063_vm2, %v11322_v20 }
 0x242   : > { %v1459_v30 = vpop.f32.mrf.mxu0 }
 0x243   : > { %v2022_v32 = vmul.f32 0.5, %v1459_v30  ;;  %v11354_v56 = vpop.f32.mrf.mxu1  ;;  %v2012_v30 = vmul.f32 0.5, %v11273_v36  ;;  %v6507_v36 = vld [vmem:[%s16979_s11 + $0x180] sm:$0xff] }
 0x244   : > { %17079 = vst [vmem:[#allocation26_spill] sm:$0xff] %v11354_v56  ;;  %6525 = vperm.xlu1 %9543, %v6507_v36   ;;  %8929 = vmatmul.msk.f32.gmra.mxu1 %vm1063_vm2, %v11297_v7 }
 0x245   : > { %8836 = vmatmul.msk.f32.gmra.mxu0 %vm1063_vm2, %v11337_v29  ;;  %9578 = vtanh.f32 %v2022_v32 }
 0x246   : > { %9580 = vtanh.f32 %v2020_v9  ;;  %v2010_v9 = vmul.f32 0.5, %v11258_v40  ;;  %v11387_v40 = vpop.permute.xlu1 %719 }
 0x24a   : > { %v1462_v14 = vpop.f32.mrf.mxu0 }
 0x24b   : > { %v2024_v12 = vmul.f32 0.5, %v1462_v14  ;;  %v9579_v26 = vpop.eup %9578  ;;  %v11371_v1 = vpop.f32.mrf.mxu1 }
 0x24c   : > { %17080 = vst [vmem:[#allocation27_spill] sm:$0xff] %v11371_v1  ;;  %v9581_v3 = vpop.eup %9580  ;;  %v2406_v38 = vmul.f32 0.5, %v9579_v26  ;;  %6590 = vperm.xlu1 %9543, %v6520_v41   ;;  %8930 = vmatmul.msk.f32.gmra.mxu1 %vm1063_vm2, %v11310_v52 }
 0x24d   : > { %9582 = vtanh.f32 %v2024_v12  ;;  %8837 = vmatmul.msk.f32.gmra.mxu0 %vm1063_vm2, %v11352_v17  ;;  %v2008_v12 = vmul.f32 0.5, %v11246_v16  ;;  %v2404_v42 = vmul.f32 0.5, %v9581_v3 }
 0x24e   : > { %9584 = vtanh.f32 %v2018_v61 }
 0x24f   : > { %9586 = vtanh.f32 %v2016_v35  ;;  %v767_v35 = vpop.f32.mrf.mxu2  ;;  %v2596_v36 = vadd.f32 0.5, %v2404_v42 }
 0x250   : > { %9588 = vtanh.f32 %v2014_v5  ;;  %v11391_v6 = vadd.f32 %v767_v35, %v11387_v40 }
 0x251   : > { %9590 = vtanh.f32 %v2012_v30  ;;  %v2004_v30 = vmul.f32 0.5, %v11226_v0  ;;  %v6036_v0 = vld [vmem:[%s16979_s11 + $0x108] sm:$0xff] }
 0x252   : > { %v11373_v32 = vpop.f32.mrf.mxu0  ;;  %9592 = vtanh.f32 %v2010_v9  ;;  %2746 = vmatmul.f32.vlgmr.msra.gmra.mxu2 %v11391_v6  ;;  %6058 = vperm.xlu2 %9544, %v6036_v0  }
 0x253   : > { %v9583_v28 = vpop.eup %9582  ;;  %9594 = vtanh.f32 %v2008_v12  ;;  %v11398_v3 = vpop.f32.mrf.mxu1 }
 0x254   : > { %v2408_v14 = vmul.f32 0.5, %v9583_v28  ;;  %v9585_v61 = vpop.eup %9584  ;;  %v2598_v28 = vadd.f32 0.5, %v2406_v38  ;;  %17081 = vst [vmem:[#allocation28_spill] sm:$0xff] %v11398_v3  ;;  %v2002_v38 = vmul.f32 0.5, %v11217_v43  ;;  %9596 = vtanh.f32 %v2006_v45  ;;  %8931 = vmatmul.msk.f32.gmra.mxu1 %vm1063_vm2, %v11322_v20  ;;  %v6983_v20 = vld [vmem:[%s16979_s11 + $0x220] sm:$0xff] }
 0x255   : > { %8838 = vmatmul.msk.f32.gmra.mxu0 %vm1063_vm2, %v11369_v48  ;;  %v9587_v5 = vpop.eup %9586  ;;  %v2402_v26 = vmul.f32 0.5, %v9585_v61  ;;  %9598 = vtanh.f32 %v2004_v30 }
 0x256   : > { %v2600_v10 = vadd.f32 0.5, %v2408_v14  ;;  %v9589_v16 = vpop.eup %9588  ;;  %v2400_v60 = vmul.f32 0.5, %v9587_v5  ;;  %v1998_v5 = vmul.f32 0.5, %v11194_v37  ;;  %9600 = vtanh.f32 %v2002_v38 }
 0x257   : > { %v9591_v14 = vpop.eup %9590  ;;  %v2398_v61 = vmul.f32 0.5, %v9589_v16  ;;  %v2594_v12 = vadd.f32 0.5, %v2402_v26  ;;  %v1996_v16 = vmul.f32 0.5, %v11178_v34  ;;  %v1994_v38 = vmul.f32 0.5, %v11162_v4  ;;  %v6049_v34 = vld [vmem:[%s16979_s11 + $0x170] sm:$0xff] }
 0x258   : > { %2759 = vmatpush.msrb.mxu3 %v2600_v10  ;;  %v9593_v42 = vpop.eup %9592  ;;  %v2000_v10 = vmul.f32 0.5, %v11207_v39  ;;  %v2396_v43 = vmul.f32 0.5, %v9591_v14  ;;  %v2592_v45 = vadd.f32 0.5, %v2400_v60  ;;  %v11419_v39 = vmul.f32 %v11152_v49, %v10974_v44  ;;  %v6513_v44 = vld [vmem:[%s16979_s11 + $0x1b0] sm:$0xff] }
 0x259   : > { %v9595_v35 = vpop.eup %9594  ;;  %v2394_v31 = vmul.f32 0.5, %v9593_v42  ;;  %6555 = vperm.xlu1 %9543, %v6513_v44  }
 0x25a   : > { %v11401_v9 = vpop.f32.mrf.mxu0  ;;  %2760 = vmatpush.msrb.mxu3 %v2598_v28  ;;  %v2590_v28 = vadd.f32 0.5, %v2398_v61  ;;  %v9597_v26 = vpop.eup %9596  ;;  %9602 = vtanh.f32 %v2000_v10  ;;  %v2588_v60 = vadd.f32 0.5, %v2396_v43  ;;  %6123 = vperm.xlu2 %9544, %v6049_v34  }
 0x25b   : > { %v11421_v30 = vpop.f32.mrf.mxu1  ;;  %v9599_v37 = vpop.eup %9598  ;;  %9604 = vtanh.f32 %v1998_v5  ;;  %v2390_v0 = vmul.f32 0.5, %v9597_v26  ;;  %v2586_v41 = vadd.f32 0.5, %v2394_v31 }
 0x25c   : > { %2761 = vmatpush.msrb.mxu3 %v2596_v36  ;;  %17082 = vst [vmem:[#allocation29_spill] sm:$0xff] %v11421_v30  ;;  %v2392_v36 = vmul.f32 0.5, %v9595_v35  ;;  %v9601_v61 = vpop.eup %9600  ;;  %9606 = vtanh.f32 %v1996_v16  ;;  %v2388_v4 = vmul.f32 0.5, %v9599_v37  ;;  %v6042_v16 = vld [vmem:[%s16979_s11 + $0x138] sm:$0xff]  ;;  %8932 = vmatmul.msk.f32.gmra.mxu1 %vm1063_vm2, %v11337_v29 }
 0x25d   : > { %8839 = vmatmul.msk.f32.gmra.mxu0 %vm1063_vm2, %v11396_v51  ;;  %9608 = vtanh.f32 %v1994_v38  ;;  %v2386_v10 = vmul.f32 0.5, %v9601_v61  ;;  %v2582_v43 = vadd.f32 0.5, %v2390_v0  ;;  %v7466_v29 = vld [vmem:[%s16979_s11 + $0x2f8] sm:$0xff] }
 0x25e   : > { %2762 = vmatpush.msrb.mxu3 %v2594_v12  ;;  %v2584_v12 = vadd.f32 0.5, %v2392_v36  ;;  %v6980_v36 = vld [vmem:[%s16979_s11 + $0x208] sm:$0xff] }
 0x260   : > { %2763 = vmatpush.msrb.mxu3 %v2592_v45  ;;  %v9603_v42 = vpop.eup %9602 }
 0x261   : > { %v9605_v45 = vpop.eup %9604  ;;  %v2384_v5 = vmul.f32 0.5, %v9603_v42  ;;  %7002 = vperm.xlu1 %9543, %v6980_v36   ;;  %v6993_v42 = vld [vmem:[%s16979_s11 + $0x270] sm:$0xff] }
 0x262   : > { %v11423_v14 = vpop.f32.mrf.mxu0  ;;  %2764 = vmatpush.msrb.mxu3 %v2590_v28  ;;  %v2580_v28 = vadd.f32 0.5, %v2388_v4  ;;  %v9607_v26 = vpop.eup %9606  ;;  %v2382_v47 = vmul.f32 0.5, %v9605_v45  ;;  %6088 = vperm.xlu2 %9544, %v6042_v16   ;;  %v6519_v16 = vld [vmem:[%s16979_s11 + $0x1e0] sm:$0xff] }
 0x263   : > { %v11440_v35 = vpop.f32.mrf.mxu1  ;;  %v9609_v37 = vpop.eup %9608  ;;  %v2380_v38 = vmul.f32 0.5, %v9607_v26  ;;  %v2576_v34 = vadd.f32 0.5, %v2384_v5  ;;  %v6986_v5 = vld [vmem:[%s16979_s11 + $0x238] sm:$0xff] }
 0x264   : > { %2765 = vmatpush.msrb.mxu3 %v2588_v60  ;;  %17083 = vst [vmem:[#allocation30_spill] sm:$0xff] %v11440_v35  ;;  %v2578_v60 = vadd.f32 0.5, %v2386_v10  ;;  %v2378_v44 = vmul.f32 0.5, %v9609_v37  ;;  %v2574_v0 = vadd.f32 0.5, %v2382_v47  ;;  %v11472_v10 = vadd.f32 %v10901_v25, %v11387_v40  ;;  %v6522_v25 = vld [vmem:[%s16979_s11 + $0x1f8] sm:$0xff]  ;;  %8933 = vmatmul.msk.f32.gmra.mxu1 %vm1063_vm2, %v11352_v17  ;;  %v7463_v17 = vld [vmem:[%s16979_s11 + $0x2e0] sm:$0xff]  ;;  %v799_v35 = vpop.f32.mrf.mxu3 }
 0x265   : > { %8840 = vmatmul.msk.f32.gmra.mxu0 %vm1063_vm2, %v11419_v39  ;;  %v2572_v4 = vadd.f32 0.5, %v2380_v38 }
 0x266   : > { %2766 = vmatpush.msrb.mxu3 %v2586_v41  ;;  %v11456_v41 = vmul.f32 %v11152_v49, %v10996_v53  ;;  %v2570_v53 = vadd.f32 0.5, %v2378_v44  ;;  %17085 = vst [vmem:[#allocation32_spill] sm:$0xff] %v11472_v10 }
 0x268   : > { %2767 = vmatpush.msrb.mxu3 %v2584_v12  ;;  %v6039_v12 = vld [vmem:[%s16979_s11 + $0x120] sm:$0xff] }
 0x269   : > { %7067 = vperm.xlu1 %9543, %v6993_v42  }
 0x26a   : > { %v11442_v31 = vpop.f32.mrf.mxu0  ;;  %2768 = vmatpush.msrb.mxu3 %v2582_v43  ;;  %6073 = vperm.xlu2 %9544, %v6039_v12   ;;  %v11479_v43 = vmul.f32 %v11152_v49, %v11007_v57  ;;  %v11497_v57 = vmul.f32 %v11152_v49, %v11018_v62  ;;  %v11515_v62 = vmul.f32 %v11152_v49, %v11029_v2 }
 0x26b   : > { %v11458_v7 = vpop.f32.mrf.mxu1  ;;  %v11533_v2 = vmul.f32 %v11152_v49, %v11042_v8  ;;  %v11551_v8 = vmul.f32 %v11152_v49, %v11058_v13  ;;  %v11569_v13 = vmul.f32 %v11152_v49, %v11072_v18  ;;  %v11587_v18 = vmul.f32 %v11152_v49, %v11086_v27  ;;  %v17089_v27 = vld [vmem:[#allocation11_spill] sm:$0xff] }
 0x26c   : > { %2769 = vmatpush.msrb.mxu3 %v2580_v28  ;;  %17084 = vst [vmem:[#allocation31_spill] sm:$0xff] %v11458_v7  ;;  %8934 = vmatmul.msk.f32.gmra.mxu1 %vm1063_vm2, %v11369_v48  ;;  %v7456_v48 = vld [vmem:[%s16979_s11 + $0x2a8] sm:$0xff] }
 0x26d   : > { %8841 = vmatmul.msk.f32.gmra.mxu0 %vm1063_vm2, %v11438_v11 }
 0x26e   : > { %2770 = vmatpush.msrb.mxu3 %v2578_v60  ;;  %v6512_v60 = vld [vmem:[%s16979_s11 + $0x1a8] sm:$0xff] }
 0x270   : > { %2771 = vmatpush.msrb.mxu3 %v2576_v34  ;;  %v6979_v34 = vld [vmem:[%s16979_s11 + $0x200] sm:$0xff] }
 0x271   : > { %7032 = vperm.xlu1 %9543, %v6986_v5  }
 0x272   : > { %v11460_v61 = vpop.f32.mrf.mxu0  ;;  %2772 = vmatpush.msrb.mxu3 %v2574_v0  ;;  %6600 = vperm.xlu2 %9544, %v6522_v25  }
 0x273   : > { %v11481_v45 = vpop.f32.mrf.mxu1 }
 0x274   : > { %2773 = vmatpush.msrb.mxu3 %v2572_v4  ;;  %17086 = vst [vmem:[#allocation33_spill] sm:$0xff] %v11481_v45  ;;  %v6992_v4 = vld [vmem:[%s16979_s11 + $0x268] sm:$0xff]  ;;  %8935 = vmatmul.msk.f32.gmra.mxu1 %vm1063_vm2, %v11396_v51  ;;  %v7923_v51 = vld [vmem:[%s16979_s11 + $0x300] sm:$0xff] }
 0x275   : > { %8842 = vmatmul.msk.f32.gmra.mxu0 %vm1063_vm2, %v11456_v41  ;;  %v6516_v45 = vld [vmem:[%s16979_s11 + $0x1c8] sm:$0xff] }
 0x276   : > { %2774 = vmatpush.msrb.mxu3 %v2570_v53  ;;  %v6985_v53 = vld [vmem:[%s16979_s11 + $0x230] sm:$0xff] }
 0x277   : > { %2775 = vmatmul.f32.vlgmr.msrb.gmra.mxu3 %v11472_v10 }
 0x279   : > { %7017 = vperm.xlu1 %9543, %v6983_v20   ;;  %v11603_v20 = vmul.f32 %v11152_v49, %v17089_v27 }
 0x27a   : > { %v11483_v52 = vpop.f32.mrf.mxu0  ;;  %6585 = vperm.xlu2 %9544, %v6519_v16   ;;  %v7452_v16 = vld [vmem:[%s16979_s11 + $0x288] sm:$0xff] }
 0x27b   : > { %v11499_v28 = vpop.f32.mrf.mxu1 }
 0x27c   : > { %17087 = vst [vmem:[#allocation34_spill] sm:$0xff] %v11499_v28  ;;  %8936 = vmatmul.msk.f32.gmra.mxu1 %vm1063_vm2, %v11419_v39  ;;  %v5641_v39 = vld [vmem:[%s16979_s11 + $0xc0] sm:$0xff] }
 0x27d   : > { %8843 = vmatmul.msk.f32.gmra.mxu0 %vm1063_vm2, %v11479_v43  ;;  %v7459_v28 = vld [vmem:[%s16979_s11 + $0x2c0] sm:$0xff] }
 0x281   : > { %7544 = vperm.xlu1 %9543, %v7466_v29  }
 0x282   : > { %v11501_v26 = vpop.f32.mrf.mxu0  ;;  %6550 = vperm.xlu2 %9544, %v6512_v60  }
 0x283   : > { %v11517_v36 = vpop.f32.mrf.mxu1  ;;  %v2038_v3 = vmul.f32 0.5, %v11501_v26 }
 0x284   : > { %17088 = vst [vmem:[#allocation35_spill] sm:$0xff] %v11517_v36  ;;  %8937 = vmatmul.msk.f32.gmra.mxu1 %vm1063_vm2, %v11438_v11  ;;  %v5644_v11 = vld [vmem:[%s16979_s11 + $0xd8] sm:$0xff] }
 0x285   : > { %8844 = vmatmul.msk.f32.gmra.mxu0 %vm1063_vm2, %v11497_v57  ;;  %v8364_v36 = vld [vmem:[%s16979_s11 + $0x58] sm:$0xff] }
 0x289   : > { %7529 = vperm.xlu1 %9543, %v7463_v17   ;;  %v17090_v17 = vld [vmem:[#allocation13_spill] sm:$0xff] }
 0x28a   : > { %v11519_v47 = vpop.f32.mrf.mxu0  ;;  %6997 = vperm.xlu2 %9544, %v6979_v34   ;;  %v7465_v34 = vld [vmem:[%s16979_s11 + $0x2f0] sm:$0xff] }
 0x28b   : > { %v11535_v37 = vpop.f32.mrf.mxu1  ;;  %v2040_v56 = vmul.f32 0.5, %v11519_v47  ;;  %v10400_v47 = vld [vmem:[%s16974_s6 + $0x8] sm:$0xff] }
 0x28c   : > { %8938 = vmatmul.msk.f32.gmra.mxu1 %vm1063_vm2, %v11456_v41  ;;  %v7937_v41 = vld [vmem:[%s16979_s11 + $0x370] sm:$0xff] }
 0x28d   : > { %8845 = vmatmul.msk.f32.gmra.mxu0 %vm1063_vm2, %v11515_v62 }
 0x291   : > { %7494 = vperm.xlu1 %9543, %v7456_v48  }
 0x292   : > { %v11537_v38 = vpop.f32.mrf.mxu0  ;;  %7062 = vperm.xlu2 %9544, %v6992_v4   ;;  %v11619_v4 = vmul.f32 %v11152_v49, %v17090_v17 }
 0x293   : > { %v11553_v44 = vpop.f32.mrf.mxu1 }
 0x294   : > { %8939 = vmatmul.msk.f32.gmra.mxu1 %vm1063_vm2, %v11479_v43  ;;  %v7455_v43 = vld [vmem:[%s16979_s11 + $0x2a0] sm:$0xff] }
 0x295   : > { %8846 = vmatmul.msk.f32.gmra.mxu0 %vm1063_vm2, %v11533_v2 }
 0x299   : > { %7941 = vperm.xlu1 %9543, %v7923_v51  }
 0x29a   : > { %v11555_v0 = vpop.f32.mrf.mxu0  ;;  %7027 = vperm.xlu2 %9544, %v6985_v53   ;;  %v770_v53 = vpop.f32.mrf.mxu2 }
 0x29b   : > { %v11571_v12 = vpop.f32.mrf.mxu1 }
 0x29c   : > { %8940 = vmatmul.msk.f32.gmra.mxu1 %vm1063_vm2, %v11497_v57 }
 0x29d   : > { %8847 = vmatmul.msk.f32.gmra.mxu0 %vm1063_vm2, %v11551_v8 }
 0x2a1   : > { %5691 = vperm.xlu1 %9543, %v5641_v39   ;;  %v11633_v39 = vpop.permute.xlu1 %724 }
 0x2a2   : > { %v11573_v42 = vpop.f32.mrf.mxu0  ;;  %7474 = vperm.xlu2 %9544, %v7452_v16   ;;  %v7458_v16 = vld [vmem:[%s16979_s11 + $0x2b8] sm:$0xff]  ;;  %v11636_v27 = vadd.f32 %v770_v53, %v11633_v39  ;;  %v11653_v53 = vpop.permute.xlu2 %729 }
 0x2a3   : > { %v11589_v25 = vpop.f32.mrf.mxu1 }
 0x2a4   : > { %2749 = vmatmul.f32.gmra.mxu2 %v11636_v27  ;;  %8941 = vmatmul.msk.f32.gmra.mxu1 %vm1063_vm2, %v11515_v62  ;;  %v2044_v62 = vmul.f32 0.5, %v11555_v0  ;;  %v5642_v0 = vld [vmem:[%s16979_s11 + $0xc8] sm:$0xff] }
 0x2a5   : > { %8848 = vmatmul.msk.f32.gmra.mxu0 %vm1063_vm2, %v11569_v13 }
 0x2a9   : > { %5706 = vperm.xlu1 %9543, %v5644_v11  }
 0x2aa   : > { %v1498_v5 = vpop.f32.mrf.mxu0  ;;  %7539 = vperm.xlu2 %9544, %v7465_v34   ;;  %v17091_v34 = vld [vmem:[#allocation15_spill] sm:$0xff] }
 0x2ab   : > { %v11605_v60 = vpop.f32.mrf.mxu1  ;;  %v11640_v11 = vmul.f32 %v11152_v49, %v17091_v34  ;;  %v10398_v49 = vld [vmem:[%s10729_s24] sm:$0x7]  ;;  %s9529_s24 = smul.u32 96, %s17614_s26 }
 0x2ac   : > { %v11676_v59 = vperm.slane %v10398_v49, 2  ;;  %v2042_v49 = vmul.f32 0.5, %v11537_v38  ;;  %8942 = vmatmul.msk.f32.gmra.mxu1 %vm1063_vm2, %v11533_v2 }
 0x2ad   : > { %8849 = vmatmul.msk.f32.gmra.mxu0 %vm1063_vm2, %v11587_v18  ;;  %s13178_s30 = scalar_lea.vmem %s16970_s2, %s9529_s24  ;;  %s16951_s22 = scalar_lea.vmem %s16980_s12, %s9529_s24 }
 0x2b1   : > { %8007 = vperm.xlu1 %9543, %v7937_v41   ;;  %v773_v41 = vpop.f32.mrf.mxu2 }
 0x2b2   : > { %v1501_v29 = vpop.f32.mrf.mxu0  ;;  %7504 = vperm.xlu2 %9544, %v7458_v16   ;;  %v6038_v16 = vld [vmem:[%s16979_s11 + $0x118] sm:$0xff]  ;;  %v11658_v15 = vadd.f32 %v773_v41, %v11653_v53 }
 0x2b3   : > { %v11621_v48 = vpop.f32.mrf.mxu1 }
 0x2b4   : > { %17092 = vst [vmem:[#allocation11_spill] sm:$0xff] %v11658_v15  ;;  %2752 = vmatmul.f32.gmra.mxu2 %v11658_v15  ;;  %8943 = vmatmul.msk.f32.gmra.mxu1 %vm1063_vm2, %v11551_v8  ;;  %v2030_v8 = vmul.f32 0.5, %v11423_v14 }
 0x2b5   : > { %8850 = vmatmul.msk.f32.gmra.mxu0 %vm1063_vm2, %v11603_v20 }
 0x2b9   : > { %6068 = vperm.xlu1 %9543, %v6038_v16   ;;  %v2048_v16 = vmul.f32 0.5, %v1498_v5  ;;  %v776_v41 = vpop.f32.mrf.mxu2 }
 0x2ba   : > { %v1504_v51 = vpop.f32.mrf.mxu0  ;;  %7489 = vperm.xlu2 %9544, %v7455_v43   ;;  %v2050_v43 = vmul.f32 0.5, %v1501_v29  ;;  %v11680_v29 = vpop.permute.xlu2 %734 }
 0x2bb   : > { %v11642_v17 = vpop.f32.mrf.mxu1  ;;  %v2052_v19 = vmul.f32 0.5, %v1504_v51  ;;  %v6045_v51 = vld [vmem:[%s16979_s11 + $0x150] sm:$0xff] }
 0x2bc   : > { %8944 = vmatmul.msk.f32.gmra.mxu1 %vm1063_vm2, %v11569_v13 }
 0x2bd   : > { %8851 = vmatmul.msk.f32.gmra.mxu0 %vm1063_vm2, %v11619_v4 }
 0x2c1   : > { %6103 = vperm.xlu1 %9543, %v6045_v51  }
 0x2c2   : > { %v1507_v10 = vpop.f32.mrf.mxu0 }
 0x2c3   : > { %v2054_v34 = vmul.f32 0.5, %v1507_v10  ;;  %v11664_v23 = vpop.f32.mrf.mxu1  ;;  %v5635_v10 = vld [vmem:[%s16979_s11 + $0x90] sm:$0xff] }
 0x2c4   : > { %5661 = vperm.xlu2 %9544, %v5635_v10   ;;  %8945 = vmatmul.msk.f32.gmra.mxu1 %vm1063_vm2, %v11587_v18 }
 0x2c5   : > { %8852 = vmatmul.msk.f32.gmra.mxu0 %vm1063_vm2, %v11640_v11  ;;  %9610 = vtanh.f32 %v2054_v34  ;;  %v2046_v34 = vmul.f32 0.5, %v11573_v42 }
 0x2c6   : > { %9612 = vtanh.f32 %v2052_v19 }
 0x2ca   : > { %v1510_v57 = vpop.f32.mrf.mxu0 }
 0x2cb   : > { %v2056_v54 = vmul.f32 0.5, %v1510_v57  ;;  %v11684_v57 = vadd.f32 %v776_v41, %v11680_v29  ;;  %v9611_v19 = vpop.eup %9610  ;;  %v11693_v10 = vpop.f32.mrf.mxu1 }
 0x2cc   : > { %v9613_v42 = vpop.eup %9612  ;;  %v2438_v41 = vmul.f32 0.5, %v9611_v19  ;;  %5696 = vperm.xlu2 %9544, %v5642_v0   ;;  %8946 = vmatmul.msk.f32.gmra.mxu1 %vm1063_vm2, %v11603_v20 }
 0x2cd   : > { %9614 = vtanh.f32 %v2056_v54  ;;  %8853 = vmatmul.msk.f32.gmra.mxu0 %vm1063_vm2, %v11662_v21  ;;  %17093 = vst [vmem:[#allocation13_spill] sm:$0xff] %v11684_v57  ;;  %v10399_v54 = vld [vmem:[%s16974_s6] sm:$0xff]  ;;  %2755 = vmatmul.f32.gmra.mxu2 %v11684_v57  ;;  %v2436_v38 = vmul.f32 0.5, %v9613_v42 }
 0x2ce   : > { %9616 = vtanh.f32 %v2050_v43  ;;  %v11691_v5 = vmul.f32 %v10399_v54, %v11676_v59  ;;  %v2630_v2 = vadd.f32 0.5, %v2438_v41 }
 0x2cf   : > { %9618 = vtanh.f32 %v2048_v16  ;;  %v6510_v16 = vld [vmem:[%s16979_s11 + $0x198] sm:$0xff] }
 0x2d0   : > { %9620 = vtanh.f32 %v2046_v34  ;;  %6540 = vperm.xlu1 %9543, %v6510_v16   ;;  %v2034_v16 = vmul.f32 0.5, %v11460_v61 }
 0x2d1   : > { %9622 = vtanh.f32 %v2044_v62  ;;  %v11716_v62 = vmul.f32 %v10400_v47, %v11676_v59 }
 0x2d2   : > { %v11696_v43 = vpop.f32.mrf.mxu0  ;;  %9624 = vtanh.f32 %v2042_v49 }
 0x2d3   : > { %v9615_v51 = vpop.eup %9614  ;;  %9626 = vtanh.f32 %v2040_v56  ;;  %v11718_v42 = vpop.f32.mrf.mxu1  ;;  %v6037_v56 = vld [vmem:[%s16979_s11 + $0x110] sm:$0xff] }
 0x2d4   : > { %v2440_v54 = vmul.f32 0.5, %v9615_v51  ;;  %v9617_v46 = vpop.eup %9616  ;;  %v2036_v51 = vmul.f32 0.5, %v11483_v52  ;;  %9628 = vtanh.f32 %v2038_v3  ;;  %v6981_v52 = vld [vmem:[%s16979_s11 + $0x210] sm:$0xff]  ;;  %6063 = vperm.xlu2 %9544, %v6037_v56   ;;  %v11735_v3 = vadd.f32 %v799_v35, %v11633_v39  ;;  %8947 = vmatmul.msk.f32.gmra.mxu1 %vm1063_vm2, %v11619_v4 }
 0x2d5   : > { %8854 = vmatmul.msk.f32.gmra.mxu0 %vm1063_vm2, %v11691_v5  ;;  %v9619_v1 = vpop.eup %9618  ;;  %v2434_v30 = vmul.f32 0.5, %v9617_v46  ;;  %v2628_v46 = vadd.f32 0.5, %v2436_v38  ;;  %v2032_v38 = vmul.f32 0.5, %v11442_v31  ;;  %v10401_v35 = vld [vmem:[%s16974_s6 + $0x10] sm:$0xff] }
 0x2d6   : > { %v2632_v34 = vadd.f32 0.5, %v2440_v54  ;;  %v9621_v19 = vpop.eup %9620  ;;  %v2432_v0 = vmul.f32 0.5, %v9619_v1  ;;  %9630 = vtanh.f32 %v2036_v51  ;;  %17094 = vst [vmem:[#allocation15_spill] sm:$0xff] %v11735_v3  ;;  %2778 = vmatmul.f32.gmra.mxu3 %v11735_v3  ;;  %v2028_v51 = vmul.f32 0.5, %v11401_v9  ;;  %v7936_v9 = vld [vmem:[%s16979_s11 + $0x368] sm:$0xff] }
 0x2d7   : > { %v9623_v49 = vpop.eup %9622  ;;  %v2430_v1 = vmul.f32 0.5, %v9621_v19  ;;  %v2626_v41 = vadd.f32 0.5, %v2434_v30  ;;  %9632 = vtanh.f32 %v2034_v16  ;;  %v11744_v47 = vmul.f32 %v10401_v35, %v11676_v59 }
 0x2d8   : > { %2788 = vmatpush.msrb.mxu2 %v2632_v34  ;;  %v9625_v54 = vpop.eup %9624  ;;  %7007 = vperm.xlu1 %9543, %v6981_v52   ;;  %v2428_v61 = vmul.f32 0.5, %v9623_v49  ;;  %v2624_v34 = vadd.f32 0.5, %v2432_v0  ;;  %9634 = vtanh.f32 %v2032_v38  ;;  %v2026_v52 = vmul.f32 0.5, %v11373_v32 }
 0x2d9   : > { %v2426_v30 = vmul.f32 0.5, %v9625_v54  ;;  %v2622_v31 = vadd.f32 0.5, %v2430_v1  ;;  %9636 = vtanh.f32 %v2030_v8  ;;  %v6989_v1 = vld [vmem:[%s16979_s11 + $0x250] sm:$0xff] }
 0x2da   : > { %v11720_v26 = vpop.f32.mrf.mxu0  ;;  %2789 = vmatpush.msrb.mxu2 %v2630_v2  ;;  %v9627_v2 = vpop.eup %9626  ;;  %v2620_v16 = vadd.f32 0.5, %v2428_v61  ;;  %9638 = vtanh.f32 %v2028_v51 }
 0x2db   : > { %v9629_v19 = vpop.eup %9628  ;;  %v11746_v0 = vpop.f32.mrf.mxu1  ;;  %v2424_v14 = vmul.f32 0.5, %v9627_v2  ;;  %v2618_v54 = vadd.f32 0.5, %v2426_v30  ;;  %9640 = vtanh.f32 %v2026_v52  ;;  %v7454_v52 = vld [vmem:[%s16979_s11 + $0x298] sm:$0xff] }
 0x2dc   : > { %2790 = vmatpush.msrb.mxu2 %v2628_v46  ;;  %v802_v46 = vpop.f32.mrf.mxu3  ;;  %v9631_v56 = vpop.eup %9630  ;;  %8002 = vperm.xlu2 %9544, %v7936_v9  }
 0x2dd   : > { %8855 = vmatmul.msk.f32.gmra.mxu0 %vm1063_vm2, %v11716_v62  ;;  %v9633_v38 = vpop.eup %9632  ;;  %v11762_v32 = vadd.f32 %v802_v46, %v11653_v53  ;;  %v2420_v61 = vmul.f32 0.5, %v9631_v56  ;;  %v6043_v56 = vld [vmem:[%s16979_s11 + $0x140] sm:$0xff]  ;;  %8948 = vmatmul.msk.f32.gmra.mxu1 %vm1063_vm2, %v11640_v11 }
 0x2de   : > { %2791 = vmatpush.msrb.mxu2 %v2626_v41  ;;  %v2422_v41 = vmul.f32 0.5, %v9629_v19  ;;  %v9635_v2 = vpop.eup %9634  ;;  %v2418_v13 = vmul.f32 0.5, %v9633_v38 }
 0x2df   : > { %17095 = vst [vmem:[#allocation36_spill] sm:$0xff] %v11762_v32  ;;  %2781 = vmatmul.f32.gmra.mxu3 %v11762_v32  ;;  %v9637_v30 = vpop.eup %9636  ;;  %v2416_v35 = vmul.f32 0.5, %v9635_v2 }
 0x2e0   : > { %2792 = vmatpush.msrb.mxu2 %v2624_v34  ;;  %7047 = vperm.xlu1 %9543, %v6989_v1   ;;  %v2616_v34 = vadd.f32 0.5, %v2424_v14  ;;  %v2614_v8 = vadd.f32 0.5, %v2422_v41  ;;  %v2612_v14 = vadd.f32 0.5, %v2420_v61  ;;  %v2414_v9 = vmul.f32 0.5, %v9637_v30 }
 0x2e1   : > { %v2610_v41 = vadd.f32 0.5, %v2418_v13  ;;  %v10403_v13 = vld [vmem:[%s16974_s6 + $0x20] sm:$0xff] }
 0x2e2   : > { %v11748_v49 = vpop.f32.mrf.mxu0  ;;  %2793 = vmatpush.msrb.mxu2 %v2622_v31  ;;  %v10402_v31 = vld [vmem:[%s16974_s6 + $0x18] sm:$0xff]  ;;  %v2606_v18 = vadd.f32 0.5, %v2414_v9 }
 0x2e3   : > { %v11769_v19 = vmul.f32 %v10402_v31, %v11676_v59  ;;  %v11771_v51 = vpop.f32.mrf.mxu1 }
 0x2e4   : > { %2794 = vmatpush.msrb.mxu2 %v2620_v16  ;;  %v9639_v16 = vpop.eup %9638  ;;  %v805_v1 = vpop.f32.mrf.mxu3  ;;  %6093 = vperm.xlu2 %9544, %v6043_v56  }
 0x2e5   : > { %8856 = vmatmul.msk.f32.gmra.mxu0 %vm1063_vm2, %v11744_v47  ;;  %v11786_v38 = vadd.f32 %v805_v1, %v11680_v29  ;;  %v2412_v61 = vmul.f32 0.5, %v9639_v16  ;;  %v7462_v16 = vld [vmem:[%s16979_s11 + $0x2d8] sm:$0xff]  ;;  %v10404_v1 = vld [vmem:[%s16974_s6 + $0x28] sm:$0xff]  ;;  %8949 = vmatmul.msk.f32.gmra.mxu1 %vm1063_vm2, %v11662_v21 }
 0x2e6   : > { %2795 = vmatpush.msrb.mxu2 %v2618_v54  ;;  %v9641_v54 = vpop.eup %9640  ;;  %v11818_v20 = vmul.f32 %v10404_v1, %v11676_v59 }
 0x2e7   : > { %17096 = vst [vmem:[#allocation37_spill] sm:$0xff] %v11786_v38  ;;  %2784 = vmatmul.f32.gmra.mxu3 %v11786_v38  ;;  %v2410_v2 = vmul.f32 0.5, %v9641_v54 }
 0x2e8   : > { %2796 = vmatpush.msrb.mxu2 %v2616_v34  ;;  %7484 = vperm.xlu1 %9543, %v7454_v52   ;;  %v2608_v34 = vadd.f32 0.5, %v2416_v35  ;;  %v6046_v35 = vld [vmem:[%s16979_s11 + $0x158] sm:$0xff]  ;;  %v17097_v52 = vld [vmem:[#allocation2_spill] sm:$0xff] }
 0x2e9   : > { %v2602_v56 = vadd.f32 0.5, %v2410_v2  ;;  %v11809_v9 = vadd.f32 %v17097_v52, %v11387_v40  ;;  %v17099_v2 = vld [vmem:[#allocation3_spill] sm:$0xff]  ;;  %v17101_v52 = vld [vmem:[#allocation4_spill] sm:$0xff] }
 0x2ea   : > { %v11773_v46 = vpop.f32.mrf.mxu0  ;;  %2797 = vmatpush.msrb.mxu2 %v2614_v8  ;;  %v11793_v8 = vmul.f32 %v10403_v13, %v11676_v59  ;;  %v10405_v13 = vld [vmem:[%s16974_s6 + $0x30] sm:$0xff]  ;;  %v11861_v1 = vadd.f32 %v17101_v52, %v11653_v53 }
 0x2eb   : > { %v11795_v30 = vpop.f32.mrf.mxu1  ;;  %17098 = vst [vmem:[#allocation2_spill] sm:$0xff] %v11809_v9 }
 0x2ec   : > { %2798 = vmatpush.msrb.mxu2 %v2612_v14  ;;  %v2604_v14 = vadd.f32 0.5, %v2412_v61  ;;  %6108 = vperm.xlu2 %9544, %v6046_v35   ;;  %v6515_v61 = vld [vmem:[%s16979_s11 + $0x1c0] sm:$0xff]  ;;  %17102 = vst [vmem:[#allocation4_spill] sm:$0xff] %v11861_v1 }
 0x2ed   : > { %8857 = vmatmul.msk.f32.gmra.mxu0 %vm1063_vm2, %v11769_v19  ;;  %8950 = vmatmul.msk.f32.gmra.mxu1 %vm1063_vm2, %v11691_v5  ;;  %v7926_v5 = vld [vmem:[%s16979_s11 + $0x318] sm:$0xff] }
 0x2ee   : > { %2799 = vmatpush.msrb.mxu2 %v2610_v41 }
 0x2f0   : > { %2800 = vmatpush.msrb.mxu2 %v2608_v34  ;;  %7524 = vperm.xlu1 %9543, %v7462_v16   ;;  %v7934_v34 = vld [vmem:[%s16979_s11 + $0x358] sm:$0xff] }
 0x2f1   : > { %v6518_v16 = vld [vmem:[%s16979_s11 + $0x1d8] sm:$0xff] }
 0x2f2   : > { %v11797_v31 = vpop.f32.mrf.mxu0  ;;  %2801 = vmatpush.msrb.mxu2 %v2606_v18  ;;  %v11836_v18 = vadd.f32 %v17099_v2, %v11633_v39 }
 0x2f3   : > { %v11820_v41 = vpop.f32.mrf.mxu1 }
 0x2f4   : > { %2802 = vmatpush.msrb.mxu2 %v2604_v14  ;;  %6565 = vperm.xlu2 %9544, %v6515_v61   ;;  %17100 = vst [vmem:[#allocation3_spill] sm:$0xff] %v11836_v18  ;;  %v11843_v14 = vmul.f32 %v10405_v13, %v11676_v59  ;;  %v10406_v61 = vld [vmem:[%s16974_s6 + $0x38] sm:$0xff]  ;;  %v7453_v13 = vld [vmem:[%s16979_s11 + $0x290] sm:$0xff] }
 0x2f5   : > { %8858 = vmatmul.msk.f32.gmra.mxu0 %vm1063_vm2, %v11793_v8  ;;  %8951 = vmatmul.msk.f32.gmra.mxu1 %vm1063_vm2, %v11716_v62  ;;  %v8367_v62 = vld [vmem:[%s16979_s11 + $0x70] sm:$0xff] }
 0x2f6   : > { %2803 = vmatpush.msrb.mxu2 %v2602_v56  ;;  %v6988_v56 = vld [vmem:[%s16979_s11 + $0x248] sm:$0xff] }
 0x2f7   : > { %2804 = vmatmul.f32.vlgmr.msrb.gmra.mxu2 %v11809_v9 }
 0x2f8   : > { %7992 = vperm.xlu1 %9543, %v7934_v34   ;;  %v11868_v34 = vmul.f32 %v10406_v61, %v11676_v59  ;;  %v10407_v61 = vld [vmem:[%s16974_s6 + $0x40] sm:$0xff] }
 0x2f9   : > { %v11893_v38 = vmul.f32 %v10407_v61, %v11676_v59 }
 0x2fa   : > { %v11822_v54 = vpop.f32.mrf.mxu0 }
 0x2fb   : > { %v11845_v35 = vpop.f32.mrf.mxu1 }
 0x2fc   : > { %6580 = vperm.xlu2 %9544, %v6518_v16   ;;  %v7931_v16 = vld [vmem:[%s16979_s11 + $0x340] sm:$0xff] }
 0x2fd   : > { %8859 = vmatmul.msk.f32.gmra.mxu0 %vm1063_vm2, %v11818_v20  ;;  %8952 = vmatmul.msk.f32.gmra.mxu1 %vm1063_vm2, %v11744_v47 }
 0x2ff   : > { %2807 = vmatmul.f32.gmra.mxu2 %v11836_v18 }
 0x300   : > { %7042 = vperm.xlu1 %9543, %v6988_v56   ;;  %v17103_v56 = vld [vmem:[#allocation5_spill] sm:$0xff] }
 0x301   : > { %v11886_v52 = vadd.f32 %v17103_v56, %v11680_v29  ;;  %v10408_v56 = vld [vmem:[%s16974_s6 + $0x48] sm:$0xff] }
 0x302   : > { %v11847_v4 = vpop.f32.mrf.mxu0  ;;  %v11913_v61 = vmul.f32 %v10408_v56, %v11676_v59 }
 0x303   : > { %v11870_v2 = vpop.f32.mrf.mxu1  ;;  %17104 = vst [vmem:[#allocation5_spill] sm:$0xff] %v11886_v52 }
 0x304   : > { %7479 = vperm.xlu2 %9544, %v7453_v13   ;;  %v7461_v13 = vld [vmem:[%s16979_s11 + $0x2d0] sm:$0xff] }
 0x305   : > { %8860 = vmatmul.msk.f32.gmra.mxu0 %vm1063_vm2, %v11843_v14  ;;  %8953 = vmatmul.msk.f32.gmra.mxu1 %vm1063_vm2, %v11769_v19 }
 0x307   : > { %2810 = vmatmul.f32.gmra.mxu2 %v11861_v1 }
 0x308   : > { %7977 = vperm.xlu1 %9543, %v7931_v16   ;;  %v8363_v16 = vld [vmem:[%s16979_s11 + $0x50] sm:$0xff] }
 0x30a   : > { %v11872_v11 = vpop.f32.mrf.mxu0 }
 0x30b   : > { %v11895_v32 = vpop.f32.mrf.mxu1 }
 0x30c   : > { %17105 = vst [vmem:[#allocation38_spill] sm:$0xff] %v11895_v32  ;;  %7519 = vperm.xlu2 %9544, %v7461_v13   ;;  %v8365_v13 = vld [vmem:[%s16979_s11 + $0x60] sm:$0xff] }
 0x30d   : > { %8861 = vmatmul.msk.f32.gmra.mxu0 %vm1063_vm2, %v11868_v34  ;;  %8954 = vmatmul.msk.f32.gmra.mxu1 %vm1063_vm2, %v11793_v8  ;;  %v10413_v8 = vld [vmem:[%s16974_s6 + $0x70] sm:$0xff] }
 0x30f   : > { %2813 = vmatmul.f32.gmra.mxu2 %v11886_v52  ;;  %v8366_v52 = vld [vmem:[%s16979_s11 + $0x68] sm:$0xff] }
 0x310   : > { %8371 = vperm.xlu1 %9543, %v8363_v16   ;;  %v10409_v16 = vld [vmem:[%s16974_s6 + $0x50] sm:$0xff] }
 0x311   : > { %v11933_v56 = vmul.f32 %v10409_v16, %v11676_v59 }
 0x312   : > { %v11897_v21 = vpop.f32.mrf.mxu0 }
 0x313   : > { %v11915_v32 = vpop.f32.mrf.mxu1 }
 0x314   : > { %17106 = vst [vmem:[#allocation39_spill] sm:$0xff] %v11915_v32  ;;  %7956 = vperm.xlu2 %9544, %v7926_v5   ;;  %v10410_v5 = vld [vmem:[%s16974_s6 + $0x58] sm:$0xff] }
 0x315   : > { %8862 = vmatmul.msk.f32.gmra.mxu0 %vm1063_vm2, %v11893_v38  ;;  %8955 = vmatmul.msk.f32.gmra.mxu1 %vm1063_vm2, %v11818_v20 }
 0x318   : > { %8381 = vperm.xlu1 %9543, %v8365_v13   ;;  %v11951_v13 = vmul.f32 %v10410_v5, %v11676_v59 }
 0x31a   : > { %v11917_v3 = vpop.f32.mrf.mxu0 }
 0x31b   : > { %v11935_v32 = vpop.f32.mrf.mxu1 }
 0x31c   : > { %17107 = vst [vmem:[#allocation40_spill] sm:$0xff] %v11935_v32  ;;  %6570 = vperm.xlu2 %9544, %v6516_v45   ;;  %v10411_v45 = vld [vmem:[%s16974_s6 + $0x60] sm:$0xff] }
 0x31d   : > { %8863 = vmatmul.msk.f32.gmra.mxu0 %vm1063_vm2, %v11913_v61  ;;  %v11966_v47 = vmul.f32 %v10411_v45, %v11676_v59  ;;  %8956 = vmatmul.msk.f32.gmra.mxu1 %vm1063_vm2, %v11843_v14  ;;  %v8368_v14 = vld [vmem:[%s16979_s11 + $0x78] sm:$0xff] }
 0x320   : > { %8391 = vperm.xlu1 %9543, %v8367_v62  }
 0x322   : > { %v1543_v7 = vpop.f32.mrf.mxu0 }
 0x323   : > { %v11953_v16 = vpop.f32.mrf.mxu1 }
 0x324   : > { %17108 = vst [vmem:[#allocation41_spill] sm:$0xff] %v11953_v16  ;;  %7509 = vperm.xlu2 %9544, %v7459_v28   ;;  %v7932_v16 = vld [vmem:[%s16979_s11 + $0x348] sm:$0xff] }
 0x325   : > { %8864 = vmatmul.msk.f32.gmra.mxu0 %vm1063_vm2, %v11933_v56  ;;  %v10412_v28 = vld [vmem:[%s16974_s6 + $0x68] sm:$0xff]  ;;  %8957 = vmatmul.msk.f32.gmra.mxu1 %vm1063_vm2, %v11868_v34 }
 0x326   : > { %v11981_v19 = vmul.f32 %v10412_v28, %v11676_v59 }
 0x32a   : > { %v1546_v32 = vpop.f32.mrf.mxu0 }
 0x32b   : > { %v11968_v62 = vpop.f32.mrf.mxu1 }
 0x32c   : > { %17109 = vst [vmem:[#allocation42_spill] sm:$0xff] %v11968_v62  ;;  %7982 = vperm.xlu2 %9544, %v7932_v16   ;;  %v11996_v16 = vmul.f32 %v10413_v8, %v11676_v59  ;;  %v10414_v8 = vld [vmem:[%s16974_s6 + $0x78] sm:$0xff] }
 0x32d   : > { %8865 = vmatmul.msk.f32.gmra.mxu0 %vm1063_vm2, %v11951_v13  ;;  %8958 = vmatmul.msk.f32.gmra.mxu1 %vm1063_vm2, %v11893_v38  ;;  %v2068_v38 = vmul.f32 0.5, %v11822_v54 }
 0x332   : > { %v1549_v5 = vpop.f32.mrf.mxu0 }
 0x333   : > { %v11983_v45 = vpop.f32.mrf.mxu1  ;;  %v2082_v9 = vmul.f32 0.5, %v1549_v5  ;;  %v2076_v5 = vmul.f32 0.5, %v11917_v3 }
 0x334   : > { %17110 = vst [vmem:[#allocation43_spill] sm:$0xff] %v11983_v45  ;;  %8376 = vperm.xlu2 %9544, %v8364_v36  }
 0x335   : > { %8866 = vmatmul.msk.f32.gmra.mxu0 %vm1063_vm2, %v11966_v47  ;;  %8959 = vmatmul.msk.f32.gmra.mxu1 %vm1063_vm2, %v11913_v61 }
 0x33a   : > { %v1552_v62 = vpop.f32.mrf.mxu0 }
 0x33b   : > { %v11998_v28 = vpop.f32.mrf.mxu1  ;;  %v2084_v20 = vmul.f32 0.5, %v1552_v62  ;;  %v2078_v62 = vmul.f32 0.5, %v1543_v7  ;;  %v2074_v7 = vmul.f32 0.5, %v11897_v21 }
 0x33c   : > { %17111 = vst [vmem:[#allocation44_spill] sm:$0xff] %v11998_v28  ;;  %8386 = vperm.xlu2 %9544, %v8366_v52   ;;  %v12011_v28 = vmul.f32 %v10414_v8, %v11676_v59  ;;  %v2080_v52 = vmul.f32 0.5, %v1546_v32 }
 0x33d   : > { %8867 = vmatmul.msk.f32.gmra.mxu0 %vm1063_vm2, %v11981_v19  ;;  %8960 = vmatmul.msk.f32.gmra.mxu1 %vm1063_vm2, %v11933_v56  ;;  %v10418_v56 = vld [vmem:[%s16974_s6 + $0x98] sm:$0xff] }
 0x342   : > { %v1555_v45 = vpop.f32.mrf.mxu0 }
 0x343   : > { %v2086_v36 = vmul.f32 0.5, %v1555_v45  ;;  %v12013_v1 = vpop.f32.mrf.mxu1 }
 0x344   : > { %17112 = vst [vmem:[#allocation45_spill] sm:$0xff] %v12013_v1  ;;  %8396 = vperm.xlu2 %9544, %v8368_v14   ;;  %v2072_v14 = vmul.f32 0.5, %v11872_v11  ;;  %v10416_v11 = vld [vmem:[%s16974_s6 + $0x88] sm:$0xff] }
 0x345   : > { %8868 = vmatmul.msk.f32.gmra.mxu0 %vm1063_vm2, %v11996_v16  ;;  %9642 = vtanh.f32 %v2086_v36  ;;  %8961 = vmatmul.msk.f32.gmra.mxu1 %vm1063_vm2, %v11951_v13 }
 0x346   : > { %9644 = vtanh.f32 %v2084_v20 }
 0x34a   : > { %v1558_v18 = vpop.f32.mrf.mxu0 }
 0x34b   : > { %v2088_v57 = vmul.f32 0.5, %v1558_v18  ;;  %v9643_v45 = vpop.eup %9642  ;;  %v10415_v18 = vld [vmem:[%s16974_s6 + $0x80] sm:$0xff]  ;;  %v12029_v34 = vpop.f32.mrf.mxu1 }
 0x34c   : > { %v12027_v36 = vmul.f32 %v10415_v18, %v11676_v59  ;;  %17113 = vst [vmem:[#allocation46_spill] sm:$0xff] %v12029_v34  ;;  %v9645_v32 = vpop.eup %9644  ;;  %v2470_v3 = vmul.f32 0.5, %v9643_v45  ;;  %v2070_v34 = vmul.f32 0.5, %v11847_v4  ;;  %v12045_v45 = vmul.f32 %v10416_v11, %v11676_v59 }
 0x34d   : > { %9646 = vtanh.f32 %v2088_v57  ;;  %8869 = vmatmul.msk.f32.gmra.mxu0 %vm1063_vm2, %v12011_v28  ;;  %8962 = vmatmul.msk.f32.gmra.mxu1 %vm1063_vm2, %v11966_v47 }
 0x34e   : > { %9648 = vtanh.f32 %v2082_v9 }
 0x34f   : > { %9650 = vtanh.f32 %v2080_v52  ;;  %v2468_v52 = vmul.f32 0.5, %v9645_v32 }
 0x350   : > { %9652 = vtanh.f32 %v2078_v62  ;;  %v2662_v62 = vadd.f32 0.5, %v2470_v3  ;;  %v2066_v3 = vmul.f32 0.5, %v11797_v31  ;;  %v2062_v31 = vmul.f32 0.5, %v11748_v49 }
 0x351   : > { %9654 = vtanh.f32 %v2076_v5  ;;  %v2660_v4 = vadd.f32 0.5, %v2468_v52 }
 0x352   : > { %v12031_v57 = vpop.f32.mrf.mxu0  ;;  %9656 = vtanh.f32 %v2074_v7 }
 0x353   : > { %v9647_v20 = vpop.eup %9646  ;;  %9658 = vtanh.f32 %v2072_v14  ;;  %v12047_v5 = vpop.f32.mrf.mxu1  ;;  %v2064_v14 = vmul.f32 0.5, %v11773_v46  ;;  %v10417_v46 = vld [vmem:[%s16974_s6 + $0x90] sm:$0xff] }
 0x354   : > { %v2472_v9 = vmul.f32 0.5, %v9647_v20  ;;  %v9649_v8 = vpop.eup %9648  ;;  %17114 = vst [vmem:[#allocation47_spill] sm:$0xff] %v12047_v5  ;;  %9660 = vtanh.f32 %v2070_v34 }
 0x355   : > { %8870 = vmatmul.msk.f32.gmra.mxu0 %vm1063_vm2, %v12027_v36  ;;  %v9651_v1 = vpop.eup %9650  ;;  %v2466_v21 = vmul.f32 0.5, %v9649_v8  ;;  %9662 = vtanh.f32 %v2068_v38  ;;  %8963 = vmatmul.msk.f32.gmra.mxu1 %vm1063_vm2, %v11981_v19  ;;  %v10422_v19 = vld [vmem:[%s16974_s6 + $0xb8] sm:$0xff] }
 0x356   : > { %v2664_v18 = vadd.f32 0.5, %v2472_v9  ;;  %v9653_v15 = vpop.eup %9652  ;;  %v2464_v32 = vmul.f32 0.5, %v9651_v1  ;;  %9664 = vtanh.f32 %v2066_v3 }
 0x357   : > { %v9655_v7 = vpop.eup %9654  ;;  %v2462_v54 = vmul.f32 0.5, %v9653_v15  ;;  %v2658_v9 = vadd.f32 0.5, %v2466_v21  ;;  %v2060_v21 = vmul.f32 0.5, %v11720_v26  ;;  %9666 = vtanh.f32 %v2064_v14 }
 0x358   : > { %2817 = vmatpush.msra.mxu3 %v2664_v18  ;;  %v9657_v8 = vpop.eup %9656  ;;  %v2460_v1 = vmul.f32 0.5, %v9655_v7  ;;  %v2656_v52 = vadd.f32 0.5, %v2464_v32  ;;  %v2058_v7 = vmul.f32 0.5, %v11696_v43  ;;  %9668 = vtanh.f32 %v2062_v31 }
 0x359   : > { %v9659_v18 = vpop.eup %9658  ;;  %v2458_v34 = vmul.f32 0.5, %v9657_v8  ;;  %v2654_v61 = vadd.f32 0.5, %v2462_v54  ;;  %9670 = vtanh.f32 %v2060_v21 }
 0x35a   : > { %v12049_v20 = vpop.f32.mrf.mxu0  ;;  %2818 = vmatpush.msra.mxu3 %v2662_v62  ;;  %v9661_v15 = vpop.eup %9660  ;;  %v12063_v62 = vmul.f32 %v10417_v46, %v11676_v59  ;;  %v2456_v11 = vmul.f32 0.5, %v9659_v18  ;;  %v2652_v49 = vadd.f32 0.5, %v2460_v1  ;;  %9672 = vtanh.f32 %v2058_v7 }
 0x35b   : > { %v12065_v38 = vpop.f32.mrf.mxu1  ;;  %v2454_v26 = vmul.f32 0.5, %v9661_v15  ;;  %v2650_v3 = vadd.f32 0.5, %v2458_v34  ;;  %v12078_v18 = vmul.f32 %v10418_v56, %v11676_v59  ;;  %v857_v56 = vpop.f32.mrf.mxu2 }
 0x35c   : > { %2819 = vmatpush.msra.mxu3 %v2660_v4  ;;  %17115 = vst [vmem:[#allocation48_spill] sm:$0xff] %v12065_v38  ;;  %v9663_v4 = vpop.eup %9662  ;;  %v2648_v8 = vadd.f32 0.5, %v2456_v11 }
 0x35d   : > { %8871 = vmatmul.msk.f32.gmra.mxu0 %vm1063_vm2, %v12045_v45  ;;  %v9665_v54 = vpop.eup %9664  ;;  %v2646_v43 = vadd.f32 0.5, %v2454_v26  ;;  %8964 = vmatmul.msk.f32.gmra.mxu1 %vm1063_vm2, %v11996_v16  ;;  %v10423_v16 = vld [vmem:[%s16974_s6 + $0xc0] sm:$0xff] }
 0x35e   : > { %2820 = vmatpush.msra.mxu3 %v2658_v9  ;;  %v2452_v9 = vmul.f32 0.5, %v9663_v4  ;;  %v9667_v14 = vpop.eup %9666  ;;  %v2450_v1 = vmul.f32 0.5, %v9665_v54  ;;  %v10419_v54 = vld [vmem:[%s16974_s6 + $0xa0] sm:$0xff] }
 0x35f   : > { %v2448_v34 = vmul.f32 0.5, %v9667_v14 }
 0x360   : > { %2821 = vmatpush.msra.mxu3 %v2656_v52  ;;  %v9669_v52 = vpop.eup %9668  ;;  %v2644_v15 = vadd.f32 0.5, %v2452_v9  ;;  %v2642_v11 = vadd.f32 0.5, %v2450_v1  ;;  %v12092_v9 = vmul.f32 %v10419_v54, %v11676_v59  ;;  %v1046_v54 = vmul.f32 %v10422_v19, %v11676_v59 }
 0x361   : > { %v9671_v21 = vpop.eup %9670  ;;  %v2446_v46 = vmul.f32 0.5, %v9669_v52  ;;  %v2640_v7 = vadd.f32 0.5, %v2448_v34  ;;  %v10420_v34 = vld [vmem:[%s16974_s6 + $0xa8] sm:$0xff] }
 0x362   : > { %v12067_v32 = vpop.f32.mrf.mxu0  ;;  %2822 = vmatpush.msra.mxu3 %v2654_v61  ;;  %v2444_v4 = vmul.f32 0.5, %v9671_v21 }
 0x363   : > { %v12080_v31 = vpop.f32.mrf.mxu1 }
 0x364   : > { %2823 = vmatpush.msra.mxu3 %v2652_v49  ;;  %17116 = vst [vmem:[#allocation49_spill] sm:$0xff] %v12080_v31  ;;  %v9673_v49 = vpop.eup %9672  ;;  %v2636_v14 = vadd.f32 0.5, %v2444_v4 }
 0x365   : > { %8872 = vmatmul.msk.f32.gmra.mxu0 %vm1063_vm2, %v12063_v62  ;;  %v2442_v26 = vmul.f32 0.5, %v9673_v49  ;;  %v10421_v49 = vld [vmem:[%s16974_s6 + $0xb0] sm:$0xff]  ;;  %8965 = vmatmul.msk.f32.gmra.mxu1 %vm1063_vm2, %v12011_v28  ;;  %v10424_v28 = vld [vmem:[%s16974_s6 + $0xc8] sm:$0xff] }
 0x366   : > { %2824 = vmatpush.msra.mxu3 %v2650_v3  ;;  %v2638_v3 = vadd.f32 0.5, %v2446_v46  ;;  %v12116_v46 = vadd.f32 %v857_v56, %v11633_v39  ;;  %v1045_v4 = vmul.f32 %v10421_v49, %v11676_v59  ;;  %v12168_v19 = vmul.f32 %v10424_v28, %v11676_v59 }
 0x367   : > { %v2634_v1 = vadd.f32 0.5, %v2442_v26 }
 0x368   : > { %2825 = vmatpush.msra.mxu3 %v2648_v8  ;;  %17121 = vst [vmem:[#allocation52_spill] sm:$0xff] %v12116_v46 }
 0x36a   : > { %v12082_v61 = vpop.f32.mrf.mxu0  ;;  %2826 = vmatpush.msra.mxu3 %v2646_v43  ;;  %v17118_v43 = vld [vmem:[#allocation6_spill] sm:$0xff] }
 0x36b   : > { %v12094_v13 = vpop.f32.mrf.mxu1  ;;  %v12102_v52 = vadd.f32 %v17118_v43, %v11387_v40 }
 0x36c   : > { %2827 = vmatpush.msra.mxu3 %v2644_v15  ;;  %17117 = vst [vmem:[#allocation50_spill] sm:$0xff] %v12094_v13  ;;  %v1044_v15 = vmul.f32 %v10420_v34, %v11676_v59  ;;  %v12156_v34 = vmul.f32 %v10423_v16, %v11676_v59 }
 0x36d   : > { %8873 = vmatmul.msk.f32.gmra.mxu0 %vm1063_vm2, %v12078_v18  ;;  %17119 = vst [vmem:[#allocation6_spill] sm:$0xff] %v12102_v52  ;;  %8966 = vmatmul.msk.f32.gmra.mxu1 %vm1063_vm2, %v12027_v36  ;;  %v10425_v36 = vld [vmem:[%s16974_s6 + $0xd0] sm:$0xff] }
 0x36e   : > { %2828 = vmatpush.msra.mxu3 %v2642_v11  ;;  %v860_v11 = vpop.f32.mrf.mxu2 }
 0x370   : > { %2829 = vmatpush.msra.mxu3 %v2640_v7 }
 0x372   : > { %v12096_v8 = vpop.f32.mrf.mxu0  ;;  %2830 = vmatpush.msra.mxu3 %v2638_v3  ;;  %v12131_v3 = vadd.f32 %v860_v11, %v11653_v53 }
 0x373   : > { %v12111_v47 = vpop.f32.mrf.mxu1 }
 0x374   : > { %2831 = vmatpush.msra.mxu3 %v2636_v14  ;;  %17120 = vst [vmem:[#allocation51_spill] sm:$0xff] %v12111_v47 }
 0x375   : > { %8874 = vmatmul.msk.f32.gmra.mxu0 %vm1063_vm2, %v12092_v9  ;;  %17123 = vst [vmem:[#allocation54_spill] sm:$0xff] %v12131_v3  ;;  %8967 = vmatmul.msk.f32.gmra.mxu1 %vm1063_vm2, %v12045_v45  ;;  %v10426_v45 = vld [vmem:[%s16974_s6 + $0xd8] sm:$0xff] }
 0x376   : > { %2832 = vmatpush.msra.mxu3 %v2634_v1  ;;  %v863_v1 = vpop.f32.mrf.mxu2 }
 0x377   : > { %2833 = vmatmul.f32.vlgmr.msra.gmra.mxu3 %v12102_v52  ;;  %v12146_v56 = vadd.f32 %v863_v1, %v11680_v29 }
 0x379   : > { %17125 = vst [vmem:[#allocation56_spill] sm:$0xff] %v12146_v56 }
 0x37a   : > { %v12113_v21 = vpop.f32.mrf.mxu0 }
 0x37b   : > { %v12126_v7 = vpop.f32.mrf.mxu1 }
 0x37c   : > { %17122 = vst [vmem:[#allocation53_spill] sm:$0xff] %v12126_v7 }
 0x37d   : > { %8875 = vmatmul.msk.f32.gmra.mxu0 %vm1063_vm2, %v1044_v15  ;;  %8968 = vmatmul.msk.f32.gmra.mxu1 %vm1063_vm2, %v12063_v62  ;;  %v10427_v62 = vld [vmem:[%s16974_s6 + $0xe0] sm:$0xff] }
 0x37e   : > { %v12204_v5 = vmul.f32 %v10427_v62, %v11676_v59 }
 0x37f   : > { %2836 = vmatmul.f32.gmra.mxu3 %v12116_v46  ;;  %v12192_v46 = vmul.f32 %v10426_v45, %v11676_v59 }
 0x382   : > { %v12128_v26 = vpop.f32.mrf.mxu0 }
 0x383   : > { %v12141_v14 = vpop.f32.mrf.mxu1 }
 0x384   : > { %17124 = vst [vmem:[#allocation55_spill] sm:$0xff] %v12141_v14 }
 0x385   : > { %8876 = vmatmul.msk.f32.gmra.mxu0 %vm1063_vm2, %v1045_v4  ;;  %8969 = vmatmul.msk.f32.gmra.mxu1 %vm1063_vm2, %v12078_v18  ;;  %v10428_v18 = vld [vmem:[%s16974_s6 + $0xe8] sm:$0xff] }
 0x386   : > { %v12216_v31 = vmul.f32 %v10428_v18, %v11676_v59 }
 0x387   : > { %2839 = vmatmul.f32.gmra.mxu3 %v12131_v3 }
 0x38a   : > { %v12143_v43 = vpop.f32.mrf.mxu0 }
 0x38b   : > { %v12158_v11 = vpop.f32.mrf.mxu1 }
 0x38c   : > { %17126 = vst [vmem:[#allocation57_spill] sm:$0xff] %v12158_v11  ;;  %v10430_v11 = vld [vmem:[%s16974_s6 + $0xf8] sm:$0xff] }
 0x38d   : > { %8877 = vmatmul.msk.f32.gmra.mxu0 %vm1063_vm2, %v1046_v54  ;;  %8970 = vmatmul.msk.f32.gmra.mxu1 %vm1063_vm2, %v12092_v9  ;;  %v10429_v9 = vld [vmem:[%s16974_s6 + $0xf0] sm:$0xff] }
 0x38e   : > { %v12227_v47 = vmul.f32 %v10429_v9, %v11676_v59 }
 0x38f   : > { %2842 = vmatmul.f32.gmra.mxu3 %v12146_v56  ;;  %v12180_v56 = vmul.f32 %v10425_v36, %v11676_v59 }
 0x392   : > { %v1585_v49 = vpop.f32.mrf.mxu0 }
 0x393   : > { %v12170_v1 = vpop.f32.mrf.mxu1 }
 0x394   : > { %17127 = vst [vmem:[#allocation58_spill] sm:$0xff] %v12170_v1  ;;  %v12238_v1 = vmul.f32 %v10430_v11, %v11676_v59 }
 0x395   : > { %8878 = vmatmul.msk.f32.gmra.mxu0 %vm1063_vm2, %v12156_v34  ;;  %8971 = vmatmul.msk.f32.gmra.mxu1 %vm1063_vm2, %v1044_v15 }
 0x39a   : > { %v1588_v16 = vpop.f32.mrf.mxu0 }
 0x39b   : > { %v12182_v3 = vpop.f32.mrf.mxu1 }
 0x39c   : > { %17128 = vst [vmem:[#allocation59_spill] sm:$0xff] %v12182_v3 }
 0x39d   : > { %8879 = vmatmul.msk.f32.gmra.mxu0 %vm1063_vm2, %v12168_v19  ;;  %8972 = vmatmul.msk.f32.gmra.mxu1 %vm1063_vm2, %v1045_v4 }
 0x3a2   : > { %v1591_v28 = vpop.f32.mrf.mxu0 }
 0x3a3   : > { %v12194_v52 = vpop.f32.mrf.mxu1 }
 0x3a4   : > { %17129 = vst [vmem:[#allocation60_spill] sm:$0xff] %v12194_v52 }
 0x3a5   : > { %8880 = vmatmul.msk.f32.gmra.mxu0 %vm1063_vm2, %v12180_v56  ;;  %8973 = vmatmul.msk.f32.gmra.mxu1 %vm1063_vm2, %v1046_v54 }
 0x3aa   : > { %v1594_v36 = vpop.f32.mrf.mxu0 }
 0x3ab   : > { %v12206_v38 = vpop.f32.mrf.mxu1  ;;  %v2112_v4 = vmul.f32 0.5, %v1594_v36 }
 0x3ac   : > { %17130 = vst [vmem:[#allocation61_spill] sm:$0xff] %v12206_v38 }
 0x3ad   : > { %8881 = vmatmul.msk.f32.gmra.mxu0 %vm1063_vm2, %v12192_v46  ;;  %8974 = vmatmul.msk.f32.gmra.mxu1 %vm1063_vm2, %v12156_v34 }
 0x3b2   : > { %v1597_v45 = vpop.f32.mrf.mxu0 }
 0x3b3   : > { %v12218_v13 = vpop.f32.mrf.mxu1  ;;  %v2114_v52 = vmul.f32 0.5, %v1597_v45 }
 0x3b4   : > { %17131 = vst [vmem:[#allocation62_spill] sm:$0xff] %v12218_v13  ;;  %v2108_v13 = vmul.f32 0.5, %v1588_v16 }
 0x3b5   : > { %8882 = vmatmul.msk.f32.gmra.mxu0 %vm1063_vm2, %v12204_v5  ;;  %8975 = vmatmul.msk.f32.gmra.mxu1 %vm1063_vm2, %v12168_v19  ;;  %v2092_v19 = vmul.f32 0.5, %v12049_v20  ;;  %v1993_v20 = vmul.f32 0.5, %v11244_v24 }
 0x3ba   : > { %v1600_v62 = vpop.f32.mrf.mxu0 }
 0x3bb   : > { %v12229_v7 = vpop.f32.mrf.mxu1  ;;  %v2116_v15 = vmul.f32 0.5, %v1600_v62 }
 0x3bc   : > { %17132 = vst [vmem:[#allocation63_spill] sm:$0xff] %v12229_v7 }
 0x3bd   : > { %8883 = vmatmul.msk.f32.gmra.mxu0 %vm1063_vm2, %v12216_v31  ;;  %8976 = vmatmul.msk.f32.gmra.mxu1 %vm1063_vm2, %v12180_v56  ;;  %v1989_v56 = vmul.f32 0.5, %v11224_v58  ;;  %v1985_v58 = vmul.f32 0.5, %v11205_v55 }
 0x3c2   : > { %v1603_v14 = vpop.f32.mrf.mxu0 }
 0x3c3   : > { %v2118_v18 = vmul.f32 0.5, %v1603_v14  ;;  %v12240_v3 = vpop.f32.mrf.mxu1  ;;  %v2110_v14 = vmul.f32 0.5, %v1591_v28  ;;  %v2104_v28 = vmul.f32 0.5, %v12143_v43 }
 0x3c5   : > { %8884 = vmatmul.msk.f32.gmra.mxu0 %vm1063_vm2, %v12227_v47  ;;  %9674 = vtanh.f32 %v2118_v18  ;;  %v2106_v18 = vmul.f32 0.5, %v1585_v49  ;;  %8977 = vmatmul.msk.f32.gmra.mxu1 %vm1063_vm2, %v12192_v46  ;;  %v1981_v46 = vmul.f32 0.5, %v11176_v50  ;;  %v17135_v50 = vld [vmem:[#allocation17_spill] sm:$0xff] }
 0x3c6   : > { %9676 = vtanh.f32 %v2116_v15 }
 0x3ca   : > { %v1606_v9 = vpop.f32.mrf.mxu0 }
 0x3cb   : > { %v2120_v38 = vmul.f32 0.5, %v1606_v9  ;;  %v9675_v62 = vpop.eup %9674  ;;  %v12245_v59 = vpop.f32.mrf.mxu1  ;;  %v2102_v9 = vmul.f32 0.5, %v12128_v26 }
 0x3cc   : > { %v9677_v11 = vpop.eup %9676 }
 0x3cd   : > { %9678 = vtanh.f32 %v2120_v38  ;;  %8885 = vmatmul.msk.f32.gmra.mxu0 %vm1063_vm2, %v12238_v1  ;;  %v2502_v38 = vmul.f32 0.5, %v9675_v62  ;;  %8978 = vmatmul.msk.f32.gmra.mxu1 %vm1063_vm2, %v12204_v5 }
 0x3ce   : > { %9680 = vtanh.f32 %v2114_v52  ;;  %v2500_v52 = vmul.f32 0.5, %v9677_v11  ;;  %v2098_v11 = vmul.f32 0.5, %v12096_v8 }
 0x3cf   : > { %9682 = vtanh.f32 %v2112_v4 }
 0x3d0   : > { %9684 = vtanh.f32 %v2110_v14  ;;  %v2100_v14 = vmul.f32 0.5, %v12113_v21  ;;  %v2096_v21 = vmul.f32 0.5, %v12082_v61 }
 0x3d1   : > { %9686 = vtanh.f32 %v2108_v13  ;;  %v2692_v13 = vadd.f32 0.5, %v2500_v52 }
 0x3d2   : > { %v12247_v7 = vpop.f32.mrf.mxu0  ;;  %9688 = vtanh.f32 %v2106_v18 }
 0x3d3   : > { %17133 = vst [vmem:[#allocation64_spill] sm:$0xff] %v12247_v7  ;;  %v9679_v45 = vpop.eup %9678  ;;  %v2694_v7 = vadd.f32 0.5, %v2502_v38  ;;  %9690 = vtanh.f32 %v2104_v28  ;;  %v12254_v34 = vpop.f32.mrf.mxu1 }
 0x3d4   : > { %v2504_v54 = vmul.f32 0.5, %v9679_v45  ;;  %v9681_v36 = vpop.eup %9680  ;;  %9692 = vtanh.f32 %v2102_v9 }
 0x3d5   : > { %v9683_v15 = vpop.eup %9682  ;;  %v2498_v4 = vmul.f32 0.5, %v9681_v36  ;;  %9694 = vtanh.f32 %v2100_v14  ;;  %v2090_v14 = vmul.f32 0.5, %v12031_v57  ;;  %8979 = vmatmul.msk.f32.gmra.mxu1 %vm1063_vm2, %v12216_v31 }
 0x3d6   : > { %v2696_v16 = vadd.f32 0.5, %v2504_v54  ;;  %v9685_v49 = vpop.eup %9684  ;;  %v2496_v62 = vmul.f32 0.5, %v9683_v15  ;;  %9696 = vtanh.f32 %v2098_v11 }
 0x3d7   : > { %v9687_v43 = vpop.eup %9686  ;;  %v2494_v26 = vmul.f32 0.5, %v9685_v49  ;;  %v2690_v18 = vadd.f32 0.5, %v2498_v4  ;;  %9698 = vtanh.f32 %v2096_v21 }
 0x3d8   : > { %2846 = vmatpush.msra.mxu2 %v2696_v16  ;;  %v9689_v38 = vpop.eup %9688  ;;  %v2492_v54 = vmul.f32 0.5, %v9687_v43  ;;  %v2688_v36 = vadd.f32 0.5, %v2496_v62 }
 0x3d9   : > { %v9691_v28 = vpop.eup %9690  ;;  %v2490_v52 = vmul.f32 0.5, %v9689_v38  ;;  %v2686_v8 = vadd.f32 0.5, %v2494_v26 }
 0x3da   : > { %v12256_v45 = vpop.f32.mrf.mxu0  ;;  %2847 = vmatpush.msra.mxu2 %v2694_v7  ;;  %v2094_v7 = vmul.f32 0.5, %v12067_v32  ;;  %v9693_v16 = vpop.eup %9692  ;;  %v2488_v9 = vmul.f32 0.5, %v9691_v28  ;;  %v2684_v61 = vadd.f32 0.5, %v2492_v54 }
 0x3db   : > { %v12264_v15 = vpop.f32.mrf.mxu1  ;;  %v9695_v49 = vpop.eup %9694  ;;  %v2486_v32 = vmul.f32 0.5, %v9693_v16  ;;  %v2682_v62 = vadd.f32 0.5, %v2490_v52  ;;  %v1987_v52 = vmul.f32 0.5, %v11215_v33 }
 0x3dc   : > { %2848 = vmatpush.msra.mxu2 %v2692_v13  ;;  %9700 = vtanh.f32 %v2094_v7  ;;  %v9697_v13 = vpop.eup %9696  ;;  %v2484_v43 = vmul.f32 0.5, %v9695_v49  ;;  %v2680_v11 = vadd.f32 0.5, %v2488_v9 }
 0x3dd   : > { %9702 = vtanh.f32 %v2092_v19  ;;  %v9699_v26 = vpop.eup %9698  ;;  %v2482_v38 = vmul.f32 0.5, %v9697_v13  ;;  %v2678_v57 = vadd.f32 0.5, %v2486_v32  ;;  %v883_v19 = vpop.f32.mrf.mxu2  ;;  %8980 = vmatmul.msk.f32.gmra.mxu1 %vm1063_vm2, %v12227_v47 }
 0x3de   : > { %2849 = vmatpush.msra.mxu2 %v2690_v18  ;;  %v1991_v18 = vmul.f32 0.5, %v11233_v22  ;;  %9704 = vtanh.f32 %v2090_v14  ;;  %v2676_v24 = vadd.f32 0.5, %v2484_v43  ;;  %v1983_v14 = vmul.f32 0.5, %v11192_v63 }
 0x3df   : > { %9706 = vtanh.f32 %v1993_v20 }
 0x3e0   : > { %2850 = vmatpush.msra.mxu2 %v2688_v36  ;;  %v2480_v36 = vmul.f32 0.5, %v9699_v26  ;;  %9708 = vtanh.f32 %v1991_v18  ;;  %v17134_v26 = vld [vmem:[#allocation18_spill] sm:$0xff] }
 0x3e1   : > { %9710 = vtanh.f32 %v1989_v56  ;;  %v1979_v18 = vmul.f32 0.5, %v17134_v26  ;;  %v12293_v56 = vadd.f32 %v883_v19, %v11387_v40  ;;  %v17139_v26 = vld [vmem:[#allocation10_spill] sm:$0xff] }
 0x3e2   : > { %v12266_v4 = vpop.f32.mrf.mxu0  ;;  %2851 = vmatpush.msra.mxu2 %v2686_v8  ;;  %v9701_v21 = vpop.eup %9700  ;;  %v2674_v8 = vadd.f32 0.5, %v2482_v38  ;;  %9712 = vtanh.f32 %v1987_v52  ;;  %v17136_v52 = vld [vmem:[#allocation16_spill] sm:$0xff] }
 0x3e3   : > { %v12274_v54 = vpop.f32.mrf.mxu1  ;;  %v9703_v7 = vpop.eup %9702  ;;  %v2478_v22 = vmul.f32 0.5, %v9701_v21  ;;  %9714 = vtanh.f32 %v1985_v58  ;;  %v1977_v21 = vmul.f32 0.5, %v17135_v50 }
 0x3e4   : > { %2852 = vmatpush.msra.mxu2 %v2684_v61  ;;  %v9705_v16 = vpop.eup %9704  ;;  %v2476_v9 = vmul.f32 0.5, %v9703_v7  ;;  %v2672_v61 = vadd.f32 0.5, %v2480_v36  ;;  %9716 = vtanh.f32 %v1983_v14 }
 0x3e5   : > { %v9707_v49 = vpop.eup %9706  ;;  %v2474_v33 = vmul.f32 0.5, %v9705_v16  ;;  %v2670_v32 = vadd.f32 0.5, %v2478_v22  ;;  %9718 = vtanh.f32 %v1981_v46  ;;  %v1975_v22 = vmul.f32 0.5, %v17136_v52  ;;  %v17141_v52 = vld [vmem:[#allocation8_spill] sm:$0xff]  ;;  %8981 = vmatmul.msk.f32.gmra.mxu1 %vm1063_vm2, %v12238_v1 }
 0x3e6   : > { %2853 = vmatpush.msra.mxu2 %v2682_v62  ;;  %v9709_v62 = vpop.eup %9708  ;;  %v2377_v20 = vmul.f32 0.5, %v9707_v49  ;;  %v2668_v43 = vadd.f32 0.5, %v2476_v9  ;;  %9720 = vtanh.f32 %v1979_v18  ;;  %v17137_v9 = vld [vmem:[#allocation14_spill] sm:$0xff]  ;;  %v1969_v18 = vmul.f32 0.5, %v17139_v26 }
 0x3e7   : > { %v2375_v63 = vmul.f32 0.5, %v9709_v62  ;;  %v2666_v38 = vadd.f32 0.5, %v2474_v33  ;;  %9722 = vtanh.f32 %v1977_v21  ;;  %v17138_v62 = vld [vmem:[#allocation12_spill] sm:$0xff]  ;;  %v17140_v21 = vld [vmem:[#allocation9_spill] sm:$0xff]  ;;  %v2055_v26 = vmul.f32 0.5, %v11845_v35 }
 0x3e8   : > { %2854 = vmatpush.msra.mxu2 %v2680_v11  ;;  %v9711_v11 = vpop.eup %9710  ;;  %v1971_v46 = vmul.f32 0.5, %v17138_v62  ;;  %9724 = vtanh.f32 %v1975_v22  ;;  %v1965_v22 = vmul.f32 0.5, %v17141_v52  ;;  %v2057_v62 = vmul.f32 0.5, %v11870_v2 }
 0x3e9   : > { %v2373_v36 = vmul.f32 0.5, %v9711_v11  ;;  %v2567_v16 = vadd.f32 0.5, %v2375_v63 }
 0x3ea   : > { %v12276_v28 = vpop.f32.mrf.mxu0  ;;  %2855 = vmatpush.msra.mxu2 %v2678_v57  ;;  %v9713_v57 = vpop.eup %9712 }
 0x3eb   : > { %v12284_v13 = vpop.f32.mrf.mxu1  ;;  %v9715_v7 = vpop.eup %9714  ;;  %v2371_v5 = vmul.f32 0.5, %v9713_v57  ;;  %v2565_v33 = vadd.f32 0.5, %v2373_v36  ;;  %v1967_v36 = vmul.f32 0.5, %v17140_v21 }
 0x3ec   : > { %2856 = vmatpush.msra.mxu2 %v2676_v24  ;;  %v2569_v24 = vadd.f32 0.5, %v2377_v20  ;;  %v9717_v58 = vpop.eup %9716  ;;  %v2369_v19 = vmul.f32 0.5, %v9715_v7 }
 0x3ed   : > { %v2367_v20 = vmul.f32 0.5, %v9717_v58 }
 0x3ee   : > { %2857 = vmatpush.msra.mxu2 %v2674_v8  ;;  %v886_v8 = vpop.f32.mrf.mxu2  ;;  %v2561_v57 = vadd.f32 0.5, %v2369_v19  ;;  %v17142_v19 = vld [vmem:[#allocation7_spill] sm:$0xff] }
 0x3ef   : > { %v12307_v63 = vadd.f32 %v886_v8, %v11633_v39 }
 0x3f0   : > { %2858 = vmatpush.msra.mxu2 %v2672_v61  ;;  %v1973_v61 = vmul.f32 0.5, %v17137_v9 }
 0x3f2   : > { %v12286_v55 = vpop.f32.mrf.mxu0  ;;  %2859 = vmatpush.msra.mxu2 %v2670_v32  ;;  %v9719_v32 = vpop.eup %9718  ;;  %9726 = vtanh.f32 %v1973_v61 }
 0x3f3   : > { %v12298_v49 = vpop.f32.mrf.mxu1  ;;  %v9721_v11 = vpop.eup %9720  ;;  %9728 = vtanh.f32 %v1971_v46 }
 0x3f4   : > { %2860 = vmatpush.msra.mxu2 %v2668_v43  ;;  %v2563_v43 = vadd.f32 0.5, %v2371_v5  ;;  %v9723_v50 = vpop.eup %9722  ;;  %v2363_v31 = vmul.f32 0.5, %v9721_v11  ;;  %9730 = vtanh.f32 %v1969_v18 }
 0x3f5   : > { %v9725_v7 = vpop.eup %9724  ;;  %9732 = vtanh.f32 %v1967_v36  ;;  %v2051_v36 = vmul.f32 0.5, %v11795_v30 }
 0x3f6   : > { %2861 = vmatpush.msra.mxu2 %v2666_v38  ;;  %v2365_v38 = vmul.f32 0.5, %v9719_v32  ;;  %v889_v5 = vpop.f32.mrf.mxu2  ;;  %v2359_v32 = vmul.f32 0.5, %v9725_v7  ;;  %v2555_v46 = vadd.f32 0.5, %v2363_v31  ;;  %9734 = vtanh.f32 %v1965_v22 }
 0x3f7   : > { %2862 = vmatmul.f32.vlgmr.msra.gmra.mxu2 %v12293_v56 }
 0x3f8   : > { %2904 = vmatpush.msrb.mxu2 %v2569_v24  ;;  %v2559_v24 = vadd.f32 0.5, %v2367_v20  ;;  %v2557_v58 = vadd.f32 0.5, %v2365_v38  ;;  %v9727_v61 = vpop.eup %9726  ;;  %v2551_v2 = vadd.f32 0.5, %v2359_v32  ;;  %v2045_v32 = vmul.f32 0.5, %v11718_v42 }
 0x3f9   : > { %v9729_v20 = vpop.eup %9728  ;;  %v2357_v11 = vmul.f32 0.5, %v9727_v61 }
 0x3fa   : > { %2905 = vmatpush.msrb.mxu2 %v2567_v16  ;;  %v12300_v14 = vpop.f32.mrf.mxu0  ;;  %v2361_v16 = vmul.f32 0.5, %v9723_v50  ;;  %v9731_v38 = vpop.eup %9730  ;;  %v2355_v47 = vmul.f32 0.5, %v9729_v20 }
 0x3fb   : > { %v12314_v9 = vpop.f32.mrf.mxu1  ;;  %v9733_v50 = vpop.eup %9732  ;;  %v2353_v21 = vmul.f32 0.5, %v9731_v38  ;;  %v2549_v35 = vadd.f32 0.5, %v2357_v11  ;;  %v2043_v11 = vmul.f32 0.5, %v11693_v10 }
 0x3fc   : > { %2906 = vmatpush.msrb.mxu2 %v2565_v33  ;;  %v1963_v33 = vmul.f32 0.5, %v17142_v19  ;;  %v2553_v18 = vadd.f32 0.5, %v2361_v16  ;;  %v2351_v7 = vmul.f32 0.5, %v9733_v50  ;;  %v2547_v22 = vadd.f32 0.5, %v2355_v47 }
 0x3fd   : > { %v2047_v19 = vmul.f32 0.5, %v11746_v0  ;;  %v2545_v1 = vadd.f32 0.5, %v2353_v21  ;;  %v2041_v47 = vmul.f32 0.5, %v11664_v23 }
 0x3fe   : > { %2907 = vmatpush.msrb.mxu2 %v2563_v43  ;;  %v12321_v43 = vadd.f32 %v889_v5, %v11653_v53  ;;  %9736 = vtanh.f32 %v1963_v33  ;;  %v892_v52 = vpop.f32.mrf.mxu2 }
 0x3ff   : > { %2865 = vmatmul.f32.gmra.mxu2 %v12307_v63  ;;  %9738 = vtanh.f32 %v2057_v62  ;;  %v12335_v30 = vadd.f32 %v892_v52, %v11680_v29  ;;  %v2543_v62 = vadd.f32 0.5, %v2351_v7  ;;  %v2037_v7 = vmul.f32 0.5, %v11621_v48 }
 0x400   : > { %2908 = vmatpush.msrb.mxu2 %v2561_v57  ;;  %v2053_v57 = vmul.f32 0.5, %v11820_v41  ;;  %9740 = vtanh.f32 %v2055_v26  ;;  %v2049_v41 = vmul.f32 0.5, %v11771_v51 }
 0x402   : > { %2909 = vmatpush.msrb.mxu2 %v2559_v24  ;;  %v12312_v8 = vpop.f32.mrf.mxu0  ;;  %v9735_v24 = vpop.eup %9734  ;;  %9742 = vtanh.f32 %v2053_v57 }
 0x403   : > { %v12332_v5 = vpop.f32.mrf.mxu1  ;;  %v2349_v61 = vmul.f32 0.5, %v9735_v24  ;;  %9744 = vtanh.f32 %v2051_v36  ;;  %v2039_v36 = vmul.f32 0.5, %v11642_v17 }
 0x404   : > { %2910 = vmatpush.msrb.mxu2 %v2557_v58  ;;  %v9737_v16 = vpop.eup %9736  ;;  %9746 = vtanh.f32 %v2049_v41 }
 0x405   : > { %v9739_v58 = vpop.eup %9738  ;;  %v2347_v51 = vmul.f32 0.5, %v9737_v16  ;;  %9748 = vtanh.f32 %v2047_v19  ;;  %v2541_v0 = vadd.f32 0.5, %v2349_v61  ;;  %v2033_v19 = vmul.f32 0.5, %v11589_v25 }
 0x406   : > { %2911 = vmatpush.msrb.mxu2 %v2555_v46  ;;  %v9741_v33 = vpop.eup %9740  ;;  %v2441_v46 = vmul.f32 0.5, %v9739_v58  ;;  %9750 = vtanh.f32 %v2045_v32 }
 0x407   : > { %2868 = vmatmul.f32.gmra.mxu2 %v12321_v43  ;;  %v2539_v57 = vadd.f32 0.5, %v2347_v51  ;;  %9752 = vtanh.f32 %v2043_v11  ;;  %v2031_v51 = vmul.f32 0.5, %v11571_v12  ;;  %v2121_v11 = vmul.f32 0.5, %v12332_v5 }
 0x408   : > { %2912 = vmatpush.msrb.mxu2 %v2553_v18  ;;  %v9743_v20 = vpop.eup %9742  ;;  %v2439_v18 = vmul.f32 0.5, %v9741_v33  ;;  %v2633_v50 = vadd.f32 0.5, %v2441_v46  ;;  %9754 = vtanh.f32 %v2041_v47  ;;  %v2029_v46 = vmul.f32 0.5, %v11553_v44 }
 0x409   : > { %v9745_v38 = vpop.eup %9744  ;;  %9756 = vtanh.f32 %v2039_v36  ;;  %v2119_v5 = vmul.f32 0.5, %v12314_v9 }
 0x40a   : > { %2913 = vmatpush.msrb.mxu2 %v2551_v2  ;;  %v12327_v31 = vpop.f32.mrf.mxu0  ;;  %v2437_v2 = vmul.f32 0.5, %v9743_v20  ;;  %v9747_v21 = vpop.eup %9746  ;;  %v2435_v10 = vmul.f32 0.5, %v9745_v38  ;;  %9758 = vtanh.f32 %v2037_v7 }
 0x40b   : > { %v12344_v42 = vpop.f32.mrf.mxu1  ;;  %v9749_v24 = vpop.eup %9748  ;;  %v2433_v23 = vmul.f32 0.5, %v9747_v21 }
 0x40c   : > { %2914 = vmatpush.msrb.mxu2 %v2549_v35  ;;  %v2631_v35 = vadd.f32 0.5, %v2439_v18  ;;  %v2629_v52 = vadd.f32 0.5, %v2437_v2  ;;  %v9751_v41 = vpop.eup %9750  ;;  %v2431_v17 = vmul.f32 0.5, %v9749_v24  ;;  %v2627_v58 = vadd.f32 0.5, %v2435_v10 }
 0x40d   : > { %v9753_v61 = vpop.eup %9752  ;;  %v2027_v18 = vmul.f32 0.5, %v11535_v37  ;;  %v2117_v10 = vmul.f32 0.5, %v12298_v49 }
 0x40e   : > { %2915 = vmatpush.msrb.mxu2 %v2547_v22  ;;  %v2035_v22 = vmul.f32 0.5, %v11605_v60  ;;  %v9755_v33 = vpop.eup %9754  ;;  %v2427_v60 = vmul.f32 0.5, %v9753_v61  ;;  %v2623_v32 = vadd.f32 0.5, %v2431_v17  ;;  %v2113_v61 = vmul.f32 0.5, %v12274_v54  ;;  %v17144_v54 = vld [vmem:[#allocation13_spill] sm:$0xff] }
 0x40f   : > { %2871 = vmatmul.f32.gmra.mxu2 %v12335_v30  ;;  %v2425_v25 = vmul.f32 0.5, %v9755_v33 }
 0x410   : > { %2916 = vmatpush.msrb.mxu2 %v2545_v1  ;;  %v2429_v1 = vmul.f32 0.5, %v9751_v41  ;;  %9760 = vtanh.f32 %v2035_v22  ;;  %v2619_v47 = vadd.f32 0.5, %v2427_v60 }
 0x411   : > { %9762 = vtanh.f32 %v2033_v19 }
 0x412   : > { %2917 = vmatpush.msrb.mxu2 %v2543_v62  ;;  %v12341_v26 = vpop.f32.mrf.mxu0  ;;  %v9757_v62 = vpop.eup %9756  ;;  %v2621_v20 = vadd.f32 0.5, %v2429_v1  ;;  %9764 = vtanh.f32 %v2031_v51 }
 0x413   : > { %v12353_v48 = vpop.f32.mrf.mxu1  ;;  %v2423_v38 = vmul.f32 0.5, %v9757_v62  ;;  %9766 = vtanh.f32 %v2029_v46  ;;  %v2109_v62 = vmul.f32 0.5, %v12254_v34 }
 0x414   : > { %2918 = vmatpush.msrb.mxu2 %v2541_v0  ;;  %v9759_v0 = vpop.eup %9758  ;;  %9768 = vtanh.f32 %v2121_v11 }
 0x415   : > { %v2421_v2 = vmul.f32 0.5, %v9759_v0  ;;  %9770 = vtanh.f32 %v2027_v18  ;;  %v2615_v37 = vadd.f32 0.5, %v2423_v38 }
 0x416   : > { %2919 = vmatpush.msrb.mxu2 %v2539_v57  ;;  %v9761_v57 = vpop.eup %9760  ;;  %9772 = vtanh.f32 %v2119_v5 }
 0x417   : > { %2920 = vmatmul.f32.vlgmr.msrb.gmra.mxu2 %v11391_v6  ;;  %v2625_v6 = vadd.f32 0.5, %v2433_v23  ;;  %v2419_v21 = vmul.f32 0.5, %v9761_v57  ;;  %v2613_v7 = vadd.f32 0.5, %v2421_v2  ;;  %9774 = vtanh.f32 %v2117_v10 }
 0x418   : > { %2962 = vmatpush.msra.mxu2 %v2633_v50  ;;  %v9763_v50 = vpop.eup %9762 }
 0x419   : > { %v9765_v36 = vpop.eup %9764  ;;  %v2417_v24 = vmul.f32 0.5, %v9763_v50  ;;  %v2611_v9 = vadd.f32 0.5, %v2419_v21  ;;  %v17145_v50 = vld [vmem:[#allocation63_spill] sm:$0xff] }
 0x41a   : > { %2963 = vmatpush.msra.mxu2 %v2631_v35  ;;  %v12350_v16 = vpop.f32.mrf.mxu0  ;;  %v17143_v35 = vld [vmem:[#allocation11_spill] sm:$0xff]  ;;  %v9767_v23 = vpop.eup %9766  ;;  %v2415_v17 = vmul.f32 0.5, %v9765_v36  ;;  %v17146_v36 = vld [vmem:[#allocation62_spill] sm:$0xff] }
 0x41b   : > { %v12362_v44 = vpop.f32.mrf.mxu1  ;;  %v9769_v22 = vpop.eup %9768  ;;  %v2413_v19 = vmul.f32 0.5, %v9767_v23  ;;  %v2609_v1 = vadd.f32 0.5, %v2417_v24  ;;  %v2101_v10 = vmul.f32 0.5, %v17146_v36  ;;  %v17148_v23 = vld [vmem:[#allocation61_spill] sm:$0xff] }
 0x41c   : > { %2964 = vmatpush.msra.mxu2 %v2629_v52  ;;  %v2115_v52 = vmul.f32 0.5, %v12284_v13  ;;  %v2111_v13 = vmul.f32 0.5, %v12264_v15  ;;  %v2505_v33 = vmul.f32 0.5, %v9769_v22  ;;  %v2607_v60 = vadd.f32 0.5, %v2415_v17 }
 0x41d   : > { %v2605_v46 = vadd.f32 0.5, %v2413_v19 }
 0x41e   : > { %2965 = vmatpush.msra.mxu2 %v2627_v58  ;;  %v9771_v58 = vpop.eup %9770  ;;  %9776 = vtanh.f32 %v2115_v52  ;;  %v2697_v11 = vadd.f32 0.5, %v2505_v33  ;;  %v2099_v52 = vmul.f32 0.5, %v17148_v23 }
 0x41f   : > { %2923 = vmatmul.f32.gmra.mxu2 %v11636_v27  ;;  %v2617_v27 = vadd.f32 0.5, %v2425_v25  ;;  %v2411_v51 = vmul.f32 0.5, %v9771_v58  ;;  %9778 = vtanh.f32 %v2113_v61  ;;  %v17149_v61 = vld [vmem:[#allocation60_spill] sm:$0xff] }
 0x420   : > { %2966 = vmatpush.msra.mxu2 %v2625_v6  ;;  %v12373_v6 = vpop.f32.mrf.mxu2  ;;  %9780 = vtanh.f32 %v2111_v13  ;;  %v2097_v19 = vmul.f32 0.5, %v17149_v61  ;;  %v17150_v13 = vld [vmem:[#allocation59_spill] sm:$0xff] }
 0x421   : > { %v2603_v18 = vadd.f32 0.5, %v2411_v51  ;;  %9782 = vtanh.f32 %v2109_v62  ;;  %v2095_v33 = vmul.f32 0.5, %v17150_v13 }
 0x422   : > { %2967 = vmatpush.msra.mxu2 %v2623_v32  ;;  %v12360_v12 = vpop.f32.mrf.mxu0  ;;  %v9773_v32 = vpop.eup %9772 }
 0x423   : > { %v12371_v49 = vpop.f32.mrf.mxu1  ;;  %v9775_v25 = vpop.eup %9774  ;;  %v2503_v15 = vmul.f32 0.5, %v9773_v32 }
 0x424   : > { %2968 = vmatpush.msra.mxu2 %v2621_v20  ;;  %v2107_v20 = vmul.f32 0.5, %v12245_v59  ;;  %v9777_v38 = vpop.eup %9776  ;;  %v2501_v57 = vmul.f32 0.5, %v9775_v25  ;;  %v2103_v59 = vmul.f32 0.5, %v17145_v50 }
 0x425   : > { %v9779_v2 = vpop.eup %9778  ;;  %v2499_v5 = vmul.f32 0.5, %v9777_v38  ;;  %v2695_v21 = vadd.f32 0.5, %v2503_v15  ;;  %v17152_v15 = vld [vmem:[#allocation3_spill] sm:$0xff] }
 0x426   : > { %2969 = vmatpush.msra.mxu2 %v2619_v47  ;;  %v2105_v47 = vmul.f32 0.5, %v12240_v3  ;;  %9784 = vtanh.f32 %v2107_v20  ;;  %v2497_v3 = vmul.f32 0.5, %v9779_v2  ;;  %v2693_v24 = vadd.f32 0.5, %v2501_v57  ;;  %v17151_v20 = vld [vmem:[#allocation58_spill] sm:$0xff]  ;;  %v17153_v57 = vld [vmem:[#allocation57_spill] sm:$0xff] }
 0x427   : > { %2926 = vmatmul.f32.gmra.mxu2 %v17143_v35  ;;  %v17147_v35 = vld [vmem:[#allocation2_spill] sm:$0xff]  ;;  %v2091_v2 = vmul.f32 0.5, %v17153_v57  ;;  %v2138_v57 = vmul.f32 0.5, %v12341_v26 }
 0x428   : > { %2970 = vmatpush.msra.mxu2 %v2617_v27  ;;  %v12384_v27 = vpop.f32.mrf.mxu2  ;;  %9786 = vtanh.f32 %v2105_v47 }
 0x429   : > { %9788 = vtanh.f32 %v2103_v59 }
 0x42a   : > { %2971 = vmatpush.msra.mxu2 %v2615_v37  ;;  %v12368_v41 = vpop.f32.mrf.mxu0  ;;  %v9781_v37 = vpop.eup %9780  ;;  %9790 = vtanh.f32 %v2101_v10 }
 0x42b   : > { %v12382_v34 = vpop.f32.mrf.mxu1  ;;  %v2495_v17 = vmul.f32 0.5, %v9781_v37  ;;  %9792 = vtanh.f32 %v2099_v52 }
 0x42c   : > { %2972 = vmatpush.msra.mxu2 %v2613_v7  ;;  %v9783_v7 = vpop.eup %9782  ;;  %9794 = vtanh.f32 %v2097_v19 }
 0x42d   : > { %v9785_v58 = vpop.eup %9784  ;;  %v2493_v51 = vmul.f32 0.5, %v9783_v7  ;;  %9796 = vtanh.f32 %v2095_v33 }
 0x42e   : > { %2973 = vmatpush.msra.mxu2 %v2611_v9  ;;  %v2691_v9 = vadd.f32 0.5, %v2499_v5  ;;  %v9787_v32 = vpop.eup %9786  ;;  %v2491_v62 = vmul.f32 0.5, %v9785_v58 }
 0x42f   : > { %2929 = vmatmul.f32.gmra.mxu2 %v17144_v54  ;;  %v2687_v54 = vadd.f32 0.5, %v2495_v17  ;;  %v2685_v38 = vadd.f32 0.5, %v2493_v51 }
 0x430   : > { %2974 = vmatpush.msra.mxu2 %v2609_v1  ;;  %v12394_v25 = vpop.f32.mrf.mxu2  ;;  %v2683_v5 = vadd.f32 0.5, %v2491_v62 }
 0x432   : > { %2975 = vmatpush.msra.mxu2 %v2607_v60  ;;  %v12379_v0 = vpop.f32.mrf.mxu0  ;;  %v2689_v60 = vadd.f32 0.5, %v2497_v3 }
 0x433   : > { %v12391_v1 = vpop.f32.mrf.mxu1  ;;  %v2146_v17 = vmul.f32 0.5, %v12379_v0 }
 0x434   : > { %2976 = vmatpush.msra.mxu2 %v2605_v46  ;;  %v9789_v46 = vpop.eup %9788 }
 0x435   : > { %v9791_v47 = vpop.eup %9790  ;;  %v2487_v59 = vmul.f32 0.5, %v9789_v46 }
 0x436   : > { %2977 = vmatpush.msra.mxu2 %v2603_v18  ;;  %v2489_v18 = vmul.f32 0.5, %v9787_v32  ;;  %v2485_v36 = vmul.f32 0.5, %v9791_v47 }
 0x437   : > { %2978 = vmatmul.f32.vlgmr.msra.gmra.mxu2 %v17147_v35  ;;  %v2679_v52 = vadd.f32 0.5, %v2487_v59 }
 0x438   : > { %3020 = vmatpush.msrb.mxu2 %v2697_v11  ;;  %v2093_v11 = vmul.f32 0.5, %v17151_v20  ;;  %v2681_v35 = vadd.f32 0.5, %v2489_v18  ;;  %v2677_v61 = vadd.f32 0.5, %v2485_v36  ;;  %v12403_v13 = vpop.f32.mrf.mxu2  ;;  %v2140_v18 = vmul.f32 0.5, %v12350_v16  ;;  %v3181_v16 = vld [vmem:[%s16976_s8 + $0x70] sm:$0xff] }
 0x43a   : > { %3021 = vmatpush.msrb.mxu2 %v2695_v21  ;;  %v1648_v22 = vpop.f32.mrf.mxu0  ;;  %v9793_v21 = vpop.eup %9792  ;;  %9798 = vtanh.f32 %v2093_v11 }
 0x43b   : > { %v12399_v37 = vpop.f32.mrf.mxu1  ;;  %v9795_v3 = vpop.eup %9794  ;;  %9800 = vtanh.f32 %v2091_v2  ;;  %v2483_v7 = vmul.f32 0.5, %v9793_v21  ;;  %v2148_v23 = vmul.f32 0.5, %v1648_v22 }
 0x43c   : > { %3022 = vmatpush.msrb.mxu2 %v2693_v24  ;;  %v9797_v24 = vpop.eup %9796  ;;  %v2481_v58 = vmul.f32 0.5, %v9795_v3  ;;  %v2134_v3 = vmul.f32 0.5, %v12312_v8 }
 0x43d   : > { %v2479_v33 = vmul.f32 0.5, %v9797_v24  ;;  %v2675_v32 = vadd.f32 0.5, %v2483_v7 }
 0x43e   : > { %3023 = vmatpush.msrb.mxu2 %v2691_v9  ;;  %v17154_v9 = vld [vmem:[#allocation4_spill] sm:$0xff]  ;;  %v2673_v46 = vadd.f32 0.5, %v2481_v58 }
 0x43f   : > { %2981 = vmatmul.f32.gmra.mxu2 %v17152_v15 }
 0x440   : > { %3024 = vmatpush.msrb.mxu2 %v2689_v60  ;;  %v9799_v19 = vpop.eup %9798  ;;  %v2144_v60 = vmul.f32 0.5, %v12368_v41  ;;  %v2671_v41 = vadd.f32 0.5, %v2479_v33  ;;  %v12416_v36 = vpop.f32.mrf.mxu2  ;;  %v2130_v33 = vmul.f32 0.5, %v12286_v55  ;;  %v2126_v55 = vmul.f32 0.5, %v12266_v4 }
 0x441   : > { %v9801_v62 = vpop.eup %9800  ;;  %v2477_v0 = vmul.f32 0.5, %v9799_v19 }
 0x442   : > { %3025 = vmatpush.msrb.mxu2 %v2687_v54  ;;  %v1651_v50 = vpop.f32.mrf.mxu0  ;;  %v2142_v54 = vmul.f32 0.5, %v12360_v12  ;;  %v2475_v15 = vmul.f32 0.5, %v9801_v62 }
 0x443   : > { %v2150_v10 = vmul.f32 0.5, %v1651_v50  ;;  %v12407_v20 = vpop.f32.mrf.mxu1  ;;  %v2669_v12 = vadd.f32 0.5, %v2477_v0 }
 0x444   : > { %3026 = vmatpush.msrb.mxu2 %v2685_v38  ;;  %v17155_v38 = vld [vmem:[#allocation5_spill] sm:$0xff]  ;;  %v2667_v21 = vadd.f32 0.5, %v2475_v15 }
 0x445   : > { %9802 = vtanh.f32 %v2150_v10 }
 0x446   : > { %3027 = vmatpush.msrb.mxu2 %v2683_v5  ;;  %9804 = vtanh.f32 %v2148_v23  ;;  %v2136_v5 = vmul.f32 0.5, %v12327_v31  ;;  %v3180_v31 = vld [vmem:[%s16976_s8 + $0x60] sm:$0xff] }
 0x447   : > { %2984 = vmatmul.f32.gmra.mxu2 %v17154_v9  ;;  %9806 = vtanh.f32 %v2146_v17  ;;  %v2132_v17 = vmul.f32 0.5, %v12300_v14 }
 0x448   : > { %3028 = vmatpush.msrb.mxu2 %v2681_v35 }
 0x44a   : > { %3029 = vmatpush.msrb.mxu2 %v2679_v52  ;;  %v1654_v51 = vpop.f32.mrf.mxu0 }
 0x44b   : > { %v2152_v22 = vmul.f32 0.5, %v1654_v51  ;;  %v9803_v11 = vpop.eup %9802  ;;  %v12424_v8 = vpop.f32.mrf.mxu1 }
 0x44c   : > { %3030 = vmatpush.msrb.mxu2 %v2677_v61  ;;  %v9805_v47 = vpop.eup %9804  ;;  %v2534_v50 = vmul.f32 0.5, %v9803_v11  ;;  %v3179_v61 = vld [vmem:[%s16976_s8 + $0x50] sm:$0xff] }
 0x44d   : > { %9808 = vtanh.f32 %v2152_v22  ;;  %v9807_v2 = vpop.eup %9806  ;;  %v2532_v10 = vmul.f32 0.5, %v9805_v47  ;;  %v2128_v22 = vmul.f32 0.5, %v12276_v28  ;;  %v17156_v47 = vld [vmem:[#allocation64_spill] sm:$0xff] }
 0x44e   : > { %3031 = vmatpush.msrb.mxu2 %v2675_v32  ;;  %9810 = vtanh.f32 %v2144_v60  ;;  %v2530_v24 = vmul.f32 0.5, %v9807_v2  ;;  %v2726_v23 = vadd.f32 0.5, %v2534_v50 }
 0x44f   : > { %2987 = vmatmul.f32.gmra.mxu2 %v17155_v38  ;;  %9812 = vtanh.f32 %v2142_v54  ;;  %v2724_v58 = vadd.f32 0.5, %v2532_v10  ;;  %v12435_v54 = vpop.f32.mrf.mxu2 }
 0x450   : > { %3032 = vmatpush.msrb.mxu2 %v2673_v46  ;;  %9814 = vtanh.f32 %v2140_v18  ;;  %v2722_v14 = vadd.f32 0.5, %v2530_v24  ;;  %v2124_v18 = vmul.f32 0.5, %v12256_v45 }
 0x451   : > { %9816 = vtanh.f32 %v2138_v57  ;;  %v2122_v57 = vmul.f32 0.5, %v17156_v47 }
 0x452   : > { %3033 = vmatpush.msrb.mxu2 %v2671_v41  ;;  %9818 = vtanh.f32 %v2136_v5 }
 0x453   : > { %v9809_v59 = vpop.eup %9808  ;;  %9820 = vtanh.f32 %v2134_v3  ;;  %v12440_v2 = vpop.f32.mrf.mxu1 }
 0x454   : > { %3034 = vmatpush.msrb.mxu2 %v2669_v12  ;;  %v2536_v35 = vmul.f32 0.5, %v9809_v59  ;;  %v9811_v26 = vpop.eup %9810  ;;  %9822 = vtanh.f32 %v2132_v17 }
 0x455   : > { %v9813_v52 = vpop.eup %9812  ;;  %v2528_v9 = vmul.f32 0.5, %v9811_v26  ;;  %9824 = vtanh.f32 %v2130_v33  ;;  %v17158_v26 = vld [vmem:[#allocation34_spill] sm:$0xff] }
 0x456   : > { %3035 = vmatpush.msrb.mxu2 %v2667_v21  ;;  %v2728_v7 = vadd.f32 0.5, %v2536_v35  ;;  %v9815_v19 = vpop.eup %9814  ;;  %v2526_v51 = vmul.f32 0.5, %v9813_v52  ;;  %9826 = vtanh.f32 %v2128_v22  ;;  %v17157_v21 = vld [vmem:[#allocation35_spill] sm:$0xff]  ;;  %v2023_v3 = vmul.f32 0.5, %v17158_v26  ;;  %v17159_v52 = vld [vmem:[#allocation33_spill] sm:$0xff]  ;;  %v912_v22 = vpop.f32.mrf.mxu3 }
 0x457   : > { %3036 = vmatmul.f32.vlgmr.msrb.gmra.mxu2 %v12293_v56  ;;  %v3178_v56 = vld [vmem:[%s16976_s8 + $0x40] sm:$0xff]  ;;  %v9817_v60 = vpop.eup %9816  ;;  %v2524_v32 = vmul.f32 0.5, %v9815_v19  ;;  %v2720_v62 = vadd.f32 0.5, %v2528_v9  ;;  %9828 = vtanh.f32 %v2126_v55  ;;  %v12444_v24 = vpop.f32.mrf.mxu2  ;;  %v2021_v17 = vmul.f32 0.5, %v17159_v52  ;;  %v17160_v19 = vld [vmem:[#allocation31_spill] sm:$0xff]  ;;  %v17162_v55 = vld [vmem:[#allocation29_spill] sm:$0xff] }
 0x458   : > { %3290 = vmatpush.msra.mxu2 %v3181_v16  ;;  %2875 = vmatpush.msrb.mxu3 %v2728_v7  ;;  %v9819_v0 = vpop.eup %9818  ;;  %v2522_v46 = vmul.f32 0.5, %v9817_v60  ;;  %v2718_v11 = vadd.f32 0.5, %v2526_v51  ;;  %9830 = vtanh.f32 %v2124_v18  ;;  %v2025_v16 = vmul.f32 0.5, %v17157_v21  ;;  %v17165_v21 = vld [vmem:[#allocation26_spill] sm:$0xff] }
 0x459   : > { %v9821_v15 = vpop.eup %9820  ;;  %v2520_v28 = vmul.f32 0.5, %v9819_v0  ;;  %v2716_v41 = vadd.f32 0.5, %v2524_v32  ;;  %9832 = vtanh.f32 %v2122_v57  ;;  %v2019_v33 = vmul.f32 0.5, %v17160_v19 }
 0x45a   : > { %3291 = vmatpush.msra.mxu2 %v3180_v31  ;;  %2876 = vmatpush.msrb.mxu3 %v2726_v23  ;;  %v9823_v38 = vpop.eup %9822  ;;  %v2518_v4 = vmul.f32 0.5, %v9821_v15  ;;  %v2714_v12 = vadd.f32 0.5, %v2522_v46  ;;  %9834 = vtanh.f32 %v2025_v16  ;;  %v2015_v46 = vmul.f32 0.5, %v17162_v55  ;;  %v17169_v55 = vld [vmem:[#allocation22_spill] sm:$0xff] }
 0x45b   : > { %v9825_v50 = vpop.eup %9824  ;;  %v2516_v59 = vmul.f32 0.5, %v9823_v38  ;;  %v2712_v45 = vadd.f32 0.5, %v2520_v28  ;;  %9836 = vtanh.f32 %v2023_v3  ;;  %v17163_v28 = vld [vmem:[#allocation28_spill] sm:$0xff]  ;;  %v3111_v38 = vld [vmem:[%s16974_s6 + $0x100] sm:$0xff]  ;;  %v2009_v16 = vmul.f32 0.5, %v17165_v21 }
 0x45c   : > { %3292 = vmatpush.msra.mxu2 %v3179_v61  ;;  %2877 = vmatpush.msrb.mxu3 %v2724_v58  ;;  %v9827_v5 = vpop.eup %9826  ;;  %v2710_v10 = vadd.f32 0.5, %v2518_v4  ;;  %9838 = vtanh.f32 %v2021_v17 }
 0x45d   : > { %v9829_v35 = vpop.eup %9828  ;;  %v2512_v7 = vmul.f32 0.5, %v9827_v5  ;;  %v2708_v23 = vadd.f32 0.5, %v2516_v59  ;;  %9840 = vtanh.f32 %v2019_v33 }
 0x45e   : > { %3293 = vmatpush.msra.mxu2 %v3178_v56  ;;  %2878 = vmatpush.msrb.mxu3 %v2722_v14  ;;  %v9831_v31 = vpop.eup %9830  ;;  %v2510_v9 = vmul.f32 0.5, %v9829_v35  ;;  %v12449_v56 = vpop.f32.mrf.mxu1 }
 0x45f   : > { %3039 = vmatmul.f32.gmra.mxu2 %v12307_v63  ;;  %v2514_v63 = vmul.f32 0.5, %v9825_v50  ;;  %v9833_v61 = vpop.eup %9832  ;;  %v2508_v51 = vmul.f32 0.5, %v9831_v31  ;;  %v2704_v14 = vadd.f32 0.5, %v2512_v7  ;;  %v12465_v57 = vpop.f32.mrf.mxu2  ;;  %v17164_v50 = vld [vmem:[#allocation27_spill] sm:$0xff]  ;;  %v17166_v7 = vld [vmem:[#allocation25_spill] sm:$0xff] }
 0x460   : > { %2879 = vmatpush.msrb.mxu3 %v2720_v62  ;;  %v2506_v32 = vmul.f32 0.5, %v9833_v61  ;;  %v2702_v62 = vadd.f32 0.5, %v2510_v9  ;;  %v9835_v0 = vpop.eup %9834  ;;  %v2011_v59 = vmul.f32 0.5, %v17164_v50  ;;  %v915_v52 = vpop.f32.mrf.mxu3  ;;  %v3112_v61 = vld [vmem:[%s16974_s6 + $0x108] sm:$0xff] }
 0x461   : > { %v2706_v58 = vadd.f32 0.5, %v2514_v63  ;;  %v2700_v15 = vadd.f32 0.5, %v2508_v51  ;;  %v9837_v18 = vpop.eup %9836  ;;  %v2409_v47 = vmul.f32 0.5, %v9835_v0  ;;  %v12471_v63 = vadd.f32 %v912_v22, %v11387_v40  ;;  %v17167_v40 = vld [vmem:[#allocation24_spill] sm:$0xff] }
 0x462   : > { %2880 = vmatpush.msrb.mxu3 %v2718_v11  ;;  %v12458_v11 = vld [vmem:[%s492_s15] ss:$0 sm:$0xff]  ;;  %v2698_v4 = vadd.f32 0.5, %v2506_v32 }
 0x463   : > { %v2601_v35 = vadd.f32 0.5, %v2409_v47 }
 0x464   : > { %2881 = vmatpush.msrb.mxu3 %v2716_v41  ;;  %v2013_v41 = vmul.f32 0.5, %v17163_v28 }
 0x466   : > { %2882 = vmatpush.msrb.mxu3 %v2714_v12  ;;  %v9839_v12 = vpop.eup %9838  ;;  %v12473_v26 = vpop.f32.mrf.mxu1 }
 0x467   : > { %3042 = vmatmul.f32.gmra.mxu2 %v12321_v43  ;;  %v17161_v43 = vld [vmem:[#allocation30_spill] sm:$0xff]  ;;  %v9841_v5 = vpop.eup %9840 }
 0x468   : > { %2883 = vmatpush.msrb.mxu3 %v2712_v45  ;;  %v2017_v60 = vmul.f32 0.5, %v17161_v43  ;;  %v3146_v45 = vmul.f32 %v12458_v11, %v3111_v38  ;;  %v2403_v31 = vmul.f32 0.5, %v9841_v5  ;;  %v17168_v43 = vld [vmem:[#allocation23_spill] sm:$0xff]  ;;  %v918_v21 = vpop.f32.mrf.mxu3 }
 0x46a   : > { %2884 = vmatpush.msrb.mxu3 %v2710_v10  ;;  %9842 = vtanh.f32 %v2017_v60  ;;  %v2405_v10 = vmul.f32 0.5, %v9839_v12  ;;  %v2003_v60 = vmul.f32 0.5, %v17168_v43  ;;  %v2595_v32 = vadd.f32 0.5, %v2403_v31  ;;  %v17173_v31 = vld [vmem:[#allocation55_spill] sm:$0xff] }
 0x46b   : > { %9844 = vtanh.f32 %v2015_v46  ;;  %v2001_v46 = vmul.f32 0.5, %v17169_v55 }
 0x46c   : > { %2885 = vmatpush.msrb.mxu3 %v2708_v23  ;;  %9846 = vtanh.f32 %v2013_v41  ;;  %v2007_v23 = vmul.f32 0.5, %v17166_v7  ;;  %v2597_v51 = vadd.f32 0.5, %v2405_v10 }
 0x46d   : > { %9848 = vtanh.f32 %v2011_v59 }
 0x46e   : > { %2886 = vmatpush.msrb.mxu3 %v2706_v58  ;;  %v2005_v58 = vmul.f32 0.5, %v17167_v40  ;;  %9850 = vtanh.f32 %v2009_v16  ;;  %v12493_v50 = vpop.f32.mrf.mxu1 }
 0x46f   : > { %3045 = vmatmul.f32.gmra.mxu2 %v12335_v30  ;;  %v2407_v30 = vmul.f32 0.5, %v9837_v18  ;;  %9852 = vtanh.f32 %v2007_v23  ;;  %v17170_v18 = vld [vmem:[#allocation21_spill] sm:$0xff] }
 0x470   : > { %2887 = vmatpush.msrb.mxu3 %v2704_v14  ;;  %v9843_v3 = vpop.eup %9842  ;;  %9854 = vtanh.f32 %v2005_v58  ;;  %v1999_v28 = vmul.f32 0.5, %v17170_v18  ;;  %v12505_v58 = vadd.f32 %v918_v21, %v11653_v53  ;;  %v3114_v53 = vld [vmem:[%s16974_s6 + $0x118] sm:$0xff] }
 0x471   : > { %v2599_v17 = vadd.f32 0.5, %v2407_v30  ;;  %v9845_v9 = vpop.eup %9844  ;;  %v2401_v19 = vmul.f32 0.5, %v9843_v3  ;;  %9856 = vtanh.f32 %v2003_v60  ;;  %v17171_v30 = vld [vmem:[#allocation20_spill] sm:$0xff]  ;;  %v17172_v3 = vld [vmem:[#allocation19_spill] sm:$0xff] }
 0x472   : > { %2888 = vmatpush.msrb.mxu3 %v2702_v62  ;;  %v9847_v14 = vpop.eup %9846  ;;  %v2399_v22 = vmul.f32 0.5, %v9845_v9  ;;  %v3147_v62 = vmul.f32 %v12458_v11, %v3112_v61  ;;  %9858 = vtanh.f32 %v2001_v46  ;;  %v1995_v7 = vmul.f32 0.5, %v17172_v3  ;;  %v17176_v46 = vld [vmem:[#allocation50_spill] sm:$0xff]  ;;  %v17178_v3 = vld [vmem:[#allocation48_spill] sm:$0xff] }
 0x473   : > { %v9849_v0 = vpop.eup %9848  ;;  %v2397_v41 = vmul.f32 0.5, %v9847_v14  ;;  %v2593_v38 = vadd.f32 0.5, %v2401_v19  ;;  %9860 = vtanh.f32 %v1999_v28  ;;  %v17174_v19 = vld [vmem:[#allocation53_spill] sm:$0xff]  ;;  %v2083_v18 = vmul.f32 0.5, %v17176_v46 }
 0x474   : > { %2889 = vmatpush.msrb.mxu3 %v2700_v15  ;;  %v12488_v15 = vadd.f32 %v915_v52, %v11633_v39  ;;  %v9851_v47 = vpop.eup %9850  ;;  %v2591_v12 = vadd.f32 0.5, %v2399_v22  ;;  %v1997_v39 = vmul.f32 0.5, %v17171_v30  ;;  %v2089_v52 = vmul.f32 0.5, %v17173_v31 }
 0x475   : > { %v9853_v59 = vpop.eup %9852  ;;  %v2393_v5 = vmul.f32 0.5, %v9851_v47  ;;  %v2589_v10 = vadd.f32 0.5, %v2397_v41 }
 0x476   : > { %2890 = vmatpush.msrb.mxu3 %v2698_v4  ;;  %v2395_v4 = vmul.f32 0.5, %v9849_v0  ;;  %v2391_v23 = vmul.f32 0.5, %v9853_v59  ;;  %9862 = vtanh.f32 %v1997_v39  ;;  %v17177_v59 = vld [vmem:[#allocation49_spill] sm:$0xff] }
 0x477   : > { %2891 = vmatmul.f32.vlgmr.msrb.gmra.mxu3 %v12471_v63  ;;  %8982 = vmatmul.msk.f32.vlgmr.msra.gmra.mxu2 %vm1063_vm2, %v3146_v45  ;;  %v3113_v45 = vld [vmem:[%s16974_s6 + $0x110] sm:$0xff]  ;;  %v2585_v14 = vadd.f32 0.5, %v2393_v5  ;;  %9864 = vtanh.f32 %v1995_v7  ;;  %v2081_v30 = vmul.f32 0.5, %v17177_v59  ;;  %v2079_v7 = vmul.f32 0.5, %v17178_v3 }
 0x478   : > { %2933 = vmatpush.msra.mxu3 %v2601_v35  ;;  %v9855_v35 = vpop.eup %9854  ;;  %v3148_v9 = vmul.f32 %v12458_v11, %v3113_v45  ;;  %9866 = vtanh.f32 %v2089_v52  ;;  %v2583_v0 = vadd.f32 0.5, %v2391_v23  ;;  %v3149_v45 = vmul.f32 %v12458_v11, %v3114_v53 }
 0x479   : > { %v9857_v40 = vpop.eup %9856  ;;  %v2389_v61 = vmul.f32 0.5, %v9855_v35 }
 0x47a   : > { %2934 = vmatpush.msra.mxu3 %v2599_v17  ;;  %v12482_v33 = vpop.f32.mrf.mxu2  ;;  %v2587_v17 = vadd.f32 0.5, %v2395_v4  ;;  %v9859_v43 = vpop.eup %9858  ;;  %v2387_v22 = vmul.f32 0.5, %v9857_v40 }
 0x47b   : > { %v9861_v60 = vpop.eup %9860  ;;  %v2385_v55 = vmul.f32 0.5, %v9859_v43  ;;  %v2581_v41 = vadd.f32 0.5, %v2389_v61  ;;  %v3115_v61 = vld [vmem:[%s16974_s6 + $0x120] sm:$0xff] }
 0x47c   : > { %2935 = vmatpush.msra.mxu3 %v2597_v51  ;;  %v2087_v51 = vmul.f32 0.5, %v17174_v19  ;;  %v9863_v47 = vpop.eup %9862  ;;  %v2383_v4 = vmul.f32 0.5, %v9861_v60  ;;  %v2579_v39 = vadd.f32 0.5, %v2387_v22 }
 0x47d   : > { %v9865_v5 = vpop.eup %9864  ;;  %v2381_v35 = vmul.f32 0.5, %v9863_v47  ;;  %v2577_v23 = vadd.f32 0.5, %v2385_v55  ;;  %v3150_v55 = vmul.f32 %v12458_v11, %v3115_v61  ;;  %v17186_v61 = vld [vmem:[#allocation41_spill] sm:$0xff] }
 0x47e   : > { %2936 = vmatpush.msra.mxu3 %v2595_v32  ;;  %v17175_v32 = vld [vmem:[#allocation51_spill] sm:$0xff]  ;;  %9868 = vtanh.f32 %v2087_v51  ;;  %v2379_v52 = vmul.f32 0.5, %v9865_v5  ;;  %v2575_v40 = vadd.f32 0.5, %v2383_v4  ;;  %v17180_v51 = vld [vmem:[#allocation46_spill] sm:$0xff]  ;;  %v17182_v4 = vld [vmem:[#allocation44_spill] sm:$0xff] }
 0x47f   : > { %2894 = vmatmul.f32.gmra.mxu3 %v12488_v15  ;;  %8983 = vmatmul.msk.f32.gmra.mxu2 %vm1063_vm2, %v3147_v62  ;;  %v2085_v62 = vmul.f32 0.5, %v17175_v32  ;;  %v2573_v60 = vadd.f32 0.5, %v2381_v35 }
 0x480   : > { %2937 = vmatpush.msra.mxu3 %v2593_v38  ;;  %v12517_v38 = vpop.f32.mrf.mxu1  ;;  %v2571_v53 = vadd.f32 0.5, %v2379_v52 }
 0x481   : > { %9870 = vtanh.f32 %v2085_v62  ;;  %v17181_v62 = vld [vmem:[#allocation45_spill] sm:$0xff] }
 0x482   : > { %2938 = vmatpush.msra.mxu3 %v2591_v12  ;;  %v12499_v16 = vpop.f32.mrf.mxu2  ;;  %v921_v12 = vpop.f32.mrf.mxu3  ;;  %9872 = vtanh.f32 %v2083_v18 }
 0x483   : > { %v12522_v21 = vadd.f32 %v921_v12, %v11680_v29  ;;  %9874 = vtanh.f32 %v2081_v30  ;;  %v2071_v12 = vmul.f32 0.5, %v17182_v4  ;;  %v17189_v4 = vld [vmem:[#allocation15_spill] sm:$0xff] }
 0x484   : > { %2939 = vmatpush.msra.mxu3 %v2589_v10  ;;  %v9867_v10 = vpop.eup %9866  ;;  %9876 = vtanh.f32 %v2079_v7  ;;  %v3116_v7 = vld [vmem:[%s16974_s6 + $0x128] sm:$0xff] }
 0x485   : > { %v9869_v31 = vpop.eup %9868  ;;  %v2473_v29 = vmul.f32 0.5, %v9867_v10  ;;  %v17184_v10 = vld [vmem:[#allocation32_spill] sm:$0xff] }
 0x486   : > { %2940 = vmatpush.msra.mxu3 %v2587_v17  ;;  %v17179_v17 = vld [vmem:[#allocation47_spill] sm:$0xff]  ;;  %v2471_v22 = vmul.f32 0.5, %v9869_v31  ;;  %v17185_v31 = vld [vmem:[#allocation42_spill] sm:$0xff] }
 0x487   : > { %2897 = vmatmul.f32.gmra.mxu3 %v12505_v58  ;;  %8984 = vmatmul.msk.f32.gmra.mxu2 %vm1063_vm2, %v3148_v9  ;;  %v2077_v9 = vmul.f32 0.5, %v17179_v17  ;;  %v9871_v19 = vpop.eup %9870  ;;  %v2067_v52 = vmul.f32 0.5, %v17185_v31 }
 0x488   : > { %2941 = vmatpush.msra.mxu3 %v2585_v14  ;;  %v2075_v14 = vmul.f32 0.5, %v17180_v51  ;;  %v9873_v32 = vpop.eup %9872  ;;  %v1956_v46 = vpop.f32.mrf.mxu1  ;;  %v2469_v18 = vmul.f32 0.5, %v9871_v19  ;;  %v2663_v30 = vadd.f32 0.5, %v2471_v22  ;;  %v2065_v19 = vmul.f32 0.5, %v17186_v61 }
 0x489   : > { %9878 = vtanh.f32 %v2077_v9  ;;  %v9875_v47 = vpop.eup %9874  ;;  %v2467_v59 = vmul.f32 0.5, %v9873_v32  ;;  %v3151_v51 = vmul.f32 %v12458_v11, %v3116_v7  ;;  %v17187_v32 = vld [vmem:[#allocation40_spill] sm:$0xff]  ;;  %v2151_v31 = vmul.f32 0.5, %v1956_v46 }
 0x48a   : > { %2942 = vmatpush.msra.mxu3 %v2583_v0  ;;  %v12515_v28 = vpop.f32.mrf.mxu2  ;;  %v2073_v0 = vmul.f32 0.5, %v17181_v62  ;;  %9880 = vtanh.f32 %v2075_v14  ;;  %v2465_v35 = vmul.f32 0.5, %v9875_v47  ;;  %v2661_v3 = vadd.f32 0.5, %v2469_v18 }
 0x48b   : > { %v2063_v62 = vmul.f32 0.5, %v17187_v32  ;;  %v2149_v61 = vmul.f32 0.5, %v12517_v38  ;;  %v2145_v38 = vmul.f32 0.5, %v12473_v26 }
 0x48c   : > { %2943 = vmatpush.msra.mxu3 %v2581_v41  ;;  %v2665_v41 = vadd.f32 0.5, %v2473_v29  ;;  %9882 = vtanh.f32 %v2073_v0 }
 0x48d   : > { %9884 = vtanh.f32 %v2071_v12 }
 0x48e   : > { %2944 = vmatpush.msra.mxu3 %v2579_v39  ;;  %v9877_v39 = vpop.eup %9876 }
 0x48f   : > { %2900 = vmatmul.f32.gmra.mxu3 %v12522_v21  ;;  %8985 = vmatmul.msk.f32.gmra.mxu2 %vm1063_vm2, %v3149_v45  ;;  %v17183_v45 = vld [vmem:[#allocation43_spill] sm:$0xff]  ;;  %v2463_v17 = vmul.f32 0.5, %v9877_v39 }
 0x490   : > { %2945 = vmatpush.msra.mxu3 %v2577_v23  ;;  %v2069_v5 = vmul.f32 0.5, %v17183_v45  ;;  %v9879_v23 = vpop.eup %9878  ;;  %v1959_v0 = vpop.f32.mrf.mxu1 }
 0x491   : > { %v9881_v29 = vpop.eup %9880  ;;  %v2461_v14 = vmul.f32 0.5, %v9879_v23  ;;  %v2153_v39 = vmul.f32 0.5, %v1959_v0 }
 0x492   : > { %2946 = vmatpush.msra.mxu3 %v2575_v40  ;;  %v12532_v43 = vpop.f32.mrf.mxu2  ;;  %v2659_v40 = vadd.f32 0.5, %v2467_v59  ;;  %9886 = vtanh.f32 %v2069_v5  ;;  %v9883_v22 = vpop.eup %9882  ;;  %v17190_v5 = vld [vmem:[#allocation38_spill] sm:$0xff] }
 0x493   : > { %9888 = vtanh.f32 %v2067_v52  ;;  %v9885_v18 = vpop.eup %9884  ;;  %v2457_v12 = vmul.f32 0.5, %v9883_v22  ;;  %v2653_v59 = vadd.f32 0.5, %v2461_v14  ;;  %v17191_v22 = vld [vmem:[#allocation36_spill] sm:$0xff] }
 0x494   : > { %2947 = vmatpush.msra.mxu3 %v2573_v60  ;;  %v2657_v60 = vadd.f32 0.5, %v2465_v35  ;;  %9890 = vtanh.f32 %v2065_v19  ;;  %v2455_v35 = vmul.f32 0.5, %v9885_v18 }
 0x495   : > { %9892 = vtanh.f32 %v2063_v62  ;;  %v3118_v62 = vld [vmem:[%s16974_s6 + $0x138] sm:$0xff] }
 0x496   : > { %2948 = vmatpush.msra.mxu3 %v2571_v53  ;;  %v2459_v53 = vmul.f32 0.5, %v9881_v29 }
 0x497   : > { %2949 = vmatmul.f32.vlgmr.msra.gmra.mxu3 %v17184_v10  ;;  %8986 = vmatmul.msk.f32.gmra.mxu2 %vm1063_vm2, %v3150_v55  ;;  %v2655_v55 = vadd.f32 0.5, %v2463_v17  ;;  %v2059_v10 = vmul.f32 0.5, %v17190_v5 }
 0x498   : > { %2991 = vmatpush.msrb.mxu3 %v2665_v41  ;;  %v17188_v41 = vld [vmem:[#allocation39_spill] sm:$0xff]  ;;  %v9887_v45 = vpop.eup %9886  ;;  %v2651_v7 = vadd.f32 0.5, %v2459_v53 }
 0x499   : > { %v2061_v47 = vmul.f32 0.5, %v17188_v41  ;;  %v9889_v23 = vpop.eup %9888  ;;  %v2453_v17 = vmul.f32 0.5, %v9887_v45 }
 0x49a   : > { %2992 = vmatpush.msrb.mxu3 %v2663_v30  ;;  %v12544_v9 = vpop.f32.mrf.mxu2  ;;  %v3117_v30 = vld [vmem:[%s16974_s6 + $0x130] sm:$0xff]  ;;  %v9891_v29 = vpop.eup %9890  ;;  %v2451_v19 = vmul.f32 0.5, %v9889_v23 }
 0x49b   : > { %9894 = vtanh.f32 %v2061_v47  ;;  %v3152_v52 = vmul.f32 %v12458_v11, %v3117_v30  ;;  %v9893_v14 = vpop.eup %9892  ;;  %v2449_v46 = vmul.f32 0.5, %v9891_v29  ;;  %v2645_v32 = vadd.f32 0.5, %v2453_v17 }
 0x49c   : > { %2993 = vmatpush.msrb.mxu3 %v2661_v3  ;;  %9896 = vtanh.f32 %v2153_v39  ;;  %v2143_v47 = vmul.f32 0.5, %v12449_v56  ;;  %v2141_v39 = vmul.f32 0.5, %v12440_v2  ;;  %v3119_v2 = vld [vmem:[%s16974_s6 + $0x140] sm:$0xff] }
 0x49d   : > { %9898 = vtanh.f32 %v2059_v10 }
 0x49e   : > { %2994 = vmatpush.msrb.mxu3 %v2659_v40  ;;  %v2649_v40 = vadd.f32 0.5, %v2457_v12  ;;  %9900 = vtanh.f32 %v2151_v31 }
 0x49f   : > { %2952 = vmatmul.f32.gmra.mxu3 %v17189_v4  ;;  %8987 = vmatmul.msk.f32.gmra.mxu2 %vm1063_vm2, %v3151_v51  ;;  %v2647_v51 = vadd.f32 0.5, %v2455_v35  ;;  %9902 = vtanh.f32 %v2149_v61  ;;  %v3153_v4 = vmul.f32 %v12458_v11, %v3118_v62  ;;  %v2139_v35 = vmul.f32 0.5, %v12424_v8 }
 0x4a0   : > { %2995 = vmatpush.msrb.mxu3 %v2657_v60  ;;  %v2147_v60 = vmul.f32 0.5, %v12493_v50  ;;  %v2643_v50 = vadd.f32 0.5, %v2451_v19  ;;  %v2135_v19 = vmul.f32 0.5, %v12399_v37 }
 0x4a1   : > { %v9895_v0 = vpop.eup %9894 }
 0x4a2   : > { %2996 = vmatpush.msrb.mxu3 %v2655_v55  ;;  %v12556_v3 = vpop.f32.mrf.mxu2  ;;  %v9897_v53 = vpop.eup %9896  ;;  %v2447_v55 = vmul.f32 0.5, %v9893_v14  ;;  %9904 = vtanh.f32 %v2147_v60  ;;  %v2445_v12 = vmul.f32 0.5, %v9895_v0  ;;  %v2131_v0 = vmul.f32 0.5, %v12382_v34 }
 0x4a3   : > { %v9899_v41 = vpop.eup %9898  ;;  %9906 = vtanh.f32 %v2145_v38  ;;  %v2537_v26 = vmul.f32 0.5, %v9897_v53  ;;  %v17193_v38 = vld [vmem:[#allocation6_spill] sm:$0xff] }
 0x4a4   : > { %2997 = vmatpush.msrb.mxu3 %v2653_v59  ;;  %v2641_v59 = vadd.f32 0.5, %v2449_v46  ;;  %v9901_v30 = vpop.eup %9900  ;;  %v2443_v45 = vmul.f32 0.5, %v9899_v41  ;;  %v2639_v5 = vadd.f32 0.5, %v2447_v55  ;;  %9908 = vtanh.f32 %v2143_v47  ;;  %v3120_v55 = vld [vmem:[%s16974_s6 + $0x148] sm:$0xff] }
 0x4a5   : > { %v9903_v10 = vpop.eup %9902  ;;  %v2535_v56 = vmul.f32 0.5, %v9901_v30  ;;  %v2637_v23 = vadd.f32 0.5, %v2445_v12  ;;  %9910 = vtanh.f32 %v2141_v39  ;;  %v2729_v17 = vadd.f32 0.5, %v2537_v26 }
 0x4a6   : > { %2998 = vmatpush.msrb.mxu3 %v2651_v7  ;;  %v17192_v7 = vld [vmem:[#allocation37_spill] sm:$0xff]  ;;  %v2635_v8 = vadd.f32 0.5, %v2443_v45  ;;  %9912 = vtanh.f32 %v2139_v35  ;;  %v2133_v46 = vmul.f32 0.5, %v12391_v1  ;;  %v2127_v12 = vmul.f32 0.5, %v12362_v44 }
 0x4a7   : > { %2955 = vmatmul.f32.gmra.mxu3 %v17191_v22  ;;  %8988 = vmatmul.msk.f32.gmra.mxu2 %vm1063_vm2, %v3152_v52  ;;  %v2137_v52 = vmul.f32 0.5, %v12407_v20  ;;  %v2727_v60 = vadd.f32 0.5, %v2535_v56  ;;  %v2125_v45 = vmul.f32 0.5, %v12353_v48  ;;  %v2123_v35 = vmul.f32 0.5, %v12344_v42 }
 0x4a8   : > { %2999 = vmatpush.msrb.mxu3 %v2649_v40  ;;  %v9905_v31 = vpop.eup %9904  ;;  %v2533_v40 = vmul.f32 0.5, %v9903_v10 }
 0x4a9   : > { %v9907_v61 = vpop.eup %9906  ;;  %v2531_v14 = vmul.f32 0.5, %v9905_v31  ;;  %9914 = vtanh.f32 %v2137_v52 }
 0x4aa   : > { %3000 = vmatpush.msrb.mxu3 %v2647_v51  ;;  %v12567_v18 = vpop.f32.mrf.mxu2  ;;  %v3154_v51 = vmul.f32 %v12458_v11, %v3119_v2  ;;  %v9909_v22 = vpop.eup %9908  ;;  %v2529_v20 = vmul.f32 0.5, %v9907_v61  ;;  %9916 = vtanh.f32 %v2135_v19 }
 0x4ab   : > { %v9911_v62 = vpop.eup %9910  ;;  %v2527_v37 = vmul.f32 0.5, %v9909_v22  ;;  %v2723_v53 = vadd.f32 0.5, %v2531_v14  ;;  %9918 = vtanh.f32 %v2133_v46 }
 0x4ac   : > { %3001 = vmatpush.msrb.mxu3 %v2645_v32  ;;  %v2725_v32 = vadd.f32 0.5, %v2533_v40  ;;  %v9913_v1 = vpop.eup %9912  ;;  %v2525_v41 = vmul.f32 0.5, %v9911_v62  ;;  %v2721_v34 = vadd.f32 0.5, %v2529_v20  ;;  %9920 = vtanh.f32 %v2131_v0  ;;  %v3122_v20 = vld [vmem:[%s16974_s6 + $0x158] sm:$0xff] }
 0x4ad   : > { %v2523_v30 = vmul.f32 0.5, %v9913_v1  ;;  %v2719_v39 = vadd.f32 0.5, %v2527_v37  ;;  %v3157_v37 = vmul.f32 %v12458_v11, %v3122_v20 }
 0x4ae   : > { %3002 = vmatpush.msrb.mxu3 %v2643_v50  ;;  %v2129_v50 = vmul.f32 0.5, %v12371_v49 }
 0x4af   : > { %2958 = vmatmul.f32.gmra.mxu3 %v17192_v7  ;;  %8989 = vmatmul.msk.f32.gmra.mxu2 %vm1063_vm2, %v3153_v4  ;;  %v9915_v4 = vpop.eup %9914  ;;  %v17194_v7 = vld [vmem:[#allocation52_spill] sm:$0xff]  ;;  %v2715_v56 = vadd.f32 0.5, %v2523_v30 }
 0x4b0   : > { %3003 = vmatpush.msrb.mxu3 %v2641_v59  ;;  %v3155_v59 = vmul.f32 %v12458_v11, %v3120_v55  ;;  %v9917_v26 = vpop.eup %9916  ;;  %9922 = vtanh.f32 %v2129_v50  ;;  %v2521_v49 = vmul.f32 0.5, %v9915_v4  ;;  %v17196_v50 = vld [vmem:[#allocation56_spill] sm:$0xff] }
 0x4b1   : > { %v9919_v10 = vpop.eup %9918  ;;  %9924 = vtanh.f32 %v2127_v12  ;;  %v2519_v44 = vmul.f32 0.5, %v9917_v26  ;;  %v3125_v26 = vld [vmem:[%s16974_s6 + $0x170] sm:$0xff] }
 0x4b2   : > { %3004 = vmatpush.msrb.mxu3 %v2639_v5  ;;  %v12579_v29 = vpop.f32.mrf.mxu2  ;;  %v2717_v5 = vadd.f32 0.5, %v2525_v41  ;;  %v9921_v48 = vpop.eup %9920  ;;  %9926 = vtanh.f32 %v2125_v45  ;;  %v2517_v2 = vmul.f32 0.5, %v9919_v10  ;;  %v2713_v52 = vadd.f32 0.5, %v2521_v49  ;;  %v3126_v49 = vld [vmem:[%s16974_s6 + $0x178] sm:$0xff]  ;;  %v3127_v10 = vld [vmem:[%s16974_s6 + $0x180] sm:$0xff] }
 0x4b3   : > { %9928 = vtanh.f32 %v2123_v35  ;;  %v2515_v40 = vmul.f32 0.5, %v9921_v48 }
 0x4b4   : > { %3005 = vmatpush.msrb.mxu3 %v2637_v23  ;;  %v3121_v23 = vld [vmem:[%s16974_s6 + $0x150] sm:$0xff] }
 0x4b5   : > { %v2707_v46 = vadd.f32 0.5, %v2515_v40 }
 0x4b6   : > { %3006 = vmatpush.msrb.mxu3 %v2635_v8  ;;  %v9923_v42 = vpop.eup %9922  ;;  %v2711_v8 = vadd.f32 0.5, %v2519_v44 }
 0x4b7   : > { %3007 = vmatmul.f32.vlgmr.msrb.gmra.mxu3 %v17193_v38  ;;  %8990 = vmatmul.msk.f32.gmra.mxu2 %vm1063_vm2, %v3154_v51  ;;  %v9925_v61 = vpop.eup %9924  ;;  %v2513_v19 = vmul.f32 0.5, %v9923_v42  ;;  %v2709_v51 = vadd.f32 0.5, %v2517_v2  ;;  %v3130_v2 = vld [vmem:[%s16974_s6 + $0x198] sm:$0xff] }
 0x4b8   : > { %3049 = vmatpush.msra.mxu3 %v2729_v17  ;;  %v3156_v17 = vmul.f32 %v12458_v11, %v3121_v23  ;;  %v9927_v14 = vpop.eup %9926  ;;  %v2511_v22 = vmul.f32 0.5, %v9925_v61  ;;  %v3165_v42 = vmul.f32 %v12458_v11, %v3130_v2  ;;  %v3132_v61 = vld [vmem:[%s16974_s6 + $0x1a8] sm:$0xff] }
 0x4b9   : > { %v2509_v62 = vmul.f32 0.5, %v9927_v14  ;;  %v2705_v38 = vadd.f32 0.5, %v2513_v19  ;;  %v3133_v14 = vld [vmem:[%s16974_s6 + $0x1b0] sm:$0xff] }
 0x4ba   : > { %3050 = vmatpush.msra.mxu3 %v2727_v60  ;;  %v12591_v47 = vpop.f32.mrf.mxu2  ;;  %v17195_v60 = vld [vmem:[#allocation54_spill] sm:$0xff]  ;;  %v2703_v55 = vadd.f32 0.5, %v2511_v22  ;;  %v3168_v22 = vmul.f32 %v12458_v11, %v3133_v14 }
 0x4bb   : > { %v2701_v1 = vadd.f32 0.5, %v2509_v62  ;;  %v3135_v62 = vld [vmem:[%s16974_s6 + $0x1c0] sm:$0xff] }
 0x4bc   : > { %3051 = vmatpush.msra.mxu3 %v2725_v32  ;;  %v9929_v32 = vpop.eup %9928 }
 0x4be   : > { %3052 = vmatpush.msra.mxu3 %v2723_v53  ;;  %v2507_v53 = vmul.f32 0.5, %v9929_v32 }
 0x4bf   : > { %3010 = vmatmul.f32.gmra.mxu3 %v17194_v7  ;;  %8991 = vmatmul.msk.f32.gmra.mxu2 %vm1063_vm2, %v3155_v59  ;;  %v3124_v59 = vld [vmem:[%s16974_s6 + $0x168] sm:$0xff] }
 0x4c0   : > { %3053 = vmatpush.msra.mxu3 %v2721_v34  ;;  %v2699_v41 = vadd.f32 0.5, %v2507_v53  ;;  %v3123_v34 = vld [vmem:[%s16974_s6 + $0x160] sm:$0xff]  ;;  %v3128_v7 = vld [vmem:[%s16974_s6 + $0x188] sm:$0xff]  ;;  %v12707_v53 = vpop.f32.mrf.mxu3 }
 0x4c1   : > { %v3158_v12 = vmul.f32 %v12458_v11, %v3123_v34  ;;  %v3137_v34 = vld [vmem:[%s16974_s6 + $0x1d0] sm:$0xff] }
 0x4c2   : > { %3054 = vmatpush.msra.mxu3 %v2719_v39  ;;  %v12602_v31 = vpop.f32.mrf.mxu2  ;;  %v3159_v39 = vmul.f32 %v12458_v11, %v3124_v59  ;;  %v3172_v59 = vmul.f32 %v12458_v11, %v3137_v34 }
 0x4c4   : > { %3055 = vmatpush.msra.mxu3 %v2717_v5 }
 0x4c6   : > { %3056 = vmatpush.msra.mxu3 %v2715_v56  ;;  %v3129_v56 = vld [vmem:[%s16974_s6 + $0x190] sm:$0xff] }
 0x4c7   : > { %3013 = vmatmul.f32.gmra.mxu3 %v17195_v60  ;;  %8992 = vmatmul.msk.f32.gmra.mxu2 %vm1063_vm2, %v3156_v17  ;;  %v3164_v48 = vmul.f32 %v12458_v11, %v3129_v56  ;;  %v3131_v17 = vld [vmem:[%s16974_s6 + $0x1a0] sm:$0xff] }
 0x4c8   : > { %3057 = vmatpush.msra.mxu3 %v2713_v52 }
 0x4ca   : > { %3058 = vmatpush.msra.mxu3 %v2711_v8  ;;  %v12610_v0 = vpop.f32.mrf.mxu2  ;;  %v3166_v8 = vmul.f32 %v12458_v11, %v3131_v17 }
 0x4cc   : > { %3059 = vmatpush.msra.mxu3 %v2709_v51  ;;  %v3167_v51 = vmul.f32 %v12458_v11, %v3132_v61 }
 0x4ce   : > { %3060 = vmatpush.msra.mxu3 %v2707_v46  ;;  %v3134_v46 = vld [vmem:[%s16974_s6 + $0x1b8] sm:$0xff] }
 0x4cf   : > { %3016 = vmatmul.f32.gmra.mxu3 %v17196_v50  ;;  %8993 = vmatmul.msk.f32.gmra.mxu2 %vm1063_vm2, %v3157_v37  ;;  %v3169_v32 = vmul.f32 %v12458_v11, %v3134_v46  ;;  %v3170_v37 = vmul.f32 %v12458_v11, %v3135_v62 }
 0x4d0   : > { %3061 = vmatpush.msra.mxu3 %v2705_v38 }
 0x4d2   : > { %3062 = vmatpush.msra.mxu3 %v2703_v55  ;;  %v12618_v4 = vpop.f32.mrf.mxu2  ;;  %v3136_v55 = vld [vmem:[%s16974_s6 + $0x1c8] sm:$0xff] }
 0x4d3   : > { %v3171_v50 = vmul.f32 %v12458_v11, %v3136_v55 }
 0x4d4   : > { %3063 = vmatpush.msra.mxu3 %v2701_v1 }
 0x4d6   : > { %3064 = vmatpush.msra.mxu3 %v2699_v41  ;;  %v12714_v41 = vpop.f32.mrf.mxu3 }
 0x4d7   : > { %3065 = vmatmul.f32.vlgmr.msra.gmra.mxu3 %v12471_v63  ;;  %8994 = vmatmul.msk.f32.gmra.mxu2 %vm1063_vm2, %v3158_v12  ;;  %v3160_v63 = vmul.f32 %v12458_v11, %v3125_v26  ;;  %v3138_v26 = vld [vmem:[%s16974_s6 + $0x1d8] sm:$0xff] }
 0x4da   : > { %v12626_v30 = vpop.f32.mrf.mxu2 }
 0x4df   : > { %3068 = vmatmul.f32.gmra.mxu3 %v12488_v15  ;;  %8995 = vmatmul.msk.f32.gmra.mxu2 %vm1063_vm2, %v3159_v39  ;;  %v3161_v15 = vmul.f32 %v12458_v11, %v3126_v49  ;;  %v12721_v39 = vpop.f32.mrf.mxu3  ;;  %v3173_v49 = vmul.f32 %v12458_v11, %v3138_v26 }
 0x4e2   : > { %v12634_v45 = vpop.f32.mrf.mxu2 }
 0x4e7   : > { %3071 = vmatmul.f32.gmra.mxu3 %v12505_v58  ;;  %8996 = vmatmul.msk.f32.gmra.mxu2 %vm1063_vm2, %v3160_v63  ;;  %v3162_v58 = vmul.f32 %v12458_v11, %v3127_v10  ;;  %v12732_v10 = vpop.f32.mrf.mxu3 }
 0x4ea   : > { %v12642_v5 = vpop.f32.mrf.mxu2 }
 0x4ef   : > { %3074 = vmatmul.f32.gmra.mxu3 %v12522_v21  ;;  %8997 = vmatmul.msk.f32.gmra.mxu2 %vm1063_vm2, %v3161_v15  ;;  %v3163_v21 = vmul.f32 %v12458_v11, %v3128_v7  ;;  %v3139_v15 = vld [vmem:[%s16974_s6 + $0x1e0] sm:$0xff]  ;;  %v2834_v56 = vpop.f32.mrf.mxu3 }
 0x4f0   : > { %v3174_v7 = vmul.f32 %v12458_v11, %v3139_v15 }
 0x4f2   : > { %v12650_v35 = vpop.f32.mrf.mxu2 }
 0x4f7   : > { %8998 = vmatmul.msk.f32.gmra.mxu2 %vm1063_vm2, %v3162_v58 }
 0x4fa   : > { %v12657_v44 = vpop.f32.mrf.mxu2 }
 0x4ff   : > { %8999 = vmatmul.msk.f32.gmra.mxu2 %vm1063_vm2, %v3163_v21  ;;  %v3140_v21 = vld [vmem:[%s16974_s6 + $0x1e8] sm:$0xff] }
 0x500   : > { %v3175_v2 = vmul.f32 %v12458_v11, %v3140_v21 }
 0x502   : > { %v12664_v23 = vpop.f32.mrf.mxu2 }
 0x507   : > { %9000 = vmatmul.msk.f32.gmra.mxu2 %vm1063_vm2, %v3164_v48 }
 0x50a   : > { %v12671_v52 = vpop.f32.mrf.mxu2 }
 0x50f   : > { %9001 = vmatmul.msk.f32.gmra.mxu2 %vm1063_vm2, %v3165_v42  ;;  %v3141_v42 = vld [vmem:[%s16974_s6 + $0x1f0] sm:$0xff] }
 0x510   : > { %v3176_v61 = vmul.f32 %v12458_v11, %v3141_v42 }
 0x512   : > { %v12678_v40 = vpop.f32.mrf.mxu2 }
 0x517   : > { %9002 = vmatmul.msk.f32.gmra.mxu2 %vm1063_vm2, %v3166_v8  ;;  %v12744_v8 = vpop.f32.mrf.mxu3 }
 0x51a   : > { %v12685_v19 = vpop.f32.mrf.mxu2 }
 0x51f   : > { %9003 = vmatmul.msk.f32.gmra.mxu2 %vm1063_vm2, %v3167_v51  ;;  %v3142_v51 = vld [vmem:[%s16974_s6 + $0x1f8] sm:$0xff]  ;;  %v12752_v46 = vpop.f32.mrf.mxu3 }
 0x522   : > { %v12692_v60 = vpop.f32.mrf.mxu2 }
 0x527   : > { %9004 = vmatmul.msk.f32.gmra.mxu2 %vm1063_vm2, %v3168_v22  ;;  %v3177_v22 = vmul.f32 %v12458_v11, %v3142_v51 }
 0x52a   : > { %v12699_v20 = vpop.f32.mrf.mxu2 }
 0x52f   : > { %9005 = vmatmul.msk.f32.gmra.mxu2 %vm1063_vm2, %v3169_v32 }
 0x532   : > { %v3316_v38 = vpop.f32.mrf.mxu2 }
 0x537   : > { %9006 = vmatmul.msk.f32.gmra.mxu2 %vm1063_vm2, %v3170_v37 }
 0x53a   : > { %v3319_v1 = vpop.f32.mrf.mxu2 }
 0x53f   : > { %9007 = vmatmul.msk.f32.gmra.mxu2 %vm1063_vm2, %v3171_v50 }
 0x542   : > { %v3322_v12 = vpop.f32.mrf.mxu2 }
 0x543   : > { %v3400_v15 = vmul.f32 0.5, %v3322_v12  ;;  %v2777_v12 = vadd.f32 %v12707_v53, %v12373_v6 }
 0x547   : > { %9008 = vmatmul.msk.f32.gmra.mxu2 %vm1063_vm2, %v3172_v59  ;;  %v12755_v59 = vpop.f32.mrf.mxu3 }
 0x54a   : > { %v3325_v63 = vpop.f32.mrf.mxu2 }
 0x54b   : > { %v3401_v26 = vmul.f32 0.5, %v3325_v63  ;;  %v3397_v63 = vmul.f32 0.5, %v12699_v20  ;;  %v3395_v20 = vmul.f32 0.5, %v12685_v19  ;;  %v3393_v19 = vmul.f32 0.5, %v12671_v52 }
 0x54c   : > { %v3391_v52 = vmul.f32 0.5, %v12657_v44 }
 0x54f   : > { %9009 = vmatmul.msk.f32.gmra.mxu2 %vm1063_vm2, %v3173_v49 }
 0x552   : > { %v3328_v58 = vpop.f32.mrf.mxu2 }
 0x553   : > { %v3402_v34 = vmul.f32 0.5, %v3328_v58 }
 0x557   : > { %9010 = vmatmul.msk.f32.gmra.mxu2 %vm1063_vm2, %v3174_v7 }
 0x55a   : > { %v3331_v48 = vpop.f32.mrf.mxu2 }
 0x55b   : > { %v3403_v55 = vmul.f32 0.5, %v3331_v48 }
 0x55f   : > { %9011 = vmatmul.msk.f32.gmra.mxu2 %vm1063_vm2, %v3175_v2  ;;  %v3399_v2 = vmul.f32 0.5, %v3319_v1 }
 0x562   : > { %v3334_v17 = vpop.f32.mrf.mxu2 }
 0x563   : > { %v3404_v62 = vmul.f32 0.5, %v3334_v17 }
 0x567   : > { %9012 = vmatmul.msk.f32.gmra.mxu2 %vm1063_vm2, %v3176_v61  ;;  %v3398_v61 = vmul.f32 0.5, %v3316_v38  ;;  %v2806_v38 = vadd.f32 %v12416_v36, %v2777_v12  ;;  %v2780_v36 = vadd.f32 %v12714_v41, %v12384_v27 }
 0x569   : > { %v2809_v27 = vadd.f32 %v12435_v54, %v2780_v36  ;;  %v2783_v54 = vadd.f32 %v12721_v39, %v12394_v25 }
 0x56a   : > { %v3337_v14 = vpop.f32.mrf.mxu2 }
 0x56b   : > { %v3405_v32 = vmul.f32 0.5, %v3337_v14 }
 0x56d   : > { %9930 = vtanh.f32 %v3405_v32 }
 0x56e   : > { %9932 = vtanh.f32 %v3404_v62 }
 0x56f   : > { %9013 = vmatmul.msk.f32.gmra.mxu2 %vm1063_vm2, %v3177_v22  ;;  %v2892_v22 = vpop.f32.mrf.mxu3 }
 0x572   : > { %v3340_v37 = vpop.f32.mrf.mxu2 }
 0x573   : > { %v3406_v50 = vmul.f32 0.5, %v3340_v37  ;;  %v9931_v49 = vpop.eup %9930  ;;  %v3396_v37 = vmul.f32 0.5, %v12692_v60 }
 0x574   : > { %v9933_v11 = vpop.eup %9932  ;;  %v3469_v42 = vmul.f32 0.5, %v9931_v49  ;;  %v2835_v49 = vadd.f32 %v2834_v56, %v2806_v38 }
 0x575   : > { %9934 = vtanh.f32 %v3406_v50  ;;  %v3468_v58 = vmul.f32 0.5, %v9933_v11  ;;  %v3394_v11 = vmul.f32 0.5, %v12678_v40  ;;  %v3392_v40 = vmul.f32 0.5, %v12664_v23 }
 0x576   : > { %9936 = vtanh.f32 %v3403_v55  ;;  %v3501_v62 = vadd.f32 0.5, %v3469_v42  ;;  %v2864_v60 = vadd.f32 %v12482_v33, %v2835_v49 }
 0x577   : > { %9938 = vtanh.f32 %v3402_v34  ;;  %v3500_v34 = vadd.f32 0.5, %v3468_v58  ;;  %v2895_v58 = vpop.f32.mrf.mxu3 }
 0x578   : > { %9940 = vtanh.f32 %v3401_v26  ;;  %v2893_v56 = vadd.f32 %v2892_v22, %v2864_v60  ;;  %v2838_v22 = vadd.f32 %v12744_v8, %v2809_v27 }
 0x579   : > { %9942 = vtanh.f32 %v3400_v15 }
 0x57a   : > { %v12757_v7 = vpop.f32.mrf.mxu2  ;;  %9944 = vtanh.f32 %v3399_v2  ;;  %v2867_v23 = vadd.f32 %v12499_v16, %v2838_v22 }
 0x57b   : > { %v9935_v21 = vpop.eup %9934  ;;  %9946 = vtanh.f32 %v3398_v61 }
 0x57c   : > { %v3470_v48 = vmul.f32 0.5, %v9935_v21  ;;  %v9937_v17 = vpop.eup %9936  ;;  %9948 = vtanh.f32 %v3397_v63  ;;  %v3078_v63 = vmul.f32 0.5, %v2893_v56  ;;  %v2896_v44 = vadd.f32 %v2895_v58, %v2867_v23 }
 0x57d   : > { %v9939_v14 = vpop.eup %9938  ;;  %v3467_v32 = vmul.f32 0.5, %v9937_v17  ;;  %9950 = vtanh.f32 %v3396_v37 }
 0x57e   : > { %v3502_v51 = vadd.f32 0.5, %v3470_v48  ;;  %v9941_v1 = vpop.eup %9940  ;;  %v3466_v55 = vmul.f32 0.5, %v9939_v14  ;;  %9952 = vtanh.f32 %v3395_v20 }
 0x57f   : > { %v9943_v26 = vpop.eup %9942  ;;  %v3465_v6 = vmul.f32 0.5, %v9941_v1  ;;  %v3499_v53 = vadd.f32 0.5, %v3467_v32  ;;  %9954 = vtanh.f32 %v3394_v11  ;;  %v2898_v16 = vpop.f32.mrf.mxu3 }
 0x580   : > { %3519 = vmatpush.msrb.mxu3 %v3502_v51  ;;  %v9945_v15 = vpop.eup %9944  ;;  %v3464_v21 = vmul.f32 0.5, %v9943_v26  ;;  %v3498_v2 = vadd.f32 0.5, %v3466_v55  ;;  %9956 = vtanh.f32 %v3393_v19  ;;  %v2812_v26 = vadd.f32 %v12444_v24, %v2783_v54 }
 0x581   : > { %v9947_v42 = vpop.eup %9946  ;;  %v3463_v48 = vmul.f32 0.5, %v9945_v15  ;;  %v3497_v17 = vadd.f32 0.5, %v3465_v6  ;;  %9958 = vtanh.f32 %v3392_v40 }
 0x582   : > { %v12764_v50 = vpop.f32.mrf.mxu2  ;;  %3520 = vmatpush.msrb.mxu3 %v3501_v62  ;;  %v9949_v61 = vpop.eup %9948  ;;  %v3462_v41 = vmul.f32 0.5, %v9947_v42  ;;  %v3496_v51 = vadd.f32 0.5, %v3464_v21  ;;  %9960 = vtanh.f32 %v3391_v52  ;;  %v2841_v6 = vadd.f32 %v12752_v46, %v2812_v26 }
 0x583   : > { %v9951_v14 = vpop.eup %9950  ;;  %v3461_v12 = vmul.f32 0.5, %v9949_v61  ;;  %v3495_v32 = vadd.f32 0.5, %v3463_v48  ;;  %9962 = vtanh.f32 %v3078_v63  ;;  %v2786_v21 = vadd.f32 %v12732_v10, %v12403_v13 }
 0x584   : > { %3521 = vmatpush.msrb.mxu3 %v3500_v34  ;;  %v9953_v62 = vpop.eup %9952  ;;  %v3460_v1 = vmul.f32 0.5, %v9951_v14  ;;  %v3494_v37 = vadd.f32 0.5, %v3462_v41  ;;  %v2870_v24 = vadd.f32 %v12515_v28, %v2841_v6 }
 0x585   : > { %v9955_v38 = vpop.eup %9954  ;;  %v3459_v55 = vmul.f32 0.5, %v9953_v62  ;;  %v3493_v8 = vadd.f32 0.5, %v3461_v12 }
 0x586   : > { %3522 = vmatpush.msrb.mxu3 %v3499_v53  ;;  %v9957_v34 = vpop.eup %9956  ;;  %v3458_v20 = vmul.f32 0.5, %v9955_v38  ;;  %v3492_v25 = vadd.f32 0.5, %v3460_v1  ;;  %v3080_v53 = vmul.f32 0.5, %v2896_v44  ;;  %v2899_v56 = vadd.f32 %v2898_v16, %v2870_v24 }
 0x587   : > { %v9959_v39 = vpop.eup %9958  ;;  %v3457_v15 = vmul.f32 0.5, %v9957_v34  ;;  %v3491_v11 = vadd.f32 0.5, %v3459_v55  ;;  %v2901_v27 = vpop.f32.mrf.mxu3 }
 0x588   : > { %3523 = vmatpush.msrb.mxu3 %v3498_v2  ;;  %v9961_v36 = vpop.eup %9960  ;;  %v3456_v2 = vmul.f32 0.5, %v9959_v39  ;;  %v3490_v42 = vadd.f32 0.5, %v3458_v20  ;;  %9964 = vtanh.f32 %v3080_v53  ;;  %v3082_v13 = vmul.f32 0.5, %v2899_v56 }
 0x589   : > { %v9963_v60 = vpop.eup %9962  ;;  %v3455_v19 = vmul.f32 0.5, %v9961_v36  ;;  %v3489_v48 = vadd.f32 0.5, %v3457_v15 }
 0x58a   : > { %v12774_v33 = vpop.f32.mrf.mxu2  ;;  %3524 = vmatpush.msrb.mxu3 %v3497_v17  ;;  %v3094_v46 = vmul.f32 0.5, %v9963_v60  ;;  %v2815_v17 = vadd.f32 %v12465_v57, %v2786_v21  ;;  %v3488_v58 = vadd.f32 0.5, %v3456_v2  ;;  %9966 = vtanh.f32 %v3082_v13 }
 0x58b   : > { %v3487_v28 = vadd.f32 0.5, %v3455_v19 }
 0x58c   : > { %3525 = vmatpush.msrb.mxu3 %v3496_v51  ;;  %v2844_v40 = vadd.f32 %v12755_v59, %v2815_v17  ;;  %v3102_v10 = vadd.f32 0.5, %v3094_v46 }
 0x58e   : > { %3526 = vmatpush.msrb.mxu3 %v3495_v32  ;;  %v9965_v41 = vpop.eup %9964  ;;  %v2873_v51 = vadd.f32 %v12532_v43, %v2844_v40 }
 0x58f   : > { %v3096_v52 = vmul.f32 0.5, %v9965_v41  ;;  %v2950_v23 = vpop.f32.mrf.mxu3 }
 0x590   : > { %3527 = vmatpush.msrb.mxu3 %v3494_v37  ;;  %v2902_v14 = vadd.f32 %v2901_v27, %v2873_v51  ;;  %v9967_v12 = vpop.eup %9966  ;;  %v2951_v40 = vadd.f32 %v2950_v23, %v12544_v9 }
 0x591   : > { %v3104_v63 = vadd.f32 0.5, %v3096_v52  ;;  %v3098_v59 = vmul.f32 0.5, %v9967_v12 }
 0x592   : > { %v12782_v49 = vpop.f32.mrf.mxu2  ;;  %3528 = vmatpush.msrb.mxu3 %v3493_v8  ;;  %v3084_v22 = vmul.f32 0.5, %v2902_v14 }
 0x593   : > { %v3106_v62 = vadd.f32 0.5, %v3098_v59 }
 0x594   : > { %3529 = vmatpush.msrb.mxu3 %v3492_v25  ;;  %9968 = vtanh.f32 %v3084_v22 }
 0x596   : > { %3530 = vmatpush.msrb.mxu3 %v3491_v11 }
 0x597   : > { %v2953_v38 = vpop.f32.mrf.mxu3 }
 0x598   : > { %3531 = vmatpush.msrb.mxu3 %v3490_v42 }
 0x59a   : > { %v12789_v61 = vpop.f32.mrf.mxu2  ;;  %3532 = vmatpush.msrb.mxu3 %v3489_v48  ;;  %v9969_v54 = vpop.eup %9968 }
 0x59b   : > { %v3100_v1 = vmul.f32 0.5, %v9969_v54 }
 0x59c   : > { %3533 = vmatpush.msrb.mxu3 %v3488_v58 }
 0x59d   : > { %v3108_v37 = vadd.f32 0.5, %v3100_v1 }
 0x59e   : > { %3534 = vmatpush.msrb.mxu3 %v3487_v28 }
 0x59f   : > { %3535 = vmatmul.f32.vlgmr.msrb.gmra.mxu3 %v3102_v10  ;;  %v12795_v8 = vpop.f32.mrf.mxu3 }
 0x5a2   : > { %v12793_v57 = vpop.f32.mrf.mxu2 }
 0x5a3   : > { %v3412_v54 = vmul.f32 0.5, %v12793_v57 }
 0x5a7   : > { %3538 = vmatmul.f32.gmra.mxu3 %v3104_v63  ;;  %v12797_v26 = vpop.f32.mrf.mxu3  ;;  %v2980_v63 = vadd.f32 %v12591_v47, %v2951_v40 }
 0x5aa   : > { %v3361_v32 = vpop.f32.mrf.mxu2 }
 0x5ab   : > { %v3413_v22 = vmul.f32 0.5, %v3361_v32  ;;  %v2954_v32 = vadd.f32 %v2953_v38, %v12556_v3 }
 0x5af   : > { %3541 = vmatmul.f32.gmra.mxu3 %v3106_v62  ;;  %v3008_v25 = vpop.f32.mrf.mxu3 }
 0x5b0   : > { %v3009_v9 = vadd.f32 %v3008_v25, %v2980_v63 }
 0x5b2   : > { %v3364_v43 = vpop.f32.mrf.mxu2  ;;  %v3038_v57 = vadd.f32 %v12626_v30, %v3009_v9 }
 0x5b3   : > { %v3414_v27 = vmul.f32 0.5, %v3364_v43 }
 0x5b7   : > { %3544 = vmatmul.f32.gmra.mxu3 %v3108_v37  ;;  %v12799_v16 = vpop.f32.mrf.mxu3  ;;  %v3411_v37 = vmul.f32 0.5, %v12789_v61  ;;  %v2983_v61 = vadd.f32 %v12602_v31, %v2954_v32  ;;  %v3407_v31 = vmul.f32 0.5, %v12757_v7 }
 0x5b9   : > { %v3012_v30 = vadd.f32 %v12799_v16, %v2983_v61  ;;  %v3721_v61 = vld [vmem:[%s16977_s9 + $0x480] sm:$0xff] }
 0x5ba   : > { %v3367_v44 = vpop.f32.mrf.mxu2 }
 0x5bb   : > { %v3415_v58 = vmul.f32 0.5, %v3367_v44 }
 0x5bf   : > { %v12801_v15 = vpop.f32.mrf.mxu3 }
 0x5c2   : > { %v3370_v55 = vpop.f32.mrf.mxu2 }
 0x5c3   : > { %v3416_v48 = vmul.f32 0.5, %v3370_v55 }
 0x5c7   : > { %v12803_v2 = vpop.f32.mrf.mxu3 }
 0x5ca   : > { %v3373_v34 = vpop.f32.mrf.mxu2 }
 0x5cb   : > { %v3417_v19 = vmul.f32 0.5, %v3373_v34  ;;  %v3410_v34 = vmul.f32 0.5, %v12782_v49  ;;  %v3408_v49 = vmul.f32 0.5, %v12764_v50  ;;  %v3041_v50 = vadd.f32 %v12634_v45, %v3012_v30  ;;  %v3697_v30 = vld [vmem:[%s16977_s9 + $0x3c0] sm:$0xff] }
 0x5cc   : > { %v2960_v45 = vadd.f32 %v12797_v26, %v12579_v29 }
 0x5cf   : > { %v3066_v52 = vpop.f32.mrf.mxu3 }
 0x5d2   : > { %v3376_v20 = vpop.f32.mrf.mxu2 }
 0x5d3   : > { %v3418_v42 = vmul.f32 0.5, %v3376_v20 }
 0x5da   : > { %v3379_v39 = vpop.f32.mrf.mxu2 }
 0x5db   : > { %v3419_v21 = vmul.f32 0.5, %v3379_v39 }
 0x5e2   : > { %v3382_v6 = vpop.f32.mrf.mxu2 }
 0x5e3   : > { %v3420_v36 = vmul.f32 0.5, %v3382_v6  ;;  %v3409_v6 = vmul.f32 0.5, %v12774_v33  ;;  %v2957_v33 = vadd.f32 %v12795_v8, %v12567_v18 }
 0x5ea   : > { %v3385_v53 = vpop.f32.mrf.mxu2 }
 0x5eb   : > { %v3421_v11 = vmul.f32 0.5, %v3385_v53  ;;  %v3067_v53 = vadd.f32 %v3066_v52, %v3038_v57  ;;  %v3745_v57 = vld [vmem:[%s16977_s9 + $0x540] sm:$0xff] }
 0x5ed   : > { %9970 = vtanh.f32 %v3421_v11 }
 0x5ee   : > { %9972 = vtanh.f32 %v3420_v36  ;;  %v3069_v36 = vpop.f32.mrf.mxu3 }
 0x5ef   : > { %v3070_v18 = vadd.f32 %v3069_v36, %v3041_v50  ;;  %v3631_v50 = vld [vmem:[%s16977_s9 + $0x1b0] sm:$0xff] }
 0x5f2   : > { %v3388_v60 = vpop.f32.mrf.mxu2 }
 0x5f3   : > { %v3422_v24 = vmul.f32 0.5, %v3388_v60  ;;  %v9971_v56 = vpop.eup %9970 }
 0x5f4   : > { %v9973_v46 = vpop.eup %9972  ;;  %v3485_v13 = vmul.f32 0.5, %v9971_v56 }
 0x5f5   : > { %9974 = vtanh.f32 %v3422_v24  ;;  %v3484_v41 = vmul.f32 0.5, %v9973_v46 }
 0x5f6   : > { %9976 = vtanh.f32 %v3419_v21  ;;  %v3517_v59 = vadd.f32 0.5, %v3485_v13 }
 0x5f7   : > { %9978 = vtanh.f32 %v3418_v42  ;;  %v3516_v1 = vadd.f32 0.5, %v3484_v41  ;;  %v3079_v42 = vmul.f32 0.5, %v3067_v53  ;;  %v3072_v41 = vpop.f32.mrf.mxu3 }
 0x5f8   : > { %9980 = vtanh.f32 %v3417_v19 }
 0x5f9   : > { %9982 = vtanh.f32 %v3416_v48 }
 0x5fa   : > { %9984 = vtanh.f32 %v3415_v58  ;;  %v2986_v58 = vadd.f32 %v12610_v0, %v2957_v33  ;;  %v3655_v33 = vld [vmem:[%s16977_s9 + $0x270] sm:$0xff] }
 0x5fb   : > { %v9975_v17 = vpop.eup %9974  ;;  %9986 = vtanh.f32 %v3414_v27 }
 0x5fc   : > { %v3486_v28 = vmul.f32 0.5, %v9975_v17  ;;  %v9977_v10 = vpop.eup %9976  ;;  %9988 = vtanh.f32 %v3413_v22  ;;  %v3015_v13 = vadd.f32 %v12801_v15, %v2986_v58  ;;  %v2989_v15 = vadd.f32 %v12618_v4, %v2960_v45  ;;  %v3637_v58 = vld [vmem:[%s16977_s9 + $0x1e0] sm:$0xff] }
 0x5fd   : > { %v9979_v14 = vpop.eup %9978  ;;  %v3483_v12 = vmul.f32 0.5, %v9977_v10  ;;  %9990 = vtanh.f32 %v3412_v54  ;;  %v3577_v45 = vld [vmem:[%s16977_s9] sm:$0xff] }
 0x5fe   : > { %v3518_v51 = vadd.f32 0.5, %v3486_v28  ;;  %v9981_v62 = vpop.eup %9980  ;;  %v3482_v23 = vmul.f32 0.5, %v9979_v14  ;;  %9992 = vtanh.f32 %v3411_v37  ;;  %v3044_v63 = vadd.f32 %v12642_v5, %v3015_v13  ;;  %v3751_v5 = vld [vmem:[%s16977_s9 + $0x570] sm:$0xff]  ;;  %v3601_v13 = vld [vmem:[%s16977_s9 + $0xc0] sm:$0xff] }
 0x5ff   : > { %v9983_v43 = vpop.eup %9982  ;;  %v3481_v44 = vmul.f32 0.5, %v9981_v62  ;;  %v3515_v47 = vadd.f32 0.5, %v3483_v12  ;;  %9994 = vtanh.f32 %v3410_v34  ;;  %v3018_v26 = vadd.f32 %v12803_v2, %v2989_v15  ;;  %v3739_v37 = vld [vmem:[%s16977_s9 + $0x510] sm:$0xff]  ;;  %v3075_v2 = vpop.f32.mrf.mxu3  ;;  %v3729_v15 = vld [vmem:[%s16977_s9 + $0x4c0] sm:$0xff] }
 0x600   : > { %3548 = vmatpush.msra.mxu3 %v3518_v51  ;;  %v9985_v55 = vpop.eup %9984  ;;  %v3480_v20 = vmul.f32 0.5, %v9983_v43  ;;  %v3514_v25 = vadd.f32 0.5, %v3482_v23  ;;  %9996 = vtanh.f32 %v3409_v6  ;;  %v3081_v51 = vmul.f32 0.5, %v3070_v18  ;;  %v3727_v34 = vld [vmem:[%s16977_s9 + $0x4b0] sm:$0xff] }
 0x601   : > { %v9987_v39 = vpop.eup %9986  ;;  %v3479_v3 = vmul.f32 0.5, %v9985_v55  ;;  %v3513_v38 = vadd.f32 0.5, %v3481_v44  ;;  %9998 = vtanh.f32 %v3408_v49  ;;  %v3073_v62 = vadd.f32 %v3072_v41, %v3044_v63  ;;  %v3757_v44 = vld [vmem:[%s16977_s9 + $0x5a0] sm:$0xff]  ;;  %v3703_v6 = vld [vmem:[%s16977_s9 + $0x3f0] sm:$0xff]  ;;  %v3734_v63 = vld [vmem:[%s16977_s9 + $0x4e8] sm:$0xff] }
 0x602   : > { %3549 = vmatpush.msra.mxu3 %v3517_v59  ;;  %v9989_v11 = vpop.eup %9988  ;;  %v3478_v60 = vmul.f32 0.5, %v9987_v39  ;;  %v3512_v21 = vadd.f32 0.5, %v3480_v20  ;;  %10000 = vtanh.f32 %v3407_v31  ;;  %v3047_v55 = vadd.f32 %v12650_v35, %v3018_v26  ;;  %v3733_v35 = vld [vmem:[%s16977_s9 + $0x4e0] sm:$0xff]  ;;  %v3679_v49 = vld [vmem:[%s16977_s9 + $0x330] sm:$0xff] }
 0x603   : > { %v9991_v24 = vpop.eup %9990  ;;  %v3477_v19 = vmul.f32 0.5, %v9989_v11  ;;  %v3511_v56 = vadd.f32 0.5, %v3479_v3  ;;  %10002 = vtanh.f32 %v3079_v42  ;;  %v3083_v4 = vmul.f32 0.5, %v3073_v62  ;;  %v3691_v3 = vld [vmem:[%s16977_s9 + $0x390] sm:$0xff]  ;;  %v3709_v11 = vld [vmem:[%s16977_s9 + $0x420] sm:$0xff]  ;;  %v3710_v62 = vld [vmem:[%s16977_s9 + $0x428] sm:$0xff] }
 0x604   : > { %3550 = vmatpush.msra.mxu3 %v3516_v1  ;;  %v9993_v48 = vpop.eup %9992  ;;  %v3476_v46 = vmul.f32 0.5, %v9991_v24  ;;  %v3510_v16 = vadd.f32 0.5, %v3478_v60  ;;  %10004 = vtanh.f32 %v3081_v51  ;;  %v3763_v1 = vld [vmem:[%s16977_s9 + $0x5d0] sm:$0xff]  ;;  %v3076_v20 = vadd.f32 %v3075_v2, %v3047_v55  ;;  %v3685_v24 = vld [vmem:[%s16977_s9 + $0x360] sm:$0xff]  ;;  %v3758_v51 = vld [vmem:[%s16977_s9 + $0x5a8] sm:$0xff] }
 0x605   : > { %v9995_v17 = vpop.eup %9994  ;;  %v3475_v8 = vmul.f32 0.5, %v9993_v48  ;;  %v3509_v7 = vadd.f32 0.5, %v3477_v19  ;;  %3943 = vmatpush.msrb.mxu2 %v3763_v1  ;;  %10006 = vtanh.f32 %v3083_v4  ;;  %v3667_v60 = vld [vmem:[%s16977_s9 + $0x2d0] sm:$0xff]  ;;  %v3673_v31 = vld [vmem:[%s16977_s9 + $0x300] sm:$0xff] }
 0x606   : > { %3551 = vmatpush.msra.mxu3 %v3515_v47  ;;  %v9997_v40 = vpop.eup %9996  ;;  %v3474_v28 = vmul.f32 0.5, %v9995_v17  ;;  %v3508_v10 = vadd.f32 0.5, %v3476_v46  ;;  %v3085_v53 = vmul.f32 0.5, %v3076_v20  ;;  %v3643_v42 = vld [vmem:[%s16977_s9 + $0x210] sm:$0xff]  ;;  %v3649_v46 = vld [vmem:[%s16977_s9 + $0x240] sm:$0xff]  ;;  %v3614_v20 = vld [vmem:[%s16977_s9 + $0x128] sm:$0xff] }
 0x607   : > { %v9999_v27 = vpop.eup %9998  ;;  %v3473_v14 = vmul.f32 0.5, %v9997_v40  ;;  %v3507_v0 = vadd.f32 0.5, %v3475_v8  ;;  %3944 = vmatpush.msrb.mxu2 %v3751_v5  ;;  %v3607_v18 = vld [vmem:[%s16977_s9 + $0xf0] sm:$0xff]  ;;  %v3625_v8 = vld [vmem:[%s16977_s9 + $0x180] sm:$0xff]  ;;  %v3674_v5 = vld [vmem:[%s16977_s9 + $0x308] sm:$0xff] }
 0x608   : > { %3552 = vmatpush.msra.mxu3 %v3514_v25  ;;  %v10001_v52 = vpop.eup %10000  ;;  %v3472_v12 = vmul.f32 0.5, %v9999_v27  ;;  %v3506_v59 = vadd.f32 0.5, %v3474_v28  ;;  %v3715_v25 = vld [vmem:[%s16977_s9 + $0x450] sm:$0xff]  ;;  %10008 = vtanh.f32 %v3085_v53  ;;  %v3613_v40 = vld [vmem:[%s16977_s9 + $0x120] sm:$0xff] }
 0x609   : > { %v10003_v22 = vpop.eup %10002  ;;  %v3471_v54 = vmul.f32 0.5, %v10001_v52  ;;  %v3505_v9 = vadd.f32 0.5, %v3473_v14  ;;  %3945 = vmatpush.msrb.mxu2 %v3739_v37  ;;  %v3595_v27 = vld [vmem:[%s16977_s9 + $0x90] sm:$0xff]  ;;  %v3765_v14 = vld [vmem:[%s16977_s9 + $0x5e0] sm:$0xff] }
 0x60a   : > { %3553 = vmatpush.msra.mxu3 %v3513_v38  ;;  %v3095_v29 = vmul.f32 0.5, %v10003_v22  ;;  %v3504_v23 = vadd.f32 0.5, %v3472_v12  ;;  %v10005_v47 = vpop.eup %10004  ;;  %v3583_v41 = vld [vmem:[%s16977_s9 + $0x30] sm:$0xff]  ;;  %v3753_v22 = vld [vmem:[%s16977_s9 + $0x580] sm:$0xff] }
 0x60b   : > { %v3503_v43 = vadd.f32 0.5, %v3471_v54  ;;  %v3097_v39 = vmul.f32 0.5, %v10005_v47  ;;  %3946 = vmatpush.msrb.mxu2 %v3727_v34  ;;  %v10007_v36 = vpop.eup %10006  ;;  %v3741_v12 = vld [vmem:[%s16977_s9 + $0x520] sm:$0xff]  ;;  %v3638_v47 = vld [vmem:[%s16977_s9 + $0x1e8] sm:$0xff] }
 0x60c   : > { %3554 = vmatpush.msra.mxu3 %v3512_v21  ;;  %v3103_v32 = vadd.f32 0.5, %v3095_v29  ;;  %v3099_v21 = vmul.f32 0.5, %v10007_v36  ;;  %v3717_v54 = vld [vmem:[%s16977_s9 + $0x460] sm:$0xff]  ;;  %v3626_v34 = vld [vmem:[%s16977_s9 + $0x188] sm:$0xff]  ;;  %v3759_v36 = vld [vmem:[%s16977_s9 + $0x5b0] sm:$0xff] }
 0x60d   : > { %3947 = vmatpush.msrb.mxu2 %v3715_v25  ;;  %v3105_v38 = vadd.f32 0.5, %v3097_v39  ;;  %v3705_v29 = vld [vmem:[%s16977_s9 + $0x400] sm:$0xff]  ;;  %v3602_v39 = vld [vmem:[%s16977_s9 + $0xc8] sm:$0xff] }
 0x60e   : > { %3555 = vmatpush.msra.mxu3 %v3511_v56  ;;  %v3107_v19 = vadd.f32 0.5, %v3099_v21  ;;  %v3661_v56 = vld [vmem:[%s16977_s9 + $0x2a0] sm:$0xff]  ;;  %v10009_v48 = vpop.eup %10008  ;;  %v3735_v21 = vld [vmem:[%s16977_s9 + $0x4f0] sm:$0xff] }
 0x60f   : > { %3948 = vmatpush.msrb.mxu2 %v3703_v6  ;;  %v3101_v17 = vmul.f32 0.5, %v10009_v48  ;;  %v3693_v1 = vld [vmem:[%s16977_s9 + $0x3a0] sm:$0xff]  ;;  %v3590_v6 = vld [vmem:[%s16977_s9 + $0x68] sm:$0xff]  ;;  %v3719_v48 = vld [vmem:[%s16977_s9 + $0x470] sm:$0xff] }
 0x610   : > { %3556 = vmatpush.msra.mxu3 %v3510_v16  ;;  %v3619_v16 = vld [vmem:[%s16977_s9 + $0x150] sm:$0xff]  ;;  %v3681_v4 = vld [vmem:[%s16977_s9 + $0x340] sm:$0xff] }
 0x611   : > { %3949 = vmatpush.msrb.mxu2 %v3691_v3  ;;  %v3669_v37 = vld [vmem:[%s16977_s9 + $0x2e0] sm:$0xff] }
 0x612   : > { %3557 = vmatpush.msra.mxu3 %v3509_v7  ;;  %v3109_v7 = vadd.f32 0.5, %v3101_v17  ;;  %v3657_v2 = vld [vmem:[%s16977_s9 + $0x280] sm:$0xff]  ;;  %v3695_v17 = vld [vmem:[%s16977_s9 + $0x3b0] sm:$0xff] }
 0x613   : > { %3950 = vmatpush.msrb.mxu2 %v3679_v49  ;;  %v3645_v55 = vld [vmem:[%s16977_s9 + $0x220] sm:$0xff]  ;;  %v3767_v49 = vld [vmem:[%s16977_s9 + $0x5f0] sm:$0xff] }
 0x614   : > { %3558 = vmatpush.msra.mxu3 %v3508_v10  ;;  %v3589_v10 = vld [vmem:[%s16977_s9 + $0x60] sm:$0xff] }
 0x615   : > { %3951 = vmatpush.msrb.mxu2 %v3667_v60  ;;  %v3621_v25 = vld [vmem:[%s16977_s9 + $0x160] sm:$0xff]  ;;  %v3755_v60 = vld [vmem:[%s16977_s9 + $0x590] sm:$0xff] }
 0x616   : > { %3559 = vmatpush.msra.mxu3 %v3507_v0  ;;  %v3746_v0 = vld [vmem:[%s16977_s9 + $0x548] sm:$0xff] }
 0x617   : > { %3952 = vmatpush.msrb.mxu2 %v3655_v33 }
 0x618   : > { %3560 = vmatpush.msra.mxu3 %v3506_v59  ;;  %v3722_v59 = vld [vmem:[%s16977_s9 + $0x488] sm:$0xff] }
 0x619   : > { %3953 = vmatpush.msrb.mxu2 %v3643_v42  ;;  %v3723_v42 = vld [vmem:[%s16977_s9 + $0x490] sm:$0xff] }
 0x61a   : > { %3561 = vmatpush.msra.mxu3 %v3505_v9  ;;  %v3698_v9 = vld [vmem:[%s16977_s9 + $0x3c8] sm:$0xff] }
 0x61b   : > { %3954 = vmatpush.msrb.mxu2 %v3631_v50  ;;  %v3699_v50 = vld [vmem:[%s16977_s9 + $0x3d0] sm:$0xff] }
 0x61c   : > { %3562 = vmatpush.msra.mxu3 %v3504_v23  ;;  %v3686_v23 = vld [vmem:[%s16977_s9 + $0x368] sm:$0xff] }
 0x61d   : > { %3955 = vmatpush.msrb.mxu2 %v3619_v16  ;;  %v3687_v16 = vld [vmem:[%s16977_s9 + $0x370] sm:$0xff] }
 0x61e   : > { %3563 = vmatpush.msra.mxu3 %v3503_v43  ;;  %v3662_v43 = vld [vmem:[%s16977_s9 + $0x2a8] sm:$0xff] }
 0x61f   : > { %3564 = vmatmul.f32.vlgmr.msra.gmra.mxu3 %v3103_v32  ;;  %3956 = vmatpush.msrb.mxu2 %v3607_v18  ;;  %v3650_v32 = vld [vmem:[%s16977_s9 + $0x248] sm:$0xff] }
 0x620   : > { %3769 = vmatpush.msrb.mxu3 %v3757_v44 }
 0x621   : > { %3957 = vmatpush.msrb.mxu2 %v3595_v27  ;;  %v3639_v27 = vld [vmem:[%s16977_s9 + $0x1f0] sm:$0xff] }
 0x622   : > { %3770 = vmatpush.msrb.mxu3 %v3745_v57  ;;  %v12912_v28 = vpop.f32.mrf.mxu3  ;;  %v3633_v57 = vld [vmem:[%s16977_s9 + $0x1c0] sm:$0xff] }
 0x623   : > { %3958 = vmatpush.msrb.mxu2 %v3583_v41 }
 0x624   : > { %3771 = vmatpush.msrb.mxu3 %v3733_v35  ;;  %v3609_v35 = vld [vmem:[%s16977_s9 + $0x100] sm:$0xff] }
 0x625   : > { %4001 = vmatpush.msra.mxu2 %v3765_v14  ;;  %v3627_v14 = vld [vmem:[%s16977_s9 + $0x190] sm:$0xff] }
 0x626   : > { %3772 = vmatpush.msrb.mxu3 %v3721_v61  ;;  %v3597_v61 = vld [vmem:[%s16977_s9 + $0xa0] sm:$0xff] }
 0x627   : > { %3567 = vmatmul.f32.gmra.mxu3 %v3105_v38  ;;  %4002 = vmatpush.msra.mxu2 %v3753_v22  ;;  %v3578_v38 = vld [vmem:[%s16977_s9 + $0x8] sm:$0xff]  ;;  %v3623_v22 = vld [vmem:[%s16977_s9 + $0x170] sm:$0xff] }
 0x628   : > { %3773 = vmatpush.msrb.mxu3 %v3709_v11  ;;  %v3585_v11 = vld [vmem:[%s16977_s9 + $0x40] sm:$0xff] }
 0x629   : > { %4003 = vmatpush.msra.mxu2 %v3741_v12  ;;  %v3611_v12 = vld [vmem:[%s16977_s9 + $0x110] sm:$0xff] }
 0x62a   : > { %3774 = vmatpush.msrb.mxu3 %v3697_v30  ;;  %v12935_v52 = vpop.f32.mrf.mxu3  ;;  %v3747_v30 = vld [vmem:[%s16977_s9 + $0x550] sm:$0xff] }
 0x62b   : > { %4004 = vmatpush.msra.mxu2 %v3729_v15  ;;  %v3599_v15 = vld [vmem:[%s16977_s9 + $0xb0] sm:$0xff] }
 0x62c   : > { %3775 = vmatpush.msrb.mxu3 %v3685_v24  ;;  %v3743_v24 = vld [vmem:[%s16977_s9 + $0x530] sm:$0xff] }
 0x62d   : > { %4005 = vmatpush.msra.mxu2 %v3717_v54  ;;  %v3587_v54 = vld [vmem:[%s16977_s9 + $0x50] sm:$0xff] }
 0x62e   : > { %3776 = vmatpush.msrb.mxu3 %v3673_v31 }
 0x62f   : > { %3570 = vmatmul.f32.gmra.mxu3 %v3107_v19  ;;  %4006 = vmatpush.msra.mxu2 %v3705_v29  ;;  %v3731_v19 = vld [vmem:[%s16977_s9 + $0x4d0] sm:$0xff]  ;;  %v3748_v29 = vld [vmem:[%s16977_s9 + $0x558] sm:$0xff] }
 0x630   : > { %3777 = vmatpush.msrb.mxu3 %v3661_v56  ;;  %v3711_v56 = vld [vmem:[%s16977_s9 + $0x430] sm:$0xff] }
 0x631   : > { %4007 = vmatpush.msra.mxu2 %v3693_v1  ;;  %v3712_v1 = vld [vmem:[%s16977_s9 + $0x438] sm:$0xff] }
 0x632   : > { %3778 = vmatpush.msrb.mxu3 %v3649_v46  ;;  %v12964_v26 = vpop.f32.mrf.mxu3  ;;  %v3707_v46 = vld [vmem:[%s16977_s9 + $0x410] sm:$0xff] }
 0x633   : > { %4008 = vmatpush.msra.mxu2 %v3681_v4  ;;  %v3688_v4 = vld [vmem:[%s16977_s9 + $0x378] sm:$0xff] }
 0x634   : > { %3779 = vmatpush.msrb.mxu3 %v3637_v58 }
 0x635   : > { %4009 = vmatpush.msra.mxu2 %v3669_v37  ;;  %v3664_v37 = vld [vmem:[%s16977_s9 + $0x2b8] sm:$0xff] }
 0x636   : > { %3780 = vmatpush.msrb.mxu3 %v3625_v8  ;;  %v3675_v8 = vld [vmem:[%s16977_s9 + $0x310] sm:$0xff] }
 0x637   : > { %3573 = vmatmul.f32.gmra.mxu3 %v3109_v7  ;;  %4010 = vmatpush.msra.mxu2 %v3657_v2  ;;  %v3683_v7 = vld [vmem:[%s16977_s9 + $0x350] sm:$0xff]  ;;  %v4225_v2 = vld [vmem:[%s13178_s30 + $0x40] sm:$0xff] }
 0x638   : > { %3781 = vmatpush.msrb.mxu3 %v3613_v40  ;;  %v3663_v40 = vld [vmem:[%s16977_s9 + $0x2b0] sm:$0xff] }
 0x639   : > { %4011 = vmatpush.msra.mxu2 %v3645_v55  ;;  %v3628_v55 = vld [vmem:[%s16977_s9 + $0x198] sm:$0xff] }
 0x63a   : > { %3782 = vmatpush.msrb.mxu3 %v3601_v13  ;;  %v12990_v44 = vpop.f32.mrf.mxu3  ;;  %v3671_v13 = vld [vmem:[%s16977_s9 + $0x2f0] sm:$0xff] }
 0x63b   : > { %4012 = vmatpush.msra.mxu2 %v3633_v57  ;;  %v4223_v57 = vld [vmem:[%s13178_s30 + $0x30] sm:$0xff] }
 0x63c   : > { %3783 = vmatpush.msrb.mxu3 %v3589_v10  ;;  %v3659_v10 = vld [vmem:[%s16977_s9 + $0x290] sm:$0xff] }
 0x63d   : > { %4013 = vmatpush.msra.mxu2 %v3621_v25  ;;  %v3604_v25 = vld [vmem:[%s16977_s9 + $0xd8] sm:$0xff] }
 0x63e   : > { %3784 = vmatpush.msrb.mxu3 %v3577_v45  ;;  %v3647_v45 = vld [vmem:[%s16977_s9 + $0x230] sm:$0xff] }
 0x63f   : > { %4014 = vmatpush.msra.mxu2 %v3609_v35  ;;  %v3592_v35 = vld [vmem:[%s16977_s9 + $0x78] sm:$0xff] }
 0x640   : > { %3798 = vmatpush.msra.mxu3 %v3758_v51 }
 0x641   : > { %4015 = vmatpush.msra.mxu2 %v3597_v61  ;;  %v3580_v61 = vld [vmem:[%s16977_s9 + $0x18] sm:$0xff] }
 0x642   : > { %3799 = vmatpush.msra.mxu3 %v3746_v0  ;;  %v3635_v0 = vld [vmem:[%s16977_s9 + $0x1d0] sm:$0xff] }
 0x643   : > { %4016 = vmatpush.msra.mxu2 %v3585_v11  ;;  %v3737_v11 = vld [vmem:[%s16977_s9 + $0x500] sm:$0xff] }
 0x644   : > { %3800 = vmatpush.msra.mxu3 %v3734_v63  ;;  %v3603_v63 = vld [vmem:[%s16977_s9 + $0xd0] sm:$0xff] }
 0x646   : > { %3801 = vmatpush.msra.mxu3 %v3722_v59  ;;  %v3591_v59 = vld [vmem:[%s16977_s9 + $0x70] sm:$0xff] }
 0x648   : > { %3802 = vmatpush.msra.mxu3 %v3710_v62  ;;  %v3579_v62 = vld [vmem:[%s16977_s9 + $0x10] sm:$0xff] }
 0x64a   : > { %3803 = vmatpush.msra.mxu3 %v3698_v9  ;;  %v3760_v9 = vld [vmem:[%s16977_s9 + $0x5b8] sm:$0xff] }
 0x64c   : > { %3804 = vmatpush.msra.mxu3 %v3686_v23  ;;  %v3724_v23 = vld [vmem:[%s16977_s9 + $0x498] sm:$0xff] }
 0x64e   : > { %3805 = vmatpush.msra.mxu3 %v3674_v5  ;;  %v3700_v5 = vld [vmem:[%s16977_s9 + $0x3d8] sm:$0xff] }
 0x650   : > { %3806 = vmatpush.msra.mxu3 %v3662_v43  ;;  %v3676_v43 = vld [vmem:[%s16977_s9 + $0x318] sm:$0xff] }
 0x652   : > { %3807 = vmatpush.msra.mxu3 %v3650_v32  ;;  %v4227_v32 = vld [vmem:[%s13178_s30 + $0x50] sm:$0xff] }
 0x654   : > { %3808 = vmatpush.msra.mxu3 %v3638_v47  ;;  %v3640_v47 = vld [vmem:[%s16977_s9 + $0x1f8] sm:$0xff] }
 0x656   : > { %3809 = vmatpush.msra.mxu3 %v3626_v34  ;;  %v3616_v34 = vld [vmem:[%s16977_s9 + $0x138] sm:$0xff] }
 0x658   : > { %3810 = vmatpush.msra.mxu3 %v3614_v20  ;;  %v4221_v20 = vld [vmem:[%s13178_s30 + $0x20] sm:$0xff] }
 0x65a   : > { %3811 = vmatpush.msra.mxu3 %v3602_v39  ;;  %v4219_v39 = vld [vmem:[%s13178_s30 + $0x10] sm:$0xff] }
 0x65c   : > { %3812 = vmatpush.msra.mxu3 %v3590_v6  ;;  %v4217_v6 = vld [vmem:[%s13178_s30] sm:$0xff] }
 0x65e   : > { %3813 = vmatpush.msra.mxu3 %v3578_v38  ;;  %v3749_v38 = vld [vmem:[%s16977_s9 + $0x560] sm:$0xff] }
 0x6a2   : > { %v3565_v53 = vpop.f32.mrf.mxu3 }
 0x6a3   : > { %v13023_v3 = vadd.f32 %v3565_v53, %v12912_v28  ;;  %v3651_v28 = vld [vmem:[%s16977_s9 + $0x250] sm:$0xff]  ;;  %v3761_v53 = vld [vmem:[%s16977_s9 + $0x5c0] sm:$0xff] }
 0x6a5   : > { %3785 = vmatmul.f32.vlgmr.msrb.gmra.mxu3 %v13023_v3  ;;  %3959 = vmatmul.f32.vlgmr.msrb.gmra.mxu2 %v13023_v3 }
 0x6a6   : > { %3827 = vmatpush.msrb.mxu3 %v3759_v36  ;;  %4059 = vmatpush.msrb.mxu2 %v3767_v49  ;;  %v3725_v36 = vld [vmem:[%s16977_s9 + $0x4a0] sm:$0xff] }
 0x6a7   : > { %v3713_v49 = vld [vmem:[%s16977_s9 + $0x440] sm:$0xff] }
 0x6a8   : > { %3828 = vmatpush.msrb.mxu3 %v3747_v30  ;;  %4060 = vmatpush.msrb.mxu2 %v3755_v60  ;;  %v3701_v30 = vld [vmem:[%s16977_s9 + $0x3e0] sm:$0xff] }
 0x6a9   : > { %v3689_v60 = vld [vmem:[%s16977_s9 + $0x380] sm:$0xff] }
 0x6aa   : > { %v3568_v33 = vpop.f32.mrf.mxu3  ;;  %3829 = vmatpush.msrb.mxu3 %v3735_v21  ;;  %4061 = vmatpush.msrb.mxu2 %v3743_v24  ;;  %v3677_v21 = vld [vmem:[%s16977_s9 + $0x320] sm:$0xff] }
 0x6ab   : > { %v13052_v31 = vadd.f32 %v3568_v33, %v12935_v52  ;;  %v3615_v52 = vld [vmem:[%s16977_s9 + $0x130] sm:$0xff]  ;;  %v3665_v24 = vld [vmem:[%s16977_s9 + $0x2c0] sm:$0xff] }
 0x6ac   : > { %3830 = vmatpush.msrb.mxu3 %v3723_v42  ;;  %4062 = vmatpush.msrb.mxu2 %v3731_v19  ;;  %v3653_v33 = vld [vmem:[%s16977_s9 + $0x260] sm:$0xff] }
 0x6ad   : > { %3788 = vmatmul.f32.gmra.mxu3 %v13052_v31  ;;  %3962 = vmatmul.f32.gmra.mxu2 %v13052_v31  ;;  %v3641_v42 = vld [vmem:[%s16977_s9 + $0x200] sm:$0xff] }
 0x6ae   : > { %3831 = vmatpush.msrb.mxu3 %v3711_v56  ;;  %4063 = vmatpush.msrb.mxu2 %v3719_v48  ;;  %v3629_v19 = vld [vmem:[%s16977_s9 + $0x1a0] sm:$0xff] }
 0x6af   : > { %v3617_v56 = vld [vmem:[%s16977_s9 + $0x140] sm:$0xff] }
 0x6b0   : > { %3832 = vmatpush.msrb.mxu3 %v3699_v50  ;;  %4064 = vmatpush.msrb.mxu2 %v3707_v46  ;;  %v3605_v48 = vld [vmem:[%s16977_s9 + $0xe0] sm:$0xff]  ;;  %v13270_v46 = vld [vmem:[%s16972_s4 + $0x10] sm:$0xff] }
 0x6b1   : > { %v3593_v50 = vld [vmem:[%s16977_s9 + $0x80] sm:$0xff] }
 0x6b2   : > { %v3571_v58 = vpop.f32.mrf.mxu3  ;;  %3833 = vmatpush.msrb.mxu3 %v3687_v16  ;;  %4065 = vmatpush.msrb.mxu2 %v3695_v17  ;;  %v3581_v16 = vld [vmem:[%s16977_s9 + $0x20] sm:$0xff]  ;;  %v3762_v17 = vld [vmem:[%s16977_s9 + $0x5c8] sm:$0xff] }
 0x6b3   : > { %v13081_v18 = vadd.f32 %v3571_v58, %v12964_v26  ;;  %v3736_v26 = vld [vmem:[%s16977_s9 + $0x4f8] sm:$0xff]  ;;  %v3750_v58 = vld [vmem:[%s16977_s9 + $0x568] sm:$0xff] }
 0x6b4   : > { %3834 = vmatpush.msrb.mxu3 %v3675_v8  ;;  %4066 = vmatpush.msrb.mxu2 %v3683_v7  ;;  %v3738_v8 = vld [vmem:[%s16977_s9 + $0x508] sm:$0xff]  ;;  %v13290_v7 = vld [vmem:[%s16972_s4 + $0x18] sm:$0xff] }
 0x6b5   : > { %3791 = vmatmul.f32.gmra.mxu3 %v13081_v18  ;;  %3965 = vmatmul.f32.gmra.mxu2 %v13081_v18 }
 0x6b6   : > { %3835 = vmatpush.msrb.mxu3 %v3663_v40  ;;  %4067 = vmatpush.msrb.mxu2 %v3671_v13  ;;  %v3726_v40 = vld [vmem:[%s16977_s9 + $0x4a8] sm:$0xff] }
 0x6b7   : > { %v3714_v13 = vld [vmem:[%s16977_s9 + $0x448] sm:$0xff] }
 0x6b8   : > { %3836 = vmatpush.msrb.mxu3 %v3651_v28  ;;  %4068 = vmatpush.msrb.mxu2 %v3659_v10  ;;  %v3702_v28 = vld [vmem:[%s16977_s9 + $0x3e8] sm:$0xff] }
 0x6b9   : > { %v3690_v10 = vld [vmem:[%s16977_s9 + $0x388] sm:$0xff] }
 0x6ba   : > { %v3574_v41 = vpop.f32.mrf.mxu3  ;;  %3837 = vmatpush.msrb.mxu3 %v3639_v27  ;;  %4069 = vmatpush.msrb.mxu2 %v3647_v45  ;;  %v13310_v27 = vld [vmem:[%s16972_s4 + $0x20] sm:$0xff]  ;;  %v3678_v45 = vld [vmem:[%s16977_s9 + $0x328] sm:$0xff] }
 0x6bb   : > { %v13110_v51 = vadd.f32 %v3574_v41, %v12990_v44  ;;  %v3652_v44 = vld [vmem:[%s16977_s9 + $0x258] sm:$0xff]  ;;  %v3666_v41 = vld [vmem:[%s16977_s9 + $0x2c8] sm:$0xff] }
 0x6bc   : > { %3838 = vmatpush.msrb.mxu3 %v3627_v14  ;;  %4070 = vmatpush.msrb.mxu2 %v3635_v0  ;;  %v3654_v14 = vld [vmem:[%s16977_s9 + $0x268] sm:$0xff] }
 0x6bd   : > { %3794 = vmatmul.f32.gmra.mxu3 %v13110_v51  ;;  %3968 = vmatmul.f32.gmra.mxu2 %v13110_v51  ;;  %v3642_v0 = vld [vmem:[%s16977_s9 + $0x208] sm:$0xff] }
 0x6be   : > { %3839 = vmatpush.msrb.mxu3 %v3615_v52  ;;  %4071 = vmatpush.msrb.mxu2 %v3623_v22  ;;  %v13330_v52 = vld [vmem:[%s16972_s4 + $0x28] sm:$0xff] }
 0x6bf   : > { %v3630_v22 = vld [vmem:[%s16977_s9 + $0x1a8] sm:$0xff] }
 0x6c0   : > { %3840 = vmatpush.msrb.mxu3 %v3603_v63  ;;  %4072 = vmatpush.msrb.mxu2 %v3611_v12  ;;  %v3618_v63 = vld [vmem:[%s16977_s9 + $0x148] sm:$0xff] }
 0x6c1   : > { %v3606_v12 = vld [vmem:[%s16977_s9 + $0xe8] sm:$0xff] }
 0x6c2   : > { %3841 = vmatpush.msrb.mxu3 %v3591_v59  ;;  %4073 = vmatpush.msrb.mxu2 %v3599_v15  ;;  %v3594_v59 = vld [vmem:[%s16977_s9 + $0x88] sm:$0xff] }
 0x6c3   : > { %v3582_v15 = vld [vmem:[%s16977_s9 + $0x28] sm:$0xff] }
 0x6c4   : > { %3842 = vmatpush.msrb.mxu3 %v3579_v62  ;;  %4074 = vmatpush.msrb.mxu2 %v3587_v54  ;;  %v3764_v62 = vld [vmem:[%s16977_s9 + $0x5d8] sm:$0xff] }
 0x6c5   : > { %3814 = vmatmul.f32.vlgmr.msra.gmra.mxu3 %v13023_v3  ;;  %4017 = vmatmul.f32.vlgmr.msra.gmra.mxu2 %v13023_v3 }
 0x6c6   : > { %3856 = vmatpush.msra.mxu3 %v3760_v9  ;;  %4275 = vmatpush.msra.mxu2 %v4227_v32  ;;  %v3680_v32 = vld [vmem:[%s16977_s9 + $0x338] sm:$0xff] }
 0x6c8   : > { %3857 = vmatpush.msra.mxu3 %v3748_v29  ;;  %4276 = vmatpush.msra.mxu2 %v4225_v2  ;;  %v3752_v29 = vld [vmem:[%s16977_s9 + $0x578] sm:$0xff] }
 0x6c9   : > { %v3668_v2 = vld [vmem:[%s16977_s9 + $0x2d8] sm:$0xff] }
 0x6ca   : > { %3858 = vmatpush.msra.mxu3 %v3736_v26  ;;  %4277 = vmatpush.msra.mxu2 %v4223_v57  ;;  %v3740_v26 = vld [vmem:[%s16977_s9 + $0x518] sm:$0xff] }
 0x6cb   : > { %v3632_v57 = vld [vmem:[%s16977_s9 + $0x1b8] sm:$0xff] }
 0x6cc   : > { %3859 = vmatpush.msra.mxu3 %v3724_v23  ;;  %4278 = vmatpush.msra.mxu2 %v4221_v20  ;;  %v3728_v23 = vld [vmem:[%s16977_s9 + $0x4b8] sm:$0xff] }
 0x6cd   : > { %3817 = vmatmul.f32.gmra.mxu3 %v13052_v31  ;;  %4020 = vmatmul.f32.gmra.mxu2 %v13052_v31  ;;  %v3620_v20 = vld [vmem:[%s16977_s9 + $0x158] sm:$0xff] }
 0x6ce   : > { %3860 = vmatpush.msra.mxu3 %v3712_v1  ;;  %4279 = vmatpush.msra.mxu2 %v4219_v39  ;;  %v3716_v1 = vld [vmem:[%s16977_s9 + $0x458] sm:$0xff] }
 0x6d0   : > { %3861 = vmatpush.msra.mxu3 %v3700_v5  ;;  %4280 = vmatpush.msra.mxu2 %v4217_v6  ;;  %v3596_v6 = vld [vmem:[%s16977_s9 + $0x98] sm:$0xff] }
 0x6d2   : > { %3862 = vmatpush.msra.mxu3 %v3688_v4 }
 0x6d4   : > { %3863 = vmatpush.msra.mxu3 %v3676_v43  ;;  %v3704_v43 = vld [vmem:[%s16977_s9 + $0x3f8] sm:$0xff] }
 0x6d5   : > { %3820 = vmatmul.f32.gmra.mxu3 %v13081_v18  ;;  %4023 = vmatmul.f32.gmra.mxu2 %v13081_v18 }
 0x6d6   : > { %3864 = vmatpush.msra.mxu3 %v3664_v37  ;;  %v3692_v37 = vld [vmem:[%s16977_s9 + $0x398] sm:$0xff] }
 0x6d8   : > { %3865 = vmatpush.msra.mxu3 %v3652_v44 }
 0x6da   : > { %3866 = vmatpush.msra.mxu3 %v3640_v47 }
 0x6dc   : > { %3867 = vmatpush.msra.mxu3 %v3628_v55  ;;  %v3656_v55 = vld [vmem:[%s16977_s9 + $0x278] sm:$0xff] }
 0x6dd   : > { %3823 = vmatmul.f32.gmra.mxu3 %v13110_v51  ;;  %4026 = vmatmul.f32.gmra.mxu2 %v13110_v51 }
 0x6de   : > { %3868 = vmatpush.msra.mxu3 %v3616_v34  ;;  %v3644_v34 = vld [vmem:[%s16977_s9 + $0x218] sm:$0xff] }
 0x6e0   : > { %3869 = vmatpush.msra.mxu3 %v3604_v25 }
 0x6e2   : > { %3870 = vmatpush.msra.mxu3 %v3592_v35  ;;  %v3608_v35 = vld [vmem:[%s16977_s9 + $0xf8] sm:$0xff] }
 0x6e4   : > { %3871 = vmatpush.msra.mxu3 %v3580_v61  ;;  %v3584_v61 = vld [vmem:[%s16977_s9 + $0x38] sm:$0xff] }
 0x6e5   : > { %3843 = vmatmul.f32.vlgmr.msrb.gmra.mxu3 %v13023_v3  ;;  %4075 = vmatmul.f32.vlgmr.msrb.gmra.mxu2 %v13023_v3 }
 0x6e6   : > { %3885 = vmatpush.msrb.mxu3 %v3761_v53  ;;  %v3766_v53 = vld [vmem:[%s16977_s9 + $0x5e8] sm:$0xff] }
 0x6e8   : > { %3886 = vmatpush.msrb.mxu3 %v3749_v38 }
 0x6ea   : > { %3887 = vmatpush.msrb.mxu3 %v3737_v11 }
 0x6ec   : > { %3888 = vmatpush.msrb.mxu3 %v3725_v36  ;;  %v3754_v36 = vld [vmem:[%s16977_s9 + $0x588] sm:$0xff] }
 0x6ed   : > { %3846 = vmatmul.f32.gmra.mxu3 %v13052_v31  ;;  %4078 = vmatmul.f32.gmra.mxu2 %v13052_v31 }
 0x6ee   : > { %3889 = vmatpush.msrb.mxu3 %v3713_v49  ;;  %v3742_v49 = vld [vmem:[%s16977_s9 + $0x528] sm:$0xff] }
 0x6f0   : > { %3890 = vmatpush.msrb.mxu3 %v3701_v30  ;;  %v3730_v30 = vld [vmem:[%s16977_s9 + $0x4c8] sm:$0xff] }
 0x6f2   : > { %3891 = vmatpush.msrb.mxu3 %v3689_v60  ;;  %v3718_v60 = vld [vmem:[%s16977_s9 + $0x468] sm:$0xff] }
 0x6f4   : > { %3892 = vmatpush.msrb.mxu3 %v3677_v21 }
 0x6f5   : > { %3849 = vmatmul.f32.gmra.mxu3 %v13081_v18  ;;  %4081 = vmatmul.f32.gmra.mxu2 %v13081_v18 }
 0x6f6   : > { %3893 = vmatpush.msrb.mxu3 %v3665_v24 }
 0x6f8   : > { %3894 = vmatpush.msrb.mxu3 %v3653_v33  ;;  %v3706_v33 = vld [vmem:[%s16977_s9 + $0x408] sm:$0xff] }
 0x6fa   : > { %3895 = vmatpush.msrb.mxu3 %v3641_v42  ;;  %v3694_v42 = vld [vmem:[%s16977_s9 + $0x3a8] sm:$0xff] }
 0x6fc   : > { %3896 = vmatpush.msrb.mxu3 %v3629_v19  ;;  %v3682_v19 = vld [vmem:[%s16977_s9 + $0x348] sm:$0xff] }
 0x6fd   : > { %3852 = vmatmul.f32.gmra.mxu3 %v13110_v51  ;;  %4084 = vmatmul.f32.gmra.mxu2 %v13110_v51 }
 0x6fe   : > { %3897 = vmatpush.msrb.mxu3 %v3617_v56  ;;  %v3670_v56 = vld [vmem:[%s16977_s9 + $0x2e8] sm:$0xff] }
 0x700   : > { %3898 = vmatpush.msrb.mxu3 %v3605_v48 }
 0x702   : > { %3899 = vmatpush.msrb.mxu3 %v3593_v50 }
 0x704   : > { %3900 = vmatpush.msrb.mxu3 %v3581_v16  ;;  %v3658_v16 = vld [vmem:[%s16977_s9 + $0x288] sm:$0xff] }
 0x705   : > { %3872 = vmatmul.f32.vlgmr.msra.gmra.mxu3 %v13023_v3  ;;  %9014 = vmatmul.msk.f32.vlgmr.msra.gmra.mxu2 %vm552_vm0, %v13270_v46 }
 0x706   : > { %3914 = vmatpush.msra.mxu3 %v3762_v17  ;;  %v3646_v17 = vld [vmem:[%s16977_s9 + $0x228] sm:$0xff] }
 0x708   : > { %3915 = vmatpush.msra.mxu3 %v3750_v58  ;;  %v3634_v58 = vld [vmem:[%s16977_s9 + $0x1c8] sm:$0xff] }
 0x70a   : > { %3916 = vmatpush.msra.mxu3 %v3738_v8  ;;  %v3622_v8 = vld [vmem:[%s16977_s9 + $0x168] sm:$0xff] }
 0x70c   : > { %3917 = vmatpush.msra.mxu3 %v3726_v40 }
 0x70d   : > { %3875 = vmatmul.f32.gmra.mxu3 %v13052_v31  ;;  %9015 = vmatmul.msk.f32.gmra.mxu2 %vm552_vm0, %v13290_v7 }
 0x70e   : > { %3918 = vmatpush.msra.mxu3 %v3714_v13 }
 0x710   : > { %3919 = vmatpush.msra.mxu3 %v3702_v28  ;;  %v3610_v28 = vld [vmem:[%s16977_s9 + $0x108] sm:$0xff] }
 0x712   : > { %3920 = vmatpush.msra.mxu3 %v3690_v10  ;;  %v3598_v10 = vld [vmem:[%s16977_s9 + $0xa8] sm:$0xff] }
 0x714   : > { %3921 = vmatpush.msra.mxu3 %v3678_v45  ;;  %v3586_v45 = vld [vmem:[%s16977_s9 + $0x48] sm:$0xff] }
 0x715   : > { %3878 = vmatmul.f32.gmra.mxu3 %v13081_v18  ;;  %9016 = vmatmul.msk.f32.gmra.mxu2 %vm552_vm0, %v13310_v27 }
 0x716   : > { %3922 = vmatpush.msra.mxu3 %v3666_v41  ;;  %v3768_v41 = vld [vmem:[%s16977_s9 + $0x5f8] sm:$0xff] }
 0x718   : > { %3923 = vmatpush.msra.mxu3 %v3654_v14 }
 0x71a   : > { %3924 = vmatpush.msra.mxu3 %v3642_v0 }
 0x71c   : > { %3925 = vmatpush.msra.mxu3 %v3630_v22 }
 0x71d   : > { %3881 = vmatmul.f32.gmra.mxu3 %v13110_v51  ;;  %9017 = vmatmul.msk.f32.gmra.mxu2 %vm552_vm0, %v13330_v52 }
 0x71e   : > { %3926 = vmatpush.msra.mxu3 %v3618_v63  ;;  %v3756_v63 = vld [vmem:[%s16977_s9 + $0x598] sm:$0xff] }
 0x720   : > { %3927 = vmatpush.msra.mxu3 %v3606_v12 }
 0x722   : > { %3928 = vmatpush.msra.mxu3 %v3594_v59  ;;  %v3744_v59 = vld [vmem:[%s16977_s9 + $0x538] sm:$0xff] }
 0x724   : > { %3929 = vmatpush.msra.mxu3 %v3582_v15  ;;  %v3732_v15 = vld [vmem:[%s16977_s9 + $0x4d8] sm:$0xff] }
 0x725   : > { %3901 = vmatmul.f32.vlgmr.msrb.gmra.mxu3 %v13023_v3 }
 0x726   : > { %3972 = vmatpush.msrb.mxu3 %v3764_v62  ;;  %v3720_v62 = vld [vmem:[%s16977_s9 + $0x478] sm:$0xff] }
 0x728   : > { %v13354_v54 = vpop.f32.mrf.mxu3  ;;  %v13356_v9 = vpop.f32.mrf.mxu2  ;;  %3973 = vmatpush.msrb.mxu3 %v3752_v29 }
 0x729   : > { %10010 = vtanh.f32 %v13354_v54 }
 0x72a   : > { %3974 = vmatpush.msrb.mxu3 %v3740_v26 }
 0x72c   : > { %3975 = vmatpush.msrb.mxu3 %v3728_v23  ;;  %v3708_v23 = vld [vmem:[%s16977_s9 + $0x418] sm:$0xff] }
 0x72d   : > { %3904 = vmatmul.f32.gmra.mxu3 %v13052_v31 }
 0x72e   : > { %3976 = vmatpush.msrb.mxu3 %v3716_v1 }
 0x72f   : > { %v10011_v14 = vpop.eup %10010 }
 0x730   : > { %v13371_v5 = vpop.f32.mrf.mxu3  ;;  %v13373_v4 = vpop.f32.mrf.mxu2  ;;  %3977 = vmatpush.msrb.mxu3 %v3704_v43  ;;  %v3684_v43 = vld [vmem:[%s16977_s9 + $0x358] sm:$0xff] }
 0x731   : > { %10012 = vtanh.f32 %v13371_v5  ;;  %v3696_v5 = vld [vmem:[%s16977_s9 + $0x3b8] sm:$0xff] }
 0x732   : > { %3978 = vmatpush.msrb.mxu3 %v3692_v37  ;;  %v3672_v37 = vld [vmem:[%s16977_s9 + $0x2f8] sm:$0xff] }
 0x734   : > { %3979 = vmatpush.msrb.mxu3 %v3680_v32 }
 0x735   : > { %3907 = vmatmul.f32.gmra.mxu3 %v13081_v18 }
 0x736   : > { %3980 = vmatpush.msrb.mxu3 %v3668_v2 }
 0x737   : > { %v10013_v54 = vpop.eup %10012 }
 0x738   : > { %v13388_v44 = vpop.f32.mrf.mxu3  ;;  %v13390_v47 = vpop.f32.mrf.mxu2  ;;  %3981 = vmatpush.msrb.mxu3 %v3656_v55  ;;  %v3660_v55 = vld [vmem:[%s16977_s9 + $0x298] sm:$0xff] }
 0x739   : > { %10014 = vtanh.f32 %v13388_v44 }
 0x73a   : > { %3982 = vmatpush.msrb.mxu3 %v3644_v34 }
 0x73c   : > { %3983 = vmatpush.msrb.mxu3 %v3632_v57  ;;  %v3648_v57 = vld [vmem:[%s16977_s9 + $0x238] sm:$0xff] }
 0x73d   : > { %3910 = vmatmul.f32.gmra.mxu3 %v13110_v51 }
 0x73e   : > { %3984 = vmatpush.msrb.mxu3 %v3620_v20  ;;  %v3636_v20 = vld [vmem:[%s16977_s9 + $0x1d8] sm:$0xff] }
 0x73f   : > { %v10015_v32 = vpop.eup %10014 }
 0x740   : > { %v13405_v25 = vpop.f32.mrf.mxu3  ;;  %v13407_v39 = vpop.f32.mrf.mxu2  ;;  %3985 = vmatpush.msrb.mxu3 %v3608_v35  ;;  %v3624_v35 = vld [vmem:[%s16977_s9 + $0x178] sm:$0xff] }
 0x742   : > { %3986 = vmatpush.msrb.mxu3 %v3596_v6 }
 0x744   : > { %3987 = vmatpush.msrb.mxu3 %v3584_v61 }
 0x745   : > { %3930 = vmatmul.f32.vlgmr.msra.gmra.mxu3 %v13023_v3 }
 0x746   : > { %4030 = vmatpush.msra.mxu3 %v3766_v53  ;;  %v3612_v53 = vld [vmem:[%s16977_s9 + $0x118] sm:$0xff] }
 0x748   : > { %v13422_v38 = vpop.f32.mrf.mxu3  ;;  %v13424_v11 = vpop.f32.mrf.mxu2  ;;  %4031 = vmatpush.msra.mxu3 %v3754_v36  ;;  %v3600_v36 = vld [vmem:[%s16977_s9 + $0xb8] sm:$0xff] }
 0x749   : > { %10016 = vtanh.f32 %v13422_v38 }
 0x74a   : > { %4032 = vmatpush.msra.mxu3 %v3742_v49  ;;  %v3588_v49 = vld [vmem:[%s16977_s9 + $0x58] sm:$0xff] }
 0x74c   : > { %4033 = vmatpush.msra.mxu3 %v3730_v30 }
 0x74d   : > { %3933 = vmatmul.f32.gmra.mxu3 %v13052_v31 }
 0x74e   : > { %4034 = vmatpush.msra.mxu3 %v3718_v60 }
 0x74f   : > { %v10017_v30 = vpop.eup %10016 }
 0x750   : > { %v13439_v21 = vpop.f32.mrf.mxu3  ;;  %v13441_v24 = vpop.f32.mrf.mxu2  ;;  %4035 = vmatpush.msra.mxu3 %v3706_v33 }
 0x751   : > { %10018 = vtanh.f32 %v13439_v21  ;;  %v13569_v21 = vpop.permute.xlu0 %4250 }
 0x752   : > { %4036 = vmatpush.msra.mxu3 %v3694_v42 }
 0x754   : > { %4037 = vmatpush.msra.mxu3 %v3682_v19 }
 0x755   : > { %3936 = vmatmul.f32.gmra.mxu3 %v13081_v18 }
 0x756   : > { %4038 = vmatpush.msra.mxu3 %v3670_v56 }
 0x757   : > { %v10019_v38 = vpop.eup %10018 }
 0x758   : > { %v13456_v48 = vpop.f32.mrf.mxu3  ;;  %v13458_v50 = vpop.f32.mrf.mxu2  ;;  %4039 = vmatpush.msra.mxu3 %v3658_v16 }
 0x759   : > { %10020 = vtanh.f32 %v13456_v48  ;;  %v4224_v48 = vld [vmem:[%s13178_s30 + $0x38] sm:$0xff] }
 0x75a   : > { %4040 = vmatpush.msra.mxu3 %v3646_v17 }
 0x75c   : > { %4041 = vmatpush.msra.mxu3 %v3634_v58 }
 0x75d   : > { %3939 = vmatmul.f32.gmra.mxu3 %v13110_v51 }
 0x75e   : > { %4042 = vmatpush.msra.mxu3 %v3622_v8 }
 0x75f   : > { %v10021_v17 = vpop.eup %10020 }
 0x760   : > { %v13473_v40 = vpop.f32.mrf.mxu3  ;;  %v13475_v13 = vpop.f32.mrf.mxu2  ;;  %4043 = vmatpush.msra.mxu3 %v3610_v28 }
 0x761   : > { %10022 = vtanh.f32 %v13473_v40 }
 0x762   : > { %4044 = vmatpush.msra.mxu3 %v3598_v10  ;;  %v4228_v10 = vld [vmem:[%s13178_s30 + $0x58] sm:$0xff]  ;;  %10024 = vtanh.f32 %v13405_v25 }
 0x764   : > { %4045 = vmatpush.msra.mxu3 %v3586_v45  ;;  %v4226_v45 = vld [vmem:[%s13178_s30 + $0x48] sm:$0xff] }
 0x765   : > { %3988 = vmatmul.f32.vlgmr.msrb.gmra.mxu3 %v13023_v3 }
 0x766   : > { %4088 = vmatpush.msrb.mxu3 %v3768_v41  ;;  %v13576_v41 = vpop.permute.xlu1 %4245 }
 0x768   : > { %v3844_v0 = vpop.f32.mrf.mxu3  ;;  %v13491_v22 = vpop.f32.mrf.mxu2  ;;  %4089 = vmatpush.msrb.mxu3 %v3756_v63 }
 0x769   : > { %v13496_v12 = vadd.f32 %v10011_v14, %v3844_v0  ;;  %v10023_v14 = vpop.eup %10022 }
 0x76a   : > { %4090 = vmatpush.msrb.mxu3 %v3744_v59  ;;  %v4222_v59 = vld [vmem:[%s13178_s30 + $0x28] sm:$0xff] }
 0x76c   : > { %4091 = vmatpush.msrb.mxu3 %v3732_v15 }
 0x76d   : > { %3991 = vmatmul.f32.gmra.mxu3 %v13052_v31 }
 0x76e   : > { %4092 = vmatpush.msrb.mxu3 %v3720_v62 }
 0x770   : > { %v3847_v29 = vpop.f32.mrf.mxu3  ;;  %v13509_v26 = vpop.f32.mrf.mxu2  ;;  %4093 = vmatpush.msrb.mxu3 %v3708_v23 }
 0x771   : > { %v13514_v1 = vadd.f32 %v10013_v54, %v3847_v29  ;;  %v13583_v54 = vpop.permute.xlu2 %4240  ;;  %v4220_v29 = vld [vmem:[%s13178_s30 + $0x18] sm:$0xff] }
 0x772   : > { %4094 = vmatpush.msrb.mxu3 %v3696_v5 }
 0x773   : > { %10026 = vtanh.f32 %v13514_v1 }
 0x774   : > { %4095 = vmatpush.msrb.mxu3 %v3684_v43  ;;  %v13587_v43 = vpop.permute.xlu0 %4235  ;;  %10028 = vtanh.f32 %v13496_v12 }
 0x775   : > { %3994 = vmatmul.f32.gmra.mxu3 %v13081_v18 }
 0x776   : > { %4096 = vmatpush.msrb.mxu3 %v3672_v37  ;;  %v4218_v37 = vld [vmem:[%s13178_s30 + $0x8] sm:$0xff]  ;;  %s500_s30 = scalar_lea.vmem %s16981_s13, %s17614_s26 }
 0x778   : > { %v3850_v2 = vpop.f32.mrf.mxu3  ;;  %v13527_v44 = vpop.f32.mrf.mxu2  ;;  %4097 = vmatpush.msrb.mxu3 %v3660_v55 }
 0x779   : > { %v13532_v34 = vadd.f32 %v10015_v32, %v3850_v2 }
 0x77a   : > { %4098 = vmatpush.msrb.mxu3 %v3648_v57 }
 0x77b   : > { %10030 = vtanh.f32 %v13532_v34  ;;  %v13616_v34 = vld [vmem:[%s16974_s6 + $0x210] sm:$0xff] }
 0x77c   : > { %4099 = vmatpush.msrb.mxu3 %v3636_v20 }
 0x77d   : > { %3997 = vmatmul.f32.gmra.mxu3 %v13110_v51 }
 0x77e   : > { %4100 = vmatpush.msrb.mxu3 %v3624_v35  ;;  %v13595_v35 = vld [vmem:[%s16974_s6 + $0x200] sm:$0xff] }
 0x780   : > { %v13544_v6 = vpop.f32.mrf.mxu3  ;;  %v13546_v61 = vpop.f32.mrf.mxu2  ;;  %4101 = vmatpush.msrb.mxu3 %v3612_v53  ;;  %v13606_v53 = vld [vmem:[%s16974_s6 + $0x208] sm:$0xff] }
 0x782   : > { %4102 = vmatpush.msrb.mxu3 %v3600_v36  ;;  %v10025_v36 = vpop.eup %10024 }
 0x784   : > { %4103 = vmatpush.msrb.mxu3 %v3588_v49  ;;  %v10027_v49 = vpop.eup %10026 }
 0x785   : > { %4046 = vmatmul.f32.vlgmr.msra.gmra.mxu3 %v13023_v3  ;;  %v10029_v1 = vpop.eup %10028 }
 0x786   : > { %4304 = vmatpush.msra.mxu3 %v4228_v10 }
 0x788   : > { %v3873_v60 = vpop.f32.mrf.mxu3  ;;  %v4282_v33 = vpop.f32.mrf.mxu2  ;;  %4305 = vmatpush.msra.mxu3 %v4226_v45 }
 0x789   : > { %v13559_v42 = vadd.f32 %v10017_v30, %v3873_v60  ;;  %v4283_v32 = vadd.f32 %v4282_v33, %v13587_v43  ;;  %v10031_v30 = vpop.eup %10030 }
 0x78a   : > { %4306 = vmatpush.msra.mxu3 %v4224_v48 }
 0x78b   : > { %v4323_v20 = vmax.f32 %v4283_v32, 0.0 }
 0x78c   : > { %4307 = vmatpush.msra.mxu3 %v4222_v59 }
 0x78d   : > { %4049 = vmatmul.f32.gmra.mxu3 %v13052_v31 }
 0x78e   : > { %4308 = vmatpush.msra.mxu3 %v4220_v29 }
 0x790   : > { %v3876_v19 = vpop.f32.mrf.mxu3  ;;  %v4285_v56 = vpop.f32.mrf.mxu2  ;;  %4309 = vmatpush.msra.mxu3 %v4218_v37 }
 0x791   : > { %v13563_v16 = vadd.f32 %v10019_v38, %v3876_v19  ;;  %v4286_v23 = vadd.f32 %v4285_v56, %v13583_v54 }
 0x793   : > { %v4325_v55 = vmax.f32 %v4286_v23, 0.0 }
 0x795   : > { %4052 = vmatmul.f32.gmra.mxu3 %v13081_v18 }
 0x798   : > { %v3879_v58 = vpop.f32.mrf.mxu3  ;;  %v4288_v8 = vpop.f32.mrf.mxu2 }
 0x799   : > { %v13567_v28 = vadd.f32 %v10021_v17, %v3879_v58  ;;  %v4289_v15 = vadd.f32 %v4288_v8, %v13576_v41  ;;  %v13624_v17 = vld [vmem:[%s16974_s6 + $0x218] sm:$0xff] }
 0x79b   : > { %v4327_v2 = vmax.f32 %v4289_v15, 0.0 }
 0x79d   : > { %4055 = vmatmul.f32.gmra.mxu3 %v13110_v51 }
 0x7a0   : > { %v3882_v0 = vpop.f32.mrf.mxu3  ;;  %v4291_v63 = vpop.f32.mrf.mxu2 }
 0x7a1   : > { %v13580_v62 = vadd.f32 %v10023_v14, %v3882_v0  ;;  %v4292_v40 = vadd.f32 %v4291_v63, %v13569_v21 }
 0x7a3   : > { %v4329_v5 = vmax.f32 %v4292_v40, 0.0 }
 0x7a5   : > { %4104 = vmatmul.f32.vlgmr.msrb.gmra.mxu3 %v13023_v3  ;;  %5041 = vmatpush.msrb.mxu0 %v4329_v5 }
 0x7a7   : > { %5042 = vmatpush.msrb.mxu0 %v4327_v2 }
 0x7a8   : > { %v3902_v57 = vpop.f32.mrf.mxu3 }
 0x7a9   : > { %5043 = vmatpush.msrb.mxu0 %v4325_v55  ;;  %v4149_v60 = vadd.f32 %v10029_v1, %v3902_v57  ;;  %v13692_v57 = vld [vmem:[%s16974_s6 + $0x240] sm:$0xff]  ;;  %v13722_v1 = vld [vmem:[%s16974_s6 + $0x250] sm:$0xff] }
 0x7ab   : > { %5044 = vmatpush.msrb.mxu0 %v4323_v20 }
 0x7ac   : > { %9118 = vmatmul.msk.f32.vlgmr.msrb.gmra.mxu0 %vm1063_vm2, %v13595_v35 }
 0x7ad   : > { %4107 = vmatmul.f32.gmra.mxu3 %v13052_v31  ;;  %v4139_v31 = vadd.f32 %v10025_v36, %v13544_v6  ;;  %v13703_v36 = vld [vmem:[%s16974_s6 + $0x388] sm:$0xff] }
 0x7af   : > { %10032 = vtanh.f32 %v4139_v31 }
 0x7b0   : > { %v3905_v3 = vpop.f32.mrf.mxu3 }
 0x7b1   : > { %v4151_v25 = vadd.f32 %v10027_v49, %v3905_v3  ;;  %v13708_v49 = vld [vmem:[%s16974_s6 + $0x248] sm:$0xff] }
 0x7b3   : > { %10034 = vtanh.f32 %v4151_v25  ;;  %v13717_v25 = vld [vmem:[%s16974_s6 + $0x390] sm:$0xff] }
 0x7b4   : > { %9119 = vmatmul.msk.f32.gmra.mxu0 %vm1063_vm2, %v13606_v53 }
 0x7b5   : > { %4110 = vmatmul.f32.gmra.mxu3 %v13081_v18  ;;  %v10033_v18 = vpop.eup %10032 }
 0x7b8   : > { %v3908_v12 = vpop.f32.mrf.mxu3 }
 0x7b9   : > { %v4153_v33 = vadd.f32 %v10031_v30, %v3908_v12  ;;  %v10035_v6 = vpop.eup %10034  ;;  %v13731_v12 = vld [vmem:[%s16974_s6 + $0x398] sm:$0xff] }
 0x7ba   : > { %v4167_v10 = vadd.f32 %v10035_v6, %v13373_v4  ;;  %v13752_v6 = vld [vmem:[%s16974_s6 + $0x260] sm:$0xff] }
 0x7bb   : > { %10036 = vtanh.f32 %v4153_v33 }
 0x7bc   : > { %9120 = vmatmul.msk.f32.gmra.mxu0 %vm1063_vm2, %v13616_v34  ;;  %10038 = vtanh.f32 %v4149_v60  ;;  %v13736_v60 = vld [vmem:[%s16974_s6 + $0x258] sm:$0xff] }
 0x7bd   : > { %4113 = vmatmul.f32.gmra.mxu3 %v13110_v51 }
 0x7c0   : > { %v3911_v38 = vpop.f32.mrf.mxu3 }
 0x7c1   : > { %v10037_v19 = vpop.eup %10036  ;;  %v4155_v56 = vadd.f32 %v10033_v18, %v3911_v38  ;;  %v13747_v18 = vld [vmem:[%s16974_s6 + $0x3a0] sm:$0xff] }
 0x7c2   : > { %v4169_v58 = vadd.f32 %v10037_v19, %v13390_v47  ;;  %v10039_v8 = vpop.eup %10038  ;;  %v13638_v47 = vld [vmem:[%s16974_s6 + $0x220] sm:$0xff]  ;;  %v13761_v19 = vld [vmem:[%s16974_s6 + $0x3a8] sm:$0xff] }
 0x7c3   : > { %10040 = vtanh.f32 %v4155_v56  ;;  %v4165_v51 = vadd.f32 %v10039_v8, %v13356_v9  ;;  %v13766_v56 = vld [vmem:[%s16974_s6 + $0x268] sm:$0xff]  ;;  %v13777_v8 = vld [vmem:[%s16974_s6 + $0x3b0] sm:$0xff] }
 0x7c4   : > { %9121 = vmatmul.msk.f32.gmra.mxu0 %vm1063_vm2, %v13624_v17  ;;  %10042 = vtanh.f32 %v4169_v58 }
 0x7c5   : > { %9018 = vmatmul.msk.f32.vlgmr.msra.gmra.mxu3 %vm552_vm0, %v13270_v46  ;;  %10044 = vtanh.f32 %v4167_v10  ;;  %v13782_v10 = vld [vmem:[%s16974_s6 + $0x270] sm:$0xff] }
 0x7c6   : > { %10046 = vtanh.f32 %v4165_v51 }
 0x7c8   : > { %v13633_v45 = vpop.f32.mrf.mxu3 }
 0x7c9   : > { %v10041_v48 = vpop.eup %10040 }
 0x7ca   : > { %v4171_v4 = vadd.f32 %v10041_v48, %v13407_v39  ;;  %v10043_v14 = vpop.eup %10042  ;;  %v13652_v39 = vld [vmem:[%s16974_s6 + $0x228] sm:$0xff] }
 0x7cb   : > { %v10045_v46 = vpop.eup %10044  ;;  %v4185_v9 = vadd.f32 %v10043_v14, %v13458_v50  ;;  %v13665_v50 = vld [vmem:[%s16974_s6 + $0x230] sm:$0xff] }
 0x7cc   : > { %10048 = vtanh.f32 %v4171_v4  ;;  %9122 = vmatmul.msk.f32.gmra.mxu0 %vm1063_vm2, %v13638_v47  ;;  %v10047_v0 = vpop.eup %10046  ;;  %v4183_v63 = vadd.f32 %v10045_v46, %v13441_v24  ;;  %v13794_v46 = vld [vmem:[%s16974_s6 + $0x3b8] sm:$0xff] }
 0x7cd   : > { %9019 = vmatmul.msk.f32.gmra.mxu3 %vm552_vm0, %v13290_v7  ;;  %v4181_v40 = vadd.f32 %v10047_v0, %v13424_v11  ;;  %10050 = vtanh.f32 %v4185_v9 }
 0x7ce   : > { %10052 = vtanh.f32 %v4183_v63 }
 0x7d0   : > { %v13647_v59 = vpop.f32.mrf.mxu3 }
 0x7d2   : > { %v10049_v15 = vpop.eup %10048 }
 0x7d3   : > { %v4187_v29 = vadd.f32 %v10049_v15, %v13475_v13  ;;  %v10051_v24 = vpop.eup %10050 }
 0x7d4   : > { %9123 = vmatmul.msk.f32.gmra.mxu0 %vm1063_vm2, %v13652_v39  ;;  %v10053_v11 = vpop.eup %10052  ;;  %v4201_v5 = vadd.f32 %v10051_v24, %v13527_v44 }
 0x7d5   : > { %10054 = vtanh.f32 %v4187_v29  ;;  %9020 = vmatmul.msk.f32.gmra.mxu3 %vm552_vm0, %v13310_v27  ;;  %v4199_v27 = vadd.f32 %v10053_v11, %v13509_v26 }
 0x7d6   : > { %10056 = vtanh.f32 %v4181_v40 }
 0x7d8   : > { %v13660_v7 = vpop.f32.mrf.mxu3 }
 0x7db   : > { %v10055_v23 = vpop.eup %10054 }
 0x7dc   : > { %v4203_v13 = vadd.f32 %v10055_v23, %v13546_v61  ;;  %9124 = vmatmul.msk.f32.gmra.mxu0 %vm1063_vm2, %v13665_v50  ;;  %v10057_v37 = vpop.eup %10056  ;;  %v13678_v61 = vld [vmem:[%s16974_s6 + $0x238] sm:$0xff] }
 0x7dd   : > { %9021 = vmatmul.msk.f32.gmra.mxu3 %vm552_vm0, %v13330_v52  ;;  %v4197_v2 = vadd.f32 %v10057_v37, %v13491_v22  ;;  %v13687_v22 = vld [vmem:[%s16974_s6 + $0x380] sm:$0xff] }
 0x7de   : > { %10058 = vtanh.f32 %v4203_v13 }
 0x7df   : > { %10060 = vtanh.f32 %v4201_v5 }
 0x7e0   : > { %v3940_v32 = vpop.f32.mrf.mxu3  ;;  %10062 = vtanh.f32 %v4199_v27 }
 0x7e1   : > { %10064 = vtanh.f32 %v4197_v2  ;;  %v13835_v2 = vld [vmem:[%s16974_s6 + $0x288] sm:$0xff] }
 0x7e2   : > { %10066 = vtanh.f32 %v13567_v28 }
 0x7e3   : > { %10068 = vtanh.f32 %v13580_v62 }
 0x7e4   : > { %v10059_v55 = vpop.eup %10058  ;;  %9125 = vmatmul.msk.f32.gmra.mxu0 %vm1063_vm2, %v13678_v61  ;;  %10070 = vtanh.f32 %v13563_v16  ;;  %v13799_v16 = vld [vmem:[%s16974_s6 + $0x278] sm:$0xff] }
 0x7e5   : > { %4583 = vmatpush.msrb.mxu2 %v10059_v55  ;;  %v10061_v52 = vpop.eup %10060  ;;  %10072 = vtanh.f32 %v13559_v42 }
 0x7e6   : > { %v10063_v44 = vpop.eup %10062 }
 0x7e7   : > { %4584 = vmatpush.msrb.mxu2 %v10061_v52  ;;  %v10065_v20 = vpop.eup %10064 }
 0x7e8   : > { %v13682_v26 = vpop.f32.mrf.mxu3  ;;  %v10067_v28 = vpop.eup %10066 }
 0x7e9   : > { %4585 = vmatpush.msrb.mxu2 %v10063_v44  ;;  %v10069_v62 = vpop.eup %10068  ;;  %v4154_v51 = vadd.f32 %v10067_v28, %v13660_v7 }
 0x7ea   : > { %v4156_v48 = vadd.f32 %v10069_v62, %v3940_v32  ;;  %v10071_v14 = vpop.eup %10070  ;;  %v13830_v32 = vld [vmem:[%s16974_s6 + $0x3c8] sm:$0xff]  ;;  %v13846_v62 = vld [vmem:[%s16974_s6 + $0x3d0] sm:$0xff] }
 0x7eb   : > { %4586 = vmatpush.msrb.mxu2 %v10065_v20  ;;  %v4152_v9 = vadd.f32 %v10071_v14, %v13647_v59  ;;  %v10073_v42 = vpop.eup %10072  ;;  %10074 = vtanh.f32 %v4154_v51  ;;  %v13812_v59 = vld [vmem:[%s16974_s6 + $0x3c0] sm:$0xff]  ;;  %v13851_v51 = vld [vmem:[%s16974_s6 + $0x290] sm:$0xff] }
 0x7ec   : > { %9022 = vmatmul.msk.f32.vlgmr.msrb.gmra.mxu2 %vm1063_vm2, %v13687_v22  ;;  %9126 = vmatmul.msk.f32.gmra.mxu0 %vm1063_vm2, %v13692_v57  ;;  %v4150_v0 = vadd.f32 %v10073_v42, %v13633_v45  ;;  %10076 = vtanh.f32 %v4156_v48  ;;  %v13817_v45 = vld [vmem:[%s16974_s6 + $0x280] sm:$0xff] }
 0x7ed   : > { %5451 = vmatpush.msra.mxu2 %v10059_v55  ;;  %10078 = vtanh.f32 %v4152_v9 }
 0x7ee   : > { %10080 = vtanh.f32 %v4150_v0  ;;  %v13868_v0 = vld [vmem:[%s16974_s6 + $0x298] sm:$0xff] }
 0x7ef   : > { %5452 = vmatpush.msra.mxu2 %v10061_v52 }
 0x7f0   : > { %v13698_v3 = vpop.f32.mrf.mxu3 }
 0x7f1   : > { %5453 = vmatpush.msra.mxu2 %v10063_v44  ;;  %v10075_v15 = vpop.eup %10074 }
 0x7f2   : > { %v10077_v29 = vpop.eup %10076 }
 0x7f3   : > { %5454 = vmatpush.msra.mxu2 %v10065_v20  ;;  %v10079_v11 = vpop.eup %10078 }
 0x7f4   : > { %9023 = vmatmul.msk.f32.gmra.mxu2 %vm1063_vm2, %v13703_v36  ;;  %9127 = vmatmul.msk.f32.gmra.mxu0 %vm1063_vm2, %v13708_v49  ;;  %v4168_v23 = vadd.f32 %v10079_v11, %v13698_v3  ;;  %v10081_v13 = vpop.eup %10080 }
 0x7f5   : > { %v4166_v5 = vadd.f32 %v10081_v13, %v13682_v26 }
 0x7f8   : > { %v3995_v31 = vpop.f32.mrf.mxu3 }
 0x7f9   : > { %v4170_v7 = vadd.f32 %v10075_v15, %v3995_v31 }
 0x7fb   : > { %10082 = vtanh.f32 %v4170_v7 }
 0x7fc   : > { %9024 = vmatmul.msk.f32.gmra.mxu2 %vm1063_vm2, %v13717_v25  ;;  %9128 = vmatmul.msk.f32.gmra.mxu0 %vm1063_vm2, %v13722_v1 }
 0x800   : > { %v3998_v30 = vpop.f32.mrf.mxu3 }
 0x801   : > { %v4172_v24 = vadd.f32 %v10077_v29, %v3998_v30  ;;  %v10083_v55 = vpop.eup %10082 }
 0x803   : > { %10084 = vtanh.f32 %v4172_v24 }
 0x804   : > { %9025 = vmatmul.msk.f32.gmra.mxu2 %vm1063_vm2, %v13731_v12  ;;  %9129 = vmatmul.msk.f32.gmra.mxu0 %vm1063_vm2, %v13736_v60  ;;  %10086 = vtanh.f32 %v4168_v23 }
 0x805   : > { %10088 = vtanh.f32 %v4166_v5  ;;  %v13879_v5 = vld [vmem:[%s16974_s6 + $0x3e0] sm:$0xff] }
 0x808   : > { %v13742_v33 = vpop.f32.mrf.mxu3 }
 0x809   : > { %v10085_v52 = vpop.eup %10084 }
 0x80a   : > { %v10087_v20 = vpop.eup %10086 }
 0x80b   : > { %v10089_v30 = vpop.eup %10088 }
 0x80c   : > { %9026 = vmatmul.msk.f32.gmra.mxu2 %vm1063_vm2, %v13747_v18  ;;  %9130 = vmatmul.msk.f32.gmra.mxu0 %vm1063_vm2, %v13752_v6 }
 0x810   : > { %v4050_v38 = vpop.f32.mrf.mxu3 }
 0x811   : > { %v4184_v3 = vadd.f32 %v10087_v20, %v4050_v38  ;;  %v13897_v20 = vld [vmem:[%s16974_s6 + $0x3e8] sm:$0xff] }
 0x814   : > { %9027 = vmatmul.msk.f32.gmra.mxu2 %vm1063_vm2, %v13761_v19  ;;  %9131 = vmatmul.msk.f32.gmra.mxu0 %vm1063_vm2, %v13766_v56 }
 0x818   : > { %v4053_v58 = vpop.f32.mrf.mxu3 }
 0x819   : > { %v4186_v44 = vadd.f32 %v10083_v55, %v4053_v58  ;;  %v4182_v58 = vadd.f32 %v10089_v30, %v13742_v33  ;;  %v13863_v33 = vld [vmem:[%s16974_s6 + $0x3d8] sm:$0xff]  ;;  %v13915_v30 = vld [vmem:[%s16974_s6 + $0x3f0] sm:$0xff] }
 0x81b   : > { %10090 = vtanh.f32 %v4186_v44 }
 0x81c   : > { %9028 = vmatmul.msk.f32.gmra.mxu2 %vm1063_vm2, %v13777_v8  ;;  %9132 = vmatmul.msk.f32.gmra.mxu0 %vm1063_vm2, %v13782_v10 }
 0x820   : > { %v4056_v4 = vpop.f32.mrf.mxu3 }
 0x821   : > { %v4188_v26 = vadd.f32 %v10085_v52, %v4056_v4  ;;  %v10091_v38 = vpop.eup %10090 }
 0x823   : > { %10092 = vtanh.f32 %v4188_v26 }
 0x824   : > { %9029 = vmatmul.msk.f32.gmra.mxu2 %vm1063_vm2, %v13794_v46  ;;  %9133 = vmatmul.msk.f32.gmra.mxu0 %vm1063_vm2, %v13799_v16  ;;  %10094 = vtanh.f32 %v4184_v3  ;;  %v13902_v3 = vld [vmem:[%s16974_s6 + $0x2a8] sm:$0xff] }
 0x825   : > { %10096 = vtanh.f32 %v4182_v58  ;;  %v13920_v58 = vld [vmem:[%s16974_s6 + $0x2b0] sm:$0xff] }
 0x828   : > { %v4105_v63 = vpop.f32.mrf.mxu3 }
 0x829   : > { %v13807_v40 = vpop.f32.mrf.mxu0  ;;  %v10093_v48 = vpop.eup %10092 }
 0x82a   : > { %v10095_v15 = vpop.eup %10094 }
 0x82b   : > { %v10097_v7 = vpop.eup %10096 }
 0x82c   : > { %9030 = vmatmul.msk.f32.gmra.mxu2 %vm1063_vm2, %v13812_v59  ;;  %9134 = vmatmul.msk.f32.gmra.mxu0 %vm1063_vm2, %v13817_v45  ;;  %v4198_v24 = vadd.f32 %v10097_v7, %v4105_v63 }
 0x830   : > { %v4108_v37 = vpop.f32.mrf.mxu3 }
 0x831   : > { %v13825_v27 = vpop.f32.mrf.mxu0  ;;  %v4200_v29 = vadd.f32 %v10095_v15, %v4108_v37  ;;  %v13884_v37 = vld [vmem:[%s16974_s6 + $0x2a0] sm:$0xff] }
 0x834   : > { %9031 = vmatmul.msk.f32.gmra.mxu2 %vm1063_vm2, %v13830_v32  ;;  %9135 = vmatmul.msk.f32.gmra.mxu0 %vm1063_vm2, %v13835_v2 }
 0x838   : > { %v4111_v31 = vpop.f32.mrf.mxu3 }
 0x839   : > { %v13841_v28 = vpop.f32.mrf.mxu0  ;;  %v4202_v14 = vadd.f32 %v10091_v38, %v4111_v31 }
 0x83c   : > { %9032 = vmatmul.msk.f32.gmra.mxu2 %vm1063_vm2, %v13846_v62  ;;  %9136 = vmatmul.msk.f32.gmra.mxu0 %vm1063_vm2, %v13851_v51 }
 0x840   : > { %v4114_v4 = vpop.f32.mrf.mxu3 }
 0x841   : > { %v4204_v9 = vadd.f32 %v10093_v48, %v4114_v4  ;;  %v13858_v42 = vpop.f32.mrf.mxu0 }
 0x843   : > { %10098 = vtanh.f32 %v4204_v9  ;;  %v13940_v9 = vld [vmem:[%s16974_s6 + $0x2b8] sm:$0xff] }
 0x844   : > { %9033 = vmatmul.msk.f32.gmra.mxu2 %vm1063_vm2, %v13863_v33  ;;  %9137 = vmatmul.msk.f32.gmra.mxu0 %vm1063_vm2, %v13868_v0  ;;  %10100 = vtanh.f32 %v4202_v14  ;;  %v13935_v14 = vld [vmem:[%s16974_s6 + $0x3f8] sm:$0xff] }
 0x845   : > { %10102 = vtanh.f32 %v4200_v29 }
 0x846   : > { %10104 = vtanh.f32 %v4198_v24 }
 0x848   : > { %v4311_v11 = vpop.f32.mrf.mxu3 }
 0x849   : > { %v10099_v23 = vpop.eup %10098  ;;  %v13874_v13 = vpop.f32.mrf.mxu0 }
 0x84a   : > { %4740 = vmatpush.msrb.mxu3 %v10099_v23  ;;  %v10101_v55 = vpop.eup %10100 }
 0x84b   : > { %v10103_v63 = vpop.eup %10102 }
 0x84c   : > { %9034 = vmatmul.msk.f32.gmra.mxu2 %vm1063_vm2, %v13879_v5  ;;  %4741 = vmatpush.msrb.mxu3 %v10101_v55  ;;  %v10105_v52 = vpop.eup %10104 }
 0x84d   : > { %9138 = vmatmul.msk.f32.gmra.mxu0 %vm1063_vm2, %v13884_v37 }
 0x84e   : > { %4742 = vmatpush.msrb.mxu3 %v10103_v63 }
 0x850   : > { %v4314_v44 = vpop.f32.mrf.mxu3  ;;  %4743 = vmatpush.msrb.mxu3 %v10105_v52 }
 0x851   : > { %9070 = vmatmul.msk.f32.vlgmr.msrb.gmra.mxu3 %vm1063_vm2, %v13687_v22  ;;  %v13892_v26 = vpop.f32.mrf.mxu0  ;;  %v4315_v15 = vadd.f32 %v4314_v44, %v13583_v54  ;;  %v13955_v54 = vld [vmem:[%s16974_s6 + $0x400] sm:$0xff] }
 0x852   : > { %5540 = vmatpush.msra.mxu3 %v10099_v23 }
 0x853   : > { %v4326_v29 = vmax.f32 %v4315_v15, 0.0  ;;  %v14070_v15 = vld [vmem:[%s16974_s6 + $0x428] sm:$0xff] }
 0x854   : > { %5541 = vmatpush.msra.mxu3 %v10101_v55  ;;  %9035 = vmatmul.msk.f32.gmra.mxu2 %vm1063_vm2, %v13897_v20  ;;  %v13978_v55 = vld [vmem:[%s16974_s6 + $0x408] sm:$0xff] }
 0x855   : > { %9139 = vmatmul.msk.f32.gmra.mxu0 %vm1063_vm2, %v13902_v3 }
 0x856   : > { %5542 = vmatpush.msra.mxu3 %v10103_v63 }
 0x858   : > { %5543 = vmatpush.msra.mxu3 %v10105_v52  ;;  %v4317_v22 = vpop.f32.mrf.mxu3  ;;  %v14001_v52 = vld [vmem:[%s16974_s6 + $0x410] sm:$0xff] }
 0x859   : > { %9071 = vmatmul.msk.f32.gmra.mxu3 %vm1063_vm2, %v13703_v36  ;;  %v13910_v31 = vpop.f32.mrf.mxu0  ;;  %v4318_v36 = vadd.f32 %v4317_v22, %v13576_v41  ;;  %v14024_v22 = vld [vmem:[%s16974_s6 + $0x418] sm:$0xff] }
 0x85c   : > { %9036 = vmatmul.msk.f32.gmra.mxu2 %vm1063_vm2, %v13915_v30 }
 0x85d   : > { %9140 = vmatmul.msk.f32.gmra.mxu0 %vm1063_vm2, %v13920_v58 }
 0x860   : > { %v4320_v38 = vpop.f32.mrf.mxu3 }
 0x861   : > { %v4321_v48 = vadd.f32 %v4320_v38, %v13569_v21  ;;  %9072 = vmatmul.msk.f32.gmra.mxu3 %vm1063_vm2, %v13717_v25  ;;  %v13930_v4 = vpop.f32.mrf.mxu0  ;;  %v4312_v21 = vadd.f32 %v4311_v11, %v13587_v43  ;;  %v4328_v25 = vmax.f32 %v4318_v36, 0.0  ;;  %v13960_v43 = vld [vmem:[%s16974_s6 + $0x2c0] sm:$0xff] }
 0x862   : > { %v14047_v36 = vld [vmem:[%s16974_s6 + $0x420] sm:$0xff] }
 0x863   : > { %v4330_v41 = vmax.f32 %v4321_v48, 0.0  ;;  %v4324_v7 = vmax.f32 %v4312_v21, 0.0  ;;  %v14093_v21 = vld [vmem:[%s16974_s6 + $0x430] sm:$0xff] }
 0x864   : > { %9037 = vmatmul.msk.f32.gmra.mxu2 %vm1063_vm2, %v13935_v14 }
 0x865   : > { %9141 = vmatmul.msk.f32.gmra.mxu0 %vm1063_vm2, %v13940_v9  ;;  %5198 = vmatpush.msra.mxu1 %v4330_v41 }
 0x867   : > { %5199 = vmatpush.msra.mxu1 %v4328_v25 }
 0x869   : > { %9073 = vmatmul.msk.f32.gmra.mxu3 %vm1063_vm2, %v13731_v12  ;;  %v13950_v24 = vpop.f32.mrf.mxu0  ;;  %5200 = vmatpush.msra.mxu1 %v4326_v29  ;;  %v14116_v29 = vld [vmem:[%s16974_s6 + $0x438] sm:$0xff] }
 0x86b   : > { %5201 = vmatpush.msra.mxu1 %v4324_v7 }
 0x86c   : > { %9038 = vmatmul.msk.f32.gmra.mxu2 %vm1063_vm2, %v13955_v54  ;;  %9166 = vmatmul.msk.f32.vlgmr.msra.gmra.mxu1 %vm1063_vm2, %v13595_v35  ;;  %v13983_v35 = vld [vmem:[%s16974_s6 + $0x2c8] sm:$0xff] }
 0x86d   : > { %9142 = vmatmul.msk.f32.gmra.mxu0 %vm1063_vm2, %v13960_v43 }
 0x86f   : > { %v4588_v12 = vpop.f32.mrf.mxu2 }
 0x870   : > { %v13969_v11 = vadd.f32 %v13807_v40, %v4588_v12  ;;  %v14139_v12 = vld [vmem:[%s16974_s6 + $0x440] sm:$0xff] }
 0x871   : > { %9074 = vmatmul.msk.f32.gmra.mxu3 %vm1063_vm2, %v13747_v18  ;;  %v13973_v23 = vpop.f32.mrf.mxu0 }
 0x874   : > { %9039 = vmatmul.msk.f32.gmra.mxu2 %vm1063_vm2, %v13978_v55  ;;  %9167 = vmatmul.msk.f32.gmra.mxu1 %vm1063_vm2, %v13606_v53  ;;  %v14006_v53 = vld [vmem:[%s16974_s6 + $0x2d0] sm:$0xff] }
 0x875   : > { %9143 = vmatmul.msk.f32.gmra.mxu0 %vm1063_vm2, %v13983_v35 }
 0x877   : > { %v4591_v18 = vpop.f32.mrf.mxu2 }
 0x878   : > { %v13992_v40 = vadd.f32 %v13825_v27, %v4591_v18 }
 0x879   : > { %9075 = vmatmul.msk.f32.gmra.mxu3 %vm1063_vm2, %v13761_v19  ;;  %v13996_v63 = vpop.f32.mrf.mxu0 }
 0x87c   : > { %9040 = vmatmul.msk.f32.gmra.mxu2 %vm1063_vm2, %v14001_v52  ;;  %9168 = vmatmul.msk.f32.gmra.mxu1 %vm1063_vm2, %v13616_v34  ;;  %v14029_v34 = vld [vmem:[%s16974_s6 + $0x2d8] sm:$0xff] }
 0x87d   : > { %9144 = vmatmul.msk.f32.gmra.mxu0 %vm1063_vm2, %v14006_v53 }
 0x87f   : > { %v4594_v19 = vpop.f32.mrf.mxu2 }
 0x880   : > { %v14015_v27 = vadd.f32 %v13841_v28, %v4594_v19  ;;  %v14162_v19 = vld [vmem:[%s16974_s6 + $0x448] sm:$0xff] }
 0x881   : > { %9076 = vmatmul.msk.f32.gmra.mxu3 %vm1063_vm2, %v13777_v8  ;;  %v14019_v44 = vpop.f32.mrf.mxu0 }
 0x882   : > { %17197 = vst [vmem:[#allocation18_spill] sm:$0xff] %v14015_v27  ;;  %v10440_v27 = vmov 0.0  }
 0x883   : > { %5793 = vmatpush.msra.mxu0 %v10440_v27  ;;  %v14464_v27 = vld [vmem:[%s16974_s6 + $0x4a8] sm:$0xff] }
 0x884   : > { %9041 = vmatmul.msk.f32.gmra.mxu2 %vm1063_vm2, %v14024_v22  ;;  %9169 = vmatmul.msk.f32.gmra.mxu1 %vm1063_vm2, %v13624_v17  ;;  %v14052_v17 = vld [vmem:[%s16974_s6 + $0x2e0] sm:$0xff] }
 0x885   : > { %9145 = vmatmul.msk.f32.gmra.mxu0 %vm1063_vm2, %v14029_v34 }
 0x887   : > { %v4597_v8 = vpop.f32.mrf.mxu2 }
 0x888   : > { %v14038_v28 = vadd.f32 %v13858_v42, %v4597_v8 }
 0x889   : > { %9077 = vmatmul.msk.f32.gmra.mxu3 %vm1063_vm2, %v13794_v46  ;;  %v14042_v38 = vpop.f32.mrf.mxu0 }
 0x88a   : > { %17198 = vst [vmem:[#allocation17_spill] sm:$0xff] %v14038_v28 }
 0x88c   : > { %9042 = vmatmul.msk.f32.gmra.mxu2 %vm1063_vm2, %v14047_v36  ;;  %9170 = vmatmul.msk.f32.gmra.mxu1 %vm1063_vm2, %v13638_v47  ;;  %v14075_v47 = vld [vmem:[%s16974_s6 + $0x2e8] sm:$0xff] }
 0x88d   : > { %9146 = vmatmul.msk.f32.gmra.mxu0 %vm1063_vm2, %v14052_v17 }
 0x88f   : > { %v4600_v46 = vpop.f32.mrf.mxu2 }
 0x890   : > { %v14061_v42 = vadd.f32 %v13874_v13, %v4600_v46  ;;  %v14185_v46 = vld [vmem:[%s16974_s6 + $0x450] sm:$0xff] }
 0x891   : > { %9078 = vmatmul.msk.f32.gmra.mxu3 %vm1063_vm2, %v13812_v59  ;;  %v14065_v48 = vpop.f32.mrf.mxu0 }
 0x892   : > { %17199 = vst [vmem:[#allocation16_spill] sm:$0xff] %v14061_v42 }
 0x894   : > { %9043 = vmatmul.msk.f32.gmra.mxu2 %vm1063_vm2, %v14070_v15  ;;  %9171 = vmatmul.msk.f32.gmra.mxu1 %vm1063_vm2, %v13652_v39  ;;  %v14098_v39 = vld [vmem:[%s16974_s6 + $0x2f0] sm:$0xff] }
 0x895   : > { %9147 = vmatmul.msk.f32.gmra.mxu0 %vm1063_vm2, %v14075_v47 }
 0x897   : > { %v4603_v59 = vpop.f32.mrf.mxu2 }
 0x898   : > { %v14084_v13 = vadd.f32 %v13892_v26, %v4603_v59 }
 0x899   : > { %9079 = vmatmul.msk.f32.gmra.mxu3 %vm1063_vm2, %v13830_v32  ;;  %v14088_v41 = vpop.f32.mrf.mxu0 }
 0x89a   : > { %17200 = vst [vmem:[#allocation14_spill] sm:$0xff] %v14084_v13  ;;  %v14383_v13 = vld [vmem:[%s16974_s6 + $0x490] sm:$0xff] }
 0x89c   : > { %9044 = vmatmul.msk.f32.gmra.mxu2 %vm1063_vm2, %v14093_v21  ;;  %9172 = vmatmul.msk.f32.gmra.mxu1 %vm1063_vm2, %v13665_v50  ;;  %v14121_v50 = vld [vmem:[%s16974_s6 + $0x2f8] sm:$0xff] }
 0x89d   : > { %9148 = vmatmul.msk.f32.gmra.mxu0 %vm1063_vm2, %v14098_v39 }
 0x89f   : > { %v4606_v32 = vpop.f32.mrf.mxu2 }
 0x8a0   : > { %v14107_v26 = vadd.f32 %v13910_v31, %v4606_v32  ;;  %v14208_v32 = vld [vmem:[%s16974_s6 + $0x458] sm:$0xff] }
 0x8a1   : > { %9080 = vmatmul.msk.f32.gmra.mxu3 %vm1063_vm2, %v13846_v62  ;;  %v14111_v25 = vpop.f32.mrf.mxu0 }
 0x8a2   : > { %17201 = vst [vmem:[#allocation12_spill] sm:$0xff] %v14107_v26 }
 0x8a4   : > { %9045 = vmatmul.msk.f32.gmra.mxu2 %vm1063_vm2, %v14116_v29  ;;  %9173 = vmatmul.msk.f32.gmra.mxu1 %vm1063_vm2, %v13678_v61  ;;  %v14144_v61 = vld [vmem:[%s16974_s6 + $0x300] sm:$0xff] }
 0x8a5   : > { %9149 = vmatmul.msk.f32.gmra.mxu0 %vm1063_vm2, %v14121_v50 }
 0x8a7   : > { %v4609_v62 = vpop.f32.mrf.mxu2 }
 0x8a8   : > { %v14130_v31 = vadd.f32 %v13930_v4, %v4609_v62  ;;  %v14229_v62 = vld [vmem:[%s16974_s6 + $0x460] sm:$0xff] }
 0x8a9   : > { %9081 = vmatmul.msk.f32.gmra.mxu3 %vm1063_vm2, %v13863_v33  ;;  %v14134_v7 = vpop.f32.mrf.mxu0 }
 0x8aa   : > { %17202 = vst [vmem:[#allocation10_spill] sm:$0xff] %v14130_v31  ;;  %v14410_v31 = vld [vmem:[%s16974_s6 + $0x498] sm:$0xff] }
 0x8ac   : > { %9046 = vmatmul.msk.f32.gmra.mxu2 %vm1063_vm2, %v14139_v12  ;;  %9174 = vmatmul.msk.f32.gmra.mxu1 %vm1063_vm2, %v13692_v57  ;;  %v14167_v57 = vld [vmem:[%s16974_s6 + $0x308] sm:$0xff] }
 0x8ad   : > { %9150 = vmatmul.msk.f32.gmra.mxu0 %vm1063_vm2, %v14144_v61 }
 0x8af   : > { %v4612_v33 = vpop.f32.mrf.mxu2 }
 0x8b0   : > { %v14153_v4 = vadd.f32 %v13950_v24, %v4612_v33 }
 0x8b1   : > { %9082 = vmatmul.msk.f32.gmra.mxu3 %vm1063_vm2, %v13879_v5  ;;  %v14157_v18 = vpop.f32.mrf.mxu0 }
 0x8b2   : > { %17203 = vst [vmem:[#allocation9_spill] sm:$0xff] %v14153_v4 }
 0x8b4   : > { %9047 = vmatmul.msk.f32.gmra.mxu2 %vm1063_vm2, %v14162_v19  ;;  %9175 = vmatmul.msk.f32.gmra.mxu1 %vm1063_vm2, %v13708_v49  ;;  %v14190_v49 = vld [vmem:[%s16974_s6 + $0x310] sm:$0xff] }
 0x8b5   : > { %9151 = vmatmul.msk.f32.gmra.mxu0 %vm1063_vm2, %v14167_v57 }
 0x8b7   : > { %v4615_v5 = vpop.f32.mrf.mxu2 }
 0x8b8   : > { %v14176_v24 = vadd.f32 %v13973_v23, %v4615_v5  ;;  %v14252_v5 = vld [vmem:[%s16974_s6 + $0x468] sm:$0xff] }
 0x8b9   : > { %9083 = vmatmul.msk.f32.gmra.mxu3 %vm1063_vm2, %v13897_v20  ;;  %v14180_v8 = vpop.f32.mrf.mxu0 }
 0x8ba   : > { %17204 = vst [vmem:[#allocation8_spill] sm:$0xff] %v14176_v24  ;;  %v14356_v24 = vld [vmem:[%s16974_s6 + $0x488] sm:$0xff] }
 0x8bc   : > { %9048 = vmatmul.msk.f32.gmra.mxu2 %vm1063_vm2, %v14185_v46  ;;  %9176 = vmatmul.msk.f32.gmra.mxu1 %vm1063_vm2, %v13722_v1  ;;  %v14213_v1 = vld [vmem:[%s16974_s6 + $0x318] sm:$0xff] }
 0x8bd   : > { %9152 = vmatmul.msk.f32.gmra.mxu0 %vm1063_vm2, %v14190_v49 }
 0x8bf   : > { %v4618_v20 = vpop.f32.mrf.mxu2 }
 0x8c0   : > { %v14199_v23 = vadd.f32 %v13996_v63, %v4618_v20 }
 0x8c1   : > { %9084 = vmatmul.msk.f32.gmra.mxu3 %vm1063_vm2, %v13915_v30  ;;  %v14203_v59 = vpop.f32.mrf.mxu0 }
 0x8c2   : > { %17205 = vst [vmem:[#allocation7_spill] sm:$0xff] %v14199_v23  ;;  %v14329_v23 = vld [vmem:[%s16974_s6 + $0x480] sm:$0xff] }
 0x8c4   : > { %9049 = vmatmul.msk.f32.gmra.mxu2 %vm1063_vm2, %v14208_v32  ;;  %9177 = vmatmul.msk.f32.gmra.mxu1 %vm1063_vm2, %v13736_v60  ;;  %v14236_v60 = vld [vmem:[%s16974_s6 + $0x320] sm:$0xff] }
 0x8c5   : > { %9153 = vmatmul.msk.f32.gmra.mxu0 %vm1063_vm2, %v14213_v1 }
 0x8c7   : > { %v4621_v30 = vpop.f32.mrf.mxu2 }
 0x8c8   : > { %v14222_v63 = vadd.f32 %v14019_v44, %v4621_v30 }
 0x8c9   : > { %9085 = vmatmul.msk.f32.gmra.mxu3 %vm1063_vm2, %v13935_v14 }
 0x8ca   : > { %17206 = vst [vmem:[#allocation11_spill] sm:$0xff] %v14222_v63  ;;  %v14231_v33 = vpop.f32.mrf.mxu0 }
 0x8cc   : > { %9050 = vmatmul.msk.f32.gmra.mxu2 %vm1063_vm2, %v14229_v62  ;;  %9178 = vmatmul.msk.f32.gmra.mxu1 %vm1063_vm2, %v13752_v6  ;;  %v14259_v6 = vld [vmem:[%s16974_s6 + $0x328] sm:$0xff] }
 0x8cd   : > { %9154 = vmatmul.msk.f32.gmra.mxu0 %vm1063_vm2, %v14236_v60 }
 0x8cf   : > { %v4624_v14 = vpop.f32.mrf.mxu2 }
 0x8d0   : > { %v14245_v44 = vadd.f32 %v14042_v38, %v4624_v14  ;;  %v14277_v14 = vld [vmem:[%s16974_s6 + $0x470] sm:$0xff] }
 0x8d1   : > { %9086 = vmatmul.msk.f32.gmra.mxu3 %vm1063_vm2, %v13955_v54 }
 0x8d2   : > { %17207 = vst [vmem:[#allocation13_spill] sm:$0xff] %v14245_v44  ;;  %v14254_v20 = vpop.f32.mrf.mxu0 }
 0x8d4   : > { %9051 = vmatmul.msk.f32.gmra.mxu2 %vm1063_vm2, %v14252_v5  ;;  %v14263_v38 = vpop.f32.mrf.mxu3  ;;  %9179 = vmatmul.msk.f32.gmra.mxu1 %vm1063_vm2, %v13766_v56  ;;  %v14284_v56 = vld [vmem:[%s16974_s6 + $0x330] sm:$0xff] }
 0x8d5   : > { %9155 = vmatmul.msk.f32.gmra.mxu0 %vm1063_vm2, %v14259_v6 }
 0x8d7   : > { %v4627_v54 = vpop.f32.mrf.mxu2 }
 0x8d8   : > { %v14270_v30 = vadd.f32 %v14065_v48, %v4627_v54 }
 0x8d9   : > { %9087 = vmatmul.msk.f32.gmra.mxu3 %vm1063_vm2, %v13978_v55 }
 0x8da   : > { %17208 = vst [vmem:[#allocation63_spill] sm:$0xff] %v14270_v30  ;;  %v14279_v44 = vpop.f32.mrf.mxu0  ;;  %v14302_v30 = vld [vmem:[%s16974_s6 + $0x478] sm:$0xff] }
 0x8dc   : > { %9052 = vmatmul.msk.f32.gmra.mxu2 %vm1063_vm2, %v14277_v14  ;;  %v14288_v48 = vpop.f32.mrf.mxu3  ;;  %9180 = vmatmul.msk.f32.gmra.mxu1 %vm1063_vm2, %v13782_v10  ;;  %v14309_v10 = vld [vmem:[%s16974_s6 + $0x338] sm:$0xff] }
 0x8dd   : > { %9156 = vmatmul.msk.f32.gmra.mxu0 %vm1063_vm2, %v14284_v56 }
 0x8df   : > { %v4630_v55 = vpop.f32.mrf.mxu2 }
 0x8e0   : > { %v14295_v54 = vadd.f32 %v14088_v41, %v4630_v55 }
 0x8e1   : > { %9088 = vmatmul.msk.f32.gmra.mxu3 %vm1063_vm2, %v14001_v52 }
 0x8e2   : > { %17209 = vst [vmem:[#allocation62_spill] sm:$0xff] %v14295_v54  ;;  %v14304_v63 = vpop.f32.mrf.mxu0 }
 0x8e4   : > { %9053 = vmatmul.msk.f32.gmra.mxu2 %vm1063_vm2, %v14302_v30  ;;  %v14313_v41 = vpop.f32.mrf.mxu3  ;;  %9181 = vmatmul.msk.f32.gmra.mxu1 %vm1063_vm2, %v13799_v16  ;;  %v14336_v16 = vld [vmem:[%s16974_s6 + $0x340] sm:$0xff] }
 0x8e5   : > { %17210 = vst [vmem:[#allocation2_spill] sm:$0xff] %v14313_v41  ;;  %9157 = vmatmul.msk.f32.gmra.mxu0 %vm1063_vm2, %v14309_v10  ;;  %v14491_v41 = vld [vmem:[%s16974_s6 + $0x4b0] sm:$0xff] }
 0x8e7   : > { %v4633_v52 = vpop.f32.mrf.mxu2 }
 0x8e8   : > { %v14320_v55 = vadd.f32 %v14111_v25, %v4633_v52 }
 0x8e9   : > { %9089 = vmatmul.msk.f32.gmra.mxu3 %vm1063_vm2, %v14024_v22  ;;  %v14324_v54 = vpop.f32.mrf.mxu1 }
 0x8ea   : > { %17211 = vst [vmem:[#allocation61_spill] sm:$0xff] %v14320_v55  ;;  %v14331_v4 = vpop.f32.mrf.mxu0 }
 0x8ec   : > { %9054 = vmatmul.msk.f32.gmra.mxu2 %vm1063_vm2, %v14329_v23  ;;  %v14340_v25 = vpop.f32.mrf.mxu3  ;;  %9182 = vmatmul.msk.f32.gmra.mxu1 %vm1063_vm2, %v13817_v45  ;;  %v14363_v45 = vld [vmem:[%s16974_s6 + $0x348] sm:$0xff] }
 0x8ed   : > { %17212 = vst [vmem:[#allocation60_spill] sm:$0xff] %v14340_v25  ;;  %9158 = vmatmul.msk.f32.gmra.mxu0 %vm1063_vm2, %v14336_v16 }
 0x8ef   : > { %v4636_v22 = vpop.f32.mrf.mxu2 }
 0x8f0   : > { %v14347_v52 = vadd.f32 %v14134_v7, %v4636_v22 }
 0x8f1   : > { %9090 = vmatmul.msk.f32.gmra.mxu3 %vm1063_vm2, %v14047_v36  ;;  %v14351_v55 = vpop.f32.mrf.mxu1 }
 0x8f2   : > { %17213 = vst [vmem:[#allocation59_spill] sm:$0xff] %v14347_v52  ;;  %v14358_v42 = vpop.f32.mrf.mxu0 }
 0x8f4   : > { %9055 = vmatmul.msk.f32.gmra.mxu2 %vm1063_vm2, %v14356_v24  ;;  %v14367_v7 = vpop.f32.mrf.mxu3  ;;  %9183 = vmatmul.msk.f32.gmra.mxu1 %vm1063_vm2, %v13835_v2  ;;  %v14390_v2 = vld [vmem:[%s16974_s6 + $0x350] sm:$0xff] }
 0x8f5   : > { %9159 = vmatmul.msk.f32.gmra.mxu0 %vm1063_vm2, %v14363_v45 }
 0x8f7   : > { %v4639_v36 = vpop.f32.mrf.mxu2 }
 0x8f8   : > { %v14374_v22 = vadd.f32 %v14157_v18, %v4639_v36 }
 0x8f9   : > { %9091 = vmatmul.msk.f32.gmra.mxu3 %vm1063_vm2, %v14070_v15  ;;  %v14378_v52 = vpop.f32.mrf.mxu1 }
 0x8fa   : > { %17214 = vst [vmem:[#allocation58_spill] sm:$0xff] %v14374_v22  ;;  %v14385_v26 = vpop.f32.mrf.mxu0 }
 0x8fb   : > { %17215 = vst [vmem:[#allocation3_spill] sm:$0xff] %v14378_v52 }
 0x8fc   : > { %9056 = vmatmul.msk.f32.gmra.mxu2 %vm1063_vm2, %v14383_v13  ;;  %v14394_v18 = vpop.f32.mrf.mxu3  ;;  %9184 = vmatmul.msk.f32.gmra.mxu1 %vm1063_vm2, %v13851_v51  ;;  %v14417_v51 = vld [vmem:[%s16974_s6 + $0x358] sm:$0xff] }
 0x8fd   : > { %9160 = vmatmul.msk.f32.gmra.mxu0 %vm1063_vm2, %v14390_v2 }
 0x8ff   : > { %v4642_v15 = vpop.f32.mrf.mxu2 }
 0x900   : > { %v14401_v36 = vadd.f32 %v14180_v8, %v4642_v15 }
 0x901   : > { %9092 = vmatmul.msk.f32.gmra.mxu3 %vm1063_vm2, %v14093_v21  ;;  %v14405_v22 = vpop.f32.mrf.mxu1 }
 0x902   : > { %17216 = vst [vmem:[#allocation57_spill] sm:$0xff] %v14401_v36  ;;  %v14412_v28 = vpop.f32.mrf.mxu0 }
 0x903   : > { %17217 = vst [vmem:[#allocation4_spill] sm:$0xff] %v14405_v22  ;;  %v14437_v22 = vld [vmem:[%s16974_s6 + $0x4a0] sm:$0xff] }
 0x904   : > { %9057 = vmatmul.msk.f32.gmra.mxu2 %vm1063_vm2, %v14410_v31  ;;  %v14421_v8 = vpop.f32.mrf.mxu3  ;;  %9185 = vmatmul.msk.f32.gmra.mxu1 %vm1063_vm2, %v13868_v0  ;;  %v14444_v0 = vld [vmem:[%s16974_s6 + $0x360] sm:$0xff] }
 0x905   : > { %9161 = vmatmul.msk.f32.gmra.mxu0 %vm1063_vm2, %v14417_v51 }
 0x907   : > { %v4645_v21 = vpop.f32.mrf.mxu2 }
 0x908   : > { %v14428_v15 = vadd.f32 %v14203_v59, %v4645_v21 }
 0x909   : > { %9093 = vmatmul.msk.f32.gmra.mxu3 %vm1063_vm2, %v14116_v29  ;;  %v14432_v36 = vpop.f32.mrf.mxu1 }
 0x90a   : > { %17218 = vst [vmem:[#allocation5_spill] sm:$0xff] %v14428_v15  ;;  %v14439_v25 = vpop.f32.mrf.mxu0 }
 0x90c   : > { %9058 = vmatmul.msk.f32.gmra.mxu2 %vm1063_vm2, %v14437_v22  ;;  %v14448_v29 = vpop.f32.mrf.mxu3  ;;  %9186 = vmatmul.msk.f32.gmra.mxu1 %vm1063_vm2, %v13884_v37  ;;  %v14471_v37 = vld [vmem:[%s16974_s6 + $0x368] sm:$0xff] }
 0x90d   : > { %17219 = vst [vmem:[#allocation64_spill] sm:$0xff] %v14448_v29  ;;  %9162 = vmatmul.msk.f32.gmra.mxu0 %vm1063_vm2, %v14444_v0  ;;  %v14518_v29 = vld [vmem:[%s16974_s6 + $0x4b8] sm:$0xff] }
 0x90f   : > { %v4648_v59 = vpop.f32.mrf.mxu2 }
 0x910   : > { %v14455_v21 = vadd.f32 %v14231_v33, %v4648_v59 }
 0x911   : > { %9094 = vmatmul.msk.f32.gmra.mxu3 %vm1063_vm2, %v14139_v12  ;;  %v14459_v15 = vpop.f32.mrf.mxu1 }
 0x912   : > { %17220 = vst [vmem:[#allocation35_spill] sm:$0xff] %v14455_v21  ;;  %v14466_v52 = vpop.f32.mrf.mxu0 }
 0x914   : > { %9059 = vmatmul.msk.f32.gmra.mxu2 %vm1063_vm2, %v14464_v27  ;;  %v14475_v33 = vpop.f32.mrf.mxu3  ;;  %9187 = vmatmul.msk.f32.gmra.mxu1 %vm1063_vm2, %v13902_v3  ;;  %v14498_v3 = vld [vmem:[%s16974_s6 + $0x370] sm:$0xff] }
 0x915   : > { %17221 = vst [vmem:[#allocation34_spill] sm:$0xff] %v14475_v33  ;;  %9163 = vmatmul.msk.f32.gmra.mxu0 %vm1063_vm2, %v14471_v37 }
 0x917   : > { %v4651_v12 = vpop.f32.mrf.mxu2 }
 0x918   : > { %v14482_v59 = vadd.f32 %v14254_v20, %v4651_v12 }
 0x919   : > { %9095 = vmatmul.msk.f32.gmra.mxu3 %vm1063_vm2, %v14162_v19  ;;  %v14486_v21 = vpop.f32.mrf.mxu1 }
 0x91a   : > { %17222 = vst [vmem:[#allocation33_spill] sm:$0xff] %v14482_v59  ;;  %v14493_v33 = vpop.f32.mrf.mxu0 }
 0x91c   : > { %9060 = vmatmul.msk.f32.gmra.mxu2 %vm1063_vm2, %v14491_v41  ;;  %v14502_v20 = vpop.f32.mrf.mxu3  ;;  %9188 = vmatmul.msk.f32.gmra.mxu1 %vm1063_vm2, %v13920_v58  ;;  %v14525_v58 = vld [vmem:[%s16974_s6 + $0x378] sm:$0xff] }
 0x91d   : > { %17223 = vst [vmem:[#allocation31_spill] sm:$0xff] %v14502_v20  ;;  %9164 = vmatmul.msk.f32.gmra.mxu0 %vm1063_vm2, %v14498_v3 }
 0x91f   : > { %v4654_v19 = vpop.f32.mrf.mxu2 }
 0x920   : > { %v14509_v12 = vadd.f32 %v14279_v44, %v4654_v19 }
 0x921   : > { %9096 = vmatmul.msk.f32.gmra.mxu3 %vm1063_vm2, %v14185_v46  ;;  %v14513_v59 = vpop.f32.mrf.mxu1 }
 0x922   : > { %17224 = vst [vmem:[#allocation30_spill] sm:$0xff] %v14509_v12  ;;  %v14520_v20 = vpop.f32.mrf.mxu0 }
 0x923   : > { %17225 = vst [vmem:[#allocation29_spill] sm:$0xff] %v14513_v59  ;;  %v14545_v59 = vld [vmem:[%s16974_s6 + $0x4c0] sm:$0xff] }
 0x924   : > { %9061 = vmatmul.msk.f32.gmra.mxu2 %vm1063_vm2, %v14518_v29  ;;  %v14529_v44 = vpop.f32.mrf.mxu3  ;;  %9189 = vmatmul.msk.f32.gmra.mxu1 %vm1063_vm2, %v13940_v9  ;;  %v5617_v9 = vld [vmem:[%s16975_s7] sm:$0xff] }
 0x925   : > { %17226 = vst [vmem:[#allocation28_spill] sm:$0xff] %v14529_v44  ;;  %9165 = vmatmul.msk.f32.gmra.mxu0 %vm1063_vm2, %v14525_v58 }
 0x927   : > { %v4657_v46 = vpop.f32.mrf.mxu2 }
 0x928   : > { %v14536_v19 = vadd.f32 %v14304_v63, %v4657_v46 }
 0x929   : > { %9097 = vmatmul.msk.f32.gmra.mxu3 %vm1063_vm2, %v14208_v32  ;;  %v14540_v12 = vpop.f32.mrf.mxu1 }
 0x92a   : > { %17227 = vst [vmem:[#allocation27_spill] sm:$0xff] %v14536_v19  ;;  %v14547_v44 = vpop.f32.mrf.mxu0 }
 0x92b   : > { %17228 = vst [vmem:[#allocation26_spill] sm:$0xff] %v14540_v12  ;;  %v14569_v12 = vld [vmem:[%s16974_s6 + $0x4c8] sm:$0xff] }
 0x92c   : > { %9062 = vmatmul.msk.f32.gmra.mxu2 %vm1063_vm2, %v14545_v59  ;;  %v14554_v63 = vpop.f32.mrf.mxu3  ;;  %9190 = vmatmul.msk.f32.gmra.mxu1 %vm1063_vm2, %v13960_v43  ;;  %v5618_v43 = vld [vmem:[%s16975_s7 + $0x8] sm:$0xff] }
 0x92d   : > { %17229 = vst [vmem:[#allocation25_spill] sm:$0xff] %v14554_v63  ;;  %9262 = vmatmul.msk.f32.vlgmr.msra.gmra.mxu0 %vm5729_vm3, %v5617_v9 }
 0x92f   : > { %v4660_v32 = vpop.f32.mrf.mxu2 }
 0x930   : > { %v14560_v46 = vadd.f32 %v14331_v4, %v4660_v32 }
 0x931   : > { %9098 = vmatmul.msk.f32.gmra.mxu3 %vm1063_vm2, %v14229_v62  ;;  %v14564_v19 = vpop.f32.mrf.mxu1 }
 0x932   : > { %17230 = vst [vmem:[#allocation24_spill] sm:$0xff] %v14560_v46  ;;  %v14571_v63 = vpop.f32.mrf.mxu0  ;;  %v14593_v46 = vld [vmem:[%s16974_s6 + $0x4d0] sm:$0xff] }
 0x933   : > { %17231 = vst [vmem:[#allocation23_spill] sm:$0xff] %v14564_v19 }
 0x934   : > { %9063 = vmatmul.msk.f32.gmra.mxu2 %vm1063_vm2, %v14569_v12  ;;  %v14578_v4 = vpop.f32.mrf.mxu3  ;;  %9191 = vmatmul.msk.f32.gmra.mxu1 %vm1063_vm2, %v13983_v35  ;;  %v5619_v35 = vld [vmem:[%s16975_s7 + $0x10] sm:$0xff] }
 0x935   : > { %17232 = vst [vmem:[#allocation22_spill] sm:$0xff] %v14578_v4  ;;  %9263 = vmatmul.msk.f32.gmra.mxu0 %vm5729_vm3, %v5618_v43 }
 0x937   : > { %v4663_v62 = vpop.f32.mrf.mxu2 }
 0x938   : > { %v14584_v9 = vadd.f32 %v14358_v42, %v4663_v62 }
 0x939   : > { %9099 = vmatmul.msk.f32.gmra.mxu3 %vm1063_vm2, %v14252_v5  ;;  %v14588_v32 = vpop.f32.mrf.mxu1 }
 0x93a   : > { %17233 = vst [vmem:[#allocation21_spill] sm:$0xff] %v14584_v9  ;;  %v14595_v4 = vpop.f32.mrf.mxu0  ;;  %v14617_v9 = vld [vmem:[%s16974_s6 + $0x4d8] sm:$0xff] }
 0x93b   : > { %17234 = vst [vmem:[#allocation20_spill] sm:$0xff] %v14588_v32 }
 0x93c   : > { %9064 = vmatmul.msk.f32.gmra.mxu2 %vm1063_vm2, %v14593_v46  ;;  %v14602_v42 = vpop.f32.mrf.mxu3  ;;  %9192 = vmatmul.msk.f32.gmra.mxu1 %vm1063_vm2, %v14006_v53  ;;  %v5620_v53 = vld [vmem:[%s16975_s7 + $0x18] sm:$0xff] }
 0x93d   : > { %17235 = vst [vmem:[#allocation19_spill] sm:$0xff] %v14602_v42  ;;  %9264 = vmatmul.msk.f32.gmra.mxu0 %vm5729_vm3, %v5619_v35  ;;  %v14624_v35 = vpop.permute.xlu1 %5656 }
 0x93f   : > { %v4666_v5 = vpop.f32.mrf.mxu2 }
 0x940   : > { %v14608_v43 = vadd.f32 %v14385_v26, %v4666_v5 }
 0x941   : > { %9100 = vmatmul.msk.f32.gmra.mxu3 %vm1063_vm2, %v14277_v14  ;;  %v14612_v62 = vpop.f32.mrf.mxu1  ;;  %v14633_v14 = vpop.permute.xlu0 %5726 }
 0x942   : > { %17236 = vst [vmem:[#allocation55_spill] sm:$0xff] %v14608_v43  ;;  %v14619_v42 = vpop.f32.mrf.mxu0 }
 0x943   : > { %17237 = vst [vmem:[#allocation53_spill] sm:$0xff] %v14612_v62 }
 0x944   : > { %9065 = vmatmul.msk.f32.gmra.mxu2 %vm1063_vm2, %v14617_v9  ;;  %v14628_v26 = vpop.f32.mrf.mxu3  ;;  %9193 = vmatmul.msk.f32.gmra.mxu1 %vm1063_vm2, %v14029_v34  ;;  %17239 = vst [vmem:[#allocation50_spill] sm:$0xff] %v14633_v14  ;;  %v5621_v34 = vld [vmem:[%s16975_s7 + $0x20] sm:$0xff] }
 0x945   : > { %17238 = vst [vmem:[#allocation51_spill] sm:$0xff] %v14628_v26  ;;  %9265 = vmatmul.msk.f32.gmra.mxu0 %vm5729_vm3, %v5620_v53  ;;  %v14645_v26 = vld [vmem:[%s16974_s6 + $0x4e0] sm:$0xff]  ;;  %v14652_v53 = vpop.permute.xlu2 %5651 }
 0x947   : > { %v4669_v5 = vpop.f32.mrf.mxu2 }
 0x948   : > { %v14636_v43 = vadd.f32 %v14412_v28, %v4669_v5 }
 0x949   : > { %9101 = vmatmul.msk.f32.gmra.mxu3 %vm1063_vm2, %v14302_v30  ;;  %v14640_v62 = vpop.f32.mrf.mxu1  ;;  %v14661_v30 = vpop.permute.xlu1 %5721 }
 0x94a   : > { %17240 = vst [vmem:[#allocation49_spill] sm:$0xff] %v14636_v43  ;;  %v14647_v32 = vpop.f32.mrf.mxu0  ;;  %v14663_v43 = vpop.permute.xlu0 %5711 }
 0x94b   : > { %17241 = vst [vmem:[#allocation48_spill] sm:$0xff] %v14640_v62 }
 0x94c   : > { %9066 = vmatmul.msk.f32.gmra.mxu2 %vm1063_vm2, %v14645_v26  ;;  %v14656_v28 = vpop.f32.mrf.mxu3  ;;  %9194 = vmatmul.msk.f32.gmra.mxu1 %vm1063_vm2, %v14052_v17  ;;  %17243 = vst [vmem:[#allocation46_spill] sm:$0xff] %v14661_v30 }
 0x94d   : > { %17242 = vst [vmem:[#allocation47_spill] sm:$0xff] %v14656_v28  ;;  %9266 = vmatmul.msk.f32.gmra.mxu0 %vm5729_vm3, %v5621_v34  ;;  %v14675_v28 = vld [vmem:[%s16974_s6 + $0x4e8] sm:$0xff] }
 0x94e   : > { %17244 = vst [vmem:[#allocation45_spill] sm:$0xff] %v14663_v43  ;;  %v5622_v34 = vld [vmem:[%s16975_s7 + $0x28] sm:$0xff] }
 0x94f   : > { %v4672_v5 = vpop.f32.mrf.mxu2 }
 0x950   : > { %v14666_v62 = vadd.f32 %v14439_v25, %v4672_v5 }
 0x951   : > { %9102 = vmatmul.msk.f32.gmra.mxu3 %vm1063_vm2, %v14329_v23  ;;  %v14670_v19 = vpop.f32.mrf.mxu1  ;;  %v14689_v23 = vpop.permute.xlu2 %5716 }
 0x952   : > { %17245 = vst [vmem:[#allocation44_spill] sm:$0xff] %v14666_v62  ;;  %v14677_v17 = vpop.f32.mrf.mxu0  ;;  %v14691_v62 = vpop.permute.xlu1 %5686 }
 0x953   : > { %17246 = vst [vmem:[#allocation43_spill] sm:$0xff] %v14670_v19 }
 0x954   : > { %9067 = vmatmul.msk.f32.gmra.mxu2 %vm1063_vm2, %v14675_v28  ;;  %v14684_v25 = vpop.f32.mrf.mxu3  ;;  %9195 = vmatmul.msk.f32.gmra.mxu1 %vm1063_vm2, %v14075_v47  ;;  %17248 = vst [vmem:[#allocation42_spill] sm:$0xff] %v14689_v23  ;;  %v14705_v47 = vpop.permute.xlu0 %5676  ;;  %v5623_v23 = vld [vmem:[%s16975_s7 + $0x30] sm:$0xff] }
 0x955   : > { %17247 = vst [vmem:[#allocation32_spill] sm:$0xff] %v14684_v25  ;;  %9267 = vmatmul.msk.f32.gmra.mxu0 %vm5729_vm3, %v5622_v34  ;;  %v14703_v25 = vld [vmem:[%s16974_s6 + $0x4f0] sm:$0xff] }
 0x957   : > { %v4675_v5 = vpop.f32.mrf.mxu2 }
 0x958   : > { %v14694_v19 = vadd.f32 %v14466_v52, %v4675_v5 }
 0x959   : > { %9103 = vmatmul.msk.f32.gmra.mxu3 %vm1063_vm2, %v14356_v24  ;;  %v14698_v43 = vpop.f32.mrf.mxu1  ;;  %v14719_v5 = vpop.permute.xlu2 %5681 }
 0x95a   : > { %17249 = vst [vmem:[#allocation41_spill] sm:$0xff] %v14694_v19  ;;  %v14707_v34 = vpop.f32.mrf.mxu0  ;;  %v14733_v14 = vpop.permute.xlu1 %5671 }
 0x95b   : > { %17250 = vst [vmem:[#allocation40_spill] sm:$0xff] %v14698_v43 }
 0x95c   : > { %9068 = vmatmul.msk.f32.gmra.mxu2 %vm1063_vm2, %v14703_v25  ;;  %v14714_v52 = vpop.f32.mrf.mxu3  ;;  %9196 = vmatmul.msk.f32.gmra.mxu1 %vm1063_vm2, %v14098_v39 }
 0x95d   : > { %17251 = vst [vmem:[#allocation39_spill] sm:$0xff] %v14714_v52  ;;  %9268 = vmatmul.msk.f32.gmra.mxu0 %vm5729_vm3, %v5623_v23  ;;  %v14731_v52 = vld [vmem:[%s16974_s6 + $0x4f8] sm:$0xff] }
 0x95e   : > { %v5624_v23 = vld [vmem:[%s16975_s7 + $0x38] sm:$0xff] }
 0x95f   : > { %v4678_v24 = vpop.f32.mrf.mxu2 }
 0x960   : > { %v14722_v19 = vadd.f32 %v14493_v33, %v4678_v24  ;;  %v14740_v33 = vpop.permute.xlu0 %6053 }
 0x961   : > { %9104 = vmatmul.msk.f32.gmra.mxu3 %vm1063_vm2, %v14383_v13  ;;  %v14726_v43 = vpop.f32.mrf.mxu1  ;;  %17254 = vst [vmem:[#allocation36_spill] sm:$0xff] %v14740_v33  ;;  %v14759_v33 = vld [vmem:[%s16974_s6 + $0x500] sm:$0xff] }
 0x962   : > { %17252 = vst [vmem:[#allocation15_spill] sm:$0xff] %v14722_v19  ;;  %v14735_v39 = vpop.f32.mrf.mxu0 }
 0x963   : > { %17253 = vst [vmem:[#allocation38_spill] sm:$0xff] %v14726_v43 }
 0x964   : > { %9069 = vmatmul.msk.f32.gmra.mxu2 %vm1063_vm2, %v14731_v52  ;;  %v14744_v13 = vpop.f32.mrf.mxu3  ;;  %9197 = vmatmul.msk.f32.gmra.mxu1 %vm1063_vm2, %v14121_v50  ;;  %v5625_v50 = vld [vmem:[%s16975_s7 + $0x40] sm:$0xff] }
 0x965   : > { %17255 = vst [vmem:[#allocation37_spill] sm:$0xff] %v14744_v13  ;;  %9269 = vmatmul.msk.f32.gmra.mxu0 %vm5729_vm3, %v5624_v23  ;;  %v14761_v13 = vpop.permute.xlu2 %6058 }
 0x967   : > { %v4681_v24 = vpop.f32.mrf.mxu2 }
 0x968   : > { %v14750_v19 = vadd.f32 %v14520_v20, %v4681_v24  ;;  %v14768_v20 = vpop.permute.xlu1 %6128 }
 0x969   : > { %9105 = vmatmul.msk.f32.gmra.mxu3 %vm1063_vm2, %v14410_v31  ;;  %v14754_v43 = vpop.f32.mrf.mxu1  ;;  %v14777_v31 = vpop.permute.xlu0 %6118 }
 0x96a   : > { %17256 = vst [vmem:[#allocation6_spill] sm:$0xff] %v14750_v19  ;;  %v14763_v30 = vpop.f32.mrf.mxu0 }
 0x96b   : > { %17257 = vst [vmem:[#allocation52_spill] sm:$0xff] %v14754_v43 }
 0x96c   : > { %17258 = vst [vmem:[#allocation54_spill] sm:$0xff] %v14763_v30  ;;  %v14770_v23 = vpop.f32.mrf.mxu3  ;;  %9198 = vmatmul.msk.f32.gmra.mxu1 %vm1063_vm2, %v14144_v61  ;;  %9214 = vmatmul.msk.f32.vlgmr.msra.gmra.mxu2 %vm1063_vm2, %v14759_v33  ;;  %v14789_v61 = vld [vmem:[%s16974_s6 + $0x508] sm:$0xff] }
 0x96d   : > { %17259 = vst [vmem:[#allocation56_spill] sm:$0xff] %v14770_v23  ;;  %9270 = vmatmul.msk.f32.gmra.mxu0 %vm5729_vm3, %v5625_v50  ;;  %v5626_v50 = vld [vmem:[%s16975_s7 + $0x48] sm:$0xff]  ;;  %v14796_v43 = vpop.permute.xlu2 %6123 }
 0x96f   : > { %v4684_v24 = vpop.f32.mrf.mxu2 }
 0x970   : > { %v14780_v30 = vadd.f32 %v14547_v44, %v4684_v24 }
 0x971   : > { %9106 = vmatmul.msk.f32.gmra.mxu3 %vm1063_vm2, %v14437_v22  ;;  %v14784_v19 = vpop.f32.mrf.mxu1  ;;  %v14805_v22 = vpop.permute.xlu1 %6113 }
 0x972   : > { %17260 = vst [vmem:[#allocation65_spill] sm:$0xff] %v14780_v30  ;;  %v14791_v23 = vpop.f32.mrf.mxu0 }
 0x973   : > { %17261 = vst [vmem:[#allocation66_spill] sm:$0xff] %v14784_v19 }
 0x974   : > { %17262 = vst [vmem:[#allocation67_spill] sm:$0xff] %v14791_v23  ;;  %v14798_v44 = vpop.f32.mrf.mxu3  ;;  %9199 = vmatmul.msk.f32.gmra.mxu1 %vm1063_vm2, %v14167_v57  ;;  %9215 = vmatmul.msk.f32.gmra.mxu2 %vm1063_vm2, %v14789_v61  ;;  %v14807_v23 = vpop.permute.xlu0 %6083  ;;  %v14819_v57 = vld [vmem:[%s16974_s6 + $0x510] sm:$0xff] }
 0x975   : > { %17263 = vst [vmem:[#allocation68_spill] sm:$0xff] %v14798_v44  ;;  %9271 = vmatmul.msk.f32.gmra.mxu0 %vm5729_vm3, %v5626_v50  ;;  %v5627_v50 = vld [vmem:[%s16975_s7 + $0x50] sm:$0xff] }
 0x976   : > { %17264 = vst [vmem:[#allocation69_spill] sm:$0xff] %v14807_v23 }
 0x977   : > { %v4687_v24 = vpop.f32.mrf.mxu2 }
 0x978   : > { %v14810_v30 = vadd.f32 %v14571_v63, %v4687_v24 }
 0x979   : > { %9107 = vmatmul.msk.f32.gmra.mxu3 %vm1063_vm2, %v14464_v27  ;;  %v14814_v44 = vpop.f32.mrf.mxu1  ;;  %v14833_v27 = vpop.permute.xlu2 %6088 }
 0x97a   : > { %17265 = vst [vmem:[#allocation70_spill] sm:$0xff] %v14810_v30  ;;  %v14821_v19 = vpop.f32.mrf.mxu0  ;;  %v14835_v24 = vpop.permute.xlu1 %6078 }
 0x97b   : > { %17266 = vst [vmem:[#allocation71_spill] sm:$0xff] %v14814_v44  ;;  %v5628_v44 = vld [vmem:[%s16975_s7 + $0x58] sm:$0xff] }
 0x97c   : > { %17267 = vst [vmem:[#allocation72_spill] sm:$0xff] %v14821_v19  ;;  %v14826_v23 = vpop.f32.mrf.mxu3  ;;  %9200 = vmatmul.msk.f32.gmra.mxu1 %vm1063_vm2, %v14190_v49  ;;  %9216 = vmatmul.msk.f32.gmra.mxu2 %vm1063_vm2, %v14819_v57  ;;  %v14847_v49 = vld [vmem:[%s16974_s6 + $0x518] sm:$0xff] }
 0x97d   : > { %17268 = vst [vmem:[#allocation73_spill] sm:$0xff] %v14826_v23  ;;  %9272 = vmatmul.msk.f32.gmra.mxu0 %vm5729_vm3, %v5627_v50  ;;  %v14849_v23 = vpop.permute.xlu0 %6530 }
 0x97e   : > { %17269 = vst [vmem:[#allocation74_spill] sm:$0xff] %v14835_v24 }
 0x97f   : > { %v4690_v63 = vpop.f32.mrf.mxu2  ;;  %17272 = vst [vmem:[#allocation77_spill] sm:$0xff] %v14849_v23 }
 0x980   : > { %v14838_v19 = vadd.f32 %v14595_v4, %v4690_v63 }
 0x981   : > { %9108 = vmatmul.msk.f32.gmra.mxu3 %vm1063_vm2, %v14491_v41  ;;  %v14842_v30 = vpop.f32.mrf.mxu1  ;;  %v14863_v63 = vpop.permute.xlu2 %6073 }
 0x982   : > { %17270 = vst [vmem:[#allocation75_spill] sm:$0xff] %v14838_v19  ;;  %v14851_v50 = vpop.f32.mrf.mxu0 }
 0x983   : > { %17271 = vst [vmem:[#allocation76_spill] sm:$0xff] %v14842_v30 }
 0x984   : > { %17273 = vst [vmem:[#allocation78_spill] sm:$0xff] %v14851_v50  ;;  %v14856_v4 = vpop.f32.mrf.mxu3  ;;  %9201 = vmatmul.msk.f32.gmra.mxu1 %vm1063_vm2, %v14213_v1  ;;  %9217 = vmatmul.msk.f32.gmra.mxu2 %vm1063_vm2, %v14847_v49  ;;  %v14875_v1 = vld [vmem:[%s16974_s6 + $0x520] sm:$0xff] }
 0x985   : > { %17274 = vst [vmem:[#allocation79_spill] sm:$0xff] %v14856_v4  ;;  %9273 = vmatmul.msk.f32.gmra.mxu0 %vm5729_vm3, %v5628_v44  ;;  %v14877_v4 = vpop.permute.xlu1 %6525  ;;  %v5629_v44 = vld [vmem:[%s16975_s7 + $0x60] sm:$0xff]  ;;  %v14882_v23 = vpop.permute.xlu0 %6595 }
 0x986   : > { %17275 = vst [vmem:[#allocation80_spill] sm:$0xff] %v14863_v63 }
 0x987   : > { %v4693_v41 = vpop.f32.mrf.mxu2  ;;  %17278 = vst [vmem:[#allocation83_spill] sm:$0xff] %v14877_v4 }
 0x988   : > { %v14866_v19 = vadd.f32 %v14619_v42, %v4693_v41  ;;  %17279 = vst [vmem:[#allocation84_spill] sm:$0xff] %v14882_v23 }
 0x989   : > { %9109 = vmatmul.msk.f32.gmra.mxu3 %vm1063_vm2, %v14518_v29  ;;  %v14870_v50 = vpop.f32.mrf.mxu1 }
 0x98a   : > { %17276 = vst [vmem:[#allocation81_spill] sm:$0xff] %v14866_v19  ;;  %v5178_v30 = vpop.f32.mrf.mxu0  ;;  %v14901_v19 = vld [vmem:[%s16974_s6 + $0x528] sm:$0xff] }
 0x98b   : > { %17277 = vst [vmem:[#allocation82_spill] sm:$0xff] %v14870_v50 }
 0x98c   : > { %v14884_v42 = vpop.f32.mrf.mxu3  ;;  %9202 = vmatmul.msk.f32.gmra.mxu1 %vm1063_vm2, %v14236_v60  ;;  %9218 = vmatmul.msk.f32.gmra.mxu2 %vm1063_vm2, %v14875_v1  ;;  %v14903_v60 = vpop.permute.xlu2 %6600 }
 0x98d   : > { %17280 = vst [vmem:[#allocation85_spill] sm:$0xff] %v14884_v42  ;;  %9274 = vmatmul.msk.f32.gmra.mxu0 %vm5729_vm3, %v5629_v44  ;;  %v5630_v44 = vld [vmem:[%s16975_s7 + $0x68] sm:$0xff]  ;;  %v14908_v42 = vpop.permute.xlu1 %6590 }
 0x98e   : > { %17283 = vst [vmem:[#allocation88_spill] sm:$0xff] %v14903_v60 }
 0x98f   : > { %v4696_v29 = vpop.f32.mrf.mxu2  ;;  %17284 = vst [vmem:[#allocation89_spill] sm:$0xff] %v14908_v42 }
 0x990   : > { %v14892_v41 = vadd.f32 %v14647_v32, %v4696_v29 }
 0x991   : > { %9110 = vmatmul.msk.f32.gmra.mxu3 %vm1063_vm2, %v14545_v59  ;;  %v14896_v30 = vpop.f32.mrf.mxu1  ;;  %v14917_v59 = vpop.permute.xlu0 %6560 }
 0x992   : > { %17281 = vst [vmem:[#allocation86_spill] sm:$0xff] %v14892_v41  ;;  %v5180_v50 = vpop.f32.mrf.mxu0 }
 0x993   : > { %17282 = vst [vmem:[#allocation87_spill] sm:$0xff] %v14896_v30 }
 0x994   : > { %v14910_v32 = vpop.f32.mrf.mxu3  ;;  %9203 = vmatmul.msk.f32.gmra.mxu1 %vm1063_vm2, %v14259_v6  ;;  %9219 = vmatmul.msk.f32.gmra.mxu2 %vm1063_vm2, %v14901_v19  ;;  %17286 = vst [vmem:[#allocation91_spill] sm:$0xff] %v14917_v59  ;;  %v14929_v6 = vld [vmem:[%s16974_s6 + $0x530] sm:$0xff]  ;;  %v14934_v30 = vpop.permute.xlu2 %6585 }
 0x995   : > { %17285 = vst [vmem:[#allocation90_spill] sm:$0xff] %v14910_v32  ;;  %9275 = vmatmul.msk.f32.gmra.mxu0 %vm5729_vm3, %v5630_v44  ;;  %v5631_v44 = vld [vmem:[%s16975_s7 + $0x70] sm:$0xff] }
 0x996   : > { %17289 = vst [vmem:[#allocation94_spill] sm:$0xff] %v14934_v30 }
 0x997   : > { %v4699_v29 = vpop.f32.mrf.mxu2 }
 0x998   : > { %v14920_v50 = vadd.f32 %v14677_v17, %v4699_v29 }
 0x999   : > { %9111 = vmatmul.msk.f32.gmra.mxu3 %vm1063_vm2, %v14569_v12  ;;  %v14924_v41 = vpop.f32.mrf.mxu1  ;;  %v14943_v12 = vpop.permute.xlu1 %6555 }
 0x99a   : > { %17287 = vst [vmem:[#allocation92_spill] sm:$0xff] %v14920_v50  ;;  %v5182_v32 = vpop.f32.mrf.mxu0 }
 0x99b   : > { %17288 = vst [vmem:[#allocation93_spill] sm:$0xff] %v14924_v41  ;;  %v14945_v32 = vpop.permute.xlu0 %6545 }
 0x99c   : > { %v14936_v59 = vpop.f32.mrf.mxu3  ;;  %9204 = vmatmul.msk.f32.gmra.mxu1 %vm1063_vm2, %v14284_v56  ;;  %9220 = vmatmul.msk.f32.gmra.mxu2 %vm1063_vm2, %v14929_v6  ;;  %17291 = vst [vmem:[#allocation96_spill] sm:$0xff] %v14943_v12  ;;  %v14957_v56 = vld [vmem:[%s16974_s6 + $0x538] sm:$0xff] }
 0x99d   : > { %17290 = vst [vmem:[#allocation95_spill] sm:$0xff] %v14936_v59  ;;  %9276 = vmatmul.msk.f32.gmra.mxu0 %vm5729_vm3, %v5631_v44  ;;  %v5632_v44 = vld [vmem:[%s16975_s7 + $0x78] sm:$0xff] }
 0x99e   : > { %17292 = vst [vmem:[#allocation97_spill] sm:$0xff] %v14945_v32 }
 0x99f   : > { %v4702_v17 = vpop.f32.mrf.mxu2 }
 0x9a0   : > { %v14948_v29 = vadd.f32 %v14707_v34, %v4702_v17 }
 0x9a1   : > { %9112 = vmatmul.msk.f32.gmra.mxu3 %vm1063_vm2, %v14593_v46  ;;  %v14952_v50 = vpop.f32.mrf.mxu1  ;;  %v14969_v46 = vpop.permute.xlu2 %6550 }
 0x9a2   : > { %17293 = vst [vmem:[#allocation98_spill] sm:$0xff] %v14948_v29  ;;  %v5184_v59 = vpop.f32.mrf.mxu0  ;;  %v14971_v17 = vpop.permute.xlu1 %7002 }
 0x9a3   : > { %17294 = vst [vmem:[#allocation99_spill] sm:$0xff] %v14952_v50 }
 0x9a4   : > { %v14962_v41 = vpop.f32.mrf.mxu3  ;;  %9205 = vmatmul.msk.f32.gmra.mxu1 %vm1063_vm2, %v14309_v10  ;;  %9221 = vmatmul.msk.f32.gmra.mxu2 %vm1063_vm2, %v14957_v56  ;;  %17296 = vst [vmem:[#allocation101_spill] sm:$0xff] %v14969_v46  ;;  %v14983_v10 = vld [vmem:[%s16974_s6 + $0x540] sm:$0xff] }
 0x9a5   : > { %17295 = vst [vmem:[#allocation100_spill] sm:$0xff] %v14962_v41  ;;  %9277 = vmatmul.msk.f32.gmra.mxu0 %vm5729_vm3, %v5632_v44  ;;  %v14985_v41 = vpop.permute.xlu0 %7072 }
 0x9a6   : > { %17297 = vst [vmem:[#allocation102_spill] sm:$0xff] %v14971_v17 }
 0x9a7   : > { %v4705_v34 = vpop.f32.mrf.mxu2  ;;  %17300 = vst [vmem:[#allocation105_spill] sm:$0xff] %v14985_v41 }
 0x9a8   : > { %v14974_v59 = vadd.f32 %v14735_v39, %v4705_v34 }
 0x9a9   : > { %9113 = vmatmul.msk.f32.gmra.mxu3 %vm1063_vm2, %v14617_v9  ;;  %v14978_v29 = vpop.f32.mrf.mxu1  ;;  %v14995_v9 = vpop.permute.xlu2 %6997 }
 0x9aa   : > { %17298 = vst [vmem:[#allocation103_spill] sm:$0xff] %v14974_v59  ;;  %v5795_v44 = vpop.f32.mrf.mxu0  ;;  %v15004_v59 = vld [vmem:[%s16974_s6 + $0x548] sm:$0xff]  ;;  %v15006_v41 = vpop.permute.xlu1 %7067 }
 0x9ab   : > { %17299 = vst [vmem:[#allocation104_spill] sm:$0xff] %v14978_v29 }
 0x9ac   : > { %v14987_v50 = vpop.f32.mrf.mxu3  ;;  %9206 = vmatmul.msk.f32.gmra.mxu1 %vm1063_vm2, %v14336_v16  ;;  %9222 = vmatmul.msk.f32.gmra.mxu2 %vm1063_vm2, %v14983_v10  ;;  %17303 = vst [vmem:[#allocation108_spill] sm:$0xff] %v14995_v9 }
 0x9ad   : > { %17301 = vst [vmem:[#allocation106_spill] sm:$0xff] %v14987_v50  ;;  %v5207_v50 = vadd.f32 %v14351_v55, %v14288_v48  ;;  %v15012_v17 = vpop.permute.xlu0 %7057 }
 0x9ae   : > { %17305 = vst [vmem:[#allocation110_spill] sm:$0xff] %v15006_v41  ;;  %v5204_v41 = vadd.f32 %v14324_v54, %v14263_v38 }
 0x9af   : > { %v14993_v39 = vpop.f32.mrf.mxu2  ;;  %17306 = vst [vmem:[#allocation111_spill] sm:$0xff] %v15012_v17 }
 0x9b0   : > { %17302 = vst [vmem:[#allocation107_spill] sm:$0xff] %v14993_v39  ;;  %v5796_v39 = vadd.f32 %v5795_v44, %v14652_v53 }
 0x9b1   : > { %9114 = vmatmul.msk.f32.gmra.mxu3 %vm1063_vm2, %v14645_v26  ;;  %v14999_v34 = vpop.f32.mrf.mxu1 }
 0x9b2   : > { %17304 = vst [vmem:[#allocation109_spill] sm:$0xff] %v14999_v34  ;;  %v5798_v16 = vpop.f32.mrf.mxu0  ;;  %v15028_v55 = vadd.f32 %v5796_v39, %v13969_v11  ;;  %v15045_v11 = vpop.permute.xlu2 %7062 }
 0x9b3   : > { %v5799_v29 = vadd.f32 %v5798_v16, %v14624_v35  ;;  %v15030_v35 = vadd.f32 %v5796_v39, %v5204_v41  ;;  %17310 = vst [vmem:[#allocation115_spill] sm:$0xff] %v15045_v11  ;;  %v15051_v53 = vpop.permute.xlu1 %7032 }
 0x9b4   : > { %v15014_v26 = vpop.f32.mrf.mxu3  ;;  %9207 = vmatmul.msk.f32.gmra.mxu1 %vm1063_vm2, %v14363_v45  ;;  %9223 = vmatmul.msk.f32.gmra.mxu2 %vm1063_vm2, %v15004_v59  ;;  %17311 = vst [vmem:[#allocation116_spill] sm:$0xff] %v15051_v53 }
 0x9b5   : > { %17307 = vst [vmem:[#allocation112_spill] sm:$0xff] %v15014_v26  ;;  %v15023_v34 = vadd.f32 %v5799_v29, %v13992_v40  ;;  %v15025_v48 = vadd.f32 %v5799_v29, %v5207_v50  ;;  %v15043_v40 = vld [vmem:[%s16974_s6 + $0x550] sm:$0xff]  ;;  %v15059_v50 = vpop.permute.xlu0 %7022 }
 0x9b6   : > { %17313 = vst [vmem:[#allocation118_spill] sm:$0xff] %v15059_v50 }
 0x9b7   : > { %5951 = vmatpush.msrb.mxu1 %v15023_v34  ;;  %5980 = vmatpush.msrb.mxu2 %v15025_v48  ;;  %v15034_v45 = vpop.f32.mrf.mxu2 }
 0x9b8   : > { %17308 = vst [vmem:[#allocation113_spill] sm:$0xff] %v15034_v45 }
 0x9b9   : > { %5952 = vmatpush.msrb.mxu1 %v15028_v55  ;;  %5981 = vmatpush.msrb.mxu2 %v15030_v35  ;;  %v15038_v38 = vpop.f32.mrf.mxu1 }
 0x9ba   : > { %17309 = vst [vmem:[#allocation114_spill] sm:$0xff] %v15038_v38  ;;  %9115 = vmatmul.msk.f32.gmra.mxu3 %vm1063_vm2, %v14675_v28  ;;  %v15049_v54 = vpop.f32.mrf.mxu0  ;;  %v15068_v28 = vld [vmem:[%s16974_s6 + $0x558] sm:$0xff] }
 0x9bc   : > { %v15053_v41 = vpop.f32.mrf.mxu3  ;;  %9208 = vmatmul.msk.f32.gmra.mxu1 %vm1063_vm2, %v14390_v2  ;;  %9224 = vmatmul.msk.f32.gmra.mxu2 %vm1063_vm2, %v15043_v40  ;;  %v15074_v2 = vpop.permute.xlu2 %7027 }
 0x9bd   : > { %17312 = vst [vmem:[#allocation117_spill] sm:$0xff] %v15053_v41  ;;  %v15086_v26 = vpop.permute.xlu0 %7469 }
 0x9be   : > { %17316 = vst [vmem:[#allocation121_spill] sm:$0xff] %v15074_v2 }
 0x9bf   : > { %v15061_v29 = vpop.f32.mrf.mxu2  ;;  %17320 = vst [vmem:[#allocation125_spill] sm:$0xff] %v15086_v26 }
 0x9c0   : > { %17314 = vst [vmem:[#allocation119_spill] sm:$0xff] %v15061_v29  ;;  %v15082_v29 = vpop.permute.xlu1 %7017 }
 0x9c1   : > { %v15063_v44 = vpop.f32.mrf.mxu1  ;;  %17318 = vst [vmem:[#allocation123_spill] sm:$0xff] %v15082_v29 }
 0x9c2   : > { %17315 = vst [vmem:[#allocation120_spill] sm:$0xff] %v15063_v44  ;;  %9116 = vmatmul.msk.f32.gmra.mxu3 %vm1063_vm2, %v14703_v25  ;;  %v15072_v39 = vpop.f32.mrf.mxu0  ;;  %v15093_v25 = vld [vmem:[%s16974_s6 + $0x560] sm:$0xff] }
 0x9c4   : > { %v15076_v16 = vpop.f32.mrf.mxu3  ;;  %9209 = vmatmul.msk.f32.gmra.mxu1 %vm1063_vm2, %v14417_v51  ;;  %9225 = vmatmul.msk.f32.gmra.mxu2 %vm1063_vm2, %v15068_v28 }
 0x9c5   : > { %17317 = vst [vmem:[#allocation122_spill] sm:$0xff] %v15076_v16  ;;  %v5216_v16 = vadd.f32 %v14432_v36, %v14367_v7  ;;  %v15120_v36 = vld [vmem:[%s16974_s6 + $0x568] sm:$0xff] }
 0x9c7   : > { %v15084_v45 = vpop.f32.mrf.mxu2 }
 0x9c8   : > { %17319 = vst [vmem:[#allocation124_spill] sm:$0xff] %v15084_v45  ;;  %v15113_v50 = vpop.permute.xlu1 %7544 }
 0x9c9   : > { %v15088_v41 = vpop.f32.mrf.mxu1  ;;  %17324 = vst [vmem:[#allocation129_spill] sm:$0xff] %v15113_v50 }
 0x9ca   : > { %17321 = vst [vmem:[#allocation126_spill] sm:$0xff] %v15088_v41  ;;  %9117 = vmatmul.msk.f32.gmra.mxu3 %vm1063_vm2, %v14731_v52  ;;  %v5807_v51 = vpop.f32.mrf.mxu0  ;;  %v15111_v41 = vpop.permute.xlu2 %7474 }
 0x9cb   : > { %v15100_v29 = vadd.f32 %v5807_v51, %v14733_v14  ;;  %17323 = vst [vmem:[#allocation128_spill] sm:$0xff] %v15111_v41  ;;  %v15122_v14 = vpop.permute.xlu0 %7534 }
 0x9cc   : > { %v15102_v45 = vpop.f32.mrf.mxu3  ;;  %9210 = vmatmul.msk.f32.gmra.mxu1 %vm1063_vm2, %v14444_v0  ;;  %9226 = vmatmul.msk.f32.gmra.mxu2 %vm1063_vm2, %v15093_v25  ;;  %17326 = vst [vmem:[#allocation131_spill] sm:$0xff] %v15122_v14 }
 0x9cd   : > { %17322 = vst [vmem:[#allocation127_spill] sm:$0xff] %v15102_v45  ;;  %v15109_v26 = vadd.f32 %v15100_v29, %v5216_v16  ;;  %v5219_v16 = vadd.f32 %v14459_v15, %v14394_v18  ;;  %v15147_v18 = vld [vmem:[%s16974_s6 + $0x570] sm:$0xff]  ;;  %v17347_v45 = vld [vmem:[#allocation3_spill] sm:$0xff] }
 0x9cf   : > { %v4720_v52 = vpop.f32.mrf.mxu2 }
 0x9d0   : > { %v15149_v15 = vpop.permute.xlu1 %7529 }
 0x9d1   : > { %v15115_v7 = vpop.f32.mrf.mxu1  ;;  %17330 = vst [vmem:[#allocation135_spill] sm:$0xff] %v15149_v15 }
 0x9d2   : > { %17325 = vst [vmem:[#allocation130_spill] sm:$0xff] %v15115_v7  ;;  %9238 = vmatmul.msk.f32.vlgmr.msra.gmra.mxu3 %vm1063_vm2, %v14759_v33  ;;  %v5810_v0 = vpop.f32.mrf.mxu0  ;;  %v15140_v33 = vpop.permute.xlu2 %7539 }
 0x9d3   : > { %v15129_v51 = vadd.f32 %v5810_v0, %v14705_v47  ;;  %17328 = vst [vmem:[#allocation133_spill] sm:$0xff] %v15140_v33  ;;  %v5222_v47 = vadd.f32 %v14486_v21, %v14421_v8  ;;  %v15158_v0 = vpop.permute.xlu0 %7499  ;;  %v15174_v8 = vld [vmem:[%s16974_s6 + $0x578] sm:$0xff] }
 0x9d4   : > { %v15131_v52 = vpop.f32.mrf.mxu3  ;;  %9211 = vmatmul.msk.f32.gmra.mxu1 %vm1063_vm2, %v14471_v37  ;;  %9227 = vmatmul.msk.f32.gmra.mxu2 %vm1063_vm2, %v15120_v36  ;;  %17331 = vst [vmem:[#allocation136_spill] sm:$0xff] %v15158_v0 }
 0x9d5   : > { %17327 = vst [vmem:[#allocation132_spill] sm:$0xff] %v15131_v52  ;;  %v15138_v14 = vadd.f32 %v15129_v51, %v5219_v16 }
 0x9d7   : > { %v4722_v50 = vpop.f32.mrf.mxu2 }
 0x9d9   : > { %v15142_v41 = vpop.f32.mrf.mxu1 }
 0x9da   : > { %17329 = vst [vmem:[#allocation134_spill] sm:$0xff] %v15142_v41  ;;  %9239 = vmatmul.msk.f32.gmra.mxu3 %vm1063_vm2, %v14789_v61  ;;  %v5813_v37 = vpop.f32.mrf.mxu0  ;;  %v15176_v21 = vpop.permute.xlu2 %7504 }
 0x9db   : > { %v15156_v50 = vadd.f32 %v5813_v37, %v14719_v5  ;;  %17334 = vst [vmem:[#allocation139_spill] sm:$0xff] %v15176_v21  ;;  %v17335_v5 = vld [vmem:[#allocation64_spill] sm:$0xff]  ;;  %v17336_v37 = vld [vmem:[#allocation29_spill] sm:$0xff] }
 0x9dc   : > { %v15160_v16 = vpop.f32.mrf.mxu3  ;;  %9212 = vmatmul.msk.f32.gmra.mxu1 %vm1063_vm2, %v14498_v3  ;;  %9228 = vmatmul.msk.f32.gmra.mxu2 %vm1063_vm2, %v15147_v18  ;;  %v5225_v0 = vadd.f32 %v17336_v37, %v17335_v5 }
 0x9dd   : > { %17332 = vst [vmem:[#allocation137_spill] sm:$0xff] %v15160_v16  ;;  %v15167_v15 = vadd.f32 %v15156_v50, %v5222_v47 }
 0x9df   : > { %v4724_v61 = vpop.f32.mrf.mxu2 }
 0x9e0   : > { %v15185_v61 = vpop.permute.xlu1 %7494 }
 0x9e1   : > { %v15169_v33 = vpop.f32.mrf.mxu1  ;;  %17337 = vst [vmem:[#allocation64_spill] sm:$0xff] %v15185_v61 }
 0x9e2   : > { %17333 = vst [vmem:[#allocation138_spill] sm:$0xff] %v15169_v33  ;;  %9240 = vmatmul.msk.f32.gmra.mxu3 %vm1063_vm2, %v14819_v57  ;;  %v5816_v3 = vpop.f32.mrf.mxu0  ;;  %v15196_v57 = vpop.permute.xlu0 %7946  ;;  %v17346_v33 = vld [vmem:[#allocation2_spill] sm:$0xff] }
 0x9e3   : > { %v15183_v47 = vadd.f32 %v5816_v3, %v14691_v62  ;;  %17339 = vst [vmem:[#allocation140_spill] sm:$0xff] %v15196_v57  ;;  %v15203_v62 = vld [vmem:[%s16974_s6 + $0x580] sm:$0xff]  ;;  %v15212_v3 = vpop.permute.xlu2 %7489  ;;  %v5210_v2 = vadd.f32 %v17347_v45, %v17346_v33 }
 0x9e4   : > { %v15187_v52 = vpop.f32.mrf.mxu3  ;;  %9213 = vmatmul.msk.f32.gmra.mxu1 %vm1063_vm2, %v14525_v58  ;;  %9229 = vmatmul.msk.f32.gmra.mxu2 %vm1063_vm2, %v15174_v8  ;;  %v15208_v58 = vld [vmem:[%s16973_s5 + $0x20] sm:$0xff]  ;;  %17341 = vst [vmem:[#allocation142_spill] sm:$0xff] %v15212_v3 }
 0x9e5   : > { %17338 = vst [vmem:[#allocation29_spill] sm:$0xff] %v15187_v52  ;;  %v15194_v21 = vadd.f32 %v15183_v47, %v5225_v0 }
 0x9e7   : > { %v4726_v16 = vpop.f32.mrf.mxu2 }
 0x9e8   : > { %v15220_v16 = vpop.permute.xlu1 %7941 }
 0x9e9   : > { %v15198_v5 = vpop.f32.mrf.mxu1  ;;  %17343 = vst [vmem:[#allocation144_spill] sm:$0xff] %v15220_v16 }
 0x9ea   : > { %17340 = vst [vmem:[#allocation141_spill] sm:$0xff] %v15198_v5  ;;  %9241 = vmatmul.msk.f32.gmra.mxu3 %vm1063_vm2, %v14847_v49  ;;  %v5819_v0 = vpop.f32.mrf.mxu0  ;;  %v5667_v52 = vpop.permute.xlu0 %5666  ;;  %v15229_v49 = vld [vmem:[%s16974_s6 + $0x588] sm:$0xff] }
 0x9eb   : > { %v5805_v9 = vadd.f32 %v15072_v39, %v5667_v52 }
 0x9ec   : > { %v15214_v37 = vpop.f32.mrf.mxu3  ;;  %9230 = vmatmul.msk.f32.gmra.mxu2 %vm1063_vm2, %v15203_v62  ;;  %9282 = vmatmul.msk.f32.vlgmr.msrb.gmra.mxu1 %vm737_vm1, %v15208_v58 }
 0x9ed   : > { %17342 = vst [vmem:[#allocation143_spill] sm:$0xff] %v15214_v37  ;;  %v15234_v37 = vld [vmem:[%s16973_s5 + $0x28] sm:$0xff] }
 0x9ef   : > { %v15222_v57 = vpop.f32.mrf.mxu2 }
 0x9f0   : > { %v5692_v41 = vpop.permute.xlu1 %5691 }
 0x9f1   : > { %v15224_v5 = vpop.f32.mrf.mxu1  ;;  %v5820_v46 = vadd.f32 %v5819_v0, %v5692_v41  ;;  %v15285_v41 = vld [vmem:[%s16973_s5 + $0x38] sm:$0xff] }
 0x9f2   : > { %17344 = vst [vmem:[#allocation145_spill] sm:$0xff] %v15224_v5  ;;  %v5822_v61 = vpop.f32.mrf.mxu0  ;;  %9242 = vmatmul.msk.f32.gmra.mxu3 %vm1063_vm2, %v14875_v1  ;;  %v5662_v5 = vpop.permute.xlu2 %5661  ;;  %v15254_v1 = vld [vmem:[%s16974_s6 + $0x590] sm:$0xff] }
 0x9f3   : > { %v5802_v3 = vadd.f32 %v15049_v54, %v5662_v5  ;;  %v5702_v17 = vpop.permute.xlu0 %5701  ;;  %v17349_v5 = vld [vmem:[#allocation18_spill] sm:$0xff]  ;;  %v5879_v52 = vsub.f32 %v15028_v55, %v5820_v46 }
 0x9f4   : > { %v15238_v16 = vpop.f32.mrf.mxu3  ;;  %9231 = vmatmul.msk.f32.gmra.mxu2 %vm1063_vm2, %v15229_v49  ;;  %9283 = vmatmul.msk.f32.gmra.mxu1 %vm737_vm1, %v15234_v37 }
 0x9f5   : > { %17345 = vst [vmem:[#allocation146_spill] sm:$0xff] %v15238_v16  ;;  %v15259_v16 = vld [vmem:[%s16973_s5 + $0x30] sm:$0xff]  ;;  %v5847_v11 = vadd.f32 %v5802_v3, %v17349_v5  ;;  %v5848_v45 = vadd.f32 %v5802_v3, %v5210_v2 }
 0x9f6   : > { %v17352_v3 = vld [vmem:[#allocation4_spill] sm:$0xff] }
 0x9f7   : > { %v15245_v7 = vpop.f32.mrf.mxu2 }
 0x9f9   : > { %v15249_v53 = vpop.f32.mrf.mxu1 }
 0x9fa   : > { %17348 = vst [vmem:[#allocation2_spill] sm:$0xff] %v15249_v53  ;;  %v5825_v54 = vpop.f32.mrf.mxu0  ;;  %9243 = vmatmul.msk.f32.gmra.mxu3 %vm1063_vm2, %v14901_v19 }
 0x9fb   : > { %v5826_v33 = vadd.f32 %v5825_v54, %v5702_v17  ;;  %v17351_v17 = vld [vmem:[#allocation60_spill] sm:$0xff] }
 0x9fc   : > { %v15264_v53 = vpop.f32.mrf.mxu3  ;;  %9232 = vmatmul.msk.f32.gmra.mxu2 %vm1063_vm2, %v15254_v1  ;;  %9284 = vmatmul.msk.f32.gmra.mxu1 %vm737_vm1, %v15259_v16  ;;  %v5213_v54 = vadd.f32 %v17352_v3, %v17351_v17  ;;  %v5880_v17 = vsub.f32 %v15030_v35, %v5820_v46 }
 0x9fd   : > { %17350 = vst [vmem:[#allocation3_spill] sm:$0xff] %v15264_v53  ;;  %v5863_v44 = vsub.f32 %v5847_v11, %v5826_v33  ;;  %v5864_v38 = vsub.f32 %v5848_v45, %v5826_v33  ;;  %v5887_v32 = vsub.f32 0.0, %v5826_v33  ;;  %v15280_v53 = vld [vmem:[%s16974_s6 + $0x598] sm:$0xff]  ;;  %v5860_v55 = vsub.f32 %v5826_v33, %v5848_v45 }
 0x9fe   : > { %v5884_v35 = vmul.f32 %v5880_v17, %v5880_v17 }
 0x9ff   : > { %v5867_v12 = vmul.f32 1.442695, %v5863_v44  ;;  %v5869_v19 = vmul.f32 1.442695, %v5864_v38  ;;  %v15271_v30 = vpop.f32.mrf.mxu2  ;;  %v5889_v2 = vmul.f32 1.442695, %v5887_v32  ;;  %v5707_v38 = vpop.permute.xlu1 %5706 }
 0xa00   : > { %v17354_v44 = vld [vmem:[#allocation17_spill] sm:$0xff] }
 0xa01   : > { %10106 = vpow2.f32 %v5867_v12  ;;  %v15275_v5 = vpop.f32.mrf.mxu1  ;;  %v5849_v39 = vadd.f32 %v5805_v9, %v17354_v44  ;;  %v5850_v12 = vadd.f32 %v5805_v9, %v5213_v54  ;;  %v5697_v9 = vpop.permute.xlu2 %5696  ;;  %v5883_v54 = vmul.f32 %v5879_v52, %v5879_v52 }
 0xa02   : > { %17353 = vst [vmem:[#allocation18_spill] sm:$0xff] %v15275_v5  ;;  %10108 = vpow2.f32 %v5869_v19  ;;  %v5828_v32 = vpop.f32.mrf.mxu0  ;;  %9244 = vmatmul.msk.f32.gmra.mxu3 %vm1063_vm2, %v14929_v6  ;;  %v5859_v5 = vsub.f32 %v5826_v33, %v5847_v11  ;;  %v15305_v11 = vld [vmem:[%s16974_s6 + $0x5a0] sm:$0xff] }
 0xa03   : > { %10110 = vpow2.f32 %v5889_v2  ;;  %v5829_v0 = vadd.f32 %v5828_v32, %v5707_v38 }
 0xa04   : > { %v15292_v3 = vpop.f32.mrf.mxu3  ;;  %9233 = vmatmul.msk.f32.gmra.mxu2 %vm1063_vm2, %v15280_v53  ;;  %9285 = vmatmul.msk.f32.gmra.mxu1 %vm737_vm1, %v15285_v41 }
 0xa05   : > { %17355 = vst [vmem:[#allocation60_spill] sm:$0xff] %v15292_v3  ;;  %v5865_v19 = vsub.f32 %v5849_v39, %v5829_v0  ;;  %v5866_v44 = vsub.f32 %v5850_v12, %v5829_v0  ;;  %v5888_v42 = vsub.f32 0.0, %v5829_v0  ;;  %v5823_v3 = vadd.f32 %v5822_v61, %v5697_v9 }
 0xa07   : > { %v10107_v6 = vpop.eup %10106  ;;  %v5871_v2 = vmul.f32 1.442695, %v5865_v19  ;;  %v5873_v38 = vmul.f32 1.442695, %v5866_v44  ;;  %v15298_v32 = vpop.f32.mrf.mxu2  ;;  %v5891_v23 = vmul.f32 1.442695, %v5888_v42  ;;  %v5881_v61 = vsub.f32 %v15023_v34, %v5823_v3 }
 0xa08   : > { %v10109_v46 = vpop.eup %10108  ;;  %v5875_v60 = vadd.f32 %v10107_v6, %v5859_v5  ;;  %v5882_v42 = vsub.f32 %v15025_v48, %v5823_v3  ;;  %v5861_v19 = vsub.f32 %v5829_v0, %v5849_v39  ;;  %v5862_v6 = vsub.f32 %v5829_v0, %v5850_v12 }
 0xa09   : > { %v10111_v4 = vpop.eup %10110  ;;  %v5876_v63 = vadd.f32 %v10109_v46, %v5860_v55  ;;  %10112 = vpow2.f32 %v5871_v2  ;;  %v15300_v24 = vpop.f32.mrf.mxu1  ;;  %v15345_v46 = vld [vmem:[%s16974_s6 + $0x5b0] sm:$0xff] }
 0xa0a   : > { %17356 = vst [vmem:[#allocation4_spill] sm:$0xff] %v15300_v24  ;;  %10114 = vpow2.f32 %v5873_v38  ;;  %9245 = vmatmul.msk.f32.gmra.mxu3 %vm1063_vm2, %v14957_v56  ;;  %v5893_v45 = vmul.f32 %v10111_v4, %v5883_v54  ;;  %v5894_v33 = vmul.f32 %v10111_v4, %v5884_v35  ;;  %v5886_v9 = vmul.f32 %v5882_v42, %v5882_v42 }
 0xa0b   : > { %10116 = vpow2.f32 %v5891_v23  ;;  %v5885_v23 = vmul.f32 %v5881_v61, %v5881_v61 }
 0xa0c   : > { %v15311_v5 = vpop.f32.mrf.mxu3  ;;  %9234 = vmatmul.msk.f32.gmra.mxu2 %vm1063_vm2, %v15305_v11  ;;  %v15315_v52 = vadd.f32 %v5893_v45, %v5875_v60  ;;  %v15317_v17 = vadd.f32 %v5894_v33, %v5876_v63  ;;  %v15326_v60 = vld [vmem:[%s16974_s6 + $0x5a8] sm:$0xff]  ;;  %v15360_v33 = vld [vmem:[%s16974_s6 + $0x5b8] sm:$0xff] }
 0xa0d   : > { %17357 = vst [vmem:[#allocation17_spill] sm:$0xff] %v15311_v5 }
 0xa0f   : > { %v10113_v44 = vpop.eup %10112  ;;  %v15319_v56 = vpop.f32.mrf.mxu2 }
 0xa10   : > { %v10115_v4 = vpop.eup %10114  ;;  %v5877_v34 = vadd.f32 %v10113_v44, %v5861_v19 }
 0xa11   : > { %v10117_v54 = vpop.eup %10116  ;;  %v5878_v48 = vadd.f32 %v10115_v4, %v5862_v6  ;;  %v15321_v3 = vpop.f32.mrf.mxu1 }
 0xa12   : > { %17358 = vst [vmem:[#allocation147_spill] sm:$0xff] %v15321_v3  ;;  %9246 = vmatmul.msk.f32.gmra.mxu3 %vm1063_vm2, %v14983_v10  ;;  %v5895_v63 = vmul.f32 %v10117_v54, %v5885_v23  ;;  %v5896_v39 = vmul.f32 %v10117_v54, %v5886_v9 }
 0xa14   : > { %v15330_v12 = vpop.f32.mrf.mxu3  ;;  %9235 = vmatmul.msk.f32.gmra.mxu2 %vm1063_vm2, %v15326_v60  ;;  %v15334_v0 = vadd.f32 %v5895_v63, %v5877_v34  ;;  %v15336_v55 = vadd.f32 %v5896_v39, %v5878_v48 }
 0xa15   : > { %17359 = vst [vmem:[#allocation148_spill] sm:$0xff] %v15330_v12 }
 0xa17   : > { %v15338_v2 = vpop.f32.mrf.mxu2 }
 0xa19   : > { %v15340_v38 = vpop.f32.mrf.mxu1 }
 0xa1a   : > { %17360 = vst [vmem:[#allocation149_spill] sm:$0xff] %v15340_v38  ;;  %9247 = vmatmul.msk.f32.gmra.mxu3 %vm1063_vm2, %v15004_v59 }
 0xa1c   : > { %v15349_v10 = vpop.f32.mrf.mxu3  ;;  %9236 = vmatmul.msk.f32.gmra.mxu2 %vm1063_vm2, %v15345_v46 }
 0xa1d   : > { %17361 = vst [vmem:[#allocation150_spill] sm:$0xff] %v15349_v10 }
 0xa1f   : > { %v15353_v35 = vpop.f32.mrf.mxu2 }
 0xa21   : > { %v15355_v45 = vpop.f32.mrf.mxu1 }
 0xa22   : > { %17362 = vst [vmem:[#allocation151_spill] sm:$0xff] %v15355_v45  ;;  %9248 = vmatmul.msk.f32.gmra.mxu3 %vm1063_vm2, %v15043_v40 }
 0xa24   : > { %v15364_v61 = vpop.f32.mrf.mxu3  ;;  %9237 = vmatmul.msk.f32.gmra.mxu2 %vm1063_vm2, %v15360_v33 }
 0xa25   : > { %17363 = vst [vmem:[#allocation152_spill] sm:$0xff] %v15364_v61  ;;  %v17376_v61 = vld [vmem:[#allocation50_spill] sm:$0xff] }
 0xa27   : > { %v15368_v59 = vpop.f32.mrf.mxu2 }
 0xa29   : > { %v15370_v42 = vpop.f32.mrf.mxu1 }
 0xa2a   : > { %17364 = vst [vmem:[#allocation153_spill] sm:$0xff] %v15370_v42  ;;  %9249 = vmatmul.msk.f32.gmra.mxu3 %vm1063_vm2, %v15068_v28 }
 0xa2c   : > { %v15374_v19 = vpop.f32.mrf.mxu3  ;;  %9286 = vmatmul.msk.f32.vlgmr.msrb.gmra.mxu2 %vm737_vm1, %v15208_v58 }
 0xa2d   : > { %17365 = vst [vmem:[#allocation154_spill] sm:$0xff] %v15374_v19 }
 0xa2f   : > { %v15378_v44 = vpop.f32.mrf.mxu2 }
 0xa31   : > { %v15380_v40 = vpop.f32.mrf.mxu1 }
 0xa32   : > { %17366 = vst [vmem:[#allocation155_spill] sm:$0xff] %v15380_v40  ;;  %9250 = vmatmul.msk.f32.gmra.mxu3 %vm1063_vm2, %v15093_v25  ;;  %v17377_v40 = vld [vmem:[#allocation42_spill] sm:$0xff] }
 0xa34   : > { %v4877_v6 = vpop.f32.mrf.mxu3  ;;  %9287 = vmatmul.msk.f32.gmra.mxu2 %vm737_vm1, %v15234_v37 }
 0xa37   : > { %v15386_v4 = vpop.f32.mrf.mxu2 }
 0xa39   : > { %v15388_v23 = vpop.f32.mrf.mxu1 }
 0xa3a   : > { %17367 = vst [vmem:[#allocation156_spill] sm:$0xff] %v15388_v23  ;;  %9251 = vmatmul.msk.f32.gmra.mxu3 %vm1063_vm2, %v15120_v36  ;;  %v17375_v23 = vld [vmem:[#allocation46_spill] sm:$0xff] }
 0xa3c   : > { %9288 = vmatmul.msk.f32.gmra.mxu2 %vm737_vm1, %v15259_v16 }
 0xa3d   : > { %v4879_v28 = vpop.f32.mrf.mxu3 }
 0xa3f   : > { %v15394_v58 = vpop.f32.mrf.mxu2 }
 0xa41   : > { %v15396_v9 = vpop.f32.mrf.mxu1 }
 0xa42   : > { %17368 = vst [vmem:[#allocation157_spill] sm:$0xff] %v15396_v9  ;;  %9252 = vmatmul.msk.f32.gmra.mxu3 %vm1063_vm2, %v15147_v18 }
 0xa44   : > { %9289 = vmatmul.msk.f32.gmra.mxu2 %vm737_vm1, %v15285_v41  ;;  %v5831_v41 = vpop.f32.mrf.mxu0 }
 0xa45   : > { %v4881_v25 = vpop.f32.mrf.mxu3 }
 0xa47   : > { %v15402_v37 = vpop.f32.mrf.mxu2 }
 0xa49   : > { %v5335_v34 = vpop.f32.mrf.mxu1 }
 0xa4a   : > { %9253 = vmatmul.msk.f32.gmra.mxu3 %vm1063_vm2, %v15174_v8 }
 0xa4c   : > { %v5834_v28 = vpop.f32.mrf.mxu0 }
 0xa4d   : > { %v4883_v36 = vpop.f32.mrf.mxu3  ;;  %v15449_v10 = vadd.f32 %v5834_v28, %v17377_v40 }
 0xa4f   : > { %v15406_v16 = vpop.f32.mrf.mxu2 }
 0xa50   : > { %17369 = vst [vmem:[#allocation158_spill] sm:$0xff] %v15406_v16 }
 0xa51   : > { %v5337_v54 = vpop.f32.mrf.mxu1 }
 0xa52   : > { %9254 = vmatmul.msk.f32.gmra.mxu3 %vm1063_vm2, %v15203_v62 }
 0xa55   : > { %v15410_v48 = vpop.f32.mrf.mxu3 }
 0xa57   : > { %v15412_v18 = vpop.f32.mrf.mxu2 }
 0xa58   : > { %17370 = vst [vmem:[#allocation159_spill] sm:$0xff] %v15412_v18 }
 0xa59   : > { %v5339_v63 = vpop.f32.mrf.mxu1 }
 0xa5a   : > { %9255 = vmatmul.msk.f32.gmra.mxu3 %vm1063_vm2, %v15229_v49  ;;  %v5837_v49 = vpop.f32.mrf.mxu0 }
 0xa5d   : > { %v15416_v39 = vpop.f32.mrf.mxu3 }
 0xa5f   : > { %v15418_v6 = vpop.f32.mrf.mxu2 }
 0xa60   : > { %17371 = vst [vmem:[#allocation160_spill] sm:$0xff] %v15418_v6 }
 0xa61   : > { %v5341_v8 = vpop.f32.mrf.mxu1 }
 0xa62   : > { %9256 = vmatmul.msk.f32.gmra.mxu3 %vm1063_vm2, %v15254_v1  ;;  %v5840_v9 = vpop.f32.mrf.mxu0 }
 0xa63   : > { %v15444_v42 = vadd.f32 %v5840_v9, %v17376_v61  ;;  %v5915_v61 = vadd.f32 %v15449_v10, %v15245_v7 }
 0xa65   : > { %v15422_v25 = vpop.f32.mrf.mxu3 }
 0xa67   : > { %v15424_v62 = vpop.f32.mrf.mxu2 }
 0xa68   : > { %17372 = vst [vmem:[#allocation161_spill] sm:$0xff] %v15424_v62 }
 0xa69   : > { %v5954_v34 = vpop.f32.mrf.mxu1 }
 0xa6a   : > { %9257 = vmatmul.msk.f32.gmra.mxu3 %vm1063_vm2, %v15280_v53  ;;  %v15441_v53 = vadd.f32 %v5837_v49, %v17375_v23 }
 0xa6c   : > { %v5917_v45 = vadd.f32 %v15441_v53, %v15271_v30 }
 0xa6d   : > { %v15428_v36 = vpop.f32.mrf.mxu3 }
 0xa6f   : > { %v15430_v54 = vpop.f32.mrf.mxu2 }
 0xa70   : > { %17373 = vst [vmem:[#allocation162_spill] sm:$0xff] %v15430_v54  ;;  %v17379_v54 = vld [vmem:[#allocation45_spill] sm:$0xff] }
 0xa71   : > { %v5957_v63 = vpop.f32.mrf.mxu1 }
 0xa72   : > { %9258 = vmatmul.msk.f32.gmra.mxu3 %vm1063_vm2, %v15305_v11 }
 0xa75   : > { %v15434_v8 = vpop.f32.mrf.mxu3 }
 0xa77   : > { %v15436_v1 = vpop.f32.mrf.mxu2 }
 0xa78   : > { %17374 = vst [vmem:[#allocation163_spill] sm:$0xff] %v15436_v1  ;;  %v15454_v1 = vadd.f32 %v5831_v41, %v17379_v54  ;;  %v5997_v41 = vadd.f32 %v5957_v63, %v5915_v61 }
 0xa79   : > { %v5960_v19 = vpop.f32.mrf.mxu1 }
 0xa7a   : > { %9259 = vmatmul.msk.f32.gmra.mxu3 %vm1063_vm2, %v15326_v60  ;;  %v5919_v60 = vadd.f32 %v15444_v42, %v15298_v32  ;;  %v5999_v9 = vadd.f32 %v5960_v19, %v5917_v45  ;;  %v5913_v40 = vadd.f32 %v15454_v1, %v15222_v57  ;;  %v17381_v32 = vld [vmem:[#allocation10_spill] sm:$0xff]  ;;  %v17383_v45 = vld [vmem:[#allocation12_spill] sm:$0xff]  ;;  %v5914_v38 = vadd.f32 %v15454_v1, %v15410_v48 }
 0xa7b   : > { %v17385_v19 = vld [vmem:[#allocation14_spill] sm:$0xff] }
 0xa7c   : > { %v5995_v30 = vadd.f32 %v5954_v34, %v5913_v40  ;;  %v5853_v34 = vadd.f32 %v15129_v51, %v17385_v19  ;;  %v15525_v19 = vld [vmem:[%s16975_s7 + $0x90] sm:$0xff] }
 0xa7d   : > { %v15446_v12 = vpop.f32.mrf.mxu3 }
 0xa7f   : > { %v15451_v11 = vpop.f32.mrf.mxu2 }
 0xa80   : > { %17378 = vst [vmem:[#allocation46_spill] sm:$0xff] %v15451_v11  ;;  %v5857_v11 = vadd.f32 %v15183_v47, %v17381_v32  ;;  %v15514_v32 = vld [vmem:[%s16975_s7 + $0x88] sm:$0xff] }
 0xa81   : > { %v5963_v23 = vpop.f32.mrf.mxu1 }
 0xa82   : > { %v6001_v49 = vadd.f32 %v5963_v23, %v5919_v60  ;;  %9260 = vmatmul.msk.f32.gmra.mxu3 %vm1063_vm2, %v15345_v46  ;;  %v5855_v46 = vadd.f32 %v15156_v50, %v17383_v45  ;;  %v17387_v60 = vld [vmem:[#allocation16_spill] sm:$0xff] }
 0xa83   : > { %v5851_v50 = vadd.f32 %v15100_v29, %v17387_v60  ;;  %v15503_v29 = vld [vmem:[%s16975_s7 + $0x80] sm:$0xff] }
 0xa84   : > { %10118 = vtanh.f32 %v6001_v49 }
 0xa85   : > { %v15466_v28 = vpop.f32.mrf.mxu3  ;;  %10120 = vtanh.f32 %v5999_v9 }
 0xa86   : > { %10122 = vtanh.f32 %v5997_v41 }
 0xa87   : > { %v15468_v54 = vpop.f32.mrf.mxu2  ;;  %10124 = vtanh.f32 %v5995_v30 }
 0xa88   : > { %17380 = vst [vmem:[#allocation50_spill] sm:$0xff] %v15468_v54  ;;  %10126 = vtanh.f32 %v5857_v11 }
 0xa89   : > { %10128 = vtanh.f32 %v5855_v46 }
 0xa8a   : > { %v15472_v7 = vpop.eup %10118  ;;  %9261 = vmatmul.msk.f32.gmra.mxu3 %vm1063_vm2, %v15360_v33  ;;  %10130 = vtanh.f32 %v5853_v34 }
 0xa8b   : > { %17382 = vst [vmem:[#allocation42_spill] sm:$0xff] %v15472_v7  ;;  %6187 = vmatpush.msrb.mxu3 %v15472_v7  ;;  %v15479_v57 = vpop.eup %10120  ;;  %10132 = vtanh.f32 %v5851_v50  ;;  %v15534_v50 = vld [vmem:[%s16975_s7 + $0x98] sm:$0xff]  ;;  %v5916_v7 = vadd.f32 %v15449_v10, %v15416_v39 }
 0xa8c   : > { %17384 = vst [vmem:[#allocation45_spill] sm:$0xff] %v15479_v57  ;;  %v15486_v63 = vpop.eup %10122 }
 0xa8d   : > { %6188 = vmatpush.msrb.mxu3 %v15479_v57  ;;  %v15484_v47 = vpop.f32.mrf.mxu3  ;;  %17386 = vst [vmem:[#allocation10_spill] sm:$0xff] %v15486_v63  ;;  %v15493_v33 = vpop.eup %10124  ;;  %v15565_v57 = vld [vmem:[%s16975_s7 + $0xb0] sm:$0xff] }
 0xa8e   : > { %17389 = vst [vmem:[#allocation14_spill] sm:$0xff] %v15493_v33  ;;  %v10127_v51 = vpop.eup %10126 }
 0xa8f   : > { %v15490_v23 = vpop.f32.mrf.mxu2  ;;  %6189 = vmatpush.msrb.mxu3 %v15486_v63  ;;  %v10129_v11 = vpop.eup %10128 }
 0xa90   : > { %17388 = vst [vmem:[#allocation12_spill] sm:$0xff] %v15490_v23  ;;  %v10131_v9 = vpop.eup %10130 }
 0xa91   : > { %6190 = vmatpush.msrb.mxu3 %v15493_v33  ;;  %v10133_v40 = vpop.eup %10132  ;;  %v5920_v33 = vadd.f32 %v15444_v42, %v15428_v36  ;;  %v6026_v36 = vld [vmem:[%s16975_s7 + $0xb8] sm:$0xff] }
 0xa93   : > { %6191 = vmatpush.msrb.mxu3 %v10127_v51 }
 0xa95   : > { %6192 = vmatpush.msrb.mxu3 %v10129_v11  ;;  %v15496_v61 = vpop.f32.mrf.mxu3 }
 0xa97   : > { %v15498_v49 = vpop.f32.mrf.mxu2  ;;  %6193 = vmatpush.msrb.mxu3 %v10131_v9  ;;  %v15543_v9 = vld [vmem:[%s16975_s7 + $0xa0] sm:$0xff] }
 0xa98   : > { %17390 = vst [vmem:[#allocation16_spill] sm:$0xff] %v15498_v49  ;;  %v15552_v49 = vld [vmem:[%s16975_s7 + $0xa8] sm:$0xff] }
 0xa99   : > { %6194 = vmatpush.msrb.mxu3 %v10133_v40 }
 0xa9a   : > { %9290 = vmatmul.msk.f32.vlgmr.msrb.gmra.mxu3 %vm5729_vm3, %v15503_v29 }
 0xa9d   : > { %v15507_v41 = vpop.f32.mrf.mxu3 }
 0xa9f   : > { %v15509_v30 = vpop.f32.mrf.mxu2 }
 0xaa0   : > { %17391 = vst [vmem:[#allocation164_spill] sm:$0xff] %v15509_v30  ;;  %v5918_v30 = vadd.f32 %v15441_v53, %v15422_v25 }
 0xaa2   : > { %9291 = vmatmul.msk.f32.gmra.mxu3 %vm5729_vm3, %v15514_v32 }
 0xaa5   : > { %v15518_v45 = vpop.f32.mrf.mxu3 }
 0xaa7   : > { %v15520_v46 = vpop.f32.mrf.mxu2 }
 0xaa8   : > { %17392 = vst [vmem:[#allocation165_spill] sm:$0xff] %v15520_v46 }
 0xaaa   : > { %9292 = vmatmul.msk.f32.gmra.mxu3 %vm5729_vm3, %v15525_v19 }
 0xaad   : > { %v15529_v34 = vpop.f32.mrf.mxu3 }
 0xaaf   : > { %v5983_v60 = vpop.f32.mrf.mxu2 }
 0xab0   : > { %v5996_v42 = vadd.f32 %v5983_v60, %v5914_v38 }
 0xab2   : > { %9293 = vmatmul.msk.f32.gmra.mxu3 %vm5729_vm3, %v15534_v50 }
 0xab5   : > { %v15538_v51 = vpop.f32.mrf.mxu3 }
 0xab6   : > { %17393 = vst [vmem:[#allocation166_spill] sm:$0xff] %v15538_v51 }
 0xab7   : > { %v5986_v11 = vpop.f32.mrf.mxu2 }
 0xab8   : > { %v5998_v3 = vadd.f32 %v5986_v11, %v5916_v7  ;;  %v6029_v7 = vld [vmem:[%s16975_s7 + $0xd0] sm:$0xff] }
 0xaba   : > { %9294 = vmatmul.msk.f32.gmra.mxu3 %vm5729_vm3, %v15543_v9 }
 0xabd   : > { %v15547_v40 = vpop.f32.mrf.mxu3 }
 0xabe   : > { %17394 = vst [vmem:[#allocation167_spill] sm:$0xff] %v15547_v40 }
 0xabf   : > { %v5989_v23 = vpop.f32.mrf.mxu2 }
 0xac0   : > { %v6000_v54 = vadd.f32 %v5989_v23, %v5918_v30  ;;  %v6030_v23 = vld [vmem:[%s16975_s7 + $0xd8] sm:$0xff]  ;;  %v6032_v30 = vld [vmem:[%s16975_s7 + $0xe8] sm:$0xff] }
 0xac2   : > { %9295 = vmatmul.msk.f32.gmra.mxu3 %vm5729_vm3, %v15552_v49 }
 0xac5   : > { %v15556_v46 = vpop.f32.mrf.mxu3 }
 0xac6   : > { %17395 = vst [vmem:[#allocation168_spill] sm:$0xff] %v15556_v46 }
 0xac7   : > { %v5992_v63 = vpop.f32.mrf.mxu2 }
 0xac8   : > { %v6002_v5 = vadd.f32 %v5992_v63, %v5920_v33 }
 0xaca   : > { %10134 = vtanh.f32 %v6002_v5  ;;  %9296 = vmatmul.msk.f32.gmra.mxu3 %vm5729_vm3, %v15565_v57 }
 0xacb   : > { %10136 = vtanh.f32 %v6000_v54 }
 0xacc   : > { %10138 = vtanh.f32 %v5998_v3 }
 0xacd   : > { %v15573_v25 = vpop.f32.mrf.mxu3  ;;  %10140 = vtanh.f32 %v5996_v42  ;;  %v17409_v42 = vld [vmem:[#allocation36_spill] sm:$0xff] }
 0xace   : > { %17396 = vst [vmem:[#allocation169_spill] sm:$0xff] %v15573_v25  ;;  %10142 = vtanh.f32 %v15194_v21  ;;  %v6027_v21 = vld [vmem:[%s16975_s7 + $0xc0] sm:$0xff] }
 0xacf   : > { %10144 = vtanh.f32 %v15167_v15 }
 0xad0   : > { %v15578_v10 = vpop.eup %10134  ;;  %10146 = vtanh.f32 %v15138_v14  ;;  %v6028_v14 = vld [vmem:[%s16975_s7 + $0xc8] sm:$0xff] }
 0xad1   : > { %17397 = vst [vmem:[#allocation170_spill] sm:$0xff] %v15578_v10  ;;  %6252 = vmatpush.msra.mxu1 %v15578_v10  ;;  %v15581_v48 = vpop.eup %10136  ;;  %10148 = vtanh.f32 %v15109_v26  ;;  %v17416_v10 = vld [vmem:[#allocation31_spill] sm:$0xff] }
 0xad2   : > { %17398 = vst [vmem:[#allocation171_spill] sm:$0xff] %v15581_v48  ;;  %9297 = vmatmul.msk.f32.gmra.mxu3 %vm5729_vm3, %v6026_v36  ;;  %v15586_v5 = vpop.eup %10138 }
 0xad3   : > { %6253 = vmatpush.msra.mxu1 %v15581_v48  ;;  %17399 = vst [vmem:[#allocation172_spill] sm:$0xff] %v15586_v5  ;;  %v15592_v38 = vpop.eup %10140 }
 0xad4   : > { %17401 = vst [vmem:[#allocation174_spill] sm:$0xff] %v15592_v38  ;;  %v10143_v39 = vpop.eup %10142 }
 0xad5   : > { %6254 = vmatpush.msra.mxu1 %v15586_v5  ;;  %v15590_v3 = vpop.f32.mrf.mxu3  ;;  %v10145_v1 = vpop.eup %10144 }
 0xad6   : > { %17400 = vst [vmem:[#allocation173_spill] sm:$0xff] %v15590_v3  ;;  %v10147_v15 = vpop.eup %10146  ;;  %v15715_v5 = vpop.permute.xlu0 %8012  ;;  %v17417_v3 = vld [vmem:[#allocation23_spill] sm:$0xff] }
 0xad7   : > { %6255 = vmatpush.msra.mxu1 %v15592_v38  ;;  %v10149_v54 = vpop.eup %10148 }
 0xad9   : > { %6256 = vmatpush.msra.mxu1 %v10143_v39 }
 0xada   : > { %9298 = vmatmul.msk.f32.gmra.mxu3 %vm5729_vm3, %v6027_v21 }
 0xadb   : > { %6257 = vmatpush.msra.mxu1 %v10145_v1 }
 0xadd   : > { %6258 = vmatpush.msra.mxu1 %v10147_v15  ;;  %v15601_v53 = vpop.f32.mrf.mxu3  ;;  %v17410_v15 = vld [vmem:[#allocation8_spill] sm:$0xff] }
 0xade   : > { %17402 = vst [vmem:[#allocation175_spill] sm:$0xff] %v15601_v53  ;;  %v5231_v53 = vadd.f32 %v17417_v3, %v17416_v10 }
 0xadf   : > { %6259 = vmatpush.msra.mxu1 %v10149_v54 }
 0xae0   : > { %9306 = vmatmul.msk.f32.vlgmr.msra.gmra.mxu1 %vm5729_vm3, %v15503_v29  ;;  %v6031_v29 = vld [vmem:[%s16975_s7 + $0xe0] sm:$0xff] }
 0xae2   : > { %9299 = vmatmul.msk.f32.gmra.mxu3 %vm5729_vm3, %v6028_v14 }
 0xae5   : > { %v15609_v26 = vpop.f32.mrf.mxu3 }
 0xae6   : > { %17403 = vst [vmem:[#allocation176_spill] sm:$0xff] %v15609_v26  ;;  %v17419_v26 = vld [vmem:[#allocation26_spill] sm:$0xff] }
 0xae8   : > { %9307 = vmatmul.msk.f32.gmra.mxu1 %vm5729_vm3, %v15514_v32 }
 0xaea   : > { %9300 = vmatmul.msk.f32.gmra.mxu3 %vm5729_vm3, %v6029_v7 }
 0xaed   : > { %v15617_v63 = vpop.f32.mrf.mxu3 }
 0xaee   : > { %17404 = vst [vmem:[#allocation177_spill] sm:$0xff] %v15617_v63 }
 0xaf0   : > { %9308 = vmatmul.msk.f32.gmra.mxu1 %vm5729_vm3, %v15525_v19  ;;  %v6033_v19 = vld [vmem:[%s16975_s7 + $0xf0] sm:$0xff] }
 0xaf2   : > { %9301 = vmatmul.msk.f32.gmra.mxu3 %vm5729_vm3, %v6030_v23 }
 0xaf5   : > { %v15625_v33 = vpop.f32.mrf.mxu3 }
 0xaf6   : > { %17405 = vst [vmem:[#allocation178_spill] sm:$0xff] %v15625_v33 }
 0xaf8   : > { %9309 = vmatmul.msk.f32.gmra.mxu1 %vm5729_vm3, %v15534_v50  ;;  %v6034_v50 = vld [vmem:[%s16975_s7 + $0xf8] sm:$0xff] }
 0xafa   : > { %9302 = vmatmul.msk.f32.gmra.mxu3 %vm5729_vm3, %v6031_v29 }
 0xafd   : > { %v15636_v32 = vpop.f32.mrf.mxu3 }
 0xafe   : > { %17406 = vst [vmem:[#allocation179_spill] sm:$0xff] %v15636_v32  ;;  %v15708_v32 = vpop.permute.xlu1 %8007 }
 0xaff   : > { %17413 = vst [vmem:[#allocation36_spill] sm:$0xff] %v15708_v32  ;;  %v17418_v32 = vld [vmem:[#allocation34_spill] sm:$0xff] }
 0xb00   : > { %9310 = vmatmul.msk.f32.gmra.mxu1 %vm5729_vm3, %v15543_v9 }
 0xb02   : > { %9303 = vmatmul.msk.f32.gmra.mxu3 %vm5729_vm3, %v6032_v30 }
 0xb05   : > { %v15646_v60 = vpop.f32.mrf.mxu3 }
 0xb06   : > { %17407 = vst [vmem:[#allocation180_spill] sm:$0xff] %v15646_v60  ;;  %v15713_v38 = vpop.permute.xlu1 %6068 }
 0xb08   : > { %9311 = vmatmul.msk.f32.gmra.mxu1 %vm5729_vm3, %v15552_v49 }
 0xb0a   : > { %9304 = vmatmul.msk.f32.gmra.mxu3 %vm5729_vm3, %v6033_v19 }
 0xb0d   : > { %v15655_v11 = vpop.f32.mrf.mxu3 }
 0xb0e   : > { %17408 = vst [vmem:[#allocation181_spill] sm:$0xff] %v15655_v11 }
 0xb10   : > { %9312 = vmatmul.msk.f32.gmra.mxu1 %vm5729_vm3, %v15565_v57  ;;  %v17411_v57 = vld [vmem:[#allocation9_spill] sm:$0xff] }
 0xb11   : > { %17415 = vst [vmem:[#allocation9_spill] sm:$0xff] %v15715_v5  ;;  %v15730_v5 = vpop.permute.xlu1 %6103 }
 0xb12   : > { %9305 = vmatmul.msk.f32.gmra.mxu3 %vm5729_vm3, %v6034_v50 }
 0xb18   : > { %9313 = vmatmul.msk.f32.gmra.mxu1 %vm5729_vm3, %v6026_v36  ;;  %v6393_v36 = vld [vmem:[%s16973_s5 + $0x40] sm:$0xff] }
 0xb1d   : > { %v6196_v9 = vpop.f32.mrf.mxu3 }
 0xb1e   : > { %v6197_v39 = vadd.f32 %v6196_v9, %v17409_v42 }
 0xb20   : > { %9314 = vmatmul.msk.f32.gmra.mxu1 %vm5729_vm3, %v6027_v21  ;;  %v15666_v33 = vadd.f32 %v6197_v39, %v17411_v57  ;;  %v6064_v21 = vpop.permute.xlu2 %6063  ;;  %v15686_v57 = vld [vmem:[%s16973_s5 + $0x50] sm:$0xff] }
 0xb25   : > { %v6199_v49 = vpop.f32.mrf.mxu3 }
 0xb26   : > { %v6200_v1 = vadd.f32 %v6199_v49, %v14761_v13 }
 0xb28   : > { %v15662_v54 = vadd.f32 %v6200_v1, %v17410_v15  ;;  %9315 = vmatmul.msk.f32.gmra.mxu1 %vm5729_vm3, %v6028_v14  ;;  %v17412_v1 = vld [vmem:[#allocation7_spill] sm:$0xff]  ;;  %v15711_v60 = vpop.permute.xlu2 %8002 }
 0xb29   : > { %v6394_v14 = vld [vmem:[%s16973_s5 + $0x48] sm:$0xff]  ;;  %17414 = vst [vmem:[#allocation8_spill] sm:$0xff] %v15711_v60 }
 0xb2a   : > { %6423 = vmatpush.msra.mxu2 %v15662_v54 }
 0xb2c   : > { %6424 = vmatpush.msra.mxu2 %v15666_v33 }
 0xb2d   : > { %v6202_v9 = vpop.f32.mrf.mxu3  ;;  %9326 = vmatmul.msk.f32.vlgmr.msra.gmra.mxu2 %vm737_vm1, %v6393_v36 }
 0xb2e   : > { %v6203_v49 = vadd.f32 %v6202_v9, %v6064_v21 }
 0xb30   : > { %v15675_v15 = vadd.f32 %v6203_v49, %v17412_v1  ;;  %9316 = vmatmul.msk.f32.gmra.mxu1 %vm5729_vm3, %v6029_v7  ;;  %v15696_v7 = vld [vmem:[%s16973_s5 + $0x58] sm:$0xff]  ;;  %v15725_v51 = vpop.permute.xlu2 %6093 }
 0xb35   : > { %v6205_v39 = vpop.f32.mrf.mxu3  ;;  %9327 = vmatmul.msk.f32.gmra.mxu2 %vm737_vm1, %v6394_v14 }
 0xb38   : > { %9317 = vmatmul.msk.f32.gmra.mxu1 %vm5729_vm3, %v6030_v23 }
 0xb3d   : > { %v15688_v9 = vpop.f32.mrf.mxu3  ;;  %9328 = vmatmul.msk.f32.gmra.mxu2 %vm737_vm1, %v15686_v57 }
 0xb40   : > { %9318 = vmatmul.msk.f32.gmra.mxu1 %vm5729_vm3, %v6031_v29 }
 0xb45   : > { %v15698_v49 = vpop.f32.mrf.mxu3  ;;  %9329 = vmatmul.msk.f32.gmra.mxu2 %vm737_vm1, %v15696_v7 }
 0xb48   : > { %9319 = vmatmul.msk.f32.gmra.mxu1 %vm5729_vm3, %v6032_v30 }
 0xb4d   : > { %v15703_v23 = vpop.f32.mrf.mxu3 }
 0xb50   : > { %9320 = vmatmul.msk.f32.gmra.mxu1 %vm5729_vm3, %v6033_v19 }
 0xb55   : > { %v15706_v1 = vpop.f32.mrf.mxu3 }
 0xb58   : > { %9321 = vmatmul.msk.f32.gmra.mxu1 %vm5729_vm3, %v6034_v50  ;;  %v5228_v50 = vadd.f32 %v17419_v26, %v17418_v32 }
 0xb5d   : > { %v6220_v29 = vpop.f32.mrf.mxu3  ;;  %v6261_v11 = vpop.f32.mrf.mxu1 }
 0xb5e   : > { %v6262_v19 = vadd.f32 %v6261_v11, %v17409_v42  ;;  %v17421_v11 = vld [vmem:[#allocation20_spill] sm:$0xff]  ;;  %v6221_v40 = vadd.f32 %v6220_v29, %v15725_v51 }
 0xb60   : > { %v15727_v60 = vadd.f32 %v6262_v19, %v5228_v50  ;;  %v6206_v50 = vadd.f32 %v6205_v39, %v15713_v38 }
 0xb65   : > { %v6223_v48 = vpop.f32.mrf.mxu3  ;;  %v6264_v30 = vpop.f32.mrf.mxu1 }
 0xb66   : > { %v6265_v63 = vadd.f32 %v6264_v30, %v14761_v13  ;;  %v17420_v13 = vld [vmem:[#allocation28_spill] sm:$0xff] }
 0xb67   : > { %v5234_v42 = vadd.f32 %v17421_v11, %v17420_v13  ;;  %v6345_v11 = vsub.f32 %v15666_v33, %v6221_v40 }
 0xb68   : > { %v15723_v24 = vadd.f32 %v6265_v63, %v5231_v53  ;;  %v15737_v63 = vpop.permute.xlu0 %7997 }
 0xb69   : > { %17422 = vst [vmem:[#allocation7_spill] sm:$0xff] %v15737_v63 }
 0xb6a   : > { %6452 = vmatpush.msrb.mxu2 %v15723_v24 }
 0xb6c   : > { %6453 = vmatpush.msrb.mxu2 %v15727_v60 }
 0xb6d   : > { %v6226_v10 = vpop.f32.mrf.mxu3  ;;  %v6267_v3 = vpop.f32.mrf.mxu1  ;;  %9330 = vmatmul.msk.f32.vlgmr.msrb.gmra.mxu2 %vm737_vm1, %v6393_v36 }
 0xb6e   : > { %v6227_v53 = vadd.f32 %v6226_v10, %v15730_v5  ;;  %v6268_v26 = vadd.f32 %v6267_v3, %v6064_v21  ;;  %v15744_v36 = vpop.permute.xlu2 %6108  ;;  %v17423_v21 = vld [vmem:[#allocation11_spill] sm:$0xff] }
 0xb6f   : > { %v6315_v3 = vadd.f32 %v6206_v50, %v17423_v21 }
 0xb70   : > { %v6329_v32 = vsub.f32 %v15675_v15, %v6227_v53  ;;  %v6353_v30 = vsub.f32 0.0, %v6227_v53  ;;  %v15740_v19 = vadd.f32 %v6268_v26, %v5234_v42  ;;  %v15750_v63 = vpop.permute.xlu0 %6098  ;;  %v6325_v29 = vsub.f32 %v6227_v53, %v15675_v15 }
 0xb71   : > { %v9278_v15 = vadd.f32 -1.0, %v15315_v52 }
 0xb72   : > { %v6333_v25 = vmul.f32 1.442695, %v6329_v32  ;;  %v6357_v46 = vmul.f32 1.442695, %v6353_v30  ;;  %v6349_v30 = vmul.f32 %v6345_v11, %v6345_v11 }
 0xb73   : > { %v5905_v11 = vmul.f32 0.5, %v9278_v15 }
 0xb74   : > { %10150 = vpow2.f32 %v6333_v25 }
 0xb75   : > { %10152 = vpow2.f32 %v6357_v46  ;;  %v6229_v13 = vpop.f32.mrf.mxu3  ;;  %v6270_v10 = vpop.f32.mrf.mxu1  ;;  %9331 = vmatmul.msk.f32.gmra.mxu2 %vm737_vm1, %v6394_v14  ;;  %v6224_v46 = vadd.f32 %v6223_v48, %v15750_v63 }
 0xb76   : > { %v6230_v42 = vadd.f32 %v6229_v13, %v15744_v36 }
 0xb77   : > { %v6347_v33 = vsub.f32 %v15662_v54, %v6224_v46  ;;  %v9280_v54 = vadd.f32 -1.0, %v15334_v0 }
 0xb78   : > { %v6331_v26 = vsub.f32 %v6315_v3, %v6230_v42  ;;  %v6355_v39 = vsub.f32 0.0, %v6230_v42  ;;  %v6327_v13 = vsub.f32 %v6230_v42, %v6315_v3 }
 0xb79   : > { %v6351_v21 = vmul.f32 %v6347_v33, %v6347_v33 }
 0xb7a   : > { %v10151_v32 = vpop.eup %10150  ;;  %v6337_v25 = vmul.f32 1.442695, %v6331_v26  ;;  %v6361_v16 = vmul.f32 1.442695, %v6355_v39 }
 0xb7b   : > { %v10153_v18 = vpop.eup %10152  ;;  %v6341_v14 = vadd.f32 %v10151_v32, %v6325_v29 }
 0xb7c   : > { %v6365_v62 = vmul.f32 %v10153_v18, %v6349_v30  ;;  %10154 = vpow2.f32 %v6337_v25  ;;  %v17424_v25 = vld [vmem:[#allocation47_spill] sm:$0xff] }
 0xb7d   : > { %10156 = vpow2.f32 %v6361_v16  ;;  %v15754_v40 = vpop.f32.mrf.mxu1  ;;  %9332 = vmatmul.msk.f32.gmra.mxu2 %vm737_vm1, %v15686_v57  ;;  %v5907_v57 = vmul.f32 0.5, %v9280_v54 }
 0xb7e   : > { %v6369_v53 = vadd.f32 %v6365_v62, %v6341_v14  ;;  %v17425_v14 = vld [vmem:[#allocation38_spill] sm:$0xff] }
 0xb7f   : > { %v5249_v33 = vadd.f32 %v17425_v14, %v17424_v25 }
 0xb80   : > { %v9322_v50 = vadd.f32 -1.0, %v6369_v53 }
 0xb82   : > { %v10155_v48 = vpop.eup %10154  ;;  %v6377_v26 = vmul.f32 0.5, %v9322_v50 }
 0xb83   : > { %v10157_v39 = vpop.eup %10156  ;;  %v6343_v18 = vadd.f32 %v10155_v48, %v6327_v13 }
 0xb84   : > { %v15760_v29 = vadd.f32 %v6377_v26, %v5905_v11  ;;  %v6367_v16 = vmul.f32 %v10157_v39, %v6351_v21 }
 0xb85   : > { %v15762_v32 = vpop.f32.mrf.mxu1  ;;  %9333 = vmatmul.msk.f32.gmra.mxu2 %vm737_vm1, %v15696_v7  ;;  %v6232_v7 = vpop.f32.mrf.mxu3 }
 0xb86   : > { %v6371_v52 = vadd.f32 %v6367_v16, %v6343_v18  ;;  %v6271_v18 = vadd.f32 %v6270_v10, %v15713_v38 }
 0xb88   : > { %v9324_v62 = vadd.f32 -1.0, %v6371_v52 }
 0xb8a   : > { %v6379_v3 = vmul.f32 0.5, %v9324_v62  ;;  %v17426_v62 = vld [vmem:[#allocation25_spill] sm:$0xff] }
 0xb8c   : > { %v15767_v42 = vadd.f32 %v6379_v3, %v5907_v57  ;;  %v17427_v57 = vld [vmem:[#allocation53_spill] sm:$0xff] }
 0xb8d   : > { %v15769_v30 = vpop.f32.mrf.mxu1  ;;  %v6235_v0 = vpop.f32.mrf.mxu3  ;;  %v5237_v3 = vadd.f32 %v17427_v57, %v17426_v62 }
 0xb8f   : > { %v6316_v25 = vadd.f32 %v6271_v18, %v5237_v3 }
 0xb95   : > { %v6282_v46 = vpop.f32.mrf.mxu1  ;;  %v6238_v14 = vpop.f32.mrf.mxu3 }
 0xb96   : > { %v6283_v15 = vadd.f32 %v6282_v46, %v14833_v27 }
 0xb98   : > { %v15774_v53 = vadd.f32 %v6283_v15, %v5249_v33 }
 0xb9d   : > { %v6285_v50 = vpop.f32.mrf.mxu1 }
 0xb9e   : > { %v6286_v16 = vadd.f32 %v6285_v50, %v15725_v51 }
 0xba5   : > { %v6288_v13 = vpop.f32.mrf.mxu1 }
 0xba6   : > { %v6289_v50 = vadd.f32 %v6288_v13, %v15750_v63 }
 0xbad   : > { %v6291_v48 = vpop.f32.mrf.mxu1 }
 0xbae   : > { %v6292_v21 = vadd.f32 %v6291_v48, %v15730_v5  ;;  %v6346_v5 = vsub.f32 %v15727_v60, %v6286_v16  ;;  %v6348_v60 = vsub.f32 %v15723_v24, %v6289_v50  ;;  %v6241_v16 = vpop.f32.mrf.mxu3  ;;  %v9281_v50 = vadd.f32 -1.0, %v15336_v55 }
 0xbb0   : > { %v6330_v11 = vsub.f32 %v15740_v19, %v6292_v21  ;;  %v6354_v26 = vsub.f32 0.0, %v6292_v21  ;;  %v15778_v39 = vpop.f32.mrf.mxu2  ;;  %v6326_v38 = vsub.f32 %v6292_v21, %v15740_v19  ;;  %v6350_v10 = vmul.f32 %v6346_v5, %v6346_v5 }
 0xbb2   : > { %v6335_v54 = vmul.f32 1.442695, %v6330_v11  ;;  %v6359_v52 = vmul.f32 1.442695, %v6354_v26 }
 0xbb4   : > { %10158 = vpow2.f32 %v6335_v54 }
 0xbb5   : > { %10160 = vpow2.f32 %v6359_v52  ;;  %v6294_v46 = vpop.f32.mrf.mxu1 }
 0xbb6   : > { %v6295_v33 = vadd.f32 %v6294_v46, %v15744_v36  ;;  %v9279_v36 = vadd.f32 -1.0, %v15317_v17  ;;  %v6352_v46 = vmul.f32 %v6348_v60, %v6348_v60  ;;  %v6236_v17 = vadd.f32 %v6235_v0, %v14777_v31 }
 0xbb7   : > { %v6218_v0 = vadd.f32 %v15706_v1, %v14833_v27  ;;  %v17432_v27 = vld [vmem:[#allocation80_spill] sm:$0xff] }
 0xbb8   : > { %v6332_v15 = vsub.f32 %v6316_v25, %v6295_v33  ;;  %v6356_v48 = vsub.f32 0.0, %v6295_v33  ;;  %v6429_v6 = vpop.f32.mrf.mxu2  ;;  %v6328_v19 = vsub.f32 %v6295_v33, %v6316_v25  ;;  %v5906_v5 = vmul.f32 0.5, %v9279_v36 }
 0xbb9   : > { %v6233_v25 = vadd.f32 %v6232_v7, %v14805_v22  ;;  %v5908_v36 = vmul.f32 0.5, %v9281_v50 }
 0xbba   : > { %v10159_v51 = vpop.eup %10158  ;;  %v6339_v11 = vmul.f32 1.442695, %v6332_v15  ;;  %v6363_v26 = vmul.f32 1.442695, %v6356_v48  ;;  %v6239_v15 = vadd.f32 %v6238_v14, %v14796_v43  ;;  %v6242_v48 = vadd.f32 %v6241_v16, %v14768_v20 }
 0xbbb   : > { %v10161_v54 = vpop.eup %10160  ;;  %v6342_v52 = vadd.f32 %v10159_v51, %v6326_v38  ;;  %v6387_v14 = vadd.f32 %v6236_v17, %v15338_v2  ;;  %v17429_v2 = vld [vmem:[#allocation74_spill] sm:$0xff] }
 0xbbc   : > { %v6366_v62 = vmul.f32 %v10161_v54, %v6350_v10  ;;  %10162 = vpow2.f32 %v6339_v11  ;;  %v6389_v33 = vadd.f32 %v6239_v15, %v15353_v35  ;;  %v6391_v11 = vadd.f32 %v6242_v48, %v15368_v59  ;;  %v17428_v35 = vld [vmem:[#allocation69_spill] sm:$0xff] }
 0xbbd   : > { %10164 = vpow2.f32 %v6363_v26  ;;  %v6469_v55 = vadd.f32 %v6429_v6, %v6387_v14  ;;  %v6215_v59 = vadd.f32 %v15703_v23, %v17428_v35  ;;  %v17433_v6 = vld [vmem:[#allocation62_spill] sm:$0xff]  ;;  %v6297_v17 = vpop.f32.mrf.mxu1 }
 0xbbe   : > { %v6370_v18 = vadd.f32 %v6366_v62, %v6342_v52  ;;  %v15859_v14 = vld [vmem:[%s16975_s7 + $0x120] sm:$0xff] }
 0xbbf   : > { %v6321_v1 = vadd.f32 %v6215_v59, %v17433_v6 }
 0xbc0   : > { %v9323_v57 = vadd.f32 -1.0, %v6370_v18  ;;  %v6432_v3 = vpop.f32.mrf.mxu2  ;;  %v6385_v18 = vadd.f32 %v6233_v25, %v15319_v56  ;;  %v6209_v56 = vadd.f32 %v15688_v9, %v17432_v27  ;;  %v15845_v25 = vld [vmem:[%s16975_s7 + $0x110] sm:$0xff] }
 0xbc1   : > { %v6471_v52 = vadd.f32 %v6432_v3, %v6389_v33  ;;  %v17430_v3 = vld [vmem:[#allocation61_spill] sm:$0xff] }
 0xbc2   : > { %v10163_v21 = vpop.eup %10162  ;;  %v6378_v63 = vmul.f32 0.5, %v9323_v57  ;;  %v6467_v16 = vadd.f32 %v15778_v39, %v6385_v18  ;;  %v6212_v57 = vadd.f32 %v15698_v49, %v17429_v2  ;;  %v17435_v39 = vld [vmem:[#allocation63_spill] sm:$0xff] }
 0xbc3   : > { %v10165_v13 = vpop.eup %10164  ;;  %v6344_v38 = vadd.f32 %v10163_v21, %v6328_v19  ;;  %v6323_v19 = vadd.f32 %v6218_v0, %v17430_v3  ;;  %v15869_v18 = vld [vmem:[%s16975_s7 + $0x128] sm:$0xff] }
 0xbc4   : > { %v15792_v51 = vadd.f32 %v6378_v63, %v5906_v5  ;;  %v6368_v24 = vmul.f32 %v10165_v13, %v6352_v46  ;;  %v6319_v46 = vadd.f32 %v6212_v57, %v17435_v39  ;;  %v17437_v5 = vld [vmem:[#allocation13_spill] sm:$0xff] }
 0xbc5   : > { %v6317_v63 = vadd.f32 %v6209_v56, %v17437_v5  ;;  %v6300_v50 = vpop.f32.mrf.mxu1  ;;  %v6280_v56 = vadd.f32 %v15769_v30, %v17428_v35  ;;  %v6274_v30 = vadd.f32 %v15754_v40, %v17432_v27  ;;  %v6498_v40 = vld [vmem:[%s16975_s7 + $0x138] sm:$0xff] }
 0xbc6   : > { %v6372_v10 = vadd.f32 %v6368_v24, %v6344_v38  ;;  %v15831_v38 = vld [vmem:[%s16975_s7 + $0x100] sm:$0xff]  ;;  %v6301_v0 = vadd.f32 %v6300_v50, %v14777_v31 }
 0xbc8   : > { %v9325_v26 = vadd.f32 -1.0, %v6372_v10  ;;  %v6435_v54 = vpop.f32.mrf.mxu2  ;;  %v15838_v10 = vld [vmem:[%s16975_s7 + $0x108] sm:$0xff]  ;;  %v6388_v3 = vadd.f32 %v6301_v0, %v15446_v12  ;;  %v17440_v12 = vld [vmem:[#allocation40_spill] sm:$0xff] }
 0xbc9   : > { %v6473_v62 = vadd.f32 %v6435_v54, %v6391_v11 }
 0xbca   : > { %v6380_v60 = vmul.f32 0.5, %v9325_v26  ;;  %v15852_v26 = vld [vmem:[%s16975_s7 + $0x118] sm:$0xff] }
 0xbcb   : > { %10166 = vtanh.f32 %v6473_v62 }
 0xbcc   : > { %v15803_v7 = vadd.f32 %v6380_v60, %v5908_v36  ;;  %10168 = vtanh.f32 %v6471_v52 }
 0xbcd   : > { %10170 = vtanh.f32 %v6469_v55  ;;  %v6303_v11 = vpop.f32.mrf.mxu1  ;;  %v6298_v55 = vadd.f32 %v6297_v17, %v14805_v22 }
 0xbce   : > { %10172 = vtanh.f32 %v6467_v16  ;;  %v6304_v60 = vadd.f32 %v6303_v11, %v14796_v43 }
 0xbcf   : > { %10174 = vtanh.f32 %v6323_v19 }
 0xbd0   : > { %10176 = vtanh.f32 %v6321_v1  ;;  %v6390_v59 = vadd.f32 %v6304_v60, %v15466_v28  ;;  %v6497_v28 = vld [vmem:[%s16975_s7 + $0x130] sm:$0xff]  ;;  %v6277_v1 = vadd.f32 %v15762_v32, %v17429_v2 }
 0xbd1   : > { %v15811_v21 = vpop.eup %10166  ;;  %10178 = vtanh.f32 %v6319_v46  ;;  %v17442_v46 = vld [vmem:[#allocation43_spill] sm:$0xff] }
 0xbd2   : > { %17431 = vst [vmem:[#allocation31_spill] sm:$0xff] %v15811_v21  ;;  %6659 = vmatpush.msra.mxu2 %v15811_v21  ;;  %v15817_v23 = vpop.eup %10168  ;;  %10180 = vtanh.f32 %v6317_v63 }
 0xbd3   : > { %17434 = vst [vmem:[#allocation23_spill] sm:$0xff] %v15817_v23  ;;  %v15821_v49 = vpop.eup %10170 }
 0xbd4   : > { %6660 = vmatpush.msra.mxu2 %v15817_v23  ;;  %17436 = vst [vmem:[#allocation34_spill] sm:$0xff] %v15821_v49  ;;  %v15825_v9 = vpop.eup %10172 }
 0xbd5   : > { %17438 = vst [vmem:[#allocation26_spill] sm:$0xff] %v15825_v9  ;;  %v10175_v13 = vpop.eup %10174  ;;  %v6306_v52 = vpop.f32.mrf.mxu1 }
 0xbd6   : > { %6661 = vmatpush.msra.mxu2 %v15821_v49  ;;  %v10177_v15 = vpop.eup %10176  ;;  %v6307_v36 = vadd.f32 %v6306_v52, %v14768_v20  ;;  %v6386_v20 = vadd.f32 %v6298_v55, %v15434_v8  ;;  %v17441_v8 = vld [vmem:[#allocation19_spill] sm:$0xff]  ;;  %v6501_v52 = vld [vmem:[%s16975_s7 + $0x150] sm:$0xff] }
 0xbd7   : > { %v10179_v48 = vpop.eup %10178  ;;  %v5243_v5 = vadd.f32 %v17442_v46, %v17441_v8 }
 0xbd8   : > { %6662 = vmatpush.msra.mxu2 %v15825_v9  ;;  %v10181_v24 = vpop.eup %10180  ;;  %v6392_v16 = vadd.f32 %v6307_v36, %v15484_v47  ;;  %v17439_v47 = vld [vmem:[#allocation51_spill] sm:$0xff] }
 0xbd9   : > { %v5246_v6 = vadd.f32 %v17440_v12, %v17439_v47  ;;  %v6320_v2 = vadd.f32 %v6277_v1, %v5243_v5  ;;  %v17445_v36 = vld [vmem:[#allocation83_spill] sm:$0xff]  ;;  %v15993_v12 = vpop.permute.xlu2 %6565 }
 0xbda   : > { %6663 = vmatpush.msra.mxu2 %v10175_v13  ;;  %v17443_v13 = vld [vmem:[#allocation22_spill] sm:$0xff] }
 0xbdb   : > { %v6322_v35 = vadd.f32 %v6280_v56, %v5246_v6  ;;  %v6867_v56 = vld [vmem:[%s16973_s5 + $0x70] sm:$0xff] }
 0xbdc   : > { %6664 = vmatpush.msra.mxu2 %v10177_v15  ;;  %v17444_v15 = vld [vmem:[#allocation48_spill] sm:$0xff] }
 0xbdd   : > { %v5240_v32 = vadd.f32 %v17444_v15, %v17443_v13  ;;  %v17449_v13 = vld [vmem:[#allocation39_spill] sm:$0xff]  ;;  %v17450_v15 = vld [vmem:[#allocation66_spill] sm:$0xff] }
 0xbde   : > { %6665 = vmatpush.msra.mxu2 %v10179_v48 }
 0xbe0   : > { %6666 = vmatpush.msra.mxu2 %v10181_v24  ;;  %v6318_v24 = vadd.f32 %v6274_v30, %v5240_v32  ;;  %v5255_v32 = vadd.f32 %v17450_v15, %v17449_v13  ;;  %v17454_v13 = vld [vmem:[#allocation5_spill] sm:$0xff] }
 0xbe1   : > { %9334 = vmatmul.msk.f32.vlgmr.msra.gmra.mxu2 %vm5729_vm3, %v15831_v38  ;;  %v15998_v1 = vpop.permute.xlu2 %6580 }
 0xbe9   : > { %9335 = vmatmul.msk.f32.gmra.mxu2 %vm5729_vm3, %v15838_v10  ;;  %v16003_v5 = vpop.permute.xlu2 %7479 }
 0xbf0   : > { %v6455_v33 = vpop.f32.mrf.mxu2 }
 0xbf1   : > { %9336 = vmatmul.msk.f32.gmra.mxu2 %vm5729_vm3, %v15845_v25  ;;  %v6468_v22 = vadd.f32 %v6455_v33, %v6386_v20  ;;  %v6499_v33 = vld [vmem:[%s16975_s7 + $0x140] sm:$0xff]  ;;  %v6866_v20 = vld [vmem:[%s16973_s5 + $0x68] sm:$0xff] }
 0xbf8   : > { %v6458_v54 = vpop.f32.mrf.mxu2 }
 0xbf9   : > { %9337 = vmatmul.msk.f32.gmra.mxu2 %vm5729_vm3, %v15852_v26  ;;  %v6470_v31 = vadd.f32 %v6458_v54, %v6388_v3  ;;  %v6500_v54 = vld [vmem:[%s16975_s7 + $0x148] sm:$0xff] }
 0xc00   : > { %v6461_v62 = vpop.f32.mrf.mxu2 }
 0xc01   : > { %9338 = vmatmul.msk.f32.gmra.mxu2 %vm5729_vm3, %v15859_v14  ;;  %v6472_v19 = vadd.f32 %v6461_v62, %v6390_v59  ;;  %v17447_v59 = vld [vmem:[#allocation58_spill] sm:$0xff] }
 0xc08   : > { %v6464_v57 = vpop.f32.mrf.mxu2 }
 0xc09   : > { %v6474_v43 = vadd.f32 %v6464_v57, %v6392_v16  ;;  %9339 = vmatmul.msk.f32.gmra.mxu2 %vm5729_vm3, %v15869_v18  ;;  %v17448_v57 = vld [vmem:[#allocation59_spill] sm:$0xff] }
 0xc0b   : > { %10182 = vtanh.f32 %v6474_v43 }
 0xc0c   : > { %10184 = vtanh.f32 %v6472_v19  ;;  %v6865_v19 = vld [vmem:[%s16973_s5 + $0x60] sm:$0xff] }
 0xc0d   : > { %10186 = vtanh.f32 %v6470_v31 }
 0xc0e   : > { %10188 = vtanh.f32 %v6468_v22 }
 0xc0f   : > { %10190 = vtanh.f32 %v15774_v53 }
 0xc10   : > { %10192 = vtanh.f32 %v6322_v35 }
 0xc11   : > { %v15887_v39 = vpop.eup %10182  ;;  %9340 = vmatmul.msk.f32.gmra.mxu2 %vm5729_vm3, %v6497_v28  ;;  %10194 = vtanh.f32 %v6320_v2 }
 0xc12   : > { %6724 = vmatpush.msrb.mxu0 %v15887_v39  ;;  %v15895_v63 = vpop.eup %10184  ;;  %10196 = vtanh.f32 %v6318_v24 }
 0xc13   : > { %v15901_v48 = vpop.eup %10186 }
 0xc14   : > { %6725 = vmatpush.msrb.mxu0 %v15895_v63  ;;  %v15907_v27 = vpop.eup %10188 }
 0xc15   : > { %v10191_v17 = vpop.eup %10190 }
 0xc16   : > { %6726 = vmatpush.msrb.mxu0 %v15901_v48  ;;  %v10193_v53 = vpop.eup %10192 }
 0xc17   : > { %v10195_v50 = vpop.eup %10194 }
 0xc18   : > { %6727 = vmatpush.msrb.mxu0 %v15907_v27  ;;  %v10197_v11 = vpop.eup %10196 }
 0xc19   : > { %9341 = vmatmul.msk.f32.gmra.mxu2 %vm5729_vm3, %v6498_v40 }
 0xc1a   : > { %6728 = vmatpush.msrb.mxu0 %v10191_v17  ;;  %v17452_v17 = vld [vmem:[#allocation52_spill] sm:$0xff] }
 0xc1c   : > { %6729 = vmatpush.msrb.mxu0 %v10193_v53 }
 0xc1e   : > { %6730 = vmatpush.msrb.mxu0 %v10195_v50 }
 0xc20   : > { %6731 = vmatpush.msrb.mxu0 %v10197_v11 }
 0xc21   : > { %9342 = vmatmul.msk.f32.gmra.mxu2 %vm5729_vm3, %v6499_v33  ;;  %9350 = vmatmul.msk.f32.vlgmr.msrb.gmra.mxu0 %vm5729_vm3, %v15831_v38  ;;  %v6502_v38 = vld [vmem:[%s16975_s7 + $0x158] sm:$0xff] }
 0xc29   : > { %9343 = vmatmul.msk.f32.gmra.mxu2 %vm5729_vm3, %v6500_v54  ;;  %9351 = vmatmul.msk.f32.gmra.mxu0 %vm5729_vm3, %v15838_v10  ;;  %v6503_v10 = vld [vmem:[%s16975_s7 + $0x160] sm:$0xff] }
 0xc31   : > { %9344 = vmatmul.msk.f32.gmra.mxu2 %vm5729_vm3, %v6501_v52  ;;  %9352 = vmatmul.msk.f32.gmra.mxu0 %vm5729_vm3, %v15845_v25  ;;  %v6504_v25 = vld [vmem:[%s16975_s7 + $0x168] sm:$0xff] }
 0xc39   : > { %9345 = vmatmul.msk.f32.gmra.mxu2 %vm5729_vm3, %v6502_v38  ;;  %9353 = vmatmul.msk.f32.gmra.mxu0 %vm5729_vm3, %v15852_v26  ;;  %v6505_v26 = vld [vmem:[%s16975_s7 + $0x170] sm:$0xff] }
 0xc41   : > { %9346 = vmatmul.msk.f32.gmra.mxu2 %vm5729_vm3, %v6503_v10  ;;  %9354 = vmatmul.msk.f32.gmra.mxu0 %vm5729_vm3, %v15859_v14  ;;  %v6506_v14 = vld [vmem:[%s16975_s7 + $0x178] sm:$0xff] }
 0xc49   : > { %9347 = vmatmul.msk.f32.gmra.mxu2 %vm5729_vm3, %v6504_v25  ;;  %9355 = vmatmul.msk.f32.gmra.mxu0 %vm5729_vm3, %v15869_v18  ;;  %v17446_v18 = vld [vmem:[#allocation77_spill] sm:$0xff] }
 0xc51   : > { %9348 = vmatmul.msk.f32.gmra.mxu2 %vm5729_vm3, %v6505_v26  ;;  %9356 = vmatmul.msk.f32.gmra.mxu0 %vm5729_vm3, %v6497_v28  ;;  %v15987_v28 = vld [vmem:[%s16973_s5 + $0x78] sm:$0xff] }
 0xc59   : > { %9349 = vmatmul.msk.f32.gmra.mxu2 %vm5729_vm3, %v6506_v14  ;;  %9357 = vmatmul.msk.f32.gmra.mxu0 %vm5729_vm3, %v6498_v40  ;;  %v17451_v40 = vld [vmem:[#allocation32_spill] sm:$0xff] }
 0xc5a   : > { %v5252_v53 = vadd.f32 %v17452_v17, %v17451_v40 }
 0xc61   : > { %9358 = vmatmul.msk.f32.gmra.mxu0 %vm5729_vm3, %v6499_v33  ;;  %v16013_v33 = vpop.permute.xlu0 %6535 }
 0xc64   : > { %v6668_v62 = vpop.f32.mrf.mxu2 }
 0xc65   : > { %v6669_v0 = vadd.f32 %v6668_v62, %v17445_v36 }
 0xc67   : > { %v6781_v3 = vadd.f32 %v6669_v0, %v17448_v57 }
 0xc69   : > { %9359 = vmatmul.msk.f32.gmra.mxu0 %vm5729_vm3, %v6500_v54  ;;  %v16018_v54 = vpop.permute.xlu2 %7519 }
 0xc6c   : > { %v6671_v60 = vpop.f32.mrf.mxu2 }
 0xc6d   : > { %v6672_v55 = vadd.f32 %v6671_v60, %v17446_v18 }
 0xc6f   : > { %v15962_v16 = vadd.f32 %v6672_v55, %v17447_v59  ;;  %v6541_v59 = vpop.permute.xlu1 %6540 }
 0xc71   : > { %9360 = vmatmul.msk.f32.gmra.mxu0 %vm5729_vm3, %v6501_v52  ;;  %6895 = vmatpush.msra.mxu3 %v15962_v16 }
 0xc73   : > { %6896 = vmatpush.msra.mxu3 %v6781_v3 }
 0xc74   : > { %v6674_v43 = vpop.f32.mrf.mxu2  ;;  %9370 = vmatmul.msk.f32.vlgmr.msra.gmra.mxu3 %vm737_vm1, %v6865_v19 }
 0xc79   : > { %9361 = vmatmul.msk.f32.gmra.mxu0 %vm5729_vm3, %v6502_v38 }
 0xc7c   : > { %v6677_v31 = vpop.f32.mrf.mxu2  ;;  %9371 = vmatmul.msk.f32.gmra.mxu3 %vm737_vm1, %v6866_v20 }
 0xc7d   : > { %v6678_v57 = vadd.f32 %v6677_v31, %v6541_v59 }
 0xc7f   : > { %v6787_v15 = vadd.f32 %v6678_v57, %v17454_v13 }
 0xc81   : > { %9362 = vmatmul.msk.f32.gmra.mxu0 %vm5729_vm3, %v6503_v10  ;;  %v6675_v10 = vadd.f32 %v6674_v43, %v16013_v33 }
 0xc84   : > { %v15980_v22 = vpop.f32.mrf.mxu2  ;;  %9372 = vmatmul.msk.f32.gmra.mxu3 %vm737_vm1, %v6867_v56 }
 0xc89   : > { %9363 = vmatmul.msk.f32.gmra.mxu0 %vm5729_vm3, %v6504_v25  ;;  %v6576_v25 = vpop.permute.xlu0 %6575 }
 0xc8c   : > { %v15989_v47 = vpop.f32.mrf.mxu2  ;;  %9373 = vmatmul.msk.f32.gmra.mxu3 %vm737_vm1, %v15987_v28 }
 0xc91   : > { %9364 = vmatmul.msk.f32.gmra.mxu0 %vm5729_vm3, %v6505_v26 }
 0xc94   : > { %v15996_v6 = vpop.f32.mrf.mxu2 }
 0xc99   : > { %9365 = vmatmul.msk.f32.gmra.mxu0 %vm5729_vm3, %v6506_v14  ;;  %v17453_v14 = vld [vmem:[#allocation57_spill] sm:$0xff] }
 0xc9a   : > { %v6785_v62 = vadd.f32 %v6675_v10, %v17453_v14 }
 0xc9c   : > { %v16001_v8 = vpop.f32.mrf.mxu2 }
 0xc9e   : > { %v6733_v46 = vpop.f32.mrf.mxu0 }
 0xc9f   : > { %v6734_v2 = vadd.f32 %v6733_v46, %v17445_v36  ;;  %v16024_v36 = vpop.permute.xlu2 %7956 }
 0xca1   : > { %v16015_v11 = vadd.f32 %v6734_v2, %v5252_v53 }
 0xca4   : > { %v6692_v30 = vpop.f32.mrf.mxu2 }
 0xca5   : > { %v6693_v46 = vadd.f32 %v6692_v30, %v15993_v12 }
 0xca6   : > { %v6736_v35 = vpop.f32.mrf.mxu0 }
 0xca7   : > { %v6737_v24 = vadd.f32 %v6736_v35, %v17446_v18  ;;  %v6571_v17 = vpop.permute.xlu2 %6570 }
 0xca9   : > { %v16011_v50 = vadd.f32 %v6737_v24, %v5255_v32  ;;  %v6817_v32 = vsub.f32 %v6781_v3, %v6693_v46 }
 0xcab   : > { %6924 = vmatpush.msrb.mxu1 %v16011_v50  ;;  %v6821_v30 = vmul.f32 %v6817_v32, %v6817_v32 }
 0xcac   : > { %v6695_v52 = vpop.f32.mrf.mxu2 }
 0xcad   : > { %6925 = vmatpush.msrb.mxu1 %v16015_v11  ;;  %v6696_v10 = vadd.f32 %v6695_v52, %v6571_v17 }
 0xcae   : > { %v6739_v38 = vpop.f32.mrf.mxu0  ;;  %9374 = vmatmul.msk.f32.vlgmr.msrb.gmra.mxu1 %vm737_vm1, %v6865_v19 }
 0xcaf   : > { %v6819_v3 = vsub.f32 %v15962_v16, %v6696_v10 }
 0xcb4   : > { %v6698_v26 = vpop.f32.mrf.mxu2 }
 0xcb5   : > { %v6699_v60 = vadd.f32 %v6698_v26, %v6576_v25 }
 0xcb6   : > { %v6742_v0 = vpop.f32.mrf.mxu0  ;;  %9375 = vmatmul.msk.f32.gmra.mxu1 %vm737_vm1, %v6866_v20 }
 0xcb7   : > { %v6801_v18 = vsub.f32 %v6785_v62, %v6699_v60  ;;  %v6825_v55 = vsub.f32 0.0, %v6699_v60  ;;  %v6797_v31 = vsub.f32 %v6699_v60, %v6785_v62 }
 0xcb9   : > { %v6805_v35 = vmul.f32 1.442695, %v6801_v18  ;;  %v6829_v19 = vmul.f32 1.442695, %v6825_v55 }
 0xcbb   : > { %10198 = vpow2.f32 %v6805_v35 }
 0xcbc   : > { %10200 = vpow2.f32 %v6829_v19  ;;  %v6701_v43 = vpop.f32.mrf.mxu2  ;;  %v6823_v19 = vmul.f32 %v6819_v3, %v6819_v3 }
 0xcbd   : > { %v6702_v2 = vadd.f32 %v6701_v43, %v15998_v1 }
 0xcbe   : > { %v16030_v24 = vpop.f32.mrf.mxu0  ;;  %9376 = vmatmul.msk.f32.gmra.mxu1 %vm737_vm1, %v6867_v56 }
 0xcbf   : > { %v6803_v20 = vsub.f32 %v6787_v15, %v6702_v2  ;;  %v6827_v40 = vsub.f32 0.0, %v6702_v2  ;;  %v6799_v62 = vsub.f32 %v6702_v2, %v6787_v15 }
 0xcc1   : > { %v10199_v53 = vpop.eup %10198  ;;  %v6809_v26 = vmul.f32 1.442695, %v6803_v20  ;;  %v6833_v14 = vmul.f32 1.442695, %v6827_v40 }
 0xcc2   : > { %v10201_v18 = vpop.eup %10200  ;;  %v6813_v55 = vadd.f32 %v10199_v53, %v6797_v31 }
 0xcc3   : > { %v6837_v35 = vmul.f32 %v10201_v18, %v6821_v30  ;;  %10202 = vpow2.f32 %v6809_v26  ;;  %v6740_v26 = vadd.f32 %v6739_v38, %v16013_v33  ;;  %v17456_v18 = vld [vmem:[#allocation71_spill] sm:$0xff] }
 0xcc4   : > { %10204 = vpow2.f32 %v6833_v14  ;;  %v6704_v10 = vpop.f32.mrf.mxu2  ;;  %v17455_v14 = vld [vmem:[#allocation37_spill] sm:$0xff] }
 0xcc5   : > { %v6841_v57 = vadd.f32 %v6837_v35, %v6813_v55 }
 0xcc6   : > { %v16034_v46 = vpop.f32.mrf.mxu0  ;;  %9377 = vmatmul.msk.f32.gmra.mxu1 %vm737_vm1, %v15987_v28 }
 0xcc7   : > { %v9366_v56 = vadd.f32 -1.0, %v6841_v57 }
 0xcc9   : > { %v10203_v60 = vpop.eup %10202  ;;  %v6849_v52 = vmul.f32 0.5, %v9366_v56 }
 0xcca   : > { %v10205_v43 = vpop.eup %10204  ;;  %v6815_v13 = vadd.f32 %v10203_v60, %v6799_v62  ;;  %v6743_v62 = vadd.f32 %v6742_v0, %v6541_v59 }
 0xccb   : > { %v16039_v32 = vadd.f32 %v6849_v52, %v15760_v29  ;;  %v6839_v20 = vmul.f32 %v10205_v43, %v6823_v19  ;;  %v5258_v29 = vadd.f32 %v17456_v18, %v17455_v14  ;;  %v17457_v43 = vld [vmem:[#allocation56_spill] sm:$0xff] }
 0xccc   : > { %v6707_v60 = vpop.f32.mrf.mxu2 }
 0xccd   : > { %v6843_v40 = vadd.f32 %v6839_v20, %v6815_v13  ;;  %v6786_v35 = vadd.f32 %v6740_v26, %v5258_v29  ;;  %v17458_v13 = vld [vmem:[#allocation76_spill] sm:$0xff] }
 0xcce   : > { %v16041_v31 = vpop.f32.mrf.mxu0  ;;  %v5261_v20 = vadd.f32 %v17458_v13, %v17457_v43 }
 0xccf   : > { %v9368_v16 = vadd.f32 -1.0, %v6843_v40 }
 0xcd0   : > { %v6788_v38 = vadd.f32 %v6743_v62, %v5261_v20 }
 0xcd1   : > { %v6851_v53 = vmul.f32 0.5, %v9368_v16 }
 0xcd3   : > { %v16044_v30 = vadd.f32 %v6851_v53, %v15767_v42 }
 0xcd6   : > { %v16046_v28 = vpop.f32.mrf.mxu0 }
 0xcde   : > { %v6757_v15 = vpop.f32.mrf.mxu0 }
 0xcdf   : > { %v6758_v42 = vadd.f32 %v6757_v15, %v15993_v12 }
 0xce1   : > { %v6818_v40 = vsub.f32 %v16015_v11, %v6758_v42 }
 0xce3   : > { %v6822_v14 = vmul.f32 %v6818_v40, %v6818_v40 }
 0xce6   : > { %v6760_v2 = vpop.f32.mrf.mxu0 }
 0xce7   : > { %v6761_v12 = vadd.f32 %v6760_v2, %v6571_v17 }
 0xce9   : > { %v6820_v62 = vsub.f32 %v16011_v50, %v6761_v12  ;;  %v17460_v50 = vld [vmem:[#allocation88_spill] sm:$0xff]  ;;  %v17461_v12 = vld [vmem:[#allocation89_spill] sm:$0xff] }
 0xceb   : > { %v6824_v43 = vmul.f32 %v6820_v62, %v6820_v62 }
 0xcee   : > { %v6763_v55 = vpop.f32.mrf.mxu0 }
 0xcef   : > { %v6764_v3 = vadd.f32 %v6763_v55, %v6576_v25 }
 0xcf1   : > { %v6802_v57 = vsub.f32 %v6786_v35, %v6764_v3  ;;  %v6826_v56 = vsub.f32 0.0, %v6764_v3  ;;  %v6798_v0 = vsub.f32 %v6764_v3, %v6786_v35 }
 0xcf3   : > { %v6807_v19 = vmul.f32 1.442695, %v6802_v57  ;;  %v6831_v52 = vmul.f32 1.442695, %v6826_v56  ;;  %v6710_v57 = vpop.f32.mrf.mxu2 }
 0xcf5   : > { %10206 = vpow2.f32 %v6807_v19 }
 0xcf6   : > { %10208 = vpow2.f32 %v6831_v52  ;;  %v6766_v33 = vpop.f32.mrf.mxu0 }
 0xcf7   : > { %v6767_v16 = vadd.f32 %v6766_v33, %v15998_v1  ;;  %v6898_v25 = vpop.f32.mrf.mxu3 }
 0xcf9   : > { %v6804_v53 = vsub.f32 %v6788_v38, %v6767_v16  ;;  %v6828_v26 = vsub.f32 0.0, %v6767_v16  ;;  %v6800_v19 = vsub.f32 %v6767_v16, %v6788_v38  ;;  %v6708_v38 = vadd.f32 %v6707_v60, %v17461_v12 }
 0xcfb   : > { %v10207_v59 = vpop.eup %10206  ;;  %v6811_v15 = vmul.f32 1.442695, %v6804_v53  ;;  %v6835_v18 = vmul.f32 1.442695, %v6828_v26  ;;  %v6713_v20 = vpop.f32.mrf.mxu2  ;;  %v17459_v26 = vld [vmem:[#allocation84_spill] sm:$0xff] }
 0xcfc   : > { %v10209_v29 = vpop.eup %10208  ;;  %v6814_v55 = vadd.f32 %v10207_v59, %v6798_v0  ;;  %v6711_v0 = vadd.f32 %v6710_v57, %v17459_v26  ;;  %v6714_v59 = vadd.f32 %v6713_v20, %v17460_v50  ;;  %v17463_v57 = vld [vmem:[#allocation91_spill] sm:$0xff] }
 0xcfd   : > { %v6838_v56 = vmul.f32 %v10209_v29, %v6822_v14  ;;  %10210 = vpow2.f32 %v6811_v15  ;;  %v17462_v15 = vld [vmem:[#allocation94_spill] sm:$0xff] }
 0xcfe   : > { %10212 = vpow2.f32 %v6835_v18  ;;  %v6705_v18 = vadd.f32 %v6704_v10, %v17462_v15  ;;  %v6863_v29 = vadd.f32 %v6714_v59, %v15402_v37  ;;  %v16098_v59 = vld [vmem:[%s16975_s7 + $0x180] sm:$0xff] }
 0xcff   : > { %v6842_v11 = vadd.f32 %v6838_v56, %v6814_v55  ;;  %v6901_v42 = vpop.f32.mrf.mxu3  ;;  %v6859_v56 = vadd.f32 %v6708_v38, %v15386_v4 }
 0xd01   : > { %v9367_v1 = vadd.f32 -1.0, %v6842_v11  ;;  %v6941_v60 = vadd.f32 %v6901_v42, %v6859_v56  ;;  %v16112_v56 = vld [vmem:[%s16975_s7 + $0x190] sm:$0xff] }
 0xd03   : > { %v10211_v52 = vpop.eup %10210  ;;  %v6850_v35 = vmul.f32 0.5, %v9367_v1  ;;  %v6690_v1 = vadd.f32 %v16001_v8, %v17463_v57 }
 0xd04   : > { %v10213_v3 = vpop.eup %10212  ;;  %v6816_v13 = vadd.f32 %v10211_v52, %v6800_v19  ;;  %v6857_v19 = vadd.f32 %v6705_v18, %v15378_v44 }
 0xd05   : > { %v16058_v17 = vadd.f32 %v6850_v35, %v15792_v51  ;;  %v6840_v2 = vmul.f32 %v10213_v3, %v6824_v43  ;;  %v6861_v51 = vadd.f32 %v6711_v0, %v15394_v58  ;;  %v17465_v58 = vld [vmem:[#allocation101_spill] sm:$0xff]  ;;  %v17466_v43 = vld [vmem:[#allocation27_spill] sm:$0xff] }
 0xd06   : > { %v6939_v10 = vadd.f32 %v6898_v25, %v6857_v19  ;;  %v6684_v37 = vadd.f32 %v15989_v47, %v17465_v58  ;;  %v6795_v35 = vadd.f32 %v6690_v1, %v17466_v43  ;;  %v17467_v3 = vld [vmem:[#allocation97_spill] sm:$0xff] }
 0xd07   : > { %v6844_v33 = vadd.f32 %v6840_v2, %v6816_v13  ;;  %v6904_v40 = vpop.f32.mrf.mxu3  ;;  %v6681_v8 = vadd.f32 %v15980_v22, %v17467_v3  ;;  %v17468_v13 = vld [vmem:[#allocation30_spill] sm:$0xff]  ;;  %v17471_v2 = vld [vmem:[#allocation35_spill] sm:$0xff]  ;;  %v16119_v1 = vld [vmem:[%s16975_s7 + $0x198] sm:$0xff] }
 0xd08   : > { %v6943_v62 = vadd.f32 %v6904_v40, %v6861_v51  ;;  %v16105_v51 = vld [vmem:[%s16975_s7 + $0x188] sm:$0xff] }
 0xd09   : > { %v9369_v53 = vadd.f32 -1.0, %v6844_v33  ;;  %v6789_v20 = vadd.f32 %v6681_v8, %v17471_v2  ;;  %v6769_v33 = vpop.f32.mrf.mxu0  ;;  %v17475_v2 = vld [vmem:[#allocation79_spill] sm:$0xff] }
 0xd0b   : > { %v6852_v14 = vmul.f32 0.5, %v9369_v53 }
 0xd0d   : > { %v16064_v16 = vadd.f32 %v6852_v14, %v15803_v7  ;;  %v17464_v7 = vld [vmem:[#allocation96_spill] sm:$0xff] }
 0xd0e   : > { %v6687_v52 = vadd.f32 %v15996_v6, %v17464_v7  ;;  %v17469_v6 = vld [vmem:[#allocation33_spill] sm:$0xff] }
 0xd0f   : > { %v6907_v55 = vpop.f32.mrf.mxu3  ;;  %v6791_v25 = vadd.f32 %v6684_v37, %v17469_v6 }
 0xd10   : > { %v6945_v11 = vadd.f32 %v6907_v55, %v6863_v29  ;;  %v6793_v44 = vadd.f32 %v6687_v52, %v17468_v13 }
 0xd11   : > { %v6772_v38 = vpop.f32.mrf.mxu0 }
 0xd12   : > { %10214 = vtanh.f32 %v6945_v11  ;;  %v6773_v52 = vadd.f32 %v6772_v38, %v17461_v12 }
 0xd13   : > { %10216 = vtanh.f32 %v6943_v62 }
 0xd14   : > { %10218 = vtanh.f32 %v6941_v60  ;;  %v6860_v8 = vadd.f32 %v6773_v52, %v15507_v41 }
 0xd15   : > { %10220 = vtanh.f32 %v6939_v10  ;;  %v6770_v10 = vadd.f32 %v6769_v33, %v17462_v15  ;;  %v17473_v15 = vld [vmem:[#allocation85_spill] sm:$0xff] }
 0xd16   : > { %10222 = vtanh.f32 %v6795_v35 }
 0xd17   : > { %10224 = vtanh.f32 %v6793_v44  ;;  %v6858_v12 = vadd.f32 %v6770_v10, %v15496_v61  ;;  %v6970_v10 = vld [vmem:[%s16975_s7 + $0x1b8] sm:$0xff] }
 0xd18   : > { %v16078_v4 = vpop.eup %10214  ;;  %10226 = vtanh.f32 %v6791_v25 }
 0xd19   : > { %7131 = vmatpush.msrb.mxu3 %v16078_v4  ;;  %v16084_v42 = vpop.eup %10216  ;;  %10228 = vtanh.f32 %v6789_v20  ;;  %v6775_v29 = vpop.f32.mrf.mxu0  ;;  %v17476_v20 = vld [vmem:[#allocation93_spill] sm:$0xff] }
 0xd1a   : > { %v16088_v47 = vpop.eup %10218  ;;  %v6776_v19 = vadd.f32 %v6775_v29, %v17459_v26  ;;  %v6967_v26 = vld [vmem:[%s16975_s7 + $0x1a0] sm:$0xff]  ;;  %v5270_v33 = vadd.f32 %v17476_v20, %v17475_v2  ;;  %v7338_v20 = vld [vmem:[%s16973_s5 + $0x88] sm:$0xff] }
 0xd1b   : > { %7132 = vmatpush.msrb.mxu3 %v16084_v42  ;;  %17470 = vst [vmem:[#allocation28_spill] sm:$0xff] %v16088_v47  ;;  %v16092_v22 = vpop.eup %10220 }
 0xd1c   : > { %17472 = vst [vmem:[#allocation20_spill] sm:$0xff] %v16092_v22  ;;  %v10223_v40 = vpop.eup %10222  ;;  %v6862_v37 = vadd.f32 %v6776_v19, %v15518_v45  ;;  %v17474_v45 = vld [vmem:[#allocation99_spill] sm:$0xff] }
 0xd1d   : > { %7133 = vmatpush.msrb.mxu3 %v16088_v47  ;;  %v10225_v53 = vpop.eup %10224  ;;  %v5273_v25 = vadd.f32 %v17474_v45, %v17473_v15  ;;  %v17483_v15 = vld [vmem:[#allocation21_spill] sm:$0xff] }
 0xd1e   : > { %v10227_v0 = vpop.eup %10226 }
 0xd1f   : > { %7134 = vmatpush.msrb.mxu3 %v16092_v22  ;;  %v10229_v14 = vpop.eup %10228 }
 0xd21   : > { %7135 = vmatpush.msrb.mxu3 %v10223_v40  ;;  %v6778_v62 = vpop.f32.mrf.mxu0  ;;  %v17477_v40 = vld [vmem:[#allocation73_spill] sm:$0xff] }
 0xd22   : > { %v6779_v60 = vadd.f32 %v6778_v62, %v17460_v50  ;;  %v6755_v50 = vadd.f32 %v16046_v28, %v17463_v57  ;;  %v6749_v28 = vadd.f32 %v16034_v46, %v17465_v58  ;;  %v17479_v46 = vld [vmem:[#allocation68_spill] sm:$0xff]  ;;  %v17480_v58 = vld [vmem:[#allocation82_spill] sm:$0xff] }
 0xd23   : > { %7136 = vmatpush.msrb.mxu3 %v10225_v53  ;;  %v17478_v53 = vld [vmem:[#allocation87_spill] sm:$0xff] }
 0xd24   : > { %v6864_v43 = vadd.f32 %v6779_v60, %v15529_v34  ;;  %v6752_v34 = vadd.f32 %v16041_v31, %v17464_v7  ;;  %v6796_v57 = vadd.f32 %v6755_v50, %v5273_v25  ;;  %v6746_v31 = vadd.f32 %v16030_v24, %v17467_v3  ;;  %v17484_v25 = vld [vmem:[#allocation24_spill] sm:$0xff] }
 0xd25   : > { %7137 = vmatpush.msrb.mxu3 %v10227_v0  ;;  %v5267_v0 = vadd.f32 %v17478_v53, %v17477_v40  ;;  %v7340_v40 = vld [vmem:[%s16973_s5 + $0x98] sm:$0xff] }
 0xd26   : > { %v6794_v7 = vadd.f32 %v6752_v34, %v5270_v33 }
 0xd27   : > { %7138 = vmatpush.msrb.mxu3 %v10229_v14  ;;  %v6968_v14 = vld [vmem:[%s16975_s7 + $0x1a8] sm:$0xff]  ;;  %v6792_v29 = vadd.f32 %v6749_v28, %v5267_v0  ;;  %v7339_v28 = vld [vmem:[%s16973_s5 + $0x90] sm:$0xff]  ;;  %v16257_v0 = vpop.permute.xlu1 %7007 }
 0xd28   : > { %9378 = vmatmul.msk.f32.vlgmr.msrb.gmra.mxu3 %vm5729_vm3, %v16098_v59 }
 0xd2b   : > { %v6927_v18 = vpop.f32.mrf.mxu1 }
 0xd2c   : > { %v6940_v41 = vadd.f32 %v6927_v18, %v6858_v12  ;;  %v5264_v18 = vadd.f32 %v17480_v58, %v17479_v46  ;;  %v17482_v12 = vld [vmem:[#allocation102_spill] sm:$0xff] }
 0xd2e   : > { %v6790_v24 = vadd.f32 %v6746_v31, %v5264_v18  ;;  %v16259_v31 = vpop.permute.xlu0 %7012 }
 0xd2f   : > { %v16263_v46 = vpop.permute.xlu1 %7047 }
 0xd30   : > { %9379 = vmatmul.msk.f32.gmra.mxu3 %vm5729_vm3, %v16105_v51 }
 0xd33   : > { %v6930_v55 = vpop.f32.mrf.mxu1 }
 0xd34   : > { %v6942_v6 = vadd.f32 %v6930_v55, %v6860_v8  ;;  %v6978_v8 = vld [vmem:[%s16975_s7 + $0x1f8] sm:$0xff] }
 0xd36   : > { %v16265_v58 = vpop.permute.xlu0 %7052 }
 0xd38   : > { %9380 = vmatmul.msk.f32.gmra.mxu3 %vm5729_vm3, %v16112_v56 }
 0xd3b   : > { %v6933_v11 = vpop.f32.mrf.mxu1 }
 0xd3c   : > { %v6944_v13 = vadd.f32 %v6933_v11, %v6862_v37  ;;  %v6969_v11 = vld [vmem:[%s16975_s7 + $0x1b0] sm:$0xff]  ;;  %v6971_v37 = vld [vmem:[%s16975_s7 + $0x1c0] sm:$0xff] }
 0xd40   : > { %9381 = vmatmul.msk.f32.gmra.mxu3 %vm5729_vm3, %v16119_v1 }
 0xd43   : > { %v6936_v35 = vpop.f32.mrf.mxu1 }
 0xd44   : > { %v6946_v44 = vadd.f32 %v6936_v35, %v6864_v43  ;;  %v6976_v43 = vld [vmem:[%s16975_s7 + $0x1e8] sm:$0xff]  ;;  %v6977_v35 = vld [vmem:[%s16975_s7 + $0x1f0] sm:$0xff] }
 0xd46   : > { %10230 = vtanh.f32 %v6946_v44 }
 0xd47   : > { %10232 = vtanh.f32 %v6944_v13 }
 0xd48   : > { %9382 = vmatmul.msk.f32.gmra.mxu3 %vm5729_vm3, %v6967_v26  ;;  %10234 = vtanh.f32 %v6942_v6 }
 0xd49   : > { %10236 = vtanh.f32 %v6940_v41  ;;  %v7337_v41 = vld [vmem:[%s16973_s5 + $0x80] sm:$0xff] }
 0xd4a   : > { %10238 = vtanh.f32 %v6796_v57 }
 0xd4b   : > { %10240 = vtanh.f32 %v6794_v7 }
 0xd4c   : > { %v16145_v61 = vpop.eup %10230  ;;  %10242 = vtanh.f32 %v6792_v29  ;;  %v17485_v29 = vld [vmem:[#allocation95_spill] sm:$0xff] }
 0xd4d   : > { %7196 = vmatpush.msra.mxu1 %v16145_v61  ;;  %v16155_v38 = vpop.eup %10232  ;;  %10244 = vtanh.f32 %v6790_v24  ;;  %v17486_v24 = vld [vmem:[#allocation109_spill] sm:$0xff] }
 0xd4e   : > { %v16160_v55 = vpop.eup %10234 }
 0xd4f   : > { %7197 = vmatpush.msra.mxu1 %v16155_v38  ;;  %v16164_v3 = vpop.eup %10236 }
 0xd50   : > { %9383 = vmatmul.msk.f32.gmra.mxu3 %vm5729_vm3, %v6968_v14  ;;  %v10239_v62 = vpop.eup %10238 }
 0xd51   : > { %7198 = vmatpush.msra.mxu1 %v16160_v55  ;;  %v10241_v19 = vpop.eup %10240 }
 0xd52   : > { %v10243_v60 = vpop.eup %10242 }
 0xd53   : > { %7199 = vmatpush.msra.mxu1 %v16164_v3  ;;  %v10245_v52 = vpop.eup %10244 }
 0xd55   : > { %7200 = vmatpush.msra.mxu1 %v10239_v62  ;;  %v5279_v62 = vadd.f32 %v17486_v24, %v17485_v29 }
 0xd57   : > { %7201 = vmatpush.msra.mxu1 %v10241_v19 }
 0xd58   : > { %9384 = vmatmul.msk.f32.gmra.mxu3 %vm5729_vm3, %v6969_v11 }
 0xd59   : > { %7202 = vmatpush.msra.mxu1 %v10243_v60 }
 0xd5b   : > { %7203 = vmatpush.msra.mxu1 %v10245_v52  ;;  %v17487_v52 = vld [vmem:[#allocation90_spill] sm:$0xff] }
 0xd5c   : > { %9394 = vmatmul.msk.f32.vlgmr.msra.gmra.mxu1 %vm5729_vm3, %v16098_v59  ;;  %v6972_v59 = vld [vmem:[%s16975_s7 + $0x1c8] sm:$0xff] }
 0xd60   : > { %9385 = vmatmul.msk.f32.gmra.mxu3 %vm5729_vm3, %v6970_v10 }
 0xd64   : > { %9395 = vmatmul.msk.f32.gmra.mxu1 %vm5729_vm3, %v16105_v51  ;;  %v6973_v51 = vld [vmem:[%s16975_s7 + $0x1d0] sm:$0xff] }
 0xd68   : > { %9386 = vmatmul.msk.f32.gmra.mxu3 %vm5729_vm3, %v6971_v37 }
 0xd6c   : > { %9396 = vmatmul.msk.f32.gmra.mxu1 %vm5729_vm3, %v16112_v56  ;;  %v6974_v56 = vld [vmem:[%s16975_s7 + $0x1d8] sm:$0xff] }
 0xd70   : > { %9387 = vmatmul.msk.f32.gmra.mxu3 %vm5729_vm3, %v6972_v59 }
 0xd74   : > { %9397 = vmatmul.msk.f32.gmra.mxu1 %vm5729_vm3, %v16119_v1  ;;  %v6975_v1 = vld [vmem:[%s16975_s7 + $0x1e0] sm:$0xff] }
 0xd78   : > { %9388 = vmatmul.msk.f32.gmra.mxu3 %vm5729_vm3, %v6973_v51 }
 0xd7c   : > { %9398 = vmatmul.msk.f32.gmra.mxu1 %vm5729_vm3, %v6967_v26  ;;  %v17481_v26 = vld [vmem:[#allocation108_spill] sm:$0xff] }
 0xd80   : > { %9389 = vmatmul.msk.f32.gmra.mxu3 %vm5729_vm3, %v6974_v56 }
 0xd84   : > { %9399 = vmatmul.msk.f32.gmra.mxu1 %vm5729_vm3, %v6968_v14 }
 0xd88   : > { %9390 = vmatmul.msk.f32.gmra.mxu3 %vm5729_vm3, %v6975_v1 }
 0xd8c   : > { %9400 = vmatmul.msk.f32.gmra.mxu1 %vm5729_vm3, %v6969_v11 }
 0xd90   : > { %9391 = vmatmul.msk.f32.gmra.mxu3 %vm5729_vm3, %v6976_v43 }
 0xd94   : > { %9401 = vmatmul.msk.f32.gmra.mxu1 %vm5729_vm3, %v6970_v10  ;;  %v17488_v10 = vld [vmem:[#allocation104_spill] sm:$0xff] }
 0xd98   : > { %9392 = vmatmul.msk.f32.gmra.mxu3 %vm5729_vm3, %v6977_v35 }
 0xd9c   : > { %9402 = vmatmul.msk.f32.gmra.mxu1 %vm5729_vm3, %v6971_v37  ;;  %v5276_v37 = vadd.f32 %v17488_v10, %v17487_v52  ;;  %v17492_v52 = vld [vmem:[#allocation49_spill] sm:$0xff] }
 0xda0   : > { %9393 = vmatmul.msk.f32.gmra.mxu3 %vm5729_vm3, %v6978_v8 }
 0xda4   : > { %9403 = vmatmul.msk.f32.gmra.mxu1 %vm5729_vm3, %v6972_v59 }
 0xdab   : > { %v7140_v13 = vpop.f32.mrf.mxu3 }
 0xdac   : > { %9404 = vmatmul.msk.f32.gmra.mxu1 %vm5729_vm3, %v6973_v51  ;;  %v7141_v50 = vadd.f32 %v7140_v13, %v17481_v26 }
 0xdae   : > { %v16229_v34 = vadd.f32 %v7141_v50, %v17484_v25 }
 0xdb3   : > { %v7143_v44 = vpop.f32.mrf.mxu3 }
 0xdb4   : > { %v7144_v6 = vadd.f32 %v7143_v44, %v17482_v12  ;;  %9405 = vmatmul.msk.f32.gmra.mxu1 %vm5729_vm3, %v6974_v56  ;;  %v16281_v56 = vpop.permute.xlu1 %7484 }
 0xdb6   : > { %v16226_v45 = vadd.f32 %v7144_v6, %v17483_v15  ;;  %v17490_v15 = vld [vmem:[#allocation55_spill] sm:$0xff] }
 0xdb8   : > { %7367 = vmatpush.msrb.mxu2 %v16226_v45 }
 0xdba   : > { %7368 = vmatpush.msrb.mxu2 %v16229_v34 }
 0xdbb   : > { %v7146_v2 = vpop.f32.mrf.mxu3  ;;  %9414 = vmatmul.msk.f32.vlgmr.msrb.gmra.mxu2 %vm737_vm1, %v7337_v41 }
 0xdbc   : > { %9406 = vmatmul.msk.f32.gmra.mxu1 %vm5729_vm3, %v6975_v1  ;;  %v16291_v13 = vpop.permute.xlu1 %7524  ;;  %v7147_v50 = vadd.f32 %v7146_v2, %v16257_v0 }
 0xdbe   : > { %v7257_v25 = vadd.f32 %v7147_v50, %v17490_v15 }
 0xdc3   : > { %v7149_v33 = vpop.f32.mrf.mxu3  ;;  %9415 = vmatmul.msk.f32.gmra.mxu2 %vm737_vm1, %v7338_v20 }
 0xdc4   : > { %9407 = vmatmul.msk.f32.gmra.mxu1 %vm5729_vm3, %v6976_v43  ;;  %v16286_v43 = vpop.permute.xlu0 %7951  ;;  %v7150_v24 = vadd.f32 %v7149_v33, %v16259_v31 }
 0xdc6   : > { %v7259_v10 = vadd.f32 %v7150_v24, %v17492_v52 }
 0xdcb   : > { %v16246_v57 = vpop.f32.mrf.mxu3  ;;  %9416 = vmatmul.msk.f32.gmra.mxu2 %vm737_vm1, %v7339_v28 }
 0xdcc   : > { %9408 = vmatmul.msk.f32.gmra.mxu1 %vm5729_vm3, %v6977_v35 }
 0xdd3   : > { %v16253_v53 = vpop.f32.mrf.mxu3  ;;  %9417 = vmatmul.msk.f32.gmra.mxu2 %vm737_vm1, %v7340_v40 }
 0xdd4   : > { %9409 = vmatmul.msk.f32.gmra.mxu1 %vm5729_vm3, %v6978_v8 }
 0xdd9   : > { %v7205_v7 = vpop.f32.mrf.mxu1 }
 0xdda   : > { %v7206_v11 = vadd.f32 %v7205_v7, %v17481_v26  ;;  %v16293_v26 = vpop.permute.xlu0 %7987  ;;  %v16301_v7 = vpop.permute.xlu1 %7992 }
 0xddb   : > { %v16261_v14 = vpop.f32.mrf.mxu3  ;;  %17489 = vst [vmem:[#allocation11_spill] sm:$0xff] %v16293_v26 }
 0xddc   : > { %v16277_v51 = vadd.f32 %v7206_v11, %v5276_v37  ;;  %17491 = vst [vmem:[#allocation47_spill] sm:$0xff] %v16301_v7 }
 0xde1   : > { %v7208_v18 = vpop.f32.mrf.mxu1 }
 0xde2   : > { %v7209_v19 = vadd.f32 %v7208_v18, %v17482_v12  ;;  %v7038_v29 = vpop.permute.xlu0 %7037  ;;  %v7043_v7 = vpop.permute.xlu1 %7042 }
 0xde3   : > { %v16271_v60 = vpop.f32.mrf.mxu3 }
 0xde4   : > { %v16275_v59 = vadd.f32 %v7209_v19, %v5279_v62 }
 0xde6   : > { %7396 = vmatpush.msra.mxu0 %v16275_v59 }
 0xde8   : > { %7397 = vmatpush.msra.mxu0 %v16277_v51 }
 0xde9   : > { %v16283_v1 = vpop.f32.mrf.mxu1  ;;  %9418 = vmatmul.msk.f32.vlgmr.msra.gmra.mxu0 %vm737_vm1, %v7337_v41 }
 0xdeb   : > { %v7164_v35 = vpop.f32.mrf.mxu3 }
 0xdec   : > { %v7165_v62 = vadd.f32 %v7164_v35, %v7038_v29 }
 0xdee   : > { %v7289_v37 = vsub.f32 %v16229_v34, %v7165_v62 }
 0xdf1   : > { %v16288_v8 = vpop.f32.mrf.mxu1  ;;  %9419 = vmatmul.msk.f32.gmra.mxu0 %vm737_vm1, %v7338_v20 }
 0xdf3   : > { %v7167_v44 = vpop.f32.mrf.mxu3 }
 0xdf9   : > { %v16296_v12 = vpop.f32.mrf.mxu1  ;;  %9420 = vmatmul.msk.f32.gmra.mxu0 %vm737_vm1, %v7339_v28 }
 0xdfb   : > { %v7170_v6 = vpop.f32.mrf.mxu3 }
 0xdfc   : > { %v7171_v41 = vadd.f32 %v7170_v6, %v16263_v46 }
 0xdfe   : > { %v7273_v18 = vsub.f32 %v7257_v25, %v7171_v41  ;;  %v7297_v20 = vsub.f32 0.0, %v7171_v41  ;;  %v7269_v33 = vsub.f32 %v7171_v41, %v7257_v25 }
 0xe00   : > { %v7277_v11 = vmul.f32 1.442695, %v7273_v18  ;;  %v7301_v19 = vmul.f32 1.442695, %v7297_v20  ;;  %v7293_v18 = vmul.f32 %v7289_v37, %v7289_v37  ;;  %v7168_v20 = vadd.f32 %v7167_v44, %v7043_v7 }
 0xe01   : > { %v16304_v2 = vpop.f32.mrf.mxu1  ;;  %9421 = vmatmul.msk.f32.gmra.mxu0 %vm737_vm1, %v7340_v40 }
 0xe02   : > { %10246 = vpow2.f32 %v7277_v11  ;;  %v7291_v34 = vsub.f32 %v16226_v45, %v7168_v20 }
 0xe03   : > { %10248 = vpow2.f32 %v7301_v19  ;;  %v7173_v28 = vpop.f32.mrf.mxu3 }
 0xe04   : > { %v7174_v50 = vadd.f32 %v7173_v28, %v16265_v58  ;;  %v7295_v23 = vmul.f32 %v7291_v34, %v7291_v34 }
 0xe06   : > { %v7275_v6 = vsub.f32 %v7259_v10, %v7174_v50  ;;  %v7299_v15 = vsub.f32 0.0, %v7174_v50  ;;  %v7271_v28 = vsub.f32 %v7174_v50, %v7259_v10  ;;  %v7212_v10 = vadd.f32 %v16283_v1, %v16257_v0  ;;  %v17493_v50 = vld [vmem:[#allocation100_spill] sm:$0xff] }
 0xe08   : > { %v10247_v35 = vpop.eup %10246  ;;  %v7281_v26 = vmul.f32 1.442695, %v7275_v6  ;;  %v7305_v9 = vmul.f32 1.442695, %v7299_v15 }
 0xe09   : > { %v10249_v49 = vpop.eup %10248  ;;  %v7285_v40 = vadd.f32 %v10247_v35, %v7269_v33  ;;  %v16310_v11 = vpop.f32.mrf.mxu1 }
 0xe0a   : > { %v7309_v19 = vmul.f32 %v10249_v49, %v7293_v18  ;;  %10250 = vpow2.f32 %v7281_v26  ;;  %v17494_v18 = vld [vmem:[#allocation114_spill] sm:$0xff] }
 0xe0b   : > { %10252 = vpow2.f32 %v7305_v9  ;;  %v5282_v20 = vadd.f32 %v17494_v18, %v17493_v50 }
 0xe0c   : > { %v7313_v24 = vadd.f32 %v7309_v19, %v7285_v40 }
 0xe0d   : > { %v7258_v19 = vadd.f32 %v7212_v10, %v5282_v20 }
 0xe0e   : > { %v9410_v62 = vadd.f32 -1.0, %v7313_v24  ;;  %v7215_v24 = vadd.f32 %v16288_v8, %v16259_v31 }
 0xe10   : > { %v10251_v52 = vpop.eup %10250  ;;  %v7321_v25 = vmul.f32 0.5, %v9410_v62 }
 0xe11   : > { %v10253_v41 = vpop.eup %10252  ;;  %v7287_v37 = vadd.f32 %v10251_v52, %v7271_v28  ;;  %v16313_v44 = vpop.f32.mrf.mxu1  ;;  %v17495_v52 = vld [vmem:[#allocation106_spill] sm:$0xff] }
 0xe12   : > { %v7311_v6 = vmul.f32 %v10253_v41, %v7295_v23  ;;  %v16316_v15 = vadd.f32 %v7321_v25, %v16039_v32  ;;  %v17496_v25 = vld [vmem:[#allocation120_spill] sm:$0xff] }
 0xe13   : > { %v5285_v41 = vadd.f32 %v17496_v25, %v17495_v52 }
 0xe14   : > { %v7315_v33 = vadd.f32 %v7311_v6, %v7287_v37  ;;  %v7176_v37 = vpop.f32.mrf.mxu3 }
 0xe15   : > { %v7260_v1 = vadd.f32 %v7215_v24, %v5285_v41 }
 0xe16   : > { %v9412_v49 = vadd.f32 -1.0, %v7315_v33 }
 0xe18   : > { %v7323_v26 = vmul.f32 0.5, %v9412_v49 }
 0xe19   : > { %v7229_v9 = vpop.f32.mrf.mxu1 }
 0xe1a   : > { %v16319_v45 = vadd.f32 %v7323_v26, %v16044_v30  ;;  %v7230_v62 = vadd.f32 %v7229_v9, %v7038_v29 }
 0xe1c   : > { %v7290_v6 = vsub.f32 %v16277_v51, %v7230_v62 }
 0xe1e   : > { %v7294_v31 = vmul.f32 %v7290_v6, %v7290_v6 }
 0xe21   : > { %v7232_v35 = vpop.f32.mrf.mxu1 }
 0xe22   : > { %v7233_v8 = vadd.f32 %v7232_v35, %v7043_v7 }
 0xe29   : > { %v7235_v40 = vpop.f32.mrf.mxu1 }
 0xe2a   : > { %v7236_v23 = vadd.f32 %v7235_v40, %v16263_v46  ;;  %v7179_v40 = vpop.f32.mrf.mxu3 }
 0xe2c   : > { %v7274_v32 = vsub.f32 %v7258_v19, %v7236_v23  ;;  %v7298_v34 = vsub.f32 0.0, %v7236_v23  ;;  %v7270_v26 = vsub.f32 %v7236_v23, %v7258_v19 }
 0xe2e   : > { %v7279_v28 = vmul.f32 1.442695, %v7274_v32  ;;  %v7303_v30 = vmul.f32 1.442695, %v7298_v34  ;;  %v7292_v32 = vsub.f32 %v16275_v59, %v7233_v8 }
 0xe30   : > { %10254 = vpow2.f32 %v7279_v28  ;;  %v7296_v62 = vmul.f32 %v7292_v32, %v7292_v32 }
 0xe31   : > { %10256 = vpow2.f32 %v7303_v30  ;;  %v7238_v0 = vpop.f32.mrf.mxu1 }
 0xe32   : > { %v7239_v46 = vadd.f32 %v7238_v0, %v16265_v58  ;;  %v7182_v25 = vpop.f32.mrf.mxu3 }
 0xe34   : > { %v7276_v33 = vsub.f32 %v7260_v1, %v7239_v46  ;;  %v7300_v49 = vsub.f32 0.0, %v7239_v46  ;;  %v7272_v24 = vsub.f32 %v7239_v46, %v7260_v1  ;;  %v17497_v46 = vld [vmem:[#allocation110_spill] sm:$0xff] }
 0xe36   : > { %v10255_v10 = vpop.eup %10254  ;;  %v7283_v29 = vmul.f32 1.442695, %v7276_v33  ;;  %v7307_v9 = vmul.f32 1.442695, %v7300_v49  ;;  %v7183_v49 = vadd.f32 %v7182_v25, %v17497_v46  ;;  %v17507_v25 = vld [vmem:[#allocation118_spill] sm:$0xff] }
 0xe37   : > { %v10257_v50 = vpop.eup %10256  ;;  %v7286_v18 = vadd.f32 %v10255_v10, %v7270_v26  ;;  %v17498_v26 = vld [vmem:[#allocation105_spill] sm:$0xff] }
 0xe38   : > { %v7310_v20 = vmul.f32 %v10257_v50, %v7294_v31  ;;  %10258 = vpow2.f32 %v7283_v29  ;;  %v17499_v31 = vld [vmem:[#allocation115_spill] sm:$0xff] }
 0xe39   : > { %10260 = vpow2.f32 %v7307_v9  ;;  %v7180_v8 = vadd.f32 %v7179_v40, %v17499_v31  ;;  %v17500_v29 = vld [vmem:[#allocation111_spill] sm:$0xff]  ;;  %v17506_v40 = vld [vmem:[#allocation121_spill] sm:$0xff] }
 0xe3a   : > { %v7314_v34 = vadd.f32 %v7310_v20, %v7286_v18  ;;  %v7185_v33 = vpop.f32.mrf.mxu3  ;;  %v7177_v9 = vadd.f32 %v7176_v37, %v17500_v29  ;;  %v17502_v18 = vld [vmem:[#allocation161_spill] sm:$0xff]  ;;  %v7159_v37 = vadd.f32 %v16261_v14, %v17506_v40 }
 0xe3b   : > { %v7186_v10 = vadd.f32 %v7185_v33, %v17498_v26  ;;  %v17511_v14 = vld [vmem:[#allocation41_spill] sm:$0xff] }
 0xe3c   : > { %v9411_v51 = vadd.f32 -1.0, %v7314_v34  ;;  %v17503_v34 = vld [vmem:[#allocation159_spill] sm:$0xff] }
 0xe3d   : > { %v7335_v20 = vadd.f32 %v7186_v10, %v17502_v18  ;;  %v17510_v10 = vld [vmem:[#allocation15_spill] sm:$0xff] }
 0xe3e   : > { %v10259_v58 = vpop.eup %10258  ;;  %v7322_v28 = vmul.f32 0.5, %v9411_v51  ;;  %v7370_v19 = vpop.f32.mrf.mxu2  ;;  %v7331_v51 = vadd.f32 %v7180_v8, %v17503_v34  ;;  %v7265_v8 = vadd.f32 %v7159_v37, %v17510_v10 }
 0xe3f   : > { %v10261_v23 = vpop.eup %10260  ;;  %v7288_v30 = vadd.f32 %v10259_v58, %v7272_v24  ;;  %v7241_v58 = vpop.f32.mrf.mxu1 }
 0xe40   : > { %v7312_v7 = vmul.f32 %v10261_v23, %v7296_v62  ;;  %v16334_v35 = vadd.f32 %v7322_v28, %v16058_v17  ;;  %v17501_v17 = vld [vmem:[#allocation160_spill] sm:$0xff]  ;;  %v17505_v23 = vld [vmem:[#allocation158_spill] sm:$0xff] }
 0xe41   : > { %v7333_v50 = vadd.f32 %v7183_v49, %v17501_v17  ;;  %v17504_v62 = vld [vmem:[#allocation116_spill] sm:$0xff]  ;;  %v17509_v49 = vld [vmem:[#allocation123_spill] sm:$0xff] }
 0xe42   : > { %v7316_v52 = vadd.f32 %v7312_v7, %v7288_v30  ;;  %v7162_v28 = vadd.f32 %v16271_v60, %v17504_v62  ;;  %v7329_v30 = vadd.f32 %v7177_v9, %v17505_v23  ;;  %v7153_v60 = vadd.f32 %v16246_v57, %v17509_v49  ;;  %v17512_v17 = vld [vmem:[#allocation44_spill] sm:$0xff]  ;;  %v16381_v23 = vld [vmem:[%s16975_s7 + $0x208] sm:$0xff] }
 0xe44   : > { %v9413_v41 = vadd.f32 -1.0, %v7316_v52  ;;  %v7411_v52 = vadd.f32 %v7370_v19, %v7329_v30 }
 0xe46   : > { %v7373_v0 = vpop.f32.mrf.mxu2  ;;  %v7324_v6 = vmul.f32 0.5, %v9413_v41  ;;  %v7156_v41 = vadd.f32 %v16253_v53, %v17507_v25 }
 0xe47   : > { %v7413_v7 = vadd.f32 %v7373_v0, %v7331_v51  ;;  %v7244_v9 = vpop.f32.mrf.mxu1 }
 0xe48   : > { %v16337_v59 = vadd.f32 %v7324_v6, %v16064_v16  ;;  %v17508_v6 = vld [vmem:[#allocation6_spill] sm:$0xff]  ;;  %v7263_v19 = vadd.f32 %v7156_v41, %v17511_v14  ;;  %v7245_v41 = vadd.f32 %v7244_v9, %v17499_v31 }
 0xe49   : > { %v7267_v33 = vadd.f32 %v7162_v28, %v17508_v6  ;;  %v7437_v6 = vld [vmem:[%s16975_s7 + $0x210] sm:$0xff] }
 0xe4e   : > { %v7376_v1 = vpop.f32.mrf.mxu2 }
 0xe4f   : > { %v7415_v24 = vadd.f32 %v7376_v1, %v7333_v50  ;;  %v7261_v50 = vadd.f32 %v7153_v60, %v17512_v17  ;;  %v7247_v51 = vpop.f32.mrf.mxu1  ;;  %v17513_v60 = vld [vmem:[#allocation168_spill] sm:$0xff]  ;;  %v17515_v17 = vld [vmem:[#allocation167_spill] sm:$0xff] }
 0xe50   : > { %v7248_v37 = vadd.f32 %v7247_v51, %v17497_v46  ;;  %v7227_v46 = vadd.f32 %v16313_v44, %v17504_v62  ;;  %v7224_v51 = vadd.f32 %v16310_v11, %v17506_v40  ;;  %v7221_v44 = vadd.f32 %v16304_v2, %v17507_v25  ;;  %v17524_v2 = vld [vmem:[#allocation126_spill] sm:$0xff] }
 0xe51   : > { %v7218_v11 = vadd.f32 %v16296_v12, %v17509_v49  ;;  %v7439_v12 = vld [vmem:[%s16975_s7 + $0x220] sm:$0xff] }
 0xe52   : > { %v7334_v10 = vadd.f32 %v7248_v37, %v17513_v60  ;;  %v17520_v37 = vld [vmem:[#allocation134_spill] sm:$0xff] }
 0xe56   : > { %v7379_v32 = vpop.f32.mrf.mxu2 }
 0xe57   : > { %v7417_v16 = vadd.f32 %v7379_v32, %v7335_v20  ;;  %v7250_v30 = vpop.f32.mrf.mxu1 }
 0xe59   : > { %10262 = vtanh.f32 %v7417_v16 }
 0xe5a   : > { %10264 = vtanh.f32 %v7415_v24  ;;  %v16374_v24 = vld [vmem:[%s16975_s7 + $0x200] sm:$0xff] }
 0xe5b   : > { %10266 = vtanh.f32 %v7413_v7 }
 0xe5c   : > { %10268 = vtanh.f32 %v7411_v52  ;;  %v7251_v52 = vadd.f32 %v7250_v30, %v17498_v26  ;;  %v17516_v26 = vld [vmem:[#allocation166_spill] sm:$0xff]  ;;  %v7438_v30 = vld [vmem:[%s16975_s7 + $0x218] sm:$0xff] }
 0xe5d   : > { %10270 = vtanh.f32 %v7267_v33  ;;  %v7242_v33 = vadd.f32 %v7241_v58, %v17500_v29  ;;  %v17518_v29 = vld [vmem:[#allocation138_spill] sm:$0xff] }
 0xe5e   : > { %10272 = vtanh.f32 %v7265_v8  ;;  %v17514_v8 = vld [vmem:[#allocation169_spill] sm:$0xff] }
 0xe5f   : > { %v16354_v1 = vpop.eup %10262  ;;  %10274 = vtanh.f32 %v7263_v19  ;;  %v7336_v14 = vadd.f32 %v7251_v52, %v17514_v8  ;;  %v7330_v31 = vadd.f32 %v7242_v33, %v17516_v26  ;;  %v17522_v33 = vld [vmem:[#allocation130_spill] sm:$0xff]  ;;  %v7441_v26 = vld [vmem:[%s16975_s7 + $0x230] sm:$0xff] }
 0xe60   : > { %7603 = vmatpush.msra.mxu2 %v16354_v1  ;;  %v16360_v0 = vpop.eup %10264  ;;  %10276 = vtanh.f32 %v7261_v50  ;;  %v7332_v50 = vadd.f32 %v7245_v41, %v17515_v17  ;;  %v17521_v41 = vld [vmem:[#allocation117_spill] sm:$0xff] }
 0xe61   : > { %v16364_v53 = vpop.eup %10266  ;;  %v5291_v60 = vadd.f32 %v17522_v33, %v17521_v41  ;;  %v17528_v33 = vld [vmem:[#allocation65_spill] sm:$0xff] }
 0xe62   : > { %7604 = vmatpush.msra.mxu2 %v16360_v0  ;;  %v16368_v57 = vpop.eup %10268 }
 0xe63   : > { %v10271_v20 = vpop.eup %10270  ;;  %v7264_v8 = vadd.f32 %v7221_v44, %v5291_v60 }
 0xe64   : > { %7605 = vmatpush.msra.mxu2 %v16364_v53  ;;  %v10273_v32 = vpop.eup %10272 }
 0xe65   : > { %v10275_v34 = vpop.eup %10274 }
 0xe66   : > { %v7399_v18 = vpop.f32.mrf.mxu0  ;;  %7606 = vmatpush.msra.mxu2 %v16368_v57  ;;  %v10277_v16 = vpop.eup %10276 }
 0xe68   : > { %7607 = vmatpush.msra.mxu2 %v10271_v20 }
 0xe6a   : > { %7608 = vmatpush.msra.mxu2 %v10273_v32 }
 0xe6c   : > { %7609 = vmatpush.msra.mxu2 %v10275_v34  ;;  %v17517_v34 = vld [vmem:[#allocation127_spill] sm:$0xff] }
 0xe6d   : > { %v5297_v58 = vadd.f32 %v17518_v29, %v17517_v34  ;;  %v7447_v34 = vld [vmem:[%s16975_s7 + $0x260] sm:$0xff]  ;;  %v7448_v29 = vld [vmem:[%s16975_s7 + $0x268] sm:$0xff] }
 0xe6e   : > { %v7402_v28 = vpop.f32.mrf.mxu0  ;;  %7610 = vmatpush.msra.mxu2 %v10277_v16  ;;  %v7412_v16 = vadd.f32 %v7399_v18, %v7330_v31  ;;  %v7442_v31 = vld [vmem:[%s16975_s7 + $0x238] sm:$0xff] }
 0xe6f   : > { %9422 = vmatmul.msk.f32.vlgmr.msra.gmra.mxu2 %vm5729_vm3, %v16374_v24  ;;  %v7414_v9 = vadd.f32 %v7402_v28, %v7332_v50  ;;  %v7268_v62 = vadd.f32 %v7227_v46, %v5297_v58  ;;  %v7449_v58 = vld [vmem:[%s16975_s7 + $0x270] sm:$0xff] }
 0xe76   : > { %v7405_v7 = vpop.f32.mrf.mxu0 }
 0xe77   : > { %9423 = vmatmul.msk.f32.gmra.mxu2 %vm5729_vm3, %v16381_v23  ;;  %v7416_v20 = vadd.f32 %v7405_v7, %v7334_v10  ;;  %v17519_v7 = vld [vmem:[#allocation122_spill] sm:$0xff]  ;;  %v17523_v10 = vld [vmem:[#allocation112_spill] sm:$0xff] }
 0xe78   : > { %v5294_v52 = vadd.f32 %v17520_v37, %v17519_v7  ;;  %v5288_v25 = vadd.f32 %v17524_v2, %v17523_v10  ;;  %v17525_v7 = vld [vmem:[#allocation125_spill] sm:$0xff]  ;;  %v17529_v2 = vld [vmem:[#allocation75_spill] sm:$0xff] }
 0xe7a   : > { %v7266_v40 = vadd.f32 %v7224_v51, %v5294_v52  ;;  %v7450_v51 = vld [vmem:[%s16975_s7 + $0x278] sm:$0xff]  ;;  %v17526_v52 = vld [vmem:[#allocation128_spill] sm:$0xff] }
 0xe7e   : > { %v7408_v19 = vpop.f32.mrf.mxu0 }
 0xe7f   : > { %v7418_v32 = vadd.f32 %v7408_v19, %v7336_v14  ;;  %9424 = vmatmul.msk.f32.gmra.mxu2 %vm5729_vm3, %v7437_v6  ;;  %v7262_v19 = vadd.f32 %v7218_v11, %v5288_v25  ;;  %v7809_v11 = vld [vmem:[%s16973_s5 + $0xa0] sm:$0xff] }
 0xe81   : > { %10278 = vtanh.f32 %v7418_v32  ;;  %v7440_v32 = vld [vmem:[%s16975_s7 + $0x228] sm:$0xff] }
 0xe82   : > { %10280 = vtanh.f32 %v7416_v20 }
 0xe83   : > { %10282 = vtanh.f32 %v7414_v9  ;;  %v7446_v9 = vld [vmem:[%s16975_s7 + $0x258] sm:$0xff] }
 0xe84   : > { %10284 = vtanh.f32 %v7412_v16 }
 0xe85   : > { %10286 = vtanh.f32 %v7268_v62  ;;  %v17527_v62 = vld [vmem:[#allocation70_spill] sm:$0xff] }
 0xe86   : > { %10288 = vtanh.f32 %v7266_v40 }
 0xe87   : > { %v16410_v28 = vpop.eup %10278  ;;  %9425 = vmatmul.msk.f32.gmra.mxu2 %vm5729_vm3, %v7438_v30  ;;  %10290 = vtanh.f32 %v7264_v8  ;;  %v7810_v8 = vld [vmem:[%s16973_s5 + $0xa8] sm:$0xff] }
 0xe88   : > { %7668 = vmatpush.msrb.mxu0 %v16410_v28  ;;  %v16418_v18 = vpop.eup %10280  ;;  %10292 = vtanh.f32 %v7262_v19 }
 0xe89   : > { %v16423_v14 = vpop.eup %10282 }
 0xe8a   : > { %7669 = vmatpush.msrb.mxu0 %v16418_v18  ;;  %v16429_v49 = vpop.eup %10284 }
 0xe8b   : > { %v10287_v17 = vpop.eup %10286 }
 0xe8c   : > { %7670 = vmatpush.msrb.mxu0 %v16423_v14  ;;  %v10289_v50 = vpop.eup %10288 }
 0xe8d   : > { %v10291_v20 = vpop.eup %10290 }
 0xe8e   : > { %7671 = vmatpush.msrb.mxu0 %v16429_v49  ;;  %v10293_v46 = vpop.eup %10292 }
 0xe8f   : > { %9426 = vmatmul.msk.f32.gmra.mxu2 %vm5729_vm3, %v7439_v12 }
 0xe90   : > { %7672 = vmatpush.msrb.mxu0 %v10287_v17  ;;  %v17530_v17 = vld [vmem:[#allocation81_spill] sm:$0xff] }
 0xe92   : > { %7673 = vmatpush.msrb.mxu0 %v10289_v50 }
 0xe94   : > { %7674 = vmatpush.msrb.mxu0 %v10291_v20  ;;  %v7811_v20 = vld [vmem:[%s16973_s5 + $0xb0] sm:$0xff] }
 0xe96   : > { %7675 = vmatpush.msrb.mxu0 %v10293_v46  ;;  %v17531_v46 = vld [vmem:[#allocation142_spill] sm:$0xff] }
 0xe97   : > { %9427 = vmatmul.msk.f32.gmra.mxu2 %vm5729_vm3, %v7440_v32  ;;  %9438 = vmatmul.msk.f32.vlgmr.msrb.gmra.mxu0 %vm5729_vm3, %v16374_v24  ;;  %v7443_v24 = vld [vmem:[%s16975_s7 + $0x240] sm:$0xff] }
 0xe9f   : > { %9428 = vmatmul.msk.f32.gmra.mxu2 %vm5729_vm3, %v7441_v26  ;;  %9439 = vmatmul.msk.f32.gmra.mxu0 %vm5729_vm3, %v16381_v23  ;;  %v7444_v23 = vld [vmem:[%s16975_s7 + $0x248] sm:$0xff] }
 0xea7   : > { %9429 = vmatmul.msk.f32.gmra.mxu2 %vm5729_vm3, %v7442_v31  ;;  %9440 = vmatmul.msk.f32.gmra.mxu0 %vm5729_vm3, %v7437_v6  ;;  %v7445_v6 = vld [vmem:[%s16975_s7 + $0x250] sm:$0xff] }
 0xeaf   : > { %9430 = vmatmul.msk.f32.gmra.mxu2 %vm5729_vm3, %v7443_v24  ;;  %9441 = vmatmul.msk.f32.gmra.mxu0 %vm5729_vm3, %v7438_v30 }
 0xeb7   : > { %9431 = vmatmul.msk.f32.gmra.mxu2 %vm5729_vm3, %v7444_v23  ;;  %9442 = vmatmul.msk.f32.gmra.mxu0 %vm5729_vm3, %v7439_v12 }
 0xebf   : > { %9432 = vmatmul.msk.f32.gmra.mxu2 %vm5729_vm3, %v7445_v6  ;;  %9443 = vmatmul.msk.f32.gmra.mxu0 %vm5729_vm3, %v7440_v32 }
 0xec7   : > { %9433 = vmatmul.msk.f32.gmra.mxu2 %vm5729_vm3, %v7446_v9  ;;  %9444 = vmatmul.msk.f32.gmra.mxu0 %vm5729_vm3, %v7441_v26 }
 0xecf   : > { %9434 = vmatmul.msk.f32.gmra.mxu2 %vm5729_vm3, %v7447_v34  ;;  %9445 = vmatmul.msk.f32.gmra.mxu0 %vm5729_vm3, %v7442_v31 }
 0xed7   : > { %9435 = vmatmul.msk.f32.gmra.mxu2 %vm5729_vm3, %v7448_v29  ;;  %9446 = vmatmul.msk.f32.gmra.mxu0 %vm5729_vm3, %v7443_v24  ;;  %v17532_v24 = vld [vmem:[#allocation86_spill] sm:$0xff] }
 0xedf   : > { %9436 = vmatmul.msk.f32.gmra.mxu2 %vm5729_vm3, %v7449_v58  ;;  %9447 = vmatmul.msk.f32.gmra.mxu0 %vm5729_vm3, %v7444_v23 }
 0xee7   : > { %9437 = vmatmul.msk.f32.gmra.mxu2 %vm5729_vm3, %v7450_v51  ;;  %9448 = vmatmul.msk.f32.gmra.mxu0 %vm5729_vm3, %v7445_v6  ;;  %v7812_v6 = vld [vmem:[%s16973_s5 + $0xb8] sm:$0xff] }
 0xeef   : > { %9449 = vmatmul.msk.f32.gmra.mxu0 %vm5729_vm3, %v7446_v9 }
 0xef2   : > { %v7612_v16 = vpop.f32.mrf.mxu2 }
 0xef3   : > { %v7613_v37 = vadd.f32 %v7612_v16, %v17525_v7  ;;  %v17535_v16 = vld [vmem:[#allocation145_spill] sm:$0xff] }
 0xef5   : > { %v7725_v60 = vadd.f32 %v7613_v37, %v17528_v33 }
 0xef7   : > { %9450 = vmatmul.msk.f32.gmra.mxu0 %vm5729_vm3, %v7447_v34  ;;  %v17533_v34 = vld [vmem:[#allocation64_spill] sm:$0xff] }
 0xefa   : > { %v7615_v30 = vpop.f32.mrf.mxu2 }
 0xefb   : > { %v7616_v44 = vadd.f32 %v7615_v30, %v17526_v52 }
 0xefd   : > { %v16495_v41 = vadd.f32 %v7616_v44, %v17527_v62  ;;  %v17536_v44 = vld [vmem:[#allocation92_spill] sm:$0xff] }
 0xeff   : > { %9451 = vmatmul.msk.f32.gmra.mxu0 %vm5729_vm3, %v7448_v29  ;;  %7839 = vmatpush.msra.mxu3 %v16495_v41 }
 0xf01   : > { %7840 = vmatpush.msra.mxu3 %v7725_v60 }
 0xf02   : > { %v7618_v40 = vpop.f32.mrf.mxu2  ;;  %9458 = vmatmul.msk.f32.vlgmr.msra.gmra.mxu3 %vm737_vm1, %v7809_v11 }
 0xf03   : > { %v7619_v10 = vadd.f32 %v7618_v40, %v16003_v5  ;;  %v17537_v40 = vld [vmem:[#allocation132_spill] sm:$0xff] }
 0xf05   : > { %v16506_v25 = vadd.f32 %v7619_v10, %v17529_v2  ;;  %v17538_v10 = vld [vmem:[#allocation141_spill] sm:$0xff] }
 0xf06   : > { %v5300_v2 = vadd.f32 %v17538_v10, %v17537_v40  ;;  %v17545_v40 = vld [vmem:[#allocation18_spill] sm:$0xff] }
 0xf07   : > { %9452 = vmatmul.msk.f32.gmra.mxu0 %vm5729_vm3, %v7449_v58 }
 0xf0a   : > { %v7621_v19 = vpop.f32.mrf.mxu2  ;;  %9459 = vmatmul.msk.f32.gmra.mxu3 %vm737_vm1, %v7810_v8 }
 0xf0b   : > { %v7622_v12 = vadd.f32 %v7621_v19, %v16281_v56 }
 0xf0d   : > { %v16515_v50 = vadd.f32 %v7622_v12, %v17530_v17 }
 0xf0f   : > { %9453 = vmatmul.msk.f32.gmra.mxu0 %vm5729_vm3, %v7450_v51  ;;  %v17534_v51 = vld [vmem:[#allocation137_spill] sm:$0xff] }
 0xf10   : > { %v5303_v30 = vadd.f32 %v17535_v16, %v17534_v51 }
 0xf12   : > { %v7624_v32 = vpop.f32.mrf.mxu2  ;;  %9460 = vmatmul.msk.f32.gmra.mxu3 %vm737_vm1, %v7811_v20 }
 0xf13   : > { %v7625_v26 = vadd.f32 %v7624_v32, %v17531_v46  ;;  %v17539_v32 = vld [vmem:[#allocation136_spill] sm:$0xff] }
 0xf14   : > { %v7677_v31 = vpop.f32.mrf.mxu0 }
 0xf15   : > { %v16524_v23 = vadd.f32 %v7625_v26, %v17532_v24  ;;  %v7678_v37 = vadd.f32 %v7677_v31, %v17525_v7  ;;  %v17540_v31 = vld [vmem:[#allocation29_spill] sm:$0xff]  ;;  %v17541_v24 = vld [vmem:[#allocation2_spill] sm:$0xff] }
 0xf17   : > { %v16542_v12 = vadd.f32 %v7678_v37, %v5300_v2 }
 0xf1a   : > { %v7627_v9 = vpop.f32.mrf.mxu2  ;;  %9461 = vmatmul.msk.f32.gmra.mxu3 %vm737_vm1, %v7812_v6 }
 0xf1b   : > { %v7628_v29 = vadd.f32 %v7627_v9, %v17533_v34  ;;  %v17542_v9 = vld [vmem:[#allocation98_spill] sm:$0xff] }
 0xf1c   : > { %v7680_v58 = vpop.f32.mrf.mxu0 }
 0xf1d   : > { %v16535_v62 = vadd.f32 %v7628_v29, %v17536_v44  ;;  %v7681_v33 = vadd.f32 %v7680_v58, %v17526_v52  ;;  %v5306_v52 = vadd.f32 %v17541_v24, %v17540_v31  ;;  %v7510_v31 = vpop.permute.xlu2 %7509 }
 0xf1f   : > { %v16540_v19 = vadd.f32 %v7681_v33, %v5303_v30  ;;  %v17543_v30 = vld [vmem:[#allocation139_spill] sm:$0xff] }
 0xf20   : > { %v17544_v33 = vld [vmem:[#allocation143_spill] sm:$0xff] }
 0xf21   : > { %7868 = vmatpush.msrb.mxu1 %v16540_v19  ;;  %v5309_v10 = vadd.f32 %v17545_v40, %v17544_v33 }
 0xf22   : > { %v7630_v17 = vpop.f32.mrf.mxu2 }
 0xf23   : > { %v7631_v26 = vadd.f32 %v7630_v17, %v17539_v32  ;;  %7869 = vmatpush.msrb.mxu1 %v16542_v12 }
 0xf24   : > { %v7683_v7 = vpop.f32.mrf.mxu0  ;;  %9462 = vmatmul.msk.f32.vlgmr.msrb.gmra.mxu1 %vm737_vm1, %v7809_v11  ;;  %v17546_v11 = vld [vmem:[#allocation103_spill] sm:$0xff] }
 0xf25   : > { %v16551_v29 = vadd.f32 %v7631_v26, %v17542_v9  ;;  %v7684_v58 = vadd.f32 %v7683_v7, %v16003_v5  ;;  %v17548_v9 = vld [vmem:[#allocation4_spill] sm:$0xff] }
 0xf27   : > { %v16554_v51 = vadd.f32 %v7684_v58, %v5306_v52  ;;  %v17547_v52 = vld [vmem:[#allocation146_spill] sm:$0xff] }
 0xf28   : > { %v5312_v58 = vadd.f32 %v17548_v9, %v17547_v52 }
 0xf2a   : > { %v7633_v16 = vpop.f32.mrf.mxu2 }
 0xf2b   : > { %v7634_v37 = vadd.f32 %v7633_v16, %v17543_v30 }
 0xf2c   : > { %v7686_v44 = vpop.f32.mrf.mxu0  ;;  %9463 = vmatmul.msk.f32.gmra.mxu1 %vm737_vm1, %v7810_v8 }
 0xf2d   : > { %v16561_v2 = vadd.f32 %v7634_v37, %v17546_v11  ;;  %v7687_v17 = vadd.f32 %v7686_v44, %v16281_v56  ;;  %v7515_v37 = vpop.permute.xlu0 %7514  ;;  %v17549_v44 = vld [vmem:[#allocation3_spill] sm:$0xff] }
 0xf2f   : > { %v16564_v26 = vadd.f32 %v7687_v17, %v5309_v10  ;;  %v17550_v10 = vld [vmem:[#allocation147_spill] sm:$0xff] }
 0xf30   : > { %v5315_v17 = vadd.f32 %v17550_v10, %v17549_v44  ;;  %v17553_v10 = vld [vmem:[#allocation17_spill] sm:$0xff] }
 0xf32   : > { %v7636_v5 = vpop.f32.mrf.mxu2 }
 0xf33   : > { %v7637_v7 = vadd.f32 %v7636_v5, %v7510_v31 }
 0xf34   : > { %v7689_v24 = vpop.f32.mrf.mxu0  ;;  %9464 = vmatmul.msk.f32.gmra.mxu1 %vm737_vm1, %v7811_v20 }
 0xf35   : > { %v7761_v8 = vsub.f32 %v7725_v60, %v7637_v7  ;;  %v7690_v16 = vadd.f32 %v7689_v24, %v17531_v46  ;;  %v17551_v7 = vld [vmem:[#allocation60_spill] sm:$0xff]  ;;  %v17552_v24 = vld [vmem:[#allocation149_spill] sm:$0xff] }
 0xf36   : > { %v5318_v52 = vadd.f32 %v17552_v24, %v17551_v7 }
 0xf37   : > { %v16570_v33 = vadd.f32 %v7690_v16, %v5312_v58 }
 0xf3a   : > { %v7639_v40 = vpop.f32.mrf.mxu2 }
 0xf3b   : > { %v7640_v11 = vadd.f32 %v7639_v40, %v7515_v37 }
 0xf3c   : > { %v7692_v56 = vpop.f32.mrf.mxu0  ;;  %9465 = vmatmul.msk.f32.gmra.mxu1 %vm737_vm1, %v7812_v6 }
 0xf3d   : > { %v7763_v5 = vsub.f32 %v16495_v41, %v7640_v11  ;;  %v7693_v20 = vadd.f32 %v7692_v56, %v17533_v34 }
 0xf3f   : > { %v16577_v21 = vadd.f32 %v7693_v20, %v5315_v17  ;;  %v17554_v17 = vld [vmem:[#allocation151_spill] sm:$0xff] }
 0xf40   : > { %v5321_v20 = vadd.f32 %v17554_v17, %v17553_v10 }
 0xf42   : > { %v7642_v60 = vpop.f32.mrf.mxu2 }
 0xf43   : > { %v7643_v46 = vadd.f32 %v7642_v60, %v16018_v54 }
 0xf44   : > { %v7695_v9 = vpop.f32.mrf.mxu0 }
 0xf45   : > { %v7741_v58 = vsub.f32 %v7643_v46, %v16506_v25  ;;  %v7745_v6 = vsub.f32 %v16506_v25, %v7643_v46  ;;  %v7769_v16 = vsub.f32 0.0, %v7643_v46  ;;  %v7696_v40 = vadd.f32 %v7695_v9, %v17539_v32 }
 0xf46   : > { %v7765_v9 = vmul.f32 %v7761_v8, %v7761_v8 }
 0xf47   : > { %v7749_v44 = vmul.f32 1.442695, %v7745_v6  ;;  %v7773_v41 = vmul.f32 1.442695, %v7769_v16  ;;  %v16585_v11 = vadd.f32 %v7696_v40, %v5318_v52 }
 0xf49   : > { %10294 = vpow2.f32 %v7749_v44 }
 0xf4a   : > { %10296 = vpow2.f32 %v7773_v41  ;;  %v7645_v34 = vpop.f32.mrf.mxu2 }
 0xf4b   : > { %v7646_v56 = vadd.f32 %v7645_v34, %v16291_v13 }
 0xf4c   : > { %v7698_v60 = vpop.f32.mrf.mxu0 }
 0xf4d   : > { %v7743_v7 = vsub.f32 %v7646_v56, %v16515_v50  ;;  %v7747_v25 = vsub.f32 %v16515_v50, %v7646_v56  ;;  %v7771_v46 = vsub.f32 0.0, %v7646_v56  ;;  %v7699_v32 = vadd.f32 %v7698_v60, %v17543_v30 }
 0xf4e   : > { %v7767_v50 = vmul.f32 %v7763_v5, %v7763_v5 }
 0xf4f   : > { %v10295_v24 = vpop.eup %10294  ;;  %v7753_v52 = vmul.f32 1.442695, %v7747_v25  ;;  %v7777_v6 = vmul.f32 1.442695, %v7771_v46  ;;  %v16593_v16 = vadd.f32 %v7699_v32, %v5321_v20 }
 0xf50   : > { %v10297_v40 = vpop.eup %10296  ;;  %v7757_v44 = vadd.f32 %v10295_v24, %v7741_v58 }
 0xf51   : > { %v7781_v41 = vmul.f32 %v10297_v40, %v7765_v9  ;;  %10298 = vpow2.f32 %v7753_v52 }
 0xf52   : > { %10300 = vpow2.f32 %v7777_v6 }
 0xf53   : > { %v7785_v34 = vadd.f32 %v7781_v41, %v7757_v44 }
 0xf54   : > { %v7701_v10 = vpop.f32.mrf.mxu0 }
 0xf55   : > { %v9454_v17 = vadd.f32 -1.0, %v7785_v34  ;;  %v7702_v22 = vadd.f32 %v7701_v10, %v7510_v31 }
 0xf57   : > { %v10299_v47 = vpop.eup %10298  ;;  %v7793_v56 = vmul.f32 0.5, %v9454_v17  ;;  %v7762_v30 = vsub.f32 %v16542_v12, %v7702_v22 }
 0xf58   : > { %v10301_v60 = vpop.eup %10300  ;;  %v7759_v8 = vadd.f32 %v10299_v47, %v7743_v7 }
 0xf59   : > { %v7783_v25 = vmul.f32 %v10301_v60, %v7767_v50  ;;  %v16597_v20 = vadd.f32 %v7793_v56, %v16316_v15  ;;  %v7766_v34 = vmul.f32 %v7762_v30, %v7762_v30  ;;  %v7648_v60 = vpop.f32.mrf.mxu2 }
 0xf5b   : > { %v7787_v46 = vadd.f32 %v7783_v25, %v7759_v8 }
 0xf5c   : > { %v7704_v58 = vpop.f32.mrf.mxu0 }
 0xf5d   : > { %v9456_v32 = vadd.f32 -1.0, %v7787_v46  ;;  %v7705_v24 = vadd.f32 %v7704_v58, %v7515_v37 }
 0xf5f   : > { %v7764_v9 = vsub.f32 %v16540_v19, %v7705_v24  ;;  %v7795_v52 = vmul.f32 0.5, %v9456_v32 }
 0xf61   : > { %v16601_v31 = vadd.f32 %v7795_v52, %v16319_v45  ;;  %v7768_v46 = vmul.f32 %v7764_v9, %v7764_v9 }
 0xf64   : > { %v7707_v5 = vpop.f32.mrf.mxu0 }
 0xf65   : > { %v7708_v6 = vadd.f32 %v7707_v5, %v16018_v54  ;;  %v7651_v5 = vpop.f32.mrf.mxu2 }
 0xf67   : > { %v7742_v22 = vsub.f32 %v7708_v6, %v16554_v51  ;;  %v7746_v47 = vsub.f32 %v16554_v51, %v7708_v6  ;;  %v7770_v12 = vsub.f32 0.0, %v7708_v6 }
 0xf69   : > { %v7751_v15 = vmul.f32 1.442695, %v7746_v47  ;;  %v7775_v7 = vmul.f32 1.442695, %v7770_v12 }
 0xf6b   : > { %10302 = vpow2.f32 %v7751_v15 }
 0xf6c   : > { %10304 = vpow2.f32 %v7775_v7  ;;  %v7710_v40 = vpop.f32.mrf.mxu0 }
 0xf6d   : > { %v7711_v37 = vadd.f32 %v7710_v40, %v16291_v13  ;;  %v7654_v12 = vpop.f32.mrf.mxu2 }
 0xf6f   : > { %v7744_v19 = vsub.f32 %v7711_v37, %v16564_v26  ;;  %v7748_v45 = vsub.f32 %v16564_v26, %v7711_v37  ;;  %v7772_v44 = vsub.f32 0.0, %v7711_v37  ;;  %v17555_v37 = vld [vmem:[#allocation133_spill] sm:$0xff] }
 0xf71   : > { %v10303_v41 = vpop.eup %10302  ;;  %v7755_v54 = vmul.f32 1.442695, %v7748_v45  ;;  %v7779_v10 = vmul.f32 1.442695, %v7772_v44  ;;  %v7655_v45 = vadd.f32 %v7654_v12, %v17555_v37 }
 0xf72   : > { %v10305_v17 = vpop.eup %10304  ;;  %v7758_v50 = vadd.f32 %v10303_v41, %v7742_v22  ;;  %v17557_v41 = vld [vmem:[#allocation131_spill] sm:$0xff] }
 0xf73   : > { %v7782_v51 = vmul.f32 %v10305_v17, %v7766_v34  ;;  %10306 = vpow2.f32 %v7755_v54  ;;  %v17558_v34 = vld [vmem:[#allocation135_spill] sm:$0xff] }
 0xf74   : > { %10308 = vpow2.f32 %v7779_v10  ;;  %v7713_v7 = vpop.f32.mrf.mxu0  ;;  %v7649_v54 = vadd.f32 %v7648_v60, %v17558_v34  ;;  %v17559_v10 = vld [vmem:[#allocation46_spill] sm:$0xff] }
 0xf75   : > { %v7786_v56 = vadd.f32 %v7782_v51, %v7758_v50  ;;  %v7657_v40 = vpop.f32.mrf.mxu2  ;;  %v7805_v17 = vadd.f32 %v7655_v45, %v17559_v10  ;;  %v17560_v50 = vld [vmem:[#allocation50_spill] sm:$0xff] }
 0xf77   : > { %v9455_v8 = vadd.f32 -1.0, %v7786_v56 }
 0xf79   : > { %v10307_v25 = vpop.eup %10306  ;;  %v7794_v13 = vmul.f32 0.5, %v9455_v8  ;;  %v17561_v8 = vld [vmem:[#allocation163_spill] sm:$0xff] }
 0xf7a   : > { %v10309_v58 = vpop.eup %10308  ;;  %v7760_v32 = vadd.f32 %v10307_v25, %v7744_v19  ;;  %v17556_v19 = vld [vmem:[#allocation129_spill] sm:$0xff] }
 0xf7b   : > { %v7784_v24 = vmul.f32 %v10309_v58, %v7768_v46  ;;  %v16610_v26 = vadd.f32 %v7794_v13, %v16334_v35  ;;  %v7658_v44 = vadd.f32 %v7657_v40, %v17556_v19  ;;  %v7652_v35 = vadd.f32 %v7651_v5, %v17557_v41  ;;  %v17562_v58 = vld [vmem:[#allocation162_spill] sm:$0xff] }
 0xf7d   : > { %v7788_v30 = vadd.f32 %v7784_v24, %v7760_v32  ;;  %v7807_v51 = vadd.f32 %v7658_v44, %v17560_v50  ;;  %v7803_v25 = vadd.f32 %v7652_v35, %v17561_v8  ;;  %v7801_v32 = vadd.f32 %v7649_v54, %v17562_v58  ;;  %v7913_v58 = vld [vmem:[%s16975_s7 + $0x2b0] sm:$0xff] }
 0xf7f   : > { %v9457_v52 = vadd.f32 -1.0, %v7788_v30 }
 0xf81   : > { %v7796_v6 = vmul.f32 0.5, %v9457_v52 }
 0xf83   : > { %v16613_v22 = vadd.f32 %v7796_v6, %v16337_v59  ;;  %v7716_v59 = vpop.f32.mrf.mxu0 }
 0xf84   : > { %v7717_v10 = vadd.f32 %v7716_v59, %v17557_v41  ;;  %v7908_v41 = vld [vmem:[%s16975_s7 + $0x288] sm:$0xff] }
 0xf85   : > { %v7842_v47 = vpop.f32.mrf.mxu3 }
 0xf86   : > { %v7883_v52 = vadd.f32 %v7842_v47, %v7801_v32  ;;  %v7914_v32 = vld [vmem:[%s16975_s7 + $0x2b8] sm:$0xff] }
 0xf8b   : > { %v7719_v60 = vpop.f32.mrf.mxu0 }
 0xf8c   : > { %v7720_v54 = vadd.f32 %v7719_v60, %v17555_v37  ;;  %v7918_v60 = vld [vmem:[%s16975_s7 + $0x2d8] sm:$0xff] }
 0xf8d   : > { %v7845_v15 = vpop.f32.mrf.mxu3 }
 0xf8e   : > { %v7885_v24 = vadd.f32 %v7845_v15, %v7803_v25  ;;  %v17565_v25 = vld [vmem:[#allocation175_spill] sm:$0xff] }
 0xf8f   : > { %v7804_v37 = vadd.f32 %v7717_v10, %v17565_v25  ;;  %v17576_v25 = vld [vmem:[#allocation54_spill] sm:$0xff] }
 0xf95   : > { %v7848_v9 = vpop.f32.mrf.mxu3 }
 0xf96   : > { %v7887_v46 = vadd.f32 %v7848_v9, %v7805_v17  ;;  %v7722_v9 = vpop.f32.mrf.mxu0  ;;  %v17563_v17 = vld [vmem:[#allocation176_spill] sm:$0xff] }
 0xf97   : > { %v7806_v50 = vadd.f32 %v7720_v54, %v17563_v17  ;;  %v17571_v54 = vld [vmem:[#allocation113_spill] sm:$0xff] }
 0xf9d   : > { %v7851_v56 = vpop.f32.mrf.mxu3 }
 0xf9e   : > { %v7889_v13 = vadd.f32 %v7851_v56, %v7807_v51  ;;  %v17564_v51 = vld [vmem:[#allocation177_spill] sm:$0xff] }
 0xfa0   : > { %10310 = vtanh.f32 %v7889_v13  ;;  %v7912_v13 = vld [vmem:[%s16975_s7 + $0x2a8] sm:$0xff] }
 0xfa1   : > { %v7871_v30 = vpop.f32.mrf.mxu1  ;;  %10312 = vtanh.f32 %v7887_v46 }
 0xfa2   : > { %10314 = vtanh.f32 %v7885_v24  ;;  %v7915_v24 = vld [vmem:[%s16975_s7 + $0x2c0] sm:$0xff] }
 0xfa3   : > { %10316 = vtanh.f32 %v7883_v52  ;;  %v7917_v52 = vld [vmem:[%s16975_s7 + $0x2d0] sm:$0xff] }
 0xfa4   : > { %10318 = vtanh.f32 %v16561_v2 }
 0xfa5   : > { %10320 = vtanh.f32 %v16551_v29  ;;  %v7907_v29 = vld [vmem:[%s16975_s7 + $0x280] sm:$0xff] }
 0xfa6   : > { %v16623_v5 = vpop.eup %10310  ;;  %10322 = vtanh.f32 %v16535_v62  ;;  %v7723_v62 = vadd.f32 %v7722_v9, %v17556_v19  ;;  %v7922_v9 = vld [vmem:[%s16975_s7 + $0x2f8] sm:$0xff] }
 0xfa7   : > { %8071 = vmatpush.msrb.mxu3 %v16623_v5  ;;  %v16626_v6 = vpop.eup %10312  ;;  %10324 = vtanh.f32 %v16524_v23  ;;  %v7714_v23 = vadd.f32 %v7713_v7, %v17558_v34 }
 0xfa8   : > { %v16630_v40 = vpop.eup %10314  ;;  %v7808_v56 = vadd.f32 %v7723_v62, %v17564_v51  ;;  %v17572_v62 = vld [vmem:[#allocation67_spill] sm:$0xff] }
 0xfa9   : > { %v7874_v12 = vpop.f32.mrf.mxu1  ;;  %8072 = vmatpush.msrb.mxu3 %v16626_v6  ;;  %v16634_v47 = vpop.eup %10316  ;;  %v5170_v10 = vadd.f32 %v17572_v62, %v17571_v54  ;;  %v17589_v54 = vld [vmem:[#allocation34_spill] sm:$0xff]  ;;  %v8264_v62 = vld [vmem:[%s16973_s5 + $0xd8] sm:$0xff] }
 0xfaa   : > { %v10319_v15 = vpop.eup %10318  ;;  %v7886_v7 = vadd.f32 %v7874_v12, %v7804_v37  ;;  %v7919_v12 = vld [vmem:[%s16975_s7 + $0x2e0] sm:$0xff] }
 0xfab   : > { %8073 = vmatpush.msrb.mxu3 %v16630_v40  ;;  %v10321_v2 = vpop.eup %10320 }
 0xfac   : > { %v10323_v44 = vpop.eup %10322 }
 0xfad   : > { %8074 = vmatpush.msrb.mxu3 %v16634_v47  ;;  %v10325_v35 = vpop.eup %10324 }
 0xfaf   : > { %8075 = vmatpush.msrb.mxu3 %v10319_v15  ;;  %v7920_v15 = vld [vmem:[%s16975_s7 + $0x2e8] sm:$0xff] }
 0xfb1   : > { %v7877_v45 = vpop.f32.mrf.mxu1  ;;  %8076 = vmatpush.msrb.mxu3 %v10321_v2  ;;  %v7921_v2 = vld [vmem:[%s16975_s7 + $0x2f0] sm:$0xff] }
 0xfb2   : > { %v7888_v46 = vadd.f32 %v7877_v45, %v7806_v50  ;;  %v16759_v45 = vld [vmem:[%s16978_s10] sm:$0xff]  ;;  %v17574_v50 = vld [vmem:[#allocation140_spill] sm:$0xff] }
 0xfb3   : > { %8077 = vmatpush.msrb.mxu3 %v10323_v44 }
 0xfb5   : > { %8078 = vmatpush.msrb.mxu3 %v10325_v35 }
 0xfb6   : > { %9466 = vmatmul.msk.f32.vlgmr.msrb.gmra.mxu3 %vm5729_vm3, %v7907_v29 }
 0xfb7   : > { %8487 = vmatpush.msra.mxu3 %v16410_v28  ;;  %v17566_v28 = vld [vmem:[#allocation173_spill] sm:$0xff] }
 0xfb8   : > { %v7802_v59 = vadd.f32 %v7714_v23, %v17566_v28  ;;  %v17573_v23 = vld [vmem:[#allocation144_spill] sm:$0xff] }
 0xfb9   : > { %8488 = vmatpush.msra.mxu3 %v16418_v18  ;;  %v7880_v8 = vpop.f32.mrf.mxu1 }
 0xfba   : > { %v7890_v19 = vadd.f32 %v7880_v8, %v7808_v56  ;;  %v7884_v34 = vadd.f32 %v7871_v30, %v7802_v59  ;;  %v7916_v30 = vld [vmem:[%s16975_s7 + $0x2c8] sm:$0xff]  ;;  %v16777_v56 = vld [vmem:[%s16978_s10 + $0x20] sm:$0xff] }
 0xfbb   : > { %8489 = vmatpush.msra.mxu3 %v16423_v14  ;;  %v7909_v14 = vld [vmem:[%s16975_s7 + $0x290] sm:$0xff]  ;;  %v17575_v8 = vld [vmem:[#allocation107_spill] sm:$0xff] }
 0xfbc   : > { %10326 = vtanh.f32 %v7890_v19  ;;  %v5167_v37 = vadd.f32 %v17576_v25, %v17575_v8  ;;  %v17577_v59 = vld [vmem:[#allocation119_spill] sm:$0xff]  ;;  %v17592_v8 = vld [vmem:[#allocation26_spill] sm:$0xff] }
 0xfbd   : > { %8490 = vmatpush.msra.mxu3 %v16429_v49  ;;  %10328 = vtanh.f32 %v7888_v46 }
 0xfbe   : > { %9467 = vmatmul.msk.f32.gmra.mxu3 %vm5729_vm3, %v7908_v41  ;;  %10330 = vtanh.f32 %v7886_v7  ;;  %v17578_v7 = vld [vmem:[#allocation72_spill] sm:$0xff] }
 0xfbf   : > { %8491 = vmatpush.msra.mxu3 %v16145_v61  ;;  %10332 = vtanh.f32 %v7884_v34  ;;  %v5173_v34 = vadd.f32 %v17578_v7, %v17577_v59  ;;  %v17594_v59 = vld [vmem:[#allocation45_spill] sm:$0xff]  ;;  %v17595_v7 = vld [vmem:[#allocation10_spill] sm:$0xff] }
 0xfc0   : > { %10334 = vtanh.f32 %v16593_v16  ;;  %v17568_v16 = vld [vmem:[#allocation171_spill] sm:$0xff] }
 0xfc1   : > { %8492 = vmatpush.msra.mxu3 %v16155_v38  ;;  %10336 = vtanh.f32 %v16585_v11 }
 0xfc2   : > { %v16661_v18 = vpop.eup %10326  ;;  %10338 = vtanh.f32 %v16577_v21  ;;  %v17567_v21 = vld [vmem:[#allocation170_spill] sm:$0xff] }
 0xfc3   : > { %8493 = vmatpush.msra.mxu3 %v16160_v55  ;;  %8132 = vmatpush.msra.mxu1 %v16661_v18  ;;  %v16668_v49 = vpop.eup %10328  ;;  %10340 = vtanh.f32 %v16570_v33  ;;  %v7911_v33 = vld [vmem:[%s16975_s7 + $0x2a0] sm:$0xff] }
 0xfc4   : > { %v16673_v61 = vpop.eup %10330 }
 0xfc5   : > { %8494 = vmatpush.msra.mxu3 %v16164_v3  ;;  %8133 = vmatpush.msra.mxu1 %v16668_v49  ;;  %v16679_v38 = vpop.eup %10332 }
 0xfc6   : > { %9468 = vmatmul.msk.f32.gmra.mxu3 %vm5729_vm3, %v7909_v14  ;;  %v10335_v55 = vpop.eup %10334 }
 0xfc7   : > { %8495 = vmatpush.msra.mxu3 %v15887_v39  ;;  %8134 = vmatpush.msra.mxu1 %v16673_v61  ;;  %v7910_v39 = vld [vmem:[%s16975_s7 + $0x298] sm:$0xff]  ;;  %v10337_v3 = vpop.eup %10336 }
 0xfc8   : > { %v10339_v11 = vpop.eup %10338 }
 0xfc9   : > { %8496 = vmatpush.msra.mxu3 %v15895_v63  ;;  %8135 = vmatpush.msra.mxu1 %v16679_v38  ;;  %v10341_v63 = vpop.eup %10340 }
 0xfcb   : > { %8497 = vmatpush.msra.mxu3 %v15901_v48  ;;  %8136 = vmatpush.msra.mxu1 %v10335_v55  ;;  %v17569_v48 = vld [vmem:[#allocation172_spill] sm:$0xff] }
 0xfcc   : > { %v8357_v55 = vld [vmem:[%s16978_s10 + $0x30] sm:$0xff] }
 0xfcd   : > { %8498 = vmatpush.msra.mxu3 %v15907_v27  ;;  %8137 = vmatpush.msra.mxu1 %v10337_v3  ;;  %v17570_v27 = vld [vmem:[#allocation174_spill] sm:$0xff]  ;;  %v8262_v3 = vld [vmem:[%s16973_s5 + $0xc8] sm:$0xff] }
 0xfce   : > { %9469 = vmatmul.msk.f32.gmra.mxu3 %vm5729_vm3, %v7910_v39 }
 0xfcf   : > { %8499 = vmatpush.msra.mxu3 %v17567_v21  ;;  %8138 = vmatpush.msra.mxu1 %v10339_v11  ;;  %v17579_v21 = vld [vmem:[#allocation124_spill] sm:$0xff] }
 0xfd1   : > { %8500 = vmatpush.msra.mxu3 %v17568_v16  ;;  %8139 = vmatpush.msra.mxu1 %v10341_v63  ;;  %v17580_v63 = vld [vmem:[#allocation78_spill] sm:$0xff] }
 0xfd2   : > { %9482 = vmatmul.msk.f32.vlgmr.msra.gmra.mxu1 %vm5729_vm3, %v7907_v29  ;;  %v16766_v29 = vld [vmem:[%s16978_s10 + $0x10] sm:$0xff]  ;;  %v5176_v16 = vadd.f32 %v17580_v63, %v17579_v21 }
 0xfd3   : > { %8501 = vmatpush.msra.mxu3 %v17569_v48 }
 0xfd5   : > { %8502 = vmatpush.msra.mxu3 %v17570_v27 }
 0xfd6   : > { %9470 = vmatmul.msk.f32.gmra.mxu3 %vm5729_vm3, %v7911_v33 }
 0xfda   : > { %9483 = vmatmul.msk.f32.gmra.mxu1 %vm5729_vm3, %v7908_v41  ;;  %v8261_v41 = vld [vmem:[%s16973_s5 + $0xc0] sm:$0xff] }
 0xfde   : > { %9471 = vmatmul.msk.f32.gmra.mxu3 %vm5729_vm3, %v7912_v13 }
 0xfe2   : > { %9484 = vmatmul.msk.f32.gmra.mxu1 %vm5729_vm3, %v7909_v14 }
 0xfe6   : > { %9472 = vmatmul.msk.f32.gmra.mxu3 %vm5729_vm3, %v7913_v58 }
 0xfea   : > { %9485 = vmatmul.msk.f32.gmra.mxu1 %vm5729_vm3, %v7910_v39 }
 0xfee   : > { %9473 = vmatmul.msk.f32.gmra.mxu3 %vm5729_vm3, %v7914_v32 }
 0xff2   : > { %9486 = vmatmul.msk.f32.gmra.mxu1 %vm5729_vm3, %v7911_v33  ;;  %v17581_v33 = vld [vmem:[#allocation28_spill] sm:$0xff] }
 0xff6   : > { %9474 = vmatmul.msk.f32.gmra.mxu3 %vm5729_vm3, %v7915_v24 }
 0xffa   : > { %9487 = vmatmul.msk.f32.gmra.mxu1 %vm5729_vm3, %v7912_v13  ;;  %v17582_v13 = vld [vmem:[#allocation150_spill] sm:$0xff] }
 0xffe   : > { %9475 = vmatmul.msk.f32.gmra.mxu3 %vm5729_vm3, %v7916_v30 }
0x1002   : > { %9488 = vmatmul.msk.f32.gmra.mxu1 %vm5729_vm3, %v7913_v58  ;;  %v17583_v58 = vld [vmem:[#allocation155_spill] sm:$0xff] }
0x1006   : > { %9476 = vmatmul.msk.f32.gmra.mxu3 %vm5729_vm3, %v7917_v52 }
0x100a   : > { %9489 = vmatmul.msk.f32.gmra.mxu1 %vm5729_vm3, %v7914_v32  ;;  %v5327_v32 = vadd.f32 %v17583_v58, %v17582_v13  ;;  %v7978_v13 = vpop.permute.xlu1 %7977 }
0x100e   : > { %9477 = vmatmul.msk.f32.gmra.mxu3 %vm5729_vm3, %v7918_v60 }
0x1012   : > { %9490 = vmatmul.msk.f32.gmra.mxu1 %vm5729_vm3, %v7915_v24 }
0x1016   : > { %9478 = vmatmul.msk.f32.gmra.mxu3 %vm5729_vm3, %v7919_v12 }
0x101a   : > { %9491 = vmatmul.msk.f32.gmra.mxu1 %vm5729_vm3, %v7916_v30  ;;  %v17584_v30 = vld [vmem:[#allocation20_spill] sm:$0xff] }
0x101e   : > { %9479 = vmatmul.msk.f32.gmra.mxu3 %vm5729_vm3, %v7920_v15 }
0x1022   : > { %9492 = vmatmul.msk.f32.gmra.mxu1 %vm5729_vm3, %v7917_v52 }
0x1026   : > { %9480 = vmatmul.msk.f32.gmra.mxu3 %vm5729_vm3, %v7921_v2 }
0x102a   : > { %9493 = vmatmul.msk.f32.gmra.mxu1 %vm5729_vm3, %v7918_v60  ;;  %v17586_v60 = vld [vmem:[#allocation153_spill] sm:$0xff] }
0x102e   : > { %9481 = vmatmul.msk.f32.gmra.mxu3 %vm5729_vm3, %v7922_v9 }
0x1032   : > { %9494 = vmatmul.msk.f32.gmra.mxu1 %vm5729_vm3, %v7919_v12 }
0x1036   : > { %8503 = vmatmul.f32.vlgmr.msra.gmra.mxu3 %v16759_v45 }
0x1039   : > { %v8080_v44 = vpop.f32.mrf.mxu3 }
0x103a   : > { %9495 = vmatmul.msk.f32.gmra.mxu1 %vm5729_vm3, %v7920_v15  ;;  %v8081_v17 = vadd.f32 %v8080_v44, %v17573_v23  ;;  %v17588_v44 = vld [vmem:[#allocation23_spill] sm:$0xff] }
0x103c   : > { %v16783_v19 = vadd.f32 %v8081_v17, %v5167_v37  ;;  %v17591_v17 = vld [vmem:[#allocation156_spill] sm:$0xff] }
0x103e   : > { %8506 = vmatmul.f32.gmra.mxu3 %v16766_v29 }
0x1041   : > { %v8083_v35 = vpop.f32.mrf.mxu3 }
0x1042   : > { %v8084_v51 = vadd.f32 %v8083_v35, %v17574_v50  ;;  %9496 = vmatmul.msk.f32.gmra.mxu1 %vm5729_vm3, %v7921_v2  ;;  %v17587_v2 = vld [vmem:[#allocation31_spill] sm:$0xff]  ;;  %v8361_v35 = vld [vmem:[%s16978_s10 + $0x50] sm:$0xff] }
0x1044   : > { %v16781_v46 = vadd.f32 %v8084_v51, %v5170_v10 }
0x1046   : > { %8291 = vmatpush.msrb.mxu2 %v16781_v46  ;;  %8509 = vmatmul.f32.gmra.mxu3 %v16777_v56 }
0x1048   : > { %8292 = vmatpush.msrb.mxu2 %v16783_v19 }
0x1049   : > { %v8086_v28 = vpop.f32.mrf.mxu3  ;;  %9502 = vmatmul.msk.f32.vlgmr.msrb.gmra.mxu2 %vm737_vm1, %v8261_v41 }
0x104a   : > { %v8087_v14 = vadd.f32 %v8086_v28, %v16286_v43  ;;  %8417 = vmatpush.msra.mxu2 %v16354_v1  ;;  %9497 = vmatmul.msk.f32.gmra.mxu1 %vm5729_vm3, %v7922_v9  ;;  %v17593_v28 = vld [vmem:[#allocation42_spill] sm:$0xff] }
0x104c   : > { %v16800_v39 = vadd.f32 %v8087_v14, %v5173_v34  ;;  %8418 = vmatpush.msra.mxu2 %v16360_v0  ;;  %v8359_v0 = vld [vmem:[%s16978_s10 + $0x40] sm:$0xff] }
0x104e   : > { %8419 = vmatpush.msra.mxu2 %v16364_v53  ;;  %8512 = vmatmul.f32.gmra.mxu3 %v8357_v55 }
0x104f   : > { %v8141_v11 = vpop.f32.mrf.mxu1 }
0x1050   : > { %8420 = vmatpush.msra.mxu2 %v16368_v57  ;;  %v8263_v57 = vld [vmem:[%s16973_s5 + $0xd0] sm:$0xff] }
0x1051   : > { %v8089_v1 = vpop.f32.mrf.mxu3  ;;  %9503 = vmatmul.msk.f32.gmra.mxu2 %vm737_vm1, %v8262_v3 }
0x1052   : > { %v8090_v48 = vadd.f32 %v8089_v1, %v16024_v36  ;;  %8421 = vmatpush.msra.mxu2 %v16078_v4  ;;  %v8142_v4 = vadd.f32 %v8141_v11, %v17573_v23  ;;  %v17590_v23 = vld [vmem:[#allocation152_spill] sm:$0xff] }
0x1054   : > { %v16816_v53 = vadd.f32 %v8090_v48, %v5176_v16  ;;  %8422 = vmatpush.msra.mxu2 %v16084_v42  ;;  %v17585_v42 = vld [vmem:[#allocation148_spill] sm:$0xff] }
0x1055   : > { %v5324_v12 = vadd.f32 %v17586_v60, %v17585_v42  ;;  %v7983_v42 = vpop.permute.xlu2 %7982 }
0x1056   : > { %8423 = vmatpush.msra.mxu2 %v17581_v33  ;;  %8515 = vmatmul.f32.gmra.mxu3 %v8359_v0  ;;  %v17597_v33 = vld [vmem:[#allocation11_spill] sm:$0xff] }
0x1057   : > { %v8144_v27 = vpop.f32.mrf.mxu1  ;;  %v16834_v9 = vadd.f32 %v8142_v4, %v5324_v12 }
0x1058   : > { %v8145_v24 = vadd.f32 %v8144_v27, %v17574_v50  ;;  %8424 = vmatpush.msra.mxu2 %v17584_v30  ;;  %v5330_v50 = vadd.f32 %v17591_v17, %v17590_v23 }
0x1059   : > { %v8092_v52 = vpop.f32.mrf.mxu3  ;;  %9504 = vmatmul.msk.f32.gmra.mxu2 %vm737_vm1, %v8263_v57 }
0x105a   : > { %v16831_v15 = vadd.f32 %v8145_v24, %v5327_v32  ;;  %8425 = vmatpush.msra.mxu2 %v17587_v2 }
0x105c   : > { %8426 = vmatpush.msra.mxu2 %v17588_v44  ;;  %8320 = vmatpush.msra.mxu0 %v16831_v15 }
0x105e   : > { %8427 = vmatpush.msra.mxu2 %v17589_v54  ;;  %8321 = vmatpush.msra.mxu0 %v16834_v9 }
0x105f   : > { %8518 = vmatmul.f32.gmra.mxu3 %v8361_v35  ;;  %v8147_v10 = vpop.f32.mrf.mxu1  ;;  %9506 = vmatmul.msk.f32.vlgmr.msra.gmra.mxu0 %vm737_vm1, %v8261_v41  ;;  %v17596_v41 = vld [vmem:[#allocation14_spill] sm:$0xff] }
0x1060   : > { %v8148_v51 = vadd.f32 %v8147_v10, %v16286_v43  ;;  %8428 = vmatpush.msra.mxu2 %v17592_v8 }
0x1061   : > { %v8094_v25 = vpop.f32.mrf.mxu3  ;;  %9505 = vmatmul.msk.f32.gmra.mxu2 %vm737_vm1, %v8264_v62 }
0x1062   : > { %v16852_v37 = vadd.f32 %v8148_v51, %v5330_v50  ;;  %8429 = vmatpush.msra.mxu2 %v17593_v28 }
0x1064   : > { %8430 = vmatpush.msra.mxu2 %v17594_v59 }
0x1066   : > { %8431 = vmatpush.msra.mxu2 %v17595_v7 }
0x1067   : > { %v16857_v34 = vpop.f32.mrf.mxu1  ;;  %9507 = vmatmul.msk.f32.gmra.mxu0 %vm737_vm1, %v8262_v3 }
0x1068   : > { %8432 = vmatpush.msra.mxu2 %v17596_v41 }
0x1069   : > { %v8096_v43 = vpop.f32.mrf.mxu3  ;;  %8433 = vmatmul.f32.vlgmr.msra.gmra.mxu2 %v16759_v45 }
0x106f   : > { %v8153_v14 = vpop.f32.mrf.mxu1  ;;  %9508 = vmatmul.msk.f32.gmra.mxu0 %vm737_vm1, %v8263_v57 }
0x1071   : > { %v8098_v11 = vpop.f32.mrf.mxu3  ;;  %8436 = vmatmul.f32.gmra.mxu2 %v16766_v29 }
0x1077   : > { %v8155_v1 = vpop.f32.mrf.mxu1  ;;  %9509 = vmatmul.msk.f32.gmra.mxu0 %vm737_vm1, %v8264_v62 }
0x1079   : > { %v8100_v21 = vpop.f32.mrf.mxu3  ;;  %8439 = vmatmul.f32.gmra.mxu2 %v16777_v56 }
0x107a   : > { %v8101_v58 = vadd.f32 %v8100_v21, %v7978_v13 }
0x107c   : > { %v8213_v56 = vsub.f32 %v16783_v19, %v8101_v58 }
0x107e   : > { %v8217_v2 = vmul.f32 %v8213_v56, %v8213_v56 }
0x107f   : > { %v8157_v63 = vpop.f32.mrf.mxu1 }
0x1081   : > { %v8103_v16 = vpop.f32.mrf.mxu3  ;;  %8442 = vmatmul.f32.gmra.mxu2 %v8357_v55  ;;  %v17598_v55 = vld [vmem:[#allocation47_spill] sm:$0xff] }
0x1082   : > { %v8104_v44 = vadd.f32 %v8103_v16, %v7983_v42 }
0x1084   : > { %v8215_v19 = vsub.f32 %v16781_v46, %v8104_v44  ;;  %v8151_v46 = vadd.f32 %v16857_v34, %v16024_v36 }
0x1086   : > { %v8219_v28 = vmul.f32 %v8215_v19, %v8215_v19 }
0x1087   : > { %v8159_v3 = vpop.f32.mrf.mxu1 }
0x1089   : > { %v8106_v48 = vpop.f32.mrf.mxu3  ;;  %8445 = vmatmul.f32.gmra.mxu2 %v8359_v0 }
0x108a   : > { %v8107_v45 = vadd.f32 %v8106_v48, %v17597_v33 }
0x108c   : > { %v8197_v27 = vsub.f32 %v16800_v39, %v8107_v45  ;;  %v8221_v57 = vsub.f32 0.0, %v8107_v45  ;;  %v8193_v60 = vsub.f32 %v8107_v45, %v16800_v39  ;;  %v17599_v45 = vld [vmem:[#allocation154_spill] sm:$0xff] }
0x108e   : > { %v8201_v29 = vmul.f32 1.442695, %v8197_v27  ;;  %v8225_v32 = vmul.f32 1.442695, %v8221_v57  ;;  %v17600_v27 = vld [vmem:[#allocation157_spill] sm:$0xff] }
0x108f   : > { %v8161_v4 = vpop.f32.mrf.mxu1  ;;  %v5333_v57 = vadd.f32 %v17600_v27, %v17599_v45  ;;  %v17604_v45 = vld [vmem:[#allocation7_spill] sm:$0xff]  ;;  %v17605_v27 = vld [vmem:[#allocation164_spill] sm:$0xff] }
0x1090   : > { %10342 = vpow2.f32 %v8201_v29  ;;  %v8162_v16 = vadd.f32 %v8161_v4, %v7978_v13 }
0x1091   : > { %10344 = vpow2.f32 %v8225_v32  ;;  %v8109_v24 = vpop.f32.mrf.mxu3  ;;  %8448 = vmatmul.f32.gmra.mxu2 %v8361_v35  ;;  %v8192_v29 = vadd.f32 %v8151_v46, %v5333_v57 }
0x1092   : > { %v8110_v30 = vadd.f32 %v8109_v24, %v17598_v55 }
0x1094   : > { %v8199_v0 = vsub.f32 %v16816_v53, %v8110_v30  ;;  %v8223_v52 = vsub.f32 0.0, %v8110_v30  ;;  %v8195_v8 = vsub.f32 %v8110_v30, %v16816_v53 }
0x1096   : > { %v10343_v12 = vpop.eup %10342  ;;  %v8205_v54 = vmul.f32 1.442695, %v8199_v0  ;;  %v8229_v62 = vmul.f32 1.442695, %v8223_v52 }
0x1097   : > { %v10345_v10 = vpop.eup %10344  ;;  %v8209_v23 = vadd.f32 %v10343_v12, %v8193_v60  ;;  %v8164_v17 = vpop.f32.mrf.mxu1 }
0x1098   : > { %v8233_v50 = vmul.f32 %v10345_v10, %v8217_v2  ;;  %10346 = vpow2.f32 %v8205_v54  ;;  %v8165_v30 = vadd.f32 %v8164_v17, %v7983_v42 }
0x1099   : > { %10348 = vpow2.f32 %v8229_v62 }
0x109a   : > { %v8237_v35 = vadd.f32 %v8233_v50, %v8209_v23 }
0x109c   : > { %v9498_v51 = vadd.f32 -1.0, %v8237_v35 }
0x109e   : > { %v10347_v25 = vpop.eup %10346  ;;  %v8245_v39 = vmul.f32 0.5, %v9498_v51 }
0x109f   : > { %v10349_v59 = vpop.eup %10348  ;;  %v8211_v7 = vadd.f32 %v10347_v25, %v8195_v8  ;;  %v8167_v41 = vpop.f32.mrf.mxu1 }
0x10a0   : > { %v8168_v43 = vadd.f32 %v8167_v41, %v17597_v33  ;;  %v8235_v14 = vmul.f32 %v10349_v59, %v8219_v28  ;;  %v8249_v11 = vadd.f32 %v8245_v39, %v16597_v20  ;;  %v8214_v20 = vsub.f32 %v16834_v9, %v8162_v16  ;;  %v8112_v25 = vpop.f32.mrf.mxu3 }
0x10a1   : > { %v8216_v9 = vsub.f32 %v16831_v15, %v8165_v30 }
0x10a2   : > { %v8198_v1 = vsub.f32 %v16852_v37, %v8168_v43  ;;  %v8222_v21 = vsub.f32 0.0, %v8168_v43  ;;  %v8239_v63 = vadd.f32 %v8235_v14, %v8211_v7  ;;  %v8194_v34 = vsub.f32 %v8168_v43, %v16852_v37 }
0x10a3   : > { %v8218_v4 = vmul.f32 %v8214_v20, %v8214_v20  ;;  %v8220_v62 = vmul.f32 %v8216_v9, %v8216_v9 }
0x10a4   : > { %v8203_v53 = vmul.f32 1.442695, %v8198_v1  ;;  %v8227_v3 = vmul.f32 1.442695, %v8222_v21  ;;  %v9500_v48 = vadd.f32 -1.0, %v8239_v63 }
0x10a6   : > { %10350 = vpow2.f32 %v8203_v53  ;;  %v8247_v58 = vmul.f32 0.5, %v9500_v48  ;;  %v17603_v53 = vld [vmem:[#allocation8_spill] sm:$0xff] }
0x10a7   : > { %10352 = vpow2.f32 %v8227_v3  ;;  %v8170_v33 = vpop.f32.mrf.mxu1 }
0x10a8   : > { %v8171_v32 = vadd.f32 %v8170_v33, %v17598_v55  ;;  %v8251_v24 = vadd.f32 %v8247_v58, %v16601_v31  ;;  %v8115_v39 = vpop.f32.mrf.mxu3  ;;  %v17606_v33 = vld [vmem:[#allocation165_spill] sm:$0xff] }
0x10a9   : > { %v8116_v3 = vadd.f32 %v8115_v39, %v17603_v53 }
0x10aa   : > { %v8200_v56 = vsub.f32 %v8192_v29, %v8171_v32  ;;  %v8224_v36 = vsub.f32 0.0, %v8171_v32  ;;  %v8196_v54 = vsub.f32 %v8171_v32, %v8192_v29  ;;  %v17607_v32 = vld [vmem:[#allocation16_spill] sm:$0xff] }
0x10ac   : > { %v10351_v13 = vpop.eup %10350  ;;  %v8207_v0 = vmul.f32 1.442695, %v8200_v56  ;;  %v8231_v52 = vmul.f32 1.442695, %v8224_v36 }
0x10ad   : > { %v10353_v60 = vpop.eup %10352  ;;  %v8210_v12 = vadd.f32 %v10351_v13, %v8194_v34  ;;  %v17608_v34 = vld [vmem:[#allocation12_spill] sm:$0xff] }
0x10ae   : > { %v8234_v2 = vmul.f32 %v10353_v60, %v8218_v4  ;;  %10354 = vpow2.f32 %v8207_v0 }
0x10af   : > { %10356 = vpow2.f32 %v8231_v52  ;;  %v8173_v7 = vpop.f32.mrf.mxu1 }
0x10b0   : > { %v8238_v44 = vadd.f32 %v8234_v2, %v8210_v12  ;;  %v8118_v41 = vpop.f32.mrf.mxu3 }
0x10b2   : > { %v9499_v55 = vadd.f32 -1.0, %v8238_v44 }
0x10b4   : > { %v10355_v31 = vpop.eup %10354  ;;  %v8246_v10 = vmul.f32 0.5, %v9499_v55 }
0x10b5   : > { %v10357_v23 = vpop.eup %10356  ;;  %v8212_v37 = vadd.f32 %v10355_v31, %v8196_v54  ;;  %v8174_v31 = vadd.f32 %v8173_v7, %v17604_v45  ;;  %v8358_v7 = vld [vmem:[%s16978_s10 + $0x38] sm:$0xff] }
0x10b6   : > { %v8236_v50 = vmul.f32 %v10357_v23, %v8220_v62  ;;  %v8250_v42 = vadd.f32 %v8246_v10, %v16610_v26  ;;  %v17601_v26 = vld [vmem:[#allocation36_spill] sm:$0xff]  ;;  %v17610_v23 = vld [vmem:[#allocation181_spill] sm:$0xff] }
0x10b7   : > { %v8176_v14 = vpop.f32.mrf.mxu1  ;;  %v8119_v46 = vadd.f32 %v8118_v41, %v17601_v26  ;;  %v17609_v62 = vld [vmem:[#allocation180_spill] sm:$0xff] }
0x10b8   : > { %v8240_v17 = vadd.f32 %v8236_v50, %v8212_v37  ;;  %v8617_v19 = vadd.f32 %v8250_v42, %v8249_v11  ;;  %v8121_v1 = vpop.f32.mrf.mxu3  ;;  %v17602_v11 = vld [vmem:[#allocation9_spill] sm:$0xff]  ;;  %v8177_v55 = vadd.f32 %v8176_v14, %v17603_v53  ;;  %v17611_v42 = vld [vmem:[#allocation179_spill] sm:$0xff] }
0x10b9   : > { %v8122_v16 = vadd.f32 %v8121_v1, %v17602_v11  ;;  %v8257_v57 = vadd.f32 %v8119_v46, %v17605_v27  ;;  %v8377_v27 = vpop.permute.xlu2 %8376 }
0x10ba   : > { %v9501_v35 = vadd.f32 -1.0, %v8240_v17  ;;  %v8618_v51 = vadd.f32 %v8617_v19, %v8251_v24  ;;  %v8255_v24 = vadd.f32 %v8116_v3, %v17607_v32  ;;  %v8256_v17 = vadd.f32 %v8177_v55, %v17611_v42 }
0x10bb   : > { %v8259_v58 = vadd.f32 %v8122_v16, %v17606_v33 }
0x10bc   : > { %v8248_v8 = vmul.f32 0.5, %v9501_v35 }
0x10be   : > { %v8252_v28 = vadd.f32 %v8248_v8, %v16613_v22  ;;  %v8113_v22 = vadd.f32 %v8112_v25, %v17604_v45 }
0x10bf   : > { %v8179_v48 = vpop.f32.mrf.mxu1 }
0x10c0   : > { %v8619_v15 = vadd.f32 %v8618_v51, %v8252_v28  ;;  %v8253_v13 = vadd.f32 %v8113_v22, %v17608_v34  ;;  %v8180_v2 = vadd.f32 %v8179_v48, %v17601_v26  ;;  %v17612_v51 = vld [vmem:[#allocation178_spill] sm:$0xff]  ;;  %v8504_v3 = vpop.f32.mrf.mxu3 }
0x10c1   : > { %v8254_v8 = vadd.f32 %v8174_v31, %v17612_v51 }
0x10c2   : > { %8620 = vadd.xlane.f32.xlu0 %v8619_v15  ;;  %v8258_v10 = vadd.f32 %v8180_v2, %v17609_v62  ;;  %v8352_v15 = vld [vmem:[%s16978_s10 + $0x8] sm:$0xff] }
0x10c7   : > { %v8182_v0 = vpop.f32.mrf.mxu1 }
0x10c8   : > { %v8183_v9 = vadd.f32 %v8182_v0, %v17602_v11  ;;  %v8372_v11 = vpop.permute.xlu1 %8371 }
0x10c9   : > { %v8505_v34 = vadd.f32 %v8504_v3, %v8372_v11 }
0x10ca   : > { %v8260_v37 = vadd.f32 %v8183_v9, %v17610_v23 }
0x10cc   : > { %v8294_v59 = vpop.f32.mrf.mxu2 }
0x10cd   : > { %v8335_v30 = vadd.f32 %v8294_v59, %v8253_v13 }
0x10d4   : > { %v8297_v43 = vpop.f32.mrf.mxu2 }
0x10d5   : > { %v8337_v4 = vadd.f32 %v8297_v43, %v8255_v24 }
0x10dc   : > { %v8300_v21 = vpop.f32.mrf.mxu2  ;;  %v8323_v63 = vpop.f32.mrf.mxu0 }
0x10dd   : > { %v8339_v56 = vadd.f32 %v8300_v21, %v8257_v57  ;;  %v8336_v28 = vadd.f32 %v8323_v63, %v8254_v8 }
0x10e4   : > { %v8303_v29 = vpop.f32.mrf.mxu2  ;;  %v8326_v20 = vpop.f32.mrf.mxu0 }
0x10e5   : > { %v8341_v36 = vadd.f32 %v8303_v29, %v8259_v58  ;;  %v8338_v25 = vadd.f32 %v8326_v20, %v8256_v17  ;;  %v8507_v20 = vpop.f32.mrf.mxu3 }
0x10e6   : > { %v8508_v62 = vadd.f32 %v8507_v20, %v8377_v27 }
0x10e7   : > { %10358 = vtanh.f32 %v8341_v36 }
0x10e8   : > { %10360 = vtanh.f32 %v8339_v56  ;;  %v8382_v56 = vpop.permute.xlu1 %8381 }
0x10e9   : > { %10362 = vtanh.f32 %v8337_v4 }
0x10ea   : > { %10364 = vtanh.f32 %v8335_v30 }
0x10ec   : > { %v8329_v52 = vpop.f32.mrf.mxu0  ;;  %v8434_v63 = vpop.f32.mrf.mxu2 }
0x10ed   : > { %v10359_v60 = vpop.eup %10358  ;;  %v8340_v19 = vadd.f32 %v8329_v52, %v8258_v10  ;;  %v8435_v16 = vadd.f32 %v8434_v63, %v8372_v11  ;;  %v8510_v55 = vpop.f32.mrf.mxu3 }
0x10ee   : > { %8460 = vmatpush.msrb.mxu0 %v10359_v60  ;;  %v10361_v12 = vpop.eup %10360 }
0x10ef   : > { %v10363_v44 = vpop.eup %10362 }
0x10f0   : > { %8461 = vmatpush.msrb.mxu0 %v10361_v12  ;;  %v10365_v54 = vpop.eup %10364 }
0x10f2   : > { %8462 = vmatpush.msrb.mxu0 %v10363_v44 }
0x10f4   : > { %v8332_v50 = vpop.f32.mrf.mxu0  ;;  %8463 = vmatpush.msrb.mxu0 %v10365_v54  ;;  %v8437_v46 = vpop.f32.mrf.mxu2 }
0x10f5   : > { %v8342_v35 = vadd.f32 %v8332_v50, %v8260_v37  ;;  %v8438_v57 = vadd.f32 %v8437_v46, %v8377_v27  ;;  %v8387_v54 = vpop.permute.xlu2 %8386 }
0x10f6   : > { %8464 = vmatpush.msrb.mxu0 %v16623_v5 }
0x10f7   : > { %10366 = vtanh.f32 %v8342_v35 }
0x10f8   : > { %8465 = vmatpush.msrb.mxu0 %v16626_v6  ;;  %10368 = vtanh.f32 %v8340_v19  ;;  %v8354_v6 = vld [vmem:[%s16978_s10 + $0x18] sm:$0xff] }
0x10f9   : > { %10370 = vtanh.f32 %v8338_v25 }
0x10fa   : > { %8466 = vmatpush.msrb.mxu0 %v16630_v40  ;;  %10372 = vtanh.f32 %v8336_v28 }
0x10fc   : > { %8467 = vmatpush.msrb.mxu0 %v16634_v47  ;;  %v8356_v47 = vld [vmem:[%s16978_s10 + $0x28] sm:$0xff]  ;;  %v8440_v22 = vpop.f32.mrf.mxu2 }
0x10fd   : > { %v10367_v39 = vpop.eup %10366  ;;  %9510 = vmatmul.msk.f32.vlgmr.msrb.gmra.mxu0 %vm5729_vm3, %v8352_v15  ;;  %v8441_v13 = vadd.f32 %v8440_v22, %v8382_v56  ;;  %v8397_v63 = vpop.permute.xlu2 %8396 }
0x10fe   : > { %8530 = vmatpush.msrb.mxu1 %v10367_v39  ;;  %v10369_v5 = vpop.eup %10368 }
0x10ff   : > { %v10371_v59 = vpop.eup %10370 }
0x1100   : > { %8531 = vmatpush.msrb.mxu1 %v10369_v5  ;;  %v10373_v40 = vpop.eup %10372  ;;  %v8511_v5 = vadd.f32 %v8510_v55, %v8382_v56 }
0x1102   : > { %8532 = vmatpush.msrb.mxu1 %v10371_v59  ;;  %v8513_v59 = vpop.f32.mrf.mxu3 }
0x1103   : > { %v8514_v46 = vadd.f32 %v8513_v59, %v8387_v54 }
0x1104   : > { %8533 = vmatpush.msrb.mxu1 %v10373_v40  ;;  %v8443_v4 = vpop.f32.mrf.mxu2 }
0x1105   : > { %9511 = vmatmul.msk.f32.gmra.mxu0 %vm5729_vm3, %v8354_v6  ;;  %v8444_v10 = vadd.f32 %v8443_v4, %v8387_v54 }
0x1106   : > { %8534 = vmatpush.msrb.mxu1 %v16661_v18  ;;  %v8360_v18 = vld [vmem:[%s16978_s10 + $0x48] sm:$0xff] }
0x1108   : > { %8535 = vmatpush.msrb.mxu1 %v16668_v49  ;;  %v8362_v49 = vld [vmem:[%s16978_s10 + $0x58] sm:$0xff] }
0x110a   : > { %8536 = vmatpush.msrb.mxu1 %v16673_v61  ;;  %v8516_v22 = vpop.f32.mrf.mxu3 }
0x110c   : > { %8537 = vmatpush.msrb.mxu1 %v16679_v38  ;;  %v8446_v17 = vpop.f32.mrf.mxu2 }
0x110d   : > { %9512 = vmatmul.msk.f32.gmra.mxu0 %vm5729_vm3, %v8356_v47  ;;  %9516 = vmatmul.msk.f32.vlgmr.msrb.gmra.mxu1 %vm5729_vm3, %v8352_v15  ;;  %v8392_v15 = vpop.permute.xlu1 %8391 }
0x1115   : > { %9513 = vmatmul.msk.f32.gmra.mxu0 %vm5729_vm3, %v8358_v7  ;;  %9517 = vmatmul.msk.f32.gmra.mxu1 %vm5729_vm3, %v8354_v6  ;;  %v8447_v6 = vadd.f32 %v8446_v17, %v8392_v15 }
0x111d   : > { %9514 = vmatmul.msk.f32.gmra.mxu0 %vm5729_vm3, %v8360_v18  ;;  %9518 = vmatmul.msk.f32.gmra.mxu1 %vm5729_vm3, %v8356_v47 }
0x1125   : > { %9515 = vmatmul.msk.f32.gmra.mxu0 %vm5729_vm3, %v8362_v49  ;;  %9519 = vmatmul.msk.f32.gmra.mxu1 %vm5729_vm3, %v8358_v7 }
0x112d   : > { %9520 = vmatmul.msk.f32.gmra.mxu1 %vm5729_vm3, %v8360_v18 }
0x1135   : > { %v8621_v61 = vpop.xlane.xlu0 %8620  ;;  %9521 = vmatmul.msk.f32.gmra.mxu1 %vm5729_vm3, %v8362_v49 }
0x1136   : > { %v8622_v38 = vrot.slane %v8621_v61, 4 }
0x1138   : > { %v8623_v41 = vadd.f32 %v8622_v38, %v8621_v61 }
0x113a   : > { %v8624_v43 = vrot.slane %v8623_v41, 2 }
0x113c   : > { %v8625_v14 = vadd.f32 %v8624_v43, %v8623_v41 }
0x113e   : > { %v8626_v1 = vrot.slane %v8625_v14, 1 }
0x1140   : > { %v8627_v21 = vadd.f32 %v8626_v1, %v8625_v14  ;;  %v8449_v14 = vpop.f32.mrf.mxu2 }
0x1141   : > { %v8450_v11 = vadd.f32 %v8449_v14, %v8397_v63 }
0x1142   : > { %9530 = vpush %v8627_v21 }
0x1173   : > { %s9531_s20 = spop %9530 }
0x1174   : > { %v8629_v26 = vstv %s9531_s20 }
0x1175   : > { %8631 = vst.msk [vmem:[%s500_s30] sm:$0x1] %vm8630_vm4, %v8629_v26 }
0x117a   : > { %v8469_v53 = vpop.f32.mrf.mxu0 }
0x117b   : > { %v8470_v48 = vadd.f32 %v8469_v53, %v8435_v16 }
0x117d   : > { %v8557_v45 = vmul.f32 0.5, %v8470_v48 }
0x117f   : > { %10374 = vtanh.f32 %v8557_v45 }
0x1182   : > { %v8472_v33 = vpop.f32.mrf.mxu0 }
0x1183   : > { %v8473_v58 = vadd.f32 %v8472_v33, %v8438_v57 }
0x1185   : > { %v10375_v29 = vpop.eup %10374  ;;  %v8559_v32 = vmul.f32 0.5, %v8473_v58 }
0x1186   : > { %v8581_v24 = vmul.f32 0.5, %v10375_v29 }
0x1187   : > { %10376 = vtanh.f32 %v8559_v32 }
0x1188   : > { %v8593_v36 = vadd.f32 0.5, %v8581_v24  ;;  %v8517_v24 = vadd.f32 %v8516_v22, %v8392_v15 }
0x118a   : > { %8605 = vst [vmem:[%s16951_s22] sm:$0xff] %v8593_v36  ;;  %v8475_v30 = vpop.f32.mrf.mxu0  ;;  %v8539_v0 = vpop.f32.mrf.mxu1 }
0x118b   : > { %v8476_v52 = vadd.f32 %v8475_v30, %v8441_v13  ;;  %v8540_v60 = vadd.f32 %v8539_v0, %v8505_v34  ;;  %v8519_v0 = vpop.f32.mrf.mxu3 }
0x118d   : > { %v10377_v12 = vpop.eup %10376  ;;  %v8561_v2 = vmul.f32 0.5, %v8476_v52  ;;  %v8558_v9 = vmul.f32 0.5, %v8540_v60 }
0x118e   : > { %v8583_v44 = vmul.f32 0.5, %v10377_v12 }
0x118f   : > { %10378 = vtanh.f32 %v8561_v2  ;;  %v8520_v2 = vadd.f32 %v8519_v0, %v8397_v63 }
0x1190   : > { %v8595_v31 = vadd.f32 0.5, %v8583_v44  ;;  %10380 = vtanh.f32 %v8558_v9 }
0x1192   : > { %8607 = vst [vmem:[%s16951_s22 + $0x10] sm:$0xff] %v8595_v31  ;;  %v8478_v23 = vpop.f32.mrf.mxu0  ;;  %v8542_v37 = vpop.f32.mrf.mxu1 }
0x1193   : > { %v8479_v50 = vadd.f32 %v8478_v23, %v8444_v10  ;;  %v8543_v42 = vadd.f32 %v8542_v37, %v8508_v62 }
0x1195   : > { %v10379_v19 = vpop.eup %10378  ;;  %v8563_v35 = vmul.f32 0.5, %v8479_v50  ;;  %v8560_v51 = vmul.f32 0.5, %v8543_v42 }
0x1196   : > { %v10381_v8 = vpop.eup %10380  ;;  %v8585_v25 = vmul.f32 0.5, %v10379_v19 }
0x1197   : > { %v8582_v28 = vmul.f32 0.5, %v10381_v8  ;;  %10382 = vtanh.f32 %v8563_v35 }
0x1198   : > { %v8597_v39 = vadd.f32 0.5, %v8585_v25  ;;  %10384 = vtanh.f32 %v8560_v51 }
0x1199   : > { %v8594_v40 = vadd.f32 0.5, %v8582_v28 }
0x119a   : > { %8609 = vst [vmem:[%s16951_s22 + $0x20] sm:$0xff] %v8597_v39  ;;  %v8481_v47 = vpop.f32.mrf.mxu0  ;;  %v8545_v7 = vpop.f32.mrf.mxu1 }
0x119b   : > { %8606 = vst [vmem:[%s16951_s22 + $0x8] sm:$0xff] %v8594_v40  ;;  %v8482_v18 = vadd.f32 %v8481_v47, %v8447_v6  ;;  %v8546_v49 = vadd.f32 %v8545_v7, %v8511_v5 }
0x119d   : > { %v10383_v61 = vpop.eup %10382  ;;  %v8565_v38 = vmul.f32 0.5, %v8482_v18  ;;  %v8562_v41 = vmul.f32 0.5, %v8546_v49 }
0x119e   : > { %v10385_v43 = vpop.eup %10384  ;;  %v8587_v1 = vmul.f32 0.5, %v10383_v61 }
0x119f   : > { %v8584_v21 = vmul.f32 0.5, %v10385_v43  ;;  %10386 = vtanh.f32 %v8565_v38 }
0x11a0   : > { %v8599_v26 = vadd.f32 0.5, %v8587_v1  ;;  %10388 = vtanh.f32 %v8562_v41 }
0x11a1   : > { %v8596_v16 = vadd.f32 0.5, %v8584_v21 }
0x11a2   : > { %8611 = vst [vmem:[%s16951_s22 + $0x30] sm:$0xff] %v8599_v26  ;;  %v8484_v53 = vpop.f32.mrf.mxu0  ;;  %v8548_v3 = vpop.f32.mrf.mxu1 }
0x11a3   : > { %8608 = vst [vmem:[%s16951_s22 + $0x18] sm:$0xff] %v8596_v16  ;;  %v8485_v48 = vadd.f32 %v8484_v53, %v8450_v11  ;;  %v8549_v45 = vadd.f32 %v8548_v3, %v8514_v46 }
0x11a5   : > { %v10387_v27 = vpop.eup %10386  ;;  %v8567_v57 = vmul.f32 0.5, %v8485_v48  ;;  %v8564_v33 = vmul.f32 0.5, %v8549_v45 }
0x11a6   : > { %v10389_v58 = vpop.eup %10388  ;;  %v8589_v29 = vmul.f32 0.5, %v10387_v27 }
0x11a7   : > { %v8586_v20 = vmul.f32 0.5, %v10389_v58  ;;  %10390 = vtanh.f32 %v8567_v57 }
0x11a8   : > { %v8601_v32 = vadd.f32 0.5, %v8589_v29  ;;  %10392 = vtanh.f32 %v8564_v33 }
0x11a9   : > { %v8598_v56 = vadd.f32 0.5, %v8586_v20 }
0x11aa   : > { %8613 = vst [vmem:[%s16951_s22 + $0x40] sm:$0xff] %v8601_v32  ;;  %v8551_v36 = vpop.f32.mrf.mxu1 }
0x11ab   : > { %8610 = vst [vmem:[%s16951_s22 + $0x28] sm:$0xff] %v8598_v56  ;;  %v8552_v34 = vadd.f32 %v8551_v36, %v8517_v24 }
0x11ad   : > { %v10391_v13 = vpop.eup %10390  ;;  %v8566_v4 = vmul.f32 0.5, %v8552_v34 }
0x11ae   : > { %v10393_v30 = vpop.eup %10392  ;;  %v8591_v52 = vmul.f32 0.5, %v10391_v13 }
0x11af   : > { %v8588_v60 = vmul.f32 0.5, %v10393_v30  ;;  %10394 = vtanh.f32 %v8566_v4 }
0x11b0   : > { %v8603_v12 = vadd.f32 0.5, %v8591_v52 }
0x11b1   : > { %v8600_v9 = vadd.f32 0.5, %v8588_v60 }
0x11b2   : > { %8615 = vst [vmem:[%s16951_s22 + $0x50] sm:$0xff] %v8603_v12  ;;  %v8554_v44 = vpop.f32.mrf.mxu1 }
0x11b3   : > { %8612 = vst [vmem:[%s16951_s22 + $0x38] sm:$0xff] %v8600_v9  ;;  %v8555_v55 = vadd.f32 %v8554_v44, %v8520_v2 }
0x11b5   : > { %v10395_v54 = vpop.eup %10394  ;;  %v8568_v31 = vmul.f32 0.5, %v8555_v55 }
0x11b6   : > { %v8590_v62 = vmul.f32 0.5, %v10395_v54 }
0x11b7   : > { %10396 = vtanh.f32 %v8568_v31 }
0x11b8   : > { %v8602_v10 = vadd.f32 0.5, %v8590_v62 }
0x11ba   : > { %8614 = vst [vmem:[%s16951_s22 + $0x48] sm:$0xff] %v8602_v10 }
0x11bd   : > { %v10397_v23 = vpop.eup %10396 }
0x11be   : > { %v8592_v37 = vmul.f32 0.5, %v10397_v23 }
0x11c0   : > { %v8604_v50 = vadd.f32 0.5, %v8592_v37 }
0x11c2   : > { %8616 = vst [vmem:[%s16951_s22 + $0x58] sm:$0xff] %v8604_v50 }
0x11c3 PF: > { %s24_s25 = sadd.s32 1, %s10437_s25  }
0x11c4   : > { %p21_p4 = scmp.ge.s32.totalorder %s24_s25, 4  }
0x11c6   :  { %23 = sbr.rel (!%p21_p4) target bundleno = 1 (0x1), region = 119 }

</bundles_post_ra>
